<compile_context>
chip_gen: v5e
topology: v5e:2x2
jax: 0.10.0
libtpu: 0.0.40
codegen_flags: <defaults>
</compile_context>

<pallas_src>
import functools

import numpy as np
import jax
import jax.numpy as jnp
from jax import lax
from jax.experimental import pallas as pl
from jax.experimental.pallas import tpu as pltpu


# ----------------------------------------------------------------------------
# In-kernel helpers
# ----------------------------------------------------------------------------
def _zero_dh_halo(pad_ref):
    """Zero the D/H halo faces of a (D+2, H+2, W*C) fused-lane scratch.

    Only D and H carry an explicit 1-voxel halo; the W boundary is folded into
    the banded weight matrices, so every store here is a full-lane-width vst.
    The interior is fully overwritten every grid step and the faces are cheap,
    so correctness never depends on scratch state across grid iterations
    (required for the 'parallel' batch axis on multi-core chips).
    """
    Dp, Hp, L = pad_ref.shape
    zd = jnp.zeros((1, Hp, L), jnp.float32)
    pad_ref[pl.ds(0, 1), :, :] = zd
    pad_ref[pl.ds(Dp - 1, 1), :, :] = zd
    zh = jnp.zeros((Dp, 1, L), jnp.float32)
    pad_ref[:, pl.ds(0, 1), :] = zh
    pad_ref[:, pl.ds(Hp - 1, 1), :] = zh


def _group_norm_fused_rows(x, gamma, beta, W, C, num_groups, eps):
    """GroupNorm of a (R, W*C) fused-lane activation (lane index = w*C + c).

    Single sweep: per-lane sum and sum-of-squares in f32, folded to per-channel
    and then per-group on the VPU/XLU (no MXU group-membership matmuls),
    var = E[x^2] - mean^2.  Returns gamma * (x - mean) / sqrt(var + eps) + beta.
    """
    R = x.shape[0]
    gsz = C // num_groups
    inv_cnt = 1.0 / float(R * W * gsz)

    s_lane = jnp.sum(x, axis=0, keepdims=True)          # (1, W*C)
    q_lane = jnp.sum(x * x, axis=0, keepdims=True)      # (1, W*C)

    # Fold the W lane-copies of each channel.
    s_c = s_lane[:, 0:C]
    q_c = q_lane[:, 0:C]
    for w in range(1, W):
        s_c = s_c + s_lane[:, w * C:(w + 1) * C]
        q_c = q_c + q_lane[:, w * C:(w + 1) * C]

    def _group_fold(v):                                  # (1, C) -> per-group, re-broadcast
        parts = []
        for g in range(num_groups):
            seg = v[:, g * gsz:(g + 1) * gsz]
            gs = jnp.sum(seg, axis=1, keepdims=True)
            parts.append(jnp.broadcast_to(gs, (1, gsz)))
        return jnp.concatenate(parts, axis=1)            # (1, C)

    mean_c = _group_fold(s_c) * inv_cnt
    var_c = _group_fold(q_c) * inv_cnt - mean_c * mean_c
    scale_c = gamma * lax.rsqrt(var_c + eps)
    shift_c = beta - mean_c * scale_c
    scale = jnp.concatenate([scale_c] * W, axis=1)       # (1, W*C)
    shift = jnp.concatenate([shift_c] * W, axis=1)
    return x * scale + shift


def _conv3x3x3_banded(pad_ref, wb_ref, D, H):
    """3x3x3 conv as 9 accumulated MXU matmuls from a padded fused-lane scratch.

    pad_ref : (D+2, H+2, W*Cin)   f32 (zero D/H halo, normalized interior)
    wb_ref  : (9, W*Cin, W*Cout)  bf16 banded weights (kw taps + W zero-padding
              folded in), tap index = kd*3 + kh.
    Returns (D*H, W*Cout) f32.
    """
    acc = None
    for kd in range(3):
        for kh in range(3):
            slab = pad_ref[pl.ds(kd, D), pl.ds(kh, H), :]          # (D, H, W*Cin)
            # cast to bf16 only at the MXU boundary; accumulate in f32.
            slab2d = slab.reshape(D * H, slab.shape[-1]).astype(jnp.bfloat16)
            part = jnp.dot(slab2d, wb_ref[kd * 3 + kh],
                           preferred_element_type=jnp.float32)
            acc = part if acc is None else acc + part
    return acc


# ----------------------------------------------------------------------------
# Fused Decoder DoubleConv kernel: one batch element per grid step.
#   GN1 -> conv1 (9 banded matmuls) -> ReLU -> GN2 -> conv2 -> ReLU
# ----------------------------------------------------------------------------
def _decoder_kernel(xcat_ref, wb1_ref, g1_ref, b1_ref, wb2_ref, g2_ref, b2_ref,
                    o_ref, pad1_ref, pad2_ref,
                    *, W, Cin, Cmid, ng1, ng2, eps):
    D = pad1_ref.shape[0] - 2
    H = pad1_ref.shape[1] - 2

    _zero_dh_halo(pad1_ref)
    _zero_dh_halo(pad2_ref)

    # concat(enc, x_up) arrives pre-fused as bf16 (rows = D*H, lanes = W*Cin);
    # upcast once and keep all element-wise math in f32.
    x = xcat_ref[...].reshape(D * H, W * Cin).astype(jnp.float32)

    # --- SingleConv1: GroupNorm -> conv3x3x3 -> ReLU -------------------------
    xn1 = _group_norm_fused_rows(x, g1_ref[...], b1_ref[...], W, Cin, ng1, eps)
    pad1_ref[pl.ds(1, D), pl.ds(1, H), :] = xn1.reshape(D, H, W * Cin)
    mid = jnp.maximum(_conv3x3x3_banded(pad1_ref, wb1_ref, D, H), 0.0)

    # --- SingleConv2: GroupNorm -> conv3x3x3 -> ReLU -------------------------
    # (mid stays a live f32 value only long enough to compute GN2 stats; the
    #  normalized result goes straight into pad2's interior, no extra buffer.)
    xn2 = _group_norm_fused_rows(mid, g2_ref[...], b2_ref[...], W, Cmid, ng2, eps)
    pad2_ref[pl.ds(1, D), pl.ds(1, H), :] = xn2.reshape(D, H, W * Cmid)
    out = jnp.maximum(_conv3x3x3_banded(pad2_ref, wb2_ref, D, H), 0.0)

    # Lane-dense output store: (D*H, W*Cout).
    o_ref[...] = out.astype(o_ref.dtype)


# ----------------------------------------------------------------------------
# Wrapper-side weight / param preprocessing
# ----------------------------------------------------------------------------
def _num_groups_for(channels, num_groups):
    ng = num_groups if channels >= num_groups else 1
    assert channels % ng == 0, (channels, ng)
    return ng


def _banded_weights(w, W):
    """Fold kw taps + W-boundary zero padding of a 3x3x3 kernel into 9 banded
    matrices.  w: (3, 3, 3, Cin, Cout) -> (9, W*Cin, W*Cout) bf16 with
    wb[kd*3+kh, wi*Cin+ci, wo*Cout+co] = w[kd, kh, wi-wo+1, ci, co]
    (zero when |wi - wo| > 1, i.e. outside the 3-wide band)."""
    Cin, Cout = w.shape[3], w.shape[4]
    sel = np.zeros((W, W, 3), np.float32)
    for wo in range(W):
        for kw in range(3):
            wi = wo + kw - 1
            if 0 <= wi < W:
                sel[wi, wo, kw] = 1.0
    wb = jnp.einsum("wvk,abkcd->abwcvd", jnp.asarray(sel), w.astype(jnp.float32))
    return wb.reshape(9, W * Cin, W * Cout).astype(jnp.bfloat16)


def decoder_double_conv(enc_cl, xup_cl, params, num_groups=8, eps=1e-5):
    """Fused DoubleConv (order='gcr' x2) on channels-last inputs.

    enc_cl: (N, D, H, W, Ce), xup_cl: (N, D, H, W, Cx); returns (N, D, H, W, Cout).
    """
    N, D, H, W, Ce = enc_cl.shape
    Cx = xup_cl.shape[-1]
    Cin = Ce + Cx
    w1, w2 = params["w1"], params["w2"]         # (3,3,3,Cin,Cmid), (3,3,3,Cmid,Cout)
    Cmid, Cout = w1.shape[-1], w2.shape[-1]
    assert w1.shape[:4] == (3, 3, 3, Cin) and w2.shape[:4] == (3, 3, 3, Cmid)

    ng1 = _num_groups_for(Cin, num_groups)
    ng2 = _num_groups_for(Cmid, num_groups)

    # Channel concat + fused-lane reshape + bf16 cast stay as (fusible) XLA glue;
    # the in-kernel lane index is w*Cin + c.
    xcat = jnp.concatenate([enc_cl, xup_cl], axis=-1)            # (N, D, H, W, Cin)
    xcat = xcat.reshape(N, D, H, W * Cin).astype(jnp.bfloat16)

    wb1 = _banded_weights(w1, W)                                 # (9, W*Cin,  W*Cmid)
    wb2 = _banded_weights(w2, W)                                 # (9, W*Cmid, W*Cout)
    g1 = params["g1"].reshape(1, Cin).astype(jnp.float32)
    b1 = params["b1"].reshape(1, Cin).astype(jnp.float32)
    g2 = params["g2"].reshape(1, Cmid).astype(jnp.float32)
    b2 = params["b2"].reshape(1, Cmid).astype(jnp.float32)

    kernel = functools.partial(_decoder_kernel, W=W, Cin=Cin, Cmid=Cmid,
                               ng1=ng1, ng2=ng2, eps=eps)

    # TODO(synk): for production U-Net volumes (32^3-64^3 spatial, C >= 96) tile
    # the D axis into the grid with a 1-voxel halo and a two-pass GroupNorm
    # (stats pass + normalize/conv pass), and for C >= 128 switch the banded
    # matmuls to plain channels-last per-tap accumulation (the band trick only
    # pays when C < 128 lanes).  The per-batch-resident form below fits easily
    # in VMEM at these sizes.
    out2d = pl.pallas_call(
        kernel,
        out_shape=jax.ShapeDtypeStruct((N, D * H, W * Cout), jnp.float32),
        grid=(N,),
        in_specs=[
            pl.BlockSpec((None, D, H, W * Cin), lambda n: (n, 0, 0, 0)),
            pl.BlockSpec((9, W * Cin, W * Cmid), lambda n: (0, 0, 0)),
            pl.BlockSpec((1, Cin), lambda n: (0, 0)),
            pl.BlockSpec((1, Cin), lambda n: (0, 0)),
            pl.BlockSpec((9, W * Cmid, W * Cout), lambda n: (0, 0, 0)),
            pl.BlockSpec((1, Cmid), lambda n: (0, 0)),
            pl.BlockSpec((1, Cmid), lambda n: (0, 0)),
        ],
        out_specs=pl.BlockSpec((None, D * H, W * Cout), lambda n: (n, 0, 0)),
        scratch_shapes=[
            pltpu.VMEM((D + 2, H + 2, W * Cin), jnp.float32),    # padded GN1 output
            pltpu.VMEM((D + 2, H + 2, W * Cmid), jnp.float32),   # padded GN2 output
        ],
        compiler_params=pltpu.CompilerParams(
            # batch elements are fully independent -> shard across cores
            dimension_semantics=("parallel",),
            vmem_limit_bytes=48 * 1024 * 1024),
    )(xcat, wb1, g1, b1, wb2, g2, b2)
    return out2d.reshape(N, D, H, W, Cout)


# ----------------------------------------------------------------------------
# Decoder forward (PyTorch NCDHW in / NCDHW out)
# ----------------------------------------------------------------------------
def decoder_forward(encoder_features, x, params, num_groups=8):
    # encoder_features: (N, Ce, D, H, W), x: (N, Cx, d, h, w)   [NCDHW]
    N, Cx, d, h, w = x.shape
    D, H, W = encoder_features.shape[2:]

    # TODO(synk): nearest upsample + NCDHW<->lane-fused transposes stay as XLA
    # glue; the gather has no clean rectangular BlockSpec form.
    idx_d = (jnp.arange(D) * d) // D
    idx_h = (jnp.arange(H) * h) // H
    idx_w = (jnp.arange(W) * w) // W
    x_up = x[:, :, idx_d][:, :, :, idx_h][:, :, :, :, idx_w]

    enc_cl = jnp.transpose(encoder_features, (0, 2, 3, 4, 1))   # (N, D, H, W, Ce)
    xup_cl = jnp.transpose(x_up, (0, 2, 3, 4, 1))               # (N, D, H, W, Cx)

    y = decoder_double_conv(enc_cl, xup_cl, params, num_groups)  # (N, D, H, W, Cout)
    return jnp.transpose(y, (0, 4, 1, 2, 3))                     # back to NCDHW


def init_decoder_params(key, in_channels, out_channels):
    k = jax.random.split(key, 6)
    return {
        "g1": 1.0 + 0.1 * jax.random.normal(k[0], (in_channels,), jnp.float32),
        "b1": 0.1 * jax.random.normal(k[1], (in_channels,), jnp.float32),
        "w1": 0.05 * jax.random.normal(k[2], (3, 3, 3, in_channels, out_channels),
                                       jnp.float32),
        "g2": 1.0 + 0.1 * jax.random.normal(k[3], (out_channels,), jnp.float32),
        "b2": 0.1 * jax.random.normal(k[4], (out_channels,), jnp.float32),
        "w2": 0.05 * jax.random.normal(k[5], (3, 3, 3, out_channels, out_channels),
                                       jnp.float32),
    }


# ----------------------------------------------------------------------------
# Pure-JAX reference (fp32, for numerical verification)
# ----------------------------------------------------------------------------
def _ref_groupnorm(x, gamma, beta, num_groups, eps=1e-5):
    N, C, D, H, W = x.shape
    if C < num_groups:
        num_groups = 1
    xg = x.reshape(N, num_groups, (C // num_groups) * D * H * W)
    mean = xg.mean(axis=2, keepdims=True)
    var = xg.var(axis=2, keepdims=True)
    xn = ((xg - mean) / jnp.sqrt(var + eps)).reshape(N, C, D, H, W)
    return xn * gamma.reshape(1, C, 1, 1, 1) + beta.reshape(1, C, 1, 1, 1)


def _ref_conv3d(x, w):
    wt = jnp.transpose(w, (4, 3, 0, 1, 2))  # (Cout, Cin, 3, 3, 3)
    return lax.conv_general_dilated(
        x, wt, window_strides=(1, 1, 1),
        padding=((1, 1), (1, 1), (1, 1)),
        dimension_numbers=("NCDHW", "OIDHW", "NCDHW"),
        precision=lax.Precision.HIGHEST)


def decoder_reference(encoder_features, x, params, num_groups=8):
    N, Cx, d, h, w = x.shape
    D, H, W = encoder_features.shape[2:]
    idx_d = (jnp.arange(D) * d) // D
    idx_h = (jnp.arange(H) * h) // H
    idx_w = (jnp.arange(W) * w) // W
    x_up = x[:, :, idx_d][:, :, :, idx_h][:, :, :, :, idx_w]
    y = jnp.concatenate([encoder_features, x_up], axis=1)
    y = jnp.maximum(_ref_conv3d(_ref_groupnorm(y, params["g1"], params["b1"],
                                               num_groups), params["w1"]), 0.0)
    y = jnp.maximum(_ref_conv3d(_ref_groupnorm(y, params["g2"], params["b2"],
                                               num_groups), params["w2"]), 0.0)
    return y


if __name__ == "__main__":
    key = jax.random.PRNGKey(0)
    k_enc, k_x, k_p = jax.random.split(key, 3)

    N = 2
    enc_C, x_C = 16, 16
    in_channels = enc_C + x_C     # channels seen by DoubleConv after concat
    out_channels = 32
    D, H, W = 8, 8, 8             # encoder (target) spatial size
    d, h, w = 4, 4, 4             # decoder input spatial size

    encoder_features = jax.random.normal(k_enc, (N, enc_C, D, H, W), jnp.float32)
    x = jax.random.normal(k_x, (N, x_C, d, h, w), jnp.float32)
    params = init_decoder_params(k_p, in_channels, out_channels)

    out = decoder_forward(encoder_features, x, params, num_groups=8)
    out = jax.block_until_ready(out)
    assert out.shape == (N, out_channels, D, H, W)

    ref = decoder_reference(encoder_features, x, params, num_groups=8)
    max_err = float(jnp.max(jnp.abs(out - ref)))
    ref_scale = float(jnp.max(jnp.abs(ref)))
    # Inputs and both conv matmuls run on the bf16 path (fp32 accumulation), so
    # allow a bf16-level tolerance relative to the output dynamic range.
    assert max_err < 4e-2 * max(ref_scale, 1.0), (
        f"mismatch vs reference: max_err={max_err}, ref_scale={ref_scale}")

    print("KERNEL_OK")
</pallas_src>

<mosaic_0001>
module attributes {stable_mosaic.version = 11 : i64} {
  func.func @_decoder_kernel(%arg0: i32, %arg1: memref<1x8x8x256xbf16, #tpu.memory_space<vmem>>, %arg2: memref<9x256x256xbf16, #tpu.memory_space<vmem>>, %arg3: memref<1x32xf32, #tpu.memory_space<vmem>>, %arg4: memref<1x32xf32, #tpu.memory_space<vmem>>, %arg5: memref<9x256x256xbf16, #tpu.memory_space<vmem>>, %arg6: memref<1x32xf32, #tpu.memory_space<vmem>>, %arg7: memref<1x32xf32, #tpu.memory_space<vmem>>, %arg8: memref<1x64x256xf32, #tpu.memory_space<vmem>>, %arg9: memref<10x10x256xf32, #tpu.memory_space<vmem>>, %arg10: memref<10x10x256xf32, #tpu.memory_space<vmem>>) attributes {dimension_semantics = [#tpu.dimension_semantics<parallel>], iteration_bounds = array<i64: 2>, scalar_prefetch = 0 : i64, scratch_operands = 2 : i64, tpu.core_type = #tpu.core_type<tc>, window_params = [{transform_indices = @transform_0, window_bounds = array<i64: 1, 8, 8, 256>}, {pipeline_mode = #tpu.pipeline_mode<synchronous>, transform_indices = @transform_1, window_bounds = array<i64: 9, 256, 256>}, {pipeline_mode = #tpu.pipeline_mode<synchronous>, transform_indices = @transform_2, window_bounds = array<i64: 1, 32>}, {pipeline_mode = #tpu.pipeline_mode<synchronous>, transform_indices = @transform_3, window_bounds = array<i64: 1, 32>}, {pipeline_mode = #tpu.pipeline_mode<synchronous>, transform_indices = @transform_4, window_bounds = array<i64: 9, 256, 256>}, {pipeline_mode = #tpu.pipeline_mode<synchronous>, transform_indices = @transform_5, window_bounds = array<i64: 1, 32>}, {pipeline_mode = #tpu.pipeline_mode<synchronous>, transform_indices = @transform_6, window_bounds = array<i64: 1, 32>}, {transform_indices = @transform_7, window_bounds = array<i64: 1, 64, 256>}]} {
    %cst = arith.constant 0.000000e+00 : f32
    %0 = vector.broadcast %cst : f32 to vector<1x10x256xf32>
    %c0 = arith.constant 0 : index
    %c0_0 = arith.constant 0 : index
    %c0_1 = arith.constant 0 : index
    %1 = vector.load %arg9[%c0, %c0_0, %c0_1] : memref<10x10x256xf32, #tpu.memory_space<vmem>>, vector<1x10x256xf32>
    tpu.vector_store %arg9[%c0, %c0_0, %c0_1], %0 {strides = array<i32>} : memref<10x10x256xf32, #tpu.memory_space<vmem>>, vector<1x10x256xf32>,
    %c9 = arith.constant 9 : index
    %c0_2 = arith.constant 0 : index
    %c0_3 = arith.constant 0 : index
    %2 = vector.load %arg9[%c9, %c0_2, %c0_3] : memref<10x10x256xf32, #tpu.memory_space<vmem>>, vector<1x10x256xf32>
    tpu.vector_store %arg9[%c9, %c0_2, %c0_3], %0 {strides = array<i32>} : memref<10x10x256xf32, #tpu.memory_space<vmem>>, vector<1x10x256xf32>,
    %cst_4 = arith.constant 0.000000e+00 : f32
    %3 = vector.broadcast %cst_4 : f32 to vector<10x1x256xf32>
    %c0_5 = arith.constant 0 : index
    %c0_6 = arith.constant 0 : index
    %c0_7 = arith.constant 0 : index
    %4 = vector.load %arg9[%c0_5, %c0_6, %c0_7] : memref<10x10x256xf32, #tpu.memory_space<vmem>>, vector<10x1x256xf32>
    tpu.vector_store %arg9[%c0_5, %c0_6, %c0_7], %3 {strides = array<i32>} : memref<10x10x256xf32, #tpu.memory_space<vmem>>, vector<10x1x256xf32>,
    %c0_8 = arith.constant 0 : index
    %c9_9 = arith.constant 9 : index
    %c0_10 = arith.constant 0 : index
    %5 = vector.load %arg9[%c0_8, %c9_9, %c0_10] : memref<10x10x256xf32, #tpu.memory_space<vmem>>, vector<10x1x256xf32>
    tpu.vector_store %arg9[%c0_8, %c9_9, %c0_10], %3 {strides = array<i32>} : memref<10x10x256xf32, #tpu.memory_space<vmem>>, vector<10x1x256xf32>,
    %cst_11 = arith.constant 0.000000e+00 : f32
    %6 = vector.broadcast %cst_11 : f32 to vector<1x10x256xf32>
    %c0_12 = arith.constant 0 : index
    %c0_13 = arith.constant 0 : index
    %c0_14 = arith.constant 0 : index
    %7 = vector.load %arg10[%c0_12, %c0_13, %c0_14] : memref<10x10x256xf32, #tpu.memory_space<vmem>>, vector<1x10x256xf32>
    tpu.vector_store %arg10[%c0_12, %c0_13, %c0_14], %6 {strides = array<i32>} : memref<10x10x256xf32, #tpu.memory_space<vmem>>, vector<1x10x256xf32>,
    %c9_15 = arith.constant 9 : index
    %c0_16 = arith.constant 0 : index
    %c0_17 = arith.constant 0 : index
    %8 = vector.load %arg10[%c9_15, %c0_16, %c0_17] : memref<10x10x256xf32, #tpu.memory_space<vmem>>, vector<1x10x256xf32>
    tpu.vector_store %arg10[%c9_15, %c0_16, %c0_17], %6 {strides = array<i32>} : memref<10x10x256xf32, #tpu.memory_space<vmem>>, vector<1x10x256xf32>,
    %cst_18 = arith.constant 0.000000e+00 : f32
    %9 = vector.broadcast %cst_18 : f32 to vector<10x1x256xf32>
    %c0_19 = arith.constant 0 : index
    %c0_20 = arith.constant 0 : index
    %c0_21 = arith.constant 0 : index
    %10 = vector.load %arg10[%c0_19, %c0_20, %c0_21] : memref<10x10x256xf32, #tpu.memory_space<vmem>>, vector<10x1x256xf32>
    tpu.vector_store %arg10[%c0_19, %c0_20, %c0_21], %9 {strides = array<i32>} : memref<10x10x256xf32, #tpu.memory_space<vmem>>, vector<10x1x256xf32>,
    %c0_22 = arith.constant 0 : index
    %c9_23 = arith.constant 9 : index
    %c0_24 = arith.constant 0 : index
    %11 = vector.load %arg10[%c0_22, %c9_23, %c0_24] : memref<10x10x256xf32, #tpu.memory_space<vmem>>, vector<10x1x256xf32>
    tpu.vector_store %arg10[%c0_22, %c9_23, %c0_24], %9 {strides = array<i32>} : memref<10x10x256xf32, #tpu.memory_space<vmem>>, vector<10x1x256xf32>,
    %c0_25 = arith.constant 0 : index
    %c0_26 = arith.constant 0 : index
    %c0_27 = arith.constant 0 : index
    %c0_28 = arith.constant 0 : index
    %12 = vector.load %arg1[%c0_25, %c0_26, %c0_27, %c0_28] : memref<1x8x8x256xbf16, #tpu.memory_space<vmem>>, vector<1x8x8x256xbf16>
    %13 = vector.shape_cast %12 : vector<1x8x8x256xbf16> to vector<8x8x256xbf16>
    %14 = vector.shape_cast %13 : vector<8x8x256xbf16> to vector<64x256xbf16>
    %15 = arith.extf %14 : vector<64x256xbf16> to vector<64x256xf32>
    %c0_29 = arith.constant 0 : index
    %c0_30 = arith.constant 0 : index
    %16 = vector.load %arg3[%c0_29, %c0_30] : memref<1x32xf32, #tpu.memory_space<vmem>>, vector<1x32xf32>
    %c0_31 = arith.constant 0 : index
    %c0_32 = arith.constant 0 : index
    %17 = vector.load %arg4[%c0_31, %c0_32] : memref<1x32xf32, #tpu.memory_space<vmem>>, vector<1x32xf32>
    %cst_33 = arith.constant dense<0.000000e+00> : vector<256xf32>
    %18 = vector.multi_reduction <add>, %15, %cst_33 [0] : vector<64x256xf32> to vector<256xf32>
    %19 = vector.shape_cast %18 : vector<256xf32> to vector<1x256xf32>
    %20 = arith.mulf %15, %15 : vector<64x256xf32>
    %cst_34 = arith.constant dense<0.000000e+00> : vector<256xf32>
    %21 = vector.multi_reduction <add>, %20, %cst_34 [0] : vector<64x256xf32> to vector<256xf32>
    %22 = vector.shape_cast %21 : vector<256xf32> to vector<1x256xf32>
    %23 = vector.extract_strided_slice %19 {offsets = [0, 0], sizes = [1, 32], strides = [1, 1]} : vector<1x256xf32> to vector<1x32xf32>
    %24 = vector.extract_strided_slice %22 {offsets = [0, 0], sizes = [1, 32], strides = [1, 1]} : vector<1x256xf32> to vector<1x32xf32>
    %25 = vector.extract_strided_slice %19 {offsets = [0, 32], sizes = [1, 32], strides = [1, 1]} : vector<1x256xf32> to vector<1x32xf32>
    %26 = arith.addf %23, %25 : vector<1x32xf32>
    %27 = vector.extract_strided_slice %22 {offsets = [0, 32], sizes = [1, 32], strides = [1, 1]} : vector<1x256xf32> to vector<1x32xf32>
    %28 = arith.addf %24, %27 : vector<1x32xf32>
    %29 = vector.extract_strided_slice %19 {offsets = [0, 64], sizes = [1, 32], strides = [1, 1]} : vector<1x256xf32> to vector<1x32xf32>
    %30 = arith.addf %26, %29 : vector<1x32xf32>
    %31 = vector.extract_strided_slice %22 {offsets = [0, 64], sizes = [1, 32], strides = [1, 1]} : vector<1x256xf32> to vector<1x32xf32>
    %32 = arith.addf %28, %31 : vector<1x32xf32>
    %33 = vector.extract_strided_slice %19 {offsets = [0, 96], sizes = [1, 32], strides = [1, 1]} : vector<1x256xf32> to vector<1x32xf32>
    %34 = arith.addf %30, %33 : vector<1x32xf32>
    %35 = vector.extract_strided_slice %22 {offsets = [0, 96], sizes = [1, 32], strides = [1, 1]} : vector<1x256xf32> to vector<1x32xf32>
    %36 = arith.addf %32, %35 : vector<1x32xf32>
    %37 = vector.extract_strided_slice %19 {offsets = [0, 128], sizes = [1, 32], strides = [1, 1]} : vector<1x256xf32> to vector<1x32xf32>
    %38 = arith.addf %34, %37 : vector<1x32xf32>
    %39 = vector.extract_strided_slice %22 {offsets = [0, 128], sizes = [1, 32], strides = [1, 1]} : vector<1x256xf32> to vector<1x32xf32>
    %40 = arith.addf %36, %39 : vector<1x32xf32>
    %41 = vector.extract_strided_slice %19 {offsets = [0, 160], sizes = [1, 32], strides = [1, 1]} : vector<1x256xf32> to vector<1x32xf32>
    %42 = arith.addf %38, %41 : vector<1x32xf32>
    %43 = vector.extract_strided_slice %22 {offsets = [0, 160], sizes = [1, 32], strides = [1, 1]} : vector<1x256xf32> to vector<1x32xf32>
    %44 = arith.addf %40, %43 : vector<1x32xf32>
    %45 = vector.extract_strided_slice %19 {offsets = [0, 192], sizes = [1, 32], strides = [1, 1]} : vector<1x256xf32> to vector<1x32xf32>
    %46 = arith.addf %42, %45 : vector<1x32xf32>
    %47 = vector.extract_strided_slice %22 {offsets = [0, 192], sizes = [1, 32], strides = [1, 1]} : vector<1x256xf32> to vector<1x32xf32>
    %48 = arith.addf %44, %47 : vector<1x32xf32>
    %49 = vector.extract_strided_slice %19 {offsets = [0, 224], sizes = [1, 32], strides = [1, 1]} : vector<1x256xf32> to vector<1x32xf32>
    %50 = arith.addf %46, %49 : vector<1x32xf32>
    %51 = vector.extract_strided_slice %22 {offsets = [0, 224], sizes = [1, 32], strides = [1, 1]} : vector<1x256xf32> to vector<1x32xf32>
    %52 = arith.addf %48, %51 : vector<1x32xf32>
    %53 = vector.extract_strided_slice %50 {offsets = [0, 0], sizes = [1, 4], strides = [1, 1]} : vector<1x32xf32> to vector<1x4xf32>
    %cst_35 = arith.constant dense<0.000000e+00> : vector<1xf32>
    %54 = vector.multi_reduction <add>, %53, %cst_35 [1] : vector<1x4xf32> to vector<1xf32>
    %55 = vector.shape_cast %54 : vector<1xf32> to vector<1x1xf32>
    %56 = vector.shape_cast %55 : vector<1x1xf32> to vector<1x1xf32>
    %57 = vector.broadcast %56 : vector<1x1xf32> to vector<1x4xf32>
    %58 = vector.extract_strided_slice %50 {offsets = [0, 4], sizes = [1, 4], strides = [1, 1]} : vector<1x32xf32> to vector<1x4xf32>
    %cst_36 = arith.constant dense<0.000000e+00> : vector<1xf32>
    %59 = vector.multi_reduction <add>, %58, %cst_36 [1] : vector<1x4xf32> to vector<1xf32>
    %60 = vector.shape_cast %59 : vector<1xf32> to vector<1x1xf32>
    %61 = vector.shape_cast %60 : vector<1x1xf32> to vector<1x1xf32>
    %62 = vector.broadcast %61 : vector<1x1xf32> to vector<1x4xf32>
    %63 = vector.extract_strided_slice %50 {offsets = [0, 8], sizes = [1, 4], strides = [1, 1]} : vector<1x32xf32> to vector<1x4xf32>
    %cst_37 = arith.constant dense<0.000000e+00> : vector<1xf32>
    %64 = vector.multi_reduction <add>, %63, %cst_37 [1] : vector<1x4xf32> to vector<1xf32>
    %65 = vector.shape_cast %64 : vector<1xf32> to vector<1x1xf32>
    %66 = vector.shape_cast %65 : vector<1x1xf32> to vector<1x1xf32>
    %67 = vector.broadcast %66 : vector<1x1xf32> to vector<1x4xf32>
    %68 = vector.extract_strided_slice %50 {offsets = [0, 12], sizes = [1, 4], strides = [1, 1]} : vector<1x32xf32> to vector<1x4xf32>
    %cst_38 = arith.constant dense<0.000000e+00> : vector<1xf32>
    %69 = vector.multi_reduction <add>, %68, %cst_38 [1] : vector<1x4xf32> to vector<1xf32>
    %70 = vector.shape_cast %69 : vector<1xf32> to vector<1x1xf32>
    %71 = vector.shape_cast %70 : vector<1x1xf32> to vector<1x1xf32>
    %72 = vector.broadcast %71 : vector<1x1xf32> to vector<1x4xf32>
    %73 = vector.extract_strided_slice %50 {offsets = [0, 16], sizes = [1, 4], strides = [1, 1]} : vector<1x32xf32> to vector<1x4xf32>
    %cst_39 = arith.constant dense<0.000000e+00> : vector<1xf32>
    %74 = vector.multi_reduction <add>, %73, %cst_39 [1] : vector<1x4xf32> to vector<1xf32>
    %75 = vector.shape_cast %74 : vector<1xf32> to vector<1x1xf32>
    %76 = vector.shape_cast %75 : vector<1x1xf32> to vector<1x1xf32>
    %77 = vector.broadcast %76 : vector<1x1xf32> to vector<1x4xf32>
    %78 = vector.extract_strided_slice %50 {offsets = [0, 20], sizes = [1, 4], strides = [1, 1]} : vector<1x32xf32> to vector<1x4xf32>
    %cst_40 = arith.constant dense<0.000000e+00> : vector<1xf32>
    %79 = vector.multi_reduction <add>, %78, %cst_40 [1] : vector<1x4xf32> to vector<1xf32>
    %80 = vector.shape_cast %79 : vector<1xf32> to vector<1x1xf32>
    %81 = vector.shape_cast %80 : vector<1x1xf32> to vector<1x1xf32>
    %82 = vector.broadcast %81 : vector<1x1xf32> to vector<1x4xf32>
    %83 = vector.extract_strided_slice %50 {offsets = [0, 24], sizes = [1, 4], strides = [1, 1]} : vector<1x32xf32> to vector<1x4xf32>
    %cst_41 = arith.constant dense<0.000000e+00> : vector<1xf32>
    %84 = vector.multi_reduction <add>, %83, %cst_41 [1] : vector<1x4xf32> to vector<1xf32>
    %85 = vector.shape_cast %84 : vector<1xf32> to vector<1x1xf32>
    %86 = vector.shape_cast %85 : vector<1x1xf32> to vector<1x1xf32>
    %87 = vector.broadcast %86 : vector<1x1xf32> to vector<1x4xf32>
    %88 = vector.extract_strided_slice %50 {offsets = [0, 28], sizes = [1, 4], strides = [1, 1]} : vector<1x32xf32> to vector<1x4xf32>
    %cst_42 = arith.constant dense<0.000000e+00> : vector<1xf32>
    %89 = vector.multi_reduction <add>, %88, %cst_42 [1] : vector<1x4xf32> to vector<1xf32>
    %90 = vector.shape_cast %89 : vector<1xf32> to vector<1x1xf32>
    %91 = vector.shape_cast %90 : vector<1x1xf32> to vector<1x1xf32>
    %92 = vector.broadcast %91 : vector<1x1xf32> to vector<1x4xf32>
    %93 = tpu.concatenate %57, %62, %67, %72, %77, %82, %87, %92 in 1 : vector<1x4xf32>, vector<1x4xf32>, vector<1x4xf32>, vector<1x4xf32>, vector<1x4xf32>, vector<1x4xf32>, vector<1x4xf32>, vector<1x4xf32> -> vector<1x32xf32>
    %cst_43 = arith.constant 4.8828125E-4 : f32
    %94 = vector.broadcast %cst_43 : f32 to vector<1x32xf32>
    %95 = arith.mulf %93, %94 : vector<1x32xf32>
    %96 = vector.extract_strided_slice %52 {offsets = [0, 0], sizes = [1, 4], strides = [1, 1]} : vector<1x32xf32> to vector<1x4xf32>
    %cst_44 = arith.constant dense<0.000000e+00> : vector<1xf32>
    %97 = vector.multi_reduction <add>, %96, %cst_44 [1] : vector<1x4xf32> to vector<1xf32>
    %98 = vector.shape_cast %97 : vector<1xf32> to vector<1x1xf32>
    %99 = vector.shape_cast %98 : vector<1x1xf32> to vector<1x1xf32>
    %100 = vector.broadcast %99 : vector<1x1xf32> to vector<1x4xf32>
    %101 = vector.extract_strided_slice %52 {offsets = [0, 4], sizes = [1, 4], strides = [1, 1]} : vector<1x32xf32> to vector<1x4xf32>
    %cst_45 = arith.constant dense<0.000000e+00> : vector<1xf32>
    %102 = vector.multi_reduction <add>, %101, %cst_45 [1] : vector<1x4xf32> to vector<1xf32>
    %103 = vector.shape_cast %102 : vector<1xf32> to vector<1x1xf32>
    %104 = vector.shape_cast %103 : vector<1x1xf32> to vector<1x1xf32>
    %105 = vector.broadcast %104 : vector<1x1xf32> to vector<1x4xf32>
    %106 = vector.extract_strided_slice %52 {offsets = [0, 8], sizes = [1, 4], strides = [1, 1]} : vector<1x32xf32> to vector<1x4xf32>
    %cst_46 = arith.constant dense<0.000000e+00> : vector<1xf32>
    %107 = vector.multi_reduction <add>, %106, %cst_46 [1] : vector<1x4xf32> to vector<1xf32>
    %108 = vector.shape_cast %107 : vector<1xf32> to vector<1x1xf32>
    %109 = vector.shape_cast %108 : vector<1x1xf32> to vector<1x1xf32>
    %110 = vector.broadcast %109 : vector<1x1xf32> to vector<1x4xf32>
    %111 = vector.extract_strided_slice %52 {offsets = [0, 12], sizes = [1, 4], strides = [1, 1]} : vector<1x32xf32> to vector<1x4xf32>
    %cst_47 = arith.constant dense<0.000000e+00> : vector<1xf32>
    %112 = vector.multi_reduction <add>, %111, %cst_47 [1] : vector<1x4xf32> to vector<1xf32>
    %113 = vector.shape_cast %112 : vector<1xf32> to vector<1x1xf32>
    %114 = vector.shape_cast %113 : vector<1x1xf32> to vector<1x1xf32>
    %115 = vector.broadcast %114 : vector<1x1xf32> to vector<1x4xf32>
    %116 = vector.extract_strided_slice %52 {offsets = [0, 16], sizes = [1, 4], strides = [1, 1]} : vector<1x32xf32> to vector<1x4xf32>
    %cst_48 = arith.constant dense<0.000000e+00> : vector<1xf32>
    %117 = vector.multi_reduction <add>, %116, %cst_48 [1] : vector<1x4xf32> to vector<1xf32>
    %118 = vector.shape_cast %117 : vector<1xf32> to vector<1x1xf32>
    %119 = vector.shape_cast %118 : vector<1x1xf32> to vector<1x1xf32>
    %120 = vector.broadcast %119 : vector<1x1xf32> to vector<1x4xf32>
    %121 = vector.extract_strided_slice %52 {offsets = [0, 20], sizes = [1, 4], strides = [1, 1]} : vector<1x32xf32> to vector<1x4xf32>
    %cst_49 = arith.constant dense<0.000000e+00> : vector<1xf32>
    %122 = vector.multi_reduction <add>, %121, %cst_49 [1] : vector<1x4xf32> to vector<1xf32>
    %123 = vector.shape_cast %122 : vector<1xf32> to vector<1x1xf32>
    %124 = vector.shape_cast %123 : vector<1x1xf32> to vector<1x1xf32>
    %125 = vector.broadcast %124 : vector<1x1xf32> to vector<1x4xf32>
    %126 = vector.extract_strided_slice %52 {offsets = [0, 24], sizes = [1, 4], strides = [1, 1]} : vector<1x32xf32> to vector<1x4xf32>
    %cst_50 = arith.constant dense<0.000000e+00> : vector<1xf32>
    %127 = vector.multi_reduction <add>, %126, %cst_50 [1] : vector<1x4xf32> to vector<1xf32>
    %128 = vector.shape_cast %127 : vector<1xf32> to vector<1x1xf32>
    %129 = vector.shape_cast %128 : vector<1x1xf32> to vector<1x1xf32>
    %130 = vector.broadcast %129 : vector<1x1xf32> to vector<1x4xf32>
    %131 = vector.extract_strided_slice %52 {offsets = [0, 28], sizes = [1, 4], strides = [1, 1]} : vector<1x32xf32> to vector<1x4xf32>
    %cst_51 = arith.constant dense<0.000000e+00> : vector<1xf32>
    %132 = vector.multi_reduction <add>, %131, %cst_51 [1] : vector<1x4xf32> to vector<1xf32>
    %133 = vector.shape_cast %132 : vector<1xf32> to vector<1x1xf32>
    %134 = vector.shape_cast %133 : vector<1x1xf32> to vector<1x1xf32>
    %135 = vector.broadcast %134 : vector<1x1xf32> to vector<1x4xf32>
    %136 = tpu.concatenate %100, %105, %110, %115, %120, %125, %130, %135 in 1 : vector<1x4xf32>, vector<1x4xf32>, vector<1x4xf32>, vector<1x4xf32>, vector<1x4xf32>, vector<1x4xf32>, vector<1x4xf32>, vector<1x4xf32> -> vector<1x32xf32>
    %cst_52 = arith.constant 4.8828125E-4 : f32
    %137 = vector.broadcast %cst_52 : f32 to vector<1x32xf32>
    %138 = arith.mulf %136, %137 : vector<1x32xf32>
    %139 = arith.mulf %95, %95 : vector<1x32xf32>
    %140 = arith.subf %138, %139 : vector<1x32xf32>
    %cst_53 = arith.constant 9.99999974E-6 : f32
    %141 = vector.broadcast %cst_53 : f32 to vector<1x32xf32>
    %142 = arith.addf %140, %141 : vector<1x32xf32>
    %143 = math.rsqrt %142 : vector<1x32xf32>
    %144 = arith.mulf %16, %143 : vector<1x32xf32>
    %145 = arith.mulf %95, %144 : vector<1x32xf32>
    %146 = arith.subf %17, %145 : vector<1x32xf32>
    %147 = tpu.concatenate %144, %144, %144, %144, %144, %144, %144, %144 in 1 : vector<1x32xf32>, vector<1x32xf32>, vector<1x32xf32>, vector<1x32xf32>, vector<1x32xf32>, vector<1x32xf32>, vector<1x32xf32>, vector<1x32xf32> -> vector<1x256xf32>
    %148 = tpu.concatenate %146, %146, %146, %146, %146, %146, %146, %146 in 1 : vector<1x32xf32>, vector<1x32xf32>, vector<1x32xf32>, vector<1x32xf32>, vector<1x32xf32>, vector<1x32xf32>, vector<1x32xf32>, vector<1x32xf32> -> vector<1x256xf32>
    %149 = vector.broadcast %147 : vector<1x256xf32> to vector<64x256xf32>
    %150 = arith.mulf %15, %149 : vector<64x256xf32>
    %151 = vector.broadcast %148 : vector<1x256xf32> to vector<64x256xf32>
    %152 = arith.addf %150, %151 : vector<64x256xf32>
    %153 = vector.shape_cast %152 : vector<64x256xf32> to vector<8x8x256xf32>
    %c1 = arith.constant 1 : index
    %c1_54 = arith.constant 1 : index
    %c0_55 = arith.constant 0 : index
    %154 = vector.load %arg9[%c1, %c1_54, %c0_55] : memref<10x10x256xf32, #tpu.memory_space<vmem>>, vector<8x8x256xf32>
    tpu.vector_store %arg9[%c1, %c1_54, %c0_55], %153 {strides = array<i32>} : memref<10x10x256xf32, #tpu.memory_space<vmem>>, vector<8x8x256xf32>,
    %c0_56 = arith.constant 0 : index
    %c0_57 = arith.constant 0 : index
    %c0_58 = arith.constant 0 : index
    %155 = vector.load %arg9[%c0_56, %c0_57, %c0_58] : memref<10x10x256xf32, #tpu.memory_space<vmem>>, vector<8x8x256xf32>
    %156 = vector.shape_cast %155 : vector<8x8x256xf32> to vector<64x256xf32>
    %157 = arith.truncf %156 : vector<64x256xf32> to vector<64x256xbf16>
    %c0_59 = arith.constant 0 : index
    %c0_60 = arith.constant 0 : index
    %c0_61 = arith.constant 0 : index
    %158 = vector.load %arg2[%c0_59, %c0_60, %c0_61] : memref<9x256x256xbf16, #tpu.memory_space<vmem>>, vector<1x256x256xbf16>
    %159 = vector.shape_cast %158 : vector<1x256x256xbf16> to vector<256x256xbf16>
    %cst_62 = arith.constant dense<0.000000e+00> : vector<64x256xf32>
    %160 = tpu.matmul %157, %159, %cst_62 {dimension_numbers = #tpu.dot_dimension_numbers<[1], [0], [0], [1], [0, 0, 1, 1], [], []>} : vector<64x256xbf16>, vector<256x256xbf16>, vector<64x256xf32> -> vector<64x256xf32>
    %c0_63 = arith.constant 0 : index
    %c1_64 = arith.constant 1 : index
    %c0_65 = arith.constant 0 : index
    %161 = vector.load %arg9[%c0_63, %c1_64, %c0_65] : memref<10x10x256xf32, #tpu.memory_space<vmem>>, vector<8x8x256xf32>
    %162 = vector.shape_cast %161 : vector<8x8x256xf32> to vector<64x256xf32>
    %163 = arith.truncf %162 : vector<64x256xf32> to vector<64x256xbf16>
    %c1_66 = arith.constant 1 : index
    %c0_67 = arith.constant 0 : index
    %c0_68 = arith.constant 0 : index
    %164 = vector.load %arg2[%c1_66, %c0_67, %c0_68] : memref<9x256x256xbf16, #tpu.memory_space<vmem>>, vector<1x256x256xbf16>
    %165 = vector.shape_cast %164 : vector<1x256x256xbf16> to vector<256x256xbf16>
    %cst_69 = arith.constant dense<0.000000e+00> : vector<64x256xf32>
    %166 = tpu.matmul %163, %165, %cst_69 {dimension_numbers = #tpu.dot_dimension_numbers<[1], [0], [0], [1], [0, 0, 1, 1], [], []>} : vector<64x256xbf16>, vector<256x256xbf16>, vector<64x256xf32> -> vector<64x256xf32>
    %167 = arith.addf %160, %166 : vector<64x256xf32>
    %c0_70 = arith.constant 0 : index
    %c2 = arith.constant 2 : index
    %c0_71 = arith.constant 0 : index
    %168 = vector.load %arg9[%c0_70, %c2, %c0_71] : memref<10x10x256xf32, #tpu.memory_space<vmem>>, vector<8x8x256xf32>
    %169 = vector.shape_cast %168 : vector<8x8x256xf32> to vector<64x256xf32>
    %170 = arith.truncf %169 : vector<64x256xf32> to vector<64x256xbf16>
    %c2_72 = arith.constant 2 : index
    %c0_73 = arith.constant 0 : index
    %c0_74 = arith.constant 0 : index
    %171 = vector.load %arg2[%c2_72, %c0_73, %c0_74] : memref<9x256x256xbf16, #tpu.memory_space<vmem>>, vector<1x256x256xbf16>
    %172 = vector.shape_cast %171 : vector<1x256x256xbf16> to vector<256x256xbf16>
    %cst_75 = arith.constant dense<0.000000e+00> : vector<64x256xf32>
    %173 = tpu.matmul %170, %172, %cst_75 {dimension_numbers = #tpu.dot_dimension_numbers<[1], [0], [0], [1], [0, 0, 1, 1], [], []>} : vector<64x256xbf16>, vector<256x256xbf16>, vector<64x256xf32> -> vector<64x256xf32>
    %174 = arith.addf %167, %173 : vector<64x256xf32>
    %c1_76 = arith.constant 1 : index
    %c0_77 = arith.constant 0 : index
    %c0_78 = arith.constant 0 : index
    %175 = vector.load %arg9[%c1_76, %c0_77, %c0_78] : memref<10x10x256xf32, #tpu.memory_space<vmem>>, vector<8x8x256xf32>
    %176 = vector.shape_cast %175 : vector<8x8x256xf32> to vector<64x256xf32>
    %177 = arith.truncf %176 : vector<64x256xf32> to vector<64x256xbf16>
    %c3 = arith.constant 3 : index
    %c0_79 = arith.constant 0 : index
    %c0_80 = arith.constant 0 : index
    %178 = vector.load %arg2[%c3, %c0_79, %c0_80] : memref<9x256x256xbf16, #tpu.memory_space<vmem>>, vector<1x256x256xbf16>
    %179 = vector.shape_cast %178 : vector<1x256x256xbf16> to vector<256x256xbf16>
    %cst_81 = arith.constant dense<0.000000e+00> : vector<64x256xf32>
    %180 = tpu.matmul %177, %179, %cst_81 {dimension_numbers = #tpu.dot_dimension_numbers<[1], [0], [0], [1], [0, 0, 1, 1], [], []>} : vector<64x256xbf16>, vector<256x256xbf16>, vector<64x256xf32> -> vector<64x256xf32>
    %181 = arith.addf %174, %180 : vector<64x256xf32>
    %c1_82 = arith.constant 1 : index
    %c1_83 = arith.constant 1 : index
    %c0_84 = arith.constant 0 : index
    %182 = vector.load %arg9[%c1_82, %c1_83, %c0_84] : memref<10x10x256xf32, #tpu.memory_space<vmem>>, vector<8x8x256xf32>
    %183 = vector.shape_cast %182 : vector<8x8x256xf32> to vector<64x256xf32>
    %184 = arith.truncf %183 : vector<64x256xf32> to vector<64x256xbf16>
    %c4 = arith.constant 4 : index
    %c0_85 = arith.constant 0 : index
    %c0_86 = arith.constant 0 : index
    %185 = vector.load %arg2[%c4, %c0_85, %c0_86] : memref<9x256x256xbf16, #tpu.memory_space<vmem>>, vector<1x256x256xbf16>
    %186 = vector.shape_cast %185 : vector<1x256x256xbf16> to vector<256x256xbf16>
    %cst_87 = arith.constant dense<0.000000e+00> : vector<64x256xf32>
    %187 = tpu.matmul %184, %186, %cst_87 {dimension_numbers = #tpu.dot_dimension_numbers<[1], [0], [0], [1], [0, 0, 1, 1], [], []>} : vector<64x256xbf16>, vector<256x256xbf16>, vector<64x256xf32> -> vector<64x256xf32>
    %188 = arith.addf %181, %187 : vector<64x256xf32>
    %c1_88 = arith.constant 1 : index
    %c2_89 = arith.constant 2 : index
    %c0_90 = arith.constant 0 : index
    %189 = vector.load %arg9[%c1_88, %c2_89, %c0_90] : memref<10x10x256xf32, #tpu.memory_space<vmem>>, vector<8x8x256xf32>
    %190 = vector.shape_cast %189 : vector<8x8x256xf32> to vector<64x256xf32>
    %191 = arith.truncf %190 : vector<64x256xf32> to vector<64x256xbf16>
    %c5 = arith.constant 5 : index
    %c0_91 = arith.constant 0 : index
    %c0_92 = arith.constant 0 : index
    %192 = vector.load %arg2[%c5, %c0_91, %c0_92] : memref<9x256x256xbf16, #tpu.memory_space<vmem>>, vector<1x256x256xbf16>
    %193 = vector.shape_cast %192 : vector<1x256x256xbf16> to vector<256x256xbf16>
    %cst_93 = arith.constant dense<0.000000e+00> : vector<64x256xf32>
    %194 = tpu.matmul %191, %193, %cst_93 {dimension_numbers = #tpu.dot_dimension_numbers<[1], [0], [0], [1], [0, 0, 1, 1], [], []>} : vector<64x256xbf16>, vector<256x256xbf16>, vector<64x256xf32> -> vector<64x256xf32>
    %195 = arith.addf %188, %194 : vector<64x256xf32>
    %c2_94 = arith.constant 2 : index
    %c0_95 = arith.constant 0 : index
    %c0_96 = arith.constant 0 : index
    %196 = vector.load %arg9[%c2_94, %c0_95, %c0_96] : memref<10x10x256xf32, #tpu.memory_space<vmem>>, vector<8x8x256xf32>
    %197 = vector.shape_cast %196 : vector<8x8x256xf32> to vector<64x256xf32>
    %198 = arith.truncf %197 : vector<64x256xf32> to vector<64x256xbf16>
    %c6 = arith.constant 6 : index
    %c0_97 = arith.constant 0 : index
    %c0_98 = arith.constant 0 : index
    %199 = vector.load %arg2[%c6, %c0_97, %c0_98] : memref<9x256x256xbf16, #tpu.memory_space<vmem>>, vector<1x256x256xbf16>
    %200 = vector.shape_cast %199 : vector<1x256x256xbf16> to vector<256x256xbf16>
    %cst_99 = arith.constant dense<0.000000e+00> : vector<64x256xf32>
    %201 = tpu.matmul %198, %200, %cst_99 {dimension_numbers = #tpu.dot_dimension_numbers<[1], [0], [0], [1], [0, 0, 1, 1], [], []>} : vector<64x256xbf16>, vector<256x256xbf16>, vector<64x256xf32> -> vector<64x256xf32>
    %202 = arith.addf %195, %201 : vector<64x256xf32>
    %c2_100 = arith.constant 2 : index
    %c1_101 = arith.constant 1 : index
    %c0_102 = arith.constant 0 : index
    %203 = vector.load %arg9[%c2_100, %c1_101, %c0_102] : memref<10x10x256xf32, #tpu.memory_space<vmem>>, vector<8x8x256xf32>
    %204 = vector.shape_cast %203 : vector<8x8x256xf32> to vector<64x256xf32>
    %205 = arith.truncf %204 : vector<64x256xf32> to vector<64x256xbf16>
    %c7 = arith.constant 7 : index
    %c0_103 = arith.constant 0 : index
    %c0_104 = arith.constant 0 : index
    %206 = vector.load %arg2[%c7, %c0_103, %c0_104] : memref<9x256x256xbf16, #tpu.memory_space<vmem>>, vector<1x256x256xbf16>
    %207 = vector.shape_cast %206 : vector<1x256x256xbf16> to vector<256x256xbf16>
    %cst_105 = arith.constant dense<0.000000e+00> : vector<64x256xf32>
    %208 = tpu.matmul %205, %207, %cst_105 {dimension_numbers = #tpu.dot_dimension_numbers<[1], [0], [0], [1], [0, 0, 1, 1], [], []>} : vector<64x256xbf16>, vector<256x256xbf16>, vector<64x256xf32> -> vector<64x256xf32>
    %209 = arith.addf %202, %208 : vector<64x256xf32>
    %c2_106 = arith.constant 2 : index
    %c2_107 = arith.constant 2 : index
    %c0_108 = arith.constant 0 : index
    %210 = vector.load %arg9[%c2_106, %c2_107, %c0_108] : memref<10x10x256xf32, #tpu.memory_space<vmem>>, vector<8x8x256xf32>
    %211 = vector.shape_cast %210 : vector<8x8x256xf32> to vector<64x256xf32>
    %212 = arith.truncf %211 : vector<64x256xf32> to vector<64x256xbf16>
    %c8 = arith.constant 8 : index
    %c0_109 = arith.constant 0 : index
    %c0_110 = arith.constant 0 : index
    %213 = vector.load %arg2[%c8, %c0_109, %c0_110] : memref<9x256x256xbf16, #tpu.memory_space<vmem>>, vector<1x256x256xbf16>
    %214 = vector.shape_cast %213 : vector<1x256x256xbf16> to vector<256x256xbf16>
    %cst_111 = arith.constant dense<0.000000e+00> : vector<64x256xf32>
    %215 = tpu.matmul %212, %214, %cst_111 {dimension_numbers = #tpu.dot_dimension_numbers<[1], [0], [0], [1], [0, 0, 1, 1], [], []>} : vector<64x256xbf16>, vector<256x256xbf16>, vector<64x256xf32> -> vector<64x256xf32>
    %216 = arith.addf %209, %215 : vector<64x256xf32>
    %cst_112 = arith.constant 0.000000e+00 : f32
    %217 = vector.broadcast %cst_112 : f32 to vector<64x256xf32>
    %218 = arith.maximumf %216, %217 : vector<64x256xf32>
    %c0_113 = arith.constant 0 : index
    %c0_114 = arith.constant 0 : index
    %219 = vector.load %arg6[%c0_113, %c0_114] : memref<1x32xf32, #tpu.memory_space<vmem>>, vector<1x32xf32>
    %c0_115 = arith.constant 0 : index
    %c0_116 = arith.constant 0 : index
    %220 = vector.load %arg7[%c0_115, %c0_116] : memref<1x32xf32, #tpu.memory_space<vmem>>, vector<1x32xf32>
    %cst_117 = arith.constant dense<0.000000e+00> : vector<256xf32>
    %221 = vector.multi_reduction <add>, %218, %cst_117 [0] : vector<64x256xf32> to vector<256xf32>
    %222 = vector.shape_cast %221 : vector<256xf32> to vector<1x256xf32>
    %223 = arith.mulf %218, %218 : vector<64x256xf32>
    %cst_118 = arith.constant dense<0.000000e+00> : vector<256xf32>
    %224 = vector.multi_reduction <add>, %223, %cst_118 [0] : vector<64x256xf32> to vector<256xf32>
    %225 = vector.shape_cast %224 : vector<256xf32> to vector<1x256xf32>
    %226 = vector.extract_strided_slice %222 {offsets = [0, 0], sizes = [1, 32], strides = [1, 1]} : vector<1x256xf32> to vector<1x32xf32>
    %227 = vector.extract_strided_slice %225 {offsets = [0, 0], sizes = [1, 32], strides = [1, 1]} : vector<1x256xf32> to vector<1x32xf32>
    %228 = vector.extract_strided_slice %222 {offsets = [0, 32], sizes = [1, 32], strides = [1, 1]} : vector<1x256xf32> to vector<1x32xf32>
    %229 = arith.addf %226, %228 : vector<1x32xf32>
    %230 = vector.extract_strided_slice %225 {offsets = [0, 32], sizes = [1, 32], strides = [1, 1]} : vector<1x256xf32> to vector<1x32xf32>
    %231 = arith.addf %227, %230 : vector<1x32xf32>
    %232 = vector.extract_strided_slice %222 {offsets = [0, 64], sizes = [1, 32], strides = [1, 1]} : vector<1x256xf32> to vector<1x32xf32>
    %233 = arith.addf %229, %232 : vector<1x32xf32>
    %234 = vector.extract_strided_slice %225 {offsets = [0, 64], sizes = [1, 32], strides = [1, 1]} : vector<1x256xf32> to vector<1x32xf32>
    %235 = arith.addf %231, %234 : vector<1x32xf32>
    %236 = vector.extract_strided_slice %222 {offsets = [0, 96], sizes = [1, 32], strides = [1, 1]} : vector<1x256xf32> to vector<1x32xf32>
    %237 = arith.addf %233, %236 : vector<1x32xf32>
    %238 = vector.extract_strided_slice %225 {offsets = [0, 96], sizes = [1, 32], strides = [1, 1]} : vector<1x256xf32> to vector<1x32xf32>
    %239 = arith.addf %235, %238 : vector<1x32xf32>
    %240 = vector.extract_strided_slice %222 {offsets = [0, 128], sizes = [1, 32], strides = [1, 1]} : vector<1x256xf32> to vector<1x32xf32>
    %241 = arith.addf %237, %240 : vector<1x32xf32>
    %242 = vector.extract_strided_slice %225 {offsets = [0, 128], sizes = [1, 32], strides = [1, 1]} : vector<1x256xf32> to vector<1x32xf32>
    %243 = arith.addf %239, %242 : vector<1x32xf32>
    %244 = vector.extract_strided_slice %222 {offsets = [0, 160], sizes = [1, 32], strides = [1, 1]} : vector<1x256xf32> to vector<1x32xf32>
    %245 = arith.addf %241, %244 : vector<1x32xf32>
    %246 = vector.extract_strided_slice %225 {offsets = [0, 160], sizes = [1, 32], strides = [1, 1]} : vector<1x256xf32> to vector<1x32xf32>
    %247 = arith.addf %243, %246 : vector<1x32xf32>
    %248 = vector.extract_strided_slice %222 {offsets = [0, 192], sizes = [1, 32], strides = [1, 1]} : vector<1x256xf32> to vector<1x32xf32>
    %249 = arith.addf %245, %248 : vector<1x32xf32>
    %250 = vector.extract_strided_slice %225 {offsets = [0, 192], sizes = [1, 32], strides = [1, 1]} : vector<1x256xf32> to vector<1x32xf32>
    %251 = arith.addf %247, %250 : vector<1x32xf32>
    %252 = vector.extract_strided_slice %222 {offsets = [0, 224], sizes = [1, 32], strides = [1, 1]} : vector<1x256xf32> to vector<1x32xf32>
    %253 = arith.addf %249, %252 : vector<1x32xf32>
    %254 = vector.extract_strided_slice %225 {offsets = [0, 224], sizes = [1, 32], strides = [1, 1]} : vector<1x256xf32> to vector<1x32xf32>
    %255 = arith.addf %251, %254 : vector<1x32xf32>
    %256 = vector.extract_strided_slice %253 {offsets = [0, 0], sizes = [1, 4], strides = [1, 1]} : vector<1x32xf32> to vector<1x4xf32>
    %cst_119 = arith.constant dense<0.000000e+00> : vector<1xf32>
    %257 = vector.multi_reduction <add>, %256, %cst_119 [1] : vector<1x4xf32> to vector<1xf32>
    %258 = vector.shape_cast %257 : vector<1xf32> to vector<1x1xf32>
    %259 = vector.shape_cast %258 : vector<1x1xf32> to vector<1x1xf32>
    %260 = vector.broadcast %259 : vector<1x1xf32> to vector<1x4xf32>
    %261 = vector.extract_strided_slice %253 {offsets = [0, 4], sizes = [1, 4], strides = [1, 1]} : vector<1x32xf32> to vector<1x4xf32>
    %cst_120 = arith.constant dense<0.000000e+00> : vector<1xf32>
    %262 = vector.multi_reduction <add>, %261, %cst_120 [1] : vector<1x4xf32> to vector<1xf32>
    %263 = vector.shape_cast %262 : vector<1xf32> to vector<1x1xf32>
    %264 = vector.shape_cast %263 : vector<1x1xf32> to vector<1x1xf32>
    %265 = vector.broadcast %264 : vector<1x1xf32> to vector<1x4xf32>
    %266 = vector.extract_strided_slice %253 {offsets = [0, 8], sizes = [1, 4], strides = [1, 1]} : vector<1x32xf32> to vector<1x4xf32>
    %cst_121 = arith.constant dense<0.000000e+00> : vector<1xf32>
    %267 = vector.multi_reduction <add>, %266, %cst_121 [1] : vector<1x4xf32> to vector<1xf32>
    %268 = vector.shape_cast %267 : vector<1xf32> to vector<1x1xf32>
    %269 = vector.shape_cast %268 : vector<1x1xf32> to vector<1x1xf32>
    %270 = vector.broadcast %269 : vector<1x1xf32> to vector<1x4xf32>
    %271 = vector.extract_strided_slice %253 {offsets = [0, 12], sizes = [1, 4], strides = [1, 1]} : vector<1x32xf32> to vector<1x4xf32>
    %cst_122 = arith.constant dense<0.000000e+00> : vector<1xf32>
    %272 = vector.multi_reduction <add>, %271, %cst_122 [1] : vector<1x4xf32> to vector<1xf32>
    %273 = vector.shape_cast %272 : vector<1xf32> to vector<1x1xf32>
    %274 = vector.shape_cast %273 : vector<1x1xf32> to vector<1x1xf32>
    %275 = vector.broadcast %274 : vector<1x1xf32> to vector<1x4xf32>
    %276 = vector.extract_strided_slice %253 {offsets = [0, 16], sizes = [1, 4], strides = [1, 1]} : vector<1x32xf32> to vector<1x4xf32>
    %cst_123 = arith.constant dense<0.000000e+00> : vector<1xf32>
    %277 = vector.multi_reduction <add>, %276, %cst_123 [1] : vector<1x4xf32> to vector<1xf32>
    %278 = vector.shape_cast %277 : vector<1xf32> to vector<1x1xf32>
    %279 = vector.shape_cast %278 : vector<1x1xf32> to vector<1x1xf32>
    %280 = vector.broadcast %279 : vector<1x1xf32> to vector<1x4xf32>
    %281 = vector.extract_strided_slice %253 {offsets = [0, 20], sizes = [1, 4], strides = [1, 1]} : vector<1x32xf32> to vector<1x4xf32>
    %cst_124 = arith.constant dense<0.000000e+00> : vector<1xf32>
    %282 = vector.multi_reduction <add>, %281, %cst_124 [1] : vector<1x4xf32> to vector<1xf32>
    %283 = vector.shape_cast %282 : vector<1xf32> to vector<1x1xf32>
    %284 = vector.shape_cast %283 : vector<1x1xf32> to vector<1x1xf32>
    %285 = vector.broadcast %284 : vector<1x1xf32> to vector<1x4xf32>
    %286 = vector.extract_strided_slice %253 {offsets = [0, 24], sizes = [1, 4], strides = [1, 1]} : vector<1x32xf32> to vector<1x4xf32>
    %cst_125 = arith.constant dense<0.000000e+00> : vector<1xf32>
    %287 = vector.multi_reduction <add>, %286, %cst_125 [1] : vector<1x4xf32> to vector<1xf32>
    %288 = vector.shape_cast %287 : vector<1xf32> to vector<1x1xf32>
    %289 = vector.shape_cast %288 : vector<1x1xf32> to vector<1x1xf32>
    %290 = vector.broadcast %289 : vector<1x1xf32> to vector<1x4xf32>
    %291 = vector.extract_strided_slice %253 {offsets = [0, 28], sizes = [1, 4], strides = [1, 1]} : vector<1x32xf32> to vector<1x4xf32>
    %cst_126 = arith.constant dense<0.000000e+00> : vector<1xf32>
    %292 = vector.multi_reduction <add>, %291, %cst_126 [1] : vector<1x4xf32> to vector<1xf32>
    %293 = vector.shape_cast %292 : vector<1xf32> to vector<1x1xf32>
    %294 = vector.shape_cast %293 : vector<1x1xf32> to vector<1x1xf32>
    %295 = vector.broadcast %294 : vector<1x1xf32> to vector<1x4xf32>
    %296 = tpu.concatenate %260, %265, %270, %275, %280, %285, %290, %295 in 1 : vector<1x4xf32>, vector<1x4xf32>, vector<1x4xf32>, vector<1x4xf32>, vector<1x4xf32>, vector<1x4xf32>, vector<1x4xf32>, vector<1x4xf32> -> vector<1x32xf32>
    %cst_127 = arith.constant 4.8828125E-4 : f32
    %297 = vector.broadcast %cst_127 : f32 to vector<1x32xf32>
    %298 = arith.mulf %296, %297 : vector<1x32xf32>
    %299 = vector.extract_strided_slice %255 {offsets = [0, 0], sizes = [1, 4], strides = [1, 1]} : vector<1x32xf32> to vector<1x4xf32>
    %cst_128 = arith.constant dense<0.000000e+00> : vector<1xf32>
    %300 = vector.multi_reduction <add>, %299, %cst_128 [1] : vector<1x4xf32> to vector<1xf32>
    %301 = vector.shape_cast %300 : vector<1xf32> to vector<1x1xf32>
    %302 = vector.shape_cast %301 : vector<1x1xf32> to vector<1x1xf32>
    %303 = vector.broadcast %302 : vector<1x1xf32> to vector<1x4xf32>
    %304 = vector.extract_strided_slice %255 {offsets = [0, 4], sizes = [1, 4], strides = [1, 1]} : vector<1x32xf32> to vector<1x4xf32>
    %cst_129 = arith.constant dense<0.000000e+00> : vector<1xf32>
    %305 = vector.multi_reduction <add>, %304, %cst_129 [1] : vector<1x4xf32> to vector<1xf32>
    %306 = vector.shape_cast %305 : vector<1xf32> to vector<1x1xf32>
    %307 = vector.shape_cast %306 : vector<1x1xf32> to vector<1x1xf32>
    %308 = vector.broadcast %307 : vector<1x1xf32> to vector<1x4xf32>
    %309 = vector.extract_strided_slice %255 {offsets = [0, 8], sizes = [1, 4], strides = [1, 1]} : vector<1x32xf32> to vector<1x4xf32>
    %cst_130 = arith.constant dense<0.000000e+00> : vector<1xf32>
    %310 = vector.multi_reduction <add>, %309, %cst_130 [1] : vector<1x4xf32> to vector<1xf32>
    %311 = vector.shape_cast %310 : vector<1xf32> to vector<1x1xf32>
    %312 = vector.shape_cast %311 : vector<1x1xf32> to vector<1x1xf32>
    %313 = vector.broadcast %312 : vector<1x1xf32> to vector<1x4xf32>
    %314 = vector.extract_strided_slice %255 {offsets = [0, 12], sizes = [1, 4], strides = [1, 1]} : vector<1x32xf32> to vector<1x4xf32>
    %cst_131 = arith.constant dense<0.000000e+00> : vector<1xf32>
    %315 = vector.multi_reduction <add>, %314, %cst_131 [1] : vector<1x4xf32> to vector<1xf32>
    %316 = vector.shape_cast %315 : vector<1xf32> to vector<1x1xf32>
    %317 = vector.shape_cast %316 : vector<1x1xf32> to vector<1x1xf32>
    %318 = vector.broadcast %317 : vector<1x1xf32> to vector<1x4xf32>
    %319 = vector.extract_strided_slice %255 {offsets = [0, 16], sizes = [1, 4], strides = [1, 1]} : vector<1x32xf32> to vector<1x4xf32>
    %cst_132 = arith.constant dense<0.000000e+00> : vector<1xf32>
    %320 = vector.multi_reduction <add>, %319, %cst_132 [1] : vector<1x4xf32> to vector<1xf32>
    %321 = vector.shape_cast %320 : vector<1xf32> to vector<1x1xf32>
    %322 = vector.shape_cast %321 : vector<1x1xf32> to vector<1x1xf32>
    %323 = vector.broadcast %322 : vector<1x1xf32> to vector<1x4xf32>
    %324 = vector.extract_strided_slice %255 {offsets = [0, 20], sizes = [1, 4], strides = [1, 1]} : vector<1x32xf32> to vector<1x4xf32>
    %cst_133 = arith.constant dense<0.000000e+00> : vector<1xf32>
    %325 = vector.multi_reduction <add>, %324, %cst_133 [1] : vector<1x4xf32> to vector<1xf32>
    %326 = vector.shape_cast %325 : vector<1xf32> to vector<1x1xf32>
    %327 = vector.shape_cast %326 : vector<1x1xf32> to vector<1x1xf32>
    %328 = vector.broadcast %327 : vector<1x1xf32> to vector<1x4xf32>
    %329 = vector.extract_strided_slice %255 {offsets = [0, 24], sizes = [1, 4], strides = [1, 1]} : vector<1x32xf32> to vector<1x4xf32>
    %cst_134 = arith.constant dense<0.000000e+00> : vector<1xf32>
    %330 = vector.multi_reduction <add>, %329, %cst_134 [1] : vector<1x4xf32> to vector<1xf32>
    %331 = vector.shape_cast %330 : vector<1xf32> to vector<1x1xf32>
    %332 = vector.shape_cast %331 : vector<1x1xf32> to vector<1x1xf32>
    %333 = vector.broadcast %332 : vector<1x1xf32> to vector<1x4xf32>
    %334 = vector.extract_strided_slice %255 {offsets = [0, 28], sizes = [1, 4], strides = [1, 1]} : vector<1x32xf32> to vector<1x4xf32>
    %cst_135 = arith.constant dense<0.000000e+00> : vector<1xf32>
    %335 = vector.multi_reduction <add>, %334, %cst_135 [1] : vector<1x4xf32> to vector<1xf32>
    %336 = vector.shape_cast %335 : vector<1xf32> to vector<1x1xf32>
    %337 = vector.shape_cast %336 : vector<1x1xf32> to vector<1x1xf32>
    %338 = vector.broadcast %337 : vector<1x1xf32> to vector<1x4xf32>
    %339 = tpu.concatenate %303, %308, %313, %318, %323, %328, %333, %338 in 1 : vector<1x4xf32>, vector<1x4xf32>, vector<1x4xf32>, vector<1x4xf32>, vector<1x4xf32>, vector<1x4xf32>, vector<1x4xf32>, vector<1x4xf32> -> vector<1x32xf32>
    %cst_136 = arith.constant 4.8828125E-4 : f32
    %340 = vector.broadcast %cst_136 : f32 to vector<1x32xf32>
    %341 = arith.mulf %339, %340 : vector<1x32xf32>
    %342 = arith.mulf %298, %298 : vector<1x32xf32>
    %343 = arith.subf %341, %342 : vector<1x32xf32>
    %cst_137 = arith.constant 9.99999974E-6 : f32
    %344 = vector.broadcast %cst_137 : f32 to vector<1x32xf32>
    %345 = arith.addf %343, %344 : vector<1x32xf32>
    %346 = math.rsqrt %345 : vector<1x32xf32>
    %347 = arith.mulf %219, %346 : vector<1x32xf32>
    %348 = arith.mulf %298, %347 : vector<1x32xf32>
    %349 = arith.subf %220, %348 : vector<1x32xf32>
    %350 = tpu.concatenate %347, %347, %347, %347, %347, %347, %347, %347 in 1 : vector<1x32xf32>, vector<1x32xf32>, vector<1x32xf32>, vector<1x32xf32>, vector<1x32xf32>, vector<1x32xf32>, vector<1x32xf32>, vector<1x32xf32> -> vector<1x256xf32>
    %351 = tpu.concatenate %349, %349, %349, %349, %349, %349, %349, %349 in 1 : vector<1x32xf32>, vector<1x32xf32>, vector<1x32xf32>, vector<1x32xf32>, vector<1x32xf32>, vector<1x32xf32>, vector<1x32xf32>, vector<1x32xf32> -> vector<1x256xf32>
    %352 = vector.broadcast %350 : vector<1x256xf32> to vector<64x256xf32>
    %353 = arith.mulf %218, %352 : vector<64x256xf32>
    %354 = vector.broadcast %351 : vector<1x256xf32> to vector<64x256xf32>
    %355 = arith.addf %353, %354 : vector<64x256xf32>
    %356 = vector.shape_cast %355 : vector<64x256xf32> to vector<8x8x256xf32>
    %c1_138 = arith.constant 1 : index
    %c1_139 = arith.constant 1 : index
    %c0_140 = arith.constant 0 : index
    %357 = vector.load %arg10[%c1_138, %c1_139, %c0_140] : memref<10x10x256xf32, #tpu.memory_space<vmem>>, vector<8x8x256xf32>
    tpu.vector_store %arg10[%c1_138, %c1_139, %c0_140], %356 {strides = array<i32>} : memref<10x10x256xf32, #tpu.memory_space<vmem>>, vector<8x8x256xf32>,
    %c0_141 = arith.constant 0 : index
    %c0_142 = arith.constant 0 : index
    %c0_143 = arith.constant 0 : index
    %358 = vector.load %arg10[%c0_141, %c0_142, %c0_143] : memref<10x10x256xf32, #tpu.memory_space<vmem>>, vector<8x8x256xf32>
    %359 = vector.shape_cast %358 : vector<8x8x256xf32> to vector<64x256xf32>
    %360 = arith.truncf %359 : vector<64x256xf32> to vector<64x256xbf16>
    %c0_144 = arith.constant 0 : index
    %c0_145 = arith.constant 0 : index
    %c0_146 = arith.constant 0 : index
    %361 = vector.load %arg5[%c0_144, %c0_145, %c0_146] : memref<9x256x256xbf16, #tpu.memory_space<vmem>>, vector<1x256x256xbf16>
    %362 = vector.shape_cast %361 : vector<1x256x256xbf16> to vector<256x256xbf16>
    %cst_147 = arith.constant dense<0.000000e+00> : vector<64x256xf32>
    %363 = tpu.matmul %360, %362, %cst_147 {dimension_numbers = #tpu.dot_dimension_numbers<[1], [0], [0], [1], [0, 0, 1, 1], [], []>} : vector<64x256xbf16>, vector<256x256xbf16>, vector<64x256xf32> -> vector<64x256xf32>
    %c0_148 = arith.constant 0 : index
    %c1_149 = arith.constant 1 : index
    %c0_150 = arith.constant 0 : index
    %364 = vector.load %arg10[%c0_148, %c1_149, %c0_150] : memref<10x10x256xf32, #tpu.memory_space<vmem>>, vector<8x8x256xf32>
    %365 = vector.shape_cast %364 : vector<8x8x256xf32> to vector<64x256xf32>
    %366 = arith.truncf %365 : vector<64x256xf32> to vector<64x256xbf16>
    %c1_151 = arith.constant 1 : index
    %c0_152 = arith.constant 0 : index
    %c0_153 = arith.constant 0 : index
    %367 = vector.load %arg5[%c1_151, %c0_152, %c0_153] : memref<9x256x256xbf16, #tpu.memory_space<vmem>>, vector<1x256x256xbf16>
    %368 = vector.shape_cast %367 : vector<1x256x256xbf16> to vector<256x256xbf16>
    %cst_154 = arith.constant dense<0.000000e+00> : vector<64x256xf32>
    %369 = tpu.matmul %366, %368, %cst_154 {dimension_numbers = #tpu.dot_dimension_numbers<[1], [0], [0], [1], [0, 0, 1, 1], [], []>} : vector<64x256xbf16>, vector<256x256xbf16>, vector<64x256xf32> -> vector<64x256xf32>
    %370 = arith.addf %363, %369 : vector<64x256xf32>
    %c0_155 = arith.constant 0 : index
    %c2_156 = arith.constant 2 : index
    %c0_157 = arith.constant 0 : index
    %371 = vector.load %arg10[%c0_155, %c2_156, %c0_157] : memref<10x10x256xf32, #tpu.memory_space<vmem>>, vector<8x8x256xf32>
    %372 = vector.shape_cast %371 : vector<8x8x256xf32> to vector<64x256xf32>
    %373 = arith.truncf %372 : vector<64x256xf32> to vector<64x256xbf16>
    %c2_158 = arith.constant 2 : index
    %c0_159 = arith.constant 0 : index
    %c0_160 = arith.constant 0 : index
    %374 = vector.load %arg5[%c2_158, %c0_159, %c0_160] : memref<9x256x256xbf16, #tpu.memory_space<vmem>>, vector<1x256x256xbf16>
    %375 = vector.shape_cast %374 : vector<1x256x256xbf16> to vector<256x256xbf16>
    %cst_161 = arith.constant dense<0.000000e+00> : vector<64x256xf32>
    %376 = tpu.matmul %373, %375, %cst_161 {dimension_numbers = #tpu.dot_dimension_numbers<[1], [0], [0], [1], [0, 0, 1, 1], [], []>} : vector<64x256xbf16>, vector<256x256xbf16>, vector<64x256xf32> -> vector<64x256xf32>
    %377 = arith.addf %370, %376 : vector<64x256xf32>
    %c1_162 = arith.constant 1 : index
    %c0_163 = arith.constant 0 : index
    %c0_164 = arith.constant 0 : index
    %378 = vector.load %arg10[%c1_162, %c0_163, %c0_164] : memref<10x10x256xf32, #tpu.memory_space<vmem>>, vector<8x8x256xf32>
    %379 = vector.shape_cast %378 : vector<8x8x256xf32> to vector<64x256xf32>
    %380 = arith.truncf %379 : vector<64x256xf32> to vector<64x256xbf16>
    %c3_165 = arith.constant 3 : index
    %c0_166 = arith.constant 0 : index
    %c0_167 = arith.constant 0 : index
    %381 = vector.load %arg5[%c3_165, %c0_166, %c0_167] : memref<9x256x256xbf16, #tpu.memory_space<vmem>>, vector<1x256x256xbf16>
    %382 = vector.shape_cast %381 : vector<1x256x256xbf16> to vector<256x256xbf16>
    %cst_168 = arith.constant dense<0.000000e+00> : vector<64x256xf32>
    %383 = tpu.matmul %380, %382, %cst_168 {dimension_numbers = #tpu.dot_dimension_numbers<[1], [0], [0], [1], [0, 0, 1, 1], [], []>} : vector<64x256xbf16>, vector<256x256xbf16>, vector<64x256xf32> -> vector<64x256xf32>
    %384 = arith.addf %377, %383 : vector<64x256xf32>
    %c1_169 = arith.constant 1 : index
    %c1_170 = arith.constant 1 : index
    %c0_171 = arith.constant 0 : index
    %385 = vector.load %arg10[%c1_169, %c1_170, %c0_171] : memref<10x10x256xf32, #tpu.memory_space<vmem>>, vector<8x8x256xf32>
    %386 = vector.shape_cast %385 : vector<8x8x256xf32> to vector<64x256xf32>
    %387 = arith.truncf %386 : vector<64x256xf32> to vector<64x256xbf16>
    %c4_172 = arith.constant 4 : index
    %c0_173 = arith.constant 0 : index
    %c0_174 = arith.constant 0 : index
    %388 = vector.load %arg5[%c4_172, %c0_173, %c0_174] : memref<9x256x256xbf16, #tpu.memory_space<vmem>>, vector<1x256x256xbf16>
    %389 = vector.shape_cast %388 : vector<1x256x256xbf16> to vector<256x256xbf16>
    %cst_175 = arith.constant dense<0.000000e+00> : vector<64x256xf32>
    %390 = tpu.matmul %387, %389, %cst_175 {dimension_numbers = #tpu.dot_dimension_numbers<[1], [0], [0], [1], [0, 0, 1, 1], [], []>} : vector<64x256xbf16>, vector<256x256xbf16>, vector<64x256xf32> -> vector<64x256xf32>
    %391 = arith.addf %384, %390 : vector<64x256xf32>
    %c1_176 = arith.constant 1 : index
    %c2_177 = arith.constant 2 : index
    %c0_178 = arith.constant 0 : index
    %392 = vector.load %arg10[%c1_176, %c2_177, %c0_178] : memref<10x10x256xf32, #tpu.memory_space<vmem>>, vector<8x8x256xf32>
    %393 = vector.shape_cast %392 : vector<8x8x256xf32> to vector<64x256xf32>
    %394 = arith.truncf %393 : vector<64x256xf32> to vector<64x256xbf16>
    %c5_179 = arith.constant 5 : index
    %c0_180 = arith.constant 0 : index
    %c0_181 = arith.constant 0 : index
    %395 = vector.load %arg5[%c5_179, %c0_180, %c0_181] : memref<9x256x256xbf16, #tpu.memory_space<vmem>>, vector<1x256x256xbf16>
    %396 = vector.shape_cast %395 : vector<1x256x256xbf16> to vector<256x256xbf16>
    %cst_182 = arith.constant dense<0.000000e+00> : vector<64x256xf32>
    %397 = tpu.matmul %394, %396, %cst_182 {dimension_numbers = #tpu.dot_dimension_numbers<[1], [0], [0], [1], [0, 0, 1, 1], [], []>} : vector<64x256xbf16>, vector<256x256xbf16>, vector<64x256xf32> -> vector<64x256xf32>
    %398 = arith.addf %391, %397 : vector<64x256xf32>
    %c2_183 = arith.constant 2 : index
    %c0_184 = arith.constant 0 : index
    %c0_185 = arith.constant 0 : index
    %399 = vector.load %arg10[%c2_183, %c0_184, %c0_185] : memref<10x10x256xf32, #tpu.memory_space<vmem>>, vector<8x8x256xf32>
    %400 = vector.shape_cast %399 : vector<8x8x256xf32> to vector<64x256xf32>
    %401 = arith.truncf %400 : vector<64x256xf32> to vector<64x256xbf16>
    %c6_186 = arith.constant 6 : index
    %c0_187 = arith.constant 0 : index
    %c0_188 = arith.constant 0 : index
    %402 = vector.load %arg5[%c6_186, %c0_187, %c0_188] : memref<9x256x256xbf16, #tpu.memory_space<vmem>>, vector<1x256x256xbf16>
    %403 = vector.shape_cast %402 : vector<1x256x256xbf16> to vector<256x256xbf16>
    %cst_189 = arith.constant dense<0.000000e+00> : vector<64x256xf32>
    %404 = tpu.matmul %401, %403, %cst_189 {dimension_numbers = #tpu.dot_dimension_numbers<[1], [0], [0], [1], [0, 0, 1, 1], [], []>} : vector<64x256xbf16>, vector<256x256xbf16>, vector<64x256xf32> -> vector<64x256xf32>
    %405 = arith.addf %398, %404 : vector<64x256xf32>
    %c2_190 = arith.constant 2 : index
    %c1_191 = arith.constant 1 : index
    %c0_192 = arith.constant 0 : index
    %406 = vector.load %arg10[%c2_190, %c1_191, %c0_192] : memref<10x10x256xf32, #tpu.memory_space<vmem>>, vector<8x8x256xf32>
    %407 = vector.shape_cast %406 : vector<8x8x256xf32> to vector<64x256xf32>
    %408 = arith.truncf %407 : vector<64x256xf32> to vector<64x256xbf16>
    %c7_193 = arith.constant 7 : index
    %c0_194 = arith.constant 0 : index
    %c0_195 = arith.constant 0 : index
    %409 = vector.load %arg5[%c7_193, %c0_194, %c0_195] : memref<9x256x256xbf16, #tpu.memory_space<vmem>>, vector<1x256x256xbf16>
    %410 = vector.shape_cast %409 : vector<1x256x256xbf16> to vector<256x256xbf16>
    %cst_196 = arith.constant dense<0.000000e+00> : vector<64x256xf32>
    %411 = tpu.matmul %408, %410, %cst_196 {dimension_numbers = #tpu.dot_dimension_numbers<[1], [0], [0], [1], [0, 0, 1, 1], [], []>} : vector<64x256xbf16>, vector<256x256xbf16>, vector<64x256xf32> -> vector<64x256xf32>
    %412 = arith.addf %405, %411 : vector<64x256xf32>
    %c2_197 = arith.constant 2 : index
    %c2_198 = arith.constant 2 : index
    %c0_199 = arith.constant 0 : index
    %413 = vector.load %arg10[%c2_197, %c2_198, %c0_199] : memref<10x10x256xf32, #tpu.memory_space<vmem>>, vector<8x8x256xf32>
    %414 = vector.shape_cast %413 : vector<8x8x256xf32> to vector<64x256xf32>
    %415 = arith.truncf %414 : vector<64x256xf32> to vector<64x256xbf16>
    %c8_200 = arith.constant 8 : index
    %c0_201 = arith.constant 0 : index
    %c0_202 = arith.constant 0 : index
    %416 = vector.load %arg5[%c8_200, %c0_201, %c0_202] : memref<9x256x256xbf16, #tpu.memory_space<vmem>>, vector<1x256x256xbf16>
    %417 = vector.shape_cast %416 : vector<1x256x256xbf16> to vector<256x256xbf16>
    %cst_203 = arith.constant dense<0.000000e+00> : vector<64x256xf32>
    %418 = tpu.matmul %415, %417, %cst_203 {dimension_numbers = #tpu.dot_dimension_numbers<[1], [0], [0], [1], [0, 0, 1, 1], [], []>} : vector<64x256xbf16>, vector<256x256xbf16>, vector<64x256xf32> -> vector<64x256xf32>
    %419 = arith.addf %412, %418 : vector<64x256xf32>
    %cst_204 = arith.constant 0.000000e+00 : f32
    %420 = vector.broadcast %cst_204 : f32 to vector<64x256xf32>
    %421 = arith.maximumf %419, %420 : vector<64x256xf32>
    %c0_205 = arith.constant 0 : index
    %c0_206 = arith.constant 0 : index
    %c0_207 = arith.constant 0 : index
    %422 = vector.load %arg8[%c0_205, %c0_206, %c0_207] : memref<1x64x256xf32, #tpu.memory_space<vmem>>, vector<1x64x256xf32>
    %423 = vector.shape_cast %422 : vector<1x64x256xf32> to vector<64x256xf32>
    %424 = vector.shape_cast %421 : vector<64x256xf32> to vector<1x64x256xf32>
    tpu.vector_store %arg8[%c0_205, %c0_206, %c0_207], %424 {strides = array<i32>} : memref<1x64x256xf32, #tpu.memory_space<vmem>>, vector<1x64x256xf32>,
    return
  }
  func.func @transform_0(%arg0: i32) -> (i32, i32, i32, i32) {
    %c0_i32 = arith.constant 0 : i32
    %c0_i32_0 = arith.constant 0 : i32
    %c0_i32_1 = arith.constant 0 : i32
    %c0_i32_2 = arith.constant 0 : i32
    return %arg0, %c0_i32, %c0_i32_0, %c0_i32_1 : i32, i32, i32, i32
  }
  func.func @transform_1(%arg0: i32) -> (i32, i32, i32) {
    %c0_i32 = arith.constant 0 : i32
    %c0_i32_0 = arith.constant 0 : i32
    %c0_i32_1 = arith.constant 0 : i32
    %c0_i32_2 = arith.constant 0 : i32
    return %c0_i32, %c0_i32_0, %c0_i32_1 : i32, i32, i32
  }
  func.func @transform_2(%arg0: i32) -> (i32, i32) {
    %c0_i32 = arith.constant 0 : i32
    %c0_i32_0 = arith.constant 0 : i32
    %c0_i32_1 = arith.constant 0 : i32
    return %c0_i32, %c0_i32_0 : i32, i32
  }
  func.func @transform_3(%arg0: i32) -> (i32, i32) {
    %c0_i32 = arith.constant 0 : i32
    %c0_i32_0 = arith.constant 0 : i32
    %c0_i32_1 = arith.constant 0 : i32
    return %c0_i32, %c0_i32_0 : i32, i32
  }
  func.func @transform_4(%arg0: i32) -> (i32, i32, i32) {
    %c0_i32 = arith.constant 0 : i32
    %c0_i32_0 = arith.constant 0 : i32
    %c0_i32_1 = arith.constant 0 : i32
    %c0_i32_2 = arith.constant 0 : i32
    return %c0_i32, %c0_i32_0, %c0_i32_1 : i32, i32, i32
  }
  func.func @transform_5(%arg0: i32) -> (i32, i32) {
    %c0_i32 = arith.constant 0 : i32
    %c0_i32_0 = arith.constant 0 : i32
    %c0_i32_1 = arith.constant 0 : i32
    return %c0_i32, %c0_i32_0 : i32, i32
  }
  func.func @transform_6(%arg0: i32) -> (i32, i32) {
    %c0_i32 = arith.constant 0 : i32
    %c0_i32_0 = arith.constant 0 : i32
    %c0_i32_1 = arith.constant 0 : i32
    return %c0_i32, %c0_i32_0 : i32, i32
  }
  func.func @transform_7(%arg0: i32) -> (i32, i32, i32) {
    %c0_i32 = arith.constant 0 : i32
    %c0_i32_0 = arith.constant 0 : i32
    %c0_i32_1 = arith.constant 0 : i32
    return %arg0, %c0_i32, %c0_i32_0 : i32, i32, i32
  }
}

</mosaic_0001>

<bundles_post_ra>
// kernel: tpu_custom_call.1
= control target key start
LH: loop header
LB: loop body
LE: loop exit
PB: predicated region body
PF: predicated region fallthrough
CT: control target
= control target key end

     0   :  { %s14426_s0 = inlined_call_operand.hbm [shape: bf16[2,8,8,256], index: 0, kind: input, shape index: {}]   ;;  %s14427_s1 = inlined_call_operand.hbm [shape: bf16[9,256,256], index: 1, kind: input, shape index: {}]   ;;  %s14428_s2 = inlined_call_operand.hbm [shape: f32[1,32], index: 2, kind: input, shape index: {}]   ;;  %s14429_s3 = inlined_call_operand.hbm [shape: f32[1,32], index: 3, kind: input, shape index: {}]   ;;  %s14430_s4 = inlined_call_operand.hbm [shape: bf16[9,256,256], index: 4, kind: input, shape index: {}]   ;;  %s14431_s5 = inlined_call_operand.hbm [shape: f32[1,32], index: 5, kind: input, shape index: {}]   ;;  %s14432_s6 = inlined_call_operand.hbm [shape: f32[1,32], index: 6, kind: input, shape index: {}]   ;;  %s14433_s7 = inlined_call_operand.hbm [shape: f32[2,64,256], index: 7, kind: output, shape index: {}]  }
   0x1   :  { %14436 = sst [smem:[#allocation36_spill]] %s14427_s1 }
   0x2   :  { %14437 = sst [smem:[#allocation37_spill]] %s14428_s2 }
   0x3   :  { %12 = vsyncpa [#allocation5], 0 }
   0x4   :  { %14 = vsyncpa [#allocation5 + $0x1], 0 }
   0x5   :  { %15 = vsyncpa [#allocation8], 0 }
   0x6   :  { %16 = vsyncpa [#allocation11], 0 }
   0x7   :  { %17 = vsyncpa [#allocation14], 0 }
   0x8   :  { %18 = vsyncpa [#allocation6], 0 }
   0x9   :  { %20 = vsyncpa [#allocation6 + $0x1], 0  ;;  %s12490_s24 = smov 0   ;;  %s12492_s25 = smov 0  }
   0xa   :  { %s12494_s26 = smov 0   ;;  %s12496_s27 = smov 0  }
   0xb LB: > { %s14438_s1 = sld [smem:[#allocation36_spill]]  ;;  %s12514_s8 = sadd.s32 4294967295, %s12427_s27   ;;  %s12427_s27 = sphi %s12496_s27, %s14483_s27   ;;  %s12423_s26 = sphi %s12494_s26, %s14482_s26   ;;  %s12419_s25 = sphi %s12492_s25, %s14481_s25   ;;  %s12415_s24 = sphi %s12490_s24, %s14480_s24  }
   0xc   : > { %p9106_p0 = scmp.ge.s32.totalorder %s12427_s27, 1  ;;  %p47_p1 = scmp.eq.s32.totalorder %s12514_s8, 0 }
   0xd   : > { %p209_p2 = scmp.lt.s32.totalorder %s12427_s27, 3  ;;  %s12429_s10 = smov [#allocation7]  }
   0xe   : > { %s222_s11 = sshll.u32 %s12429_s10, 4  ;;  %s247_s14 = sshll.u32 %s14429_s3, 4  ;;  %s223_s11 = int_to_ptr.vmem [resolvable:$true] %s222_s11  ;;  %s248_s14 = int_to_ptr.hbm [resolvable:$true] %s247_s14 }
   0xf   : > { %p12519_p3 = pnand %p9106_p0, %p209_p2  ;;  %s273_s18 = sshll.u32 %s14431_s5, 4  ;;  %s274_s18 = int_to_ptr.hbm [resolvable:$true] %s273_s18 }
  0x10   : > { %s12430_s19 = smov [#allocation10]   ;;  %s14434_s21 = smov 128  }
  0x11   : > { %s220_s30 = sshll.u32 %s14438_s1, 4  ;;  %p12041_p4 = pneg %p12519_p3  ;;  %s221_s30 = int_to_ptr.hbm [resolvable:$true] %s220_s30 }
  0x12   : > { %s249_s20 = sshll.u32 %s12430_s19, 4  ;;  %s14435_s22 = smov 8   ;;  %s250_s20 = int_to_ptr.vmem [resolvable:$true] %s249_s20 }
  0x13   : > { %p12531_p6 = pnand %p12041_p4, %p47_p1  ;;  %s14441_s2 = sld [smem:[#allocation37_spill]] }
  0x14   : > { %s12433_s10 = smov [#allocation13]   ;;  %s12434_s13 = smov [#allocation9]  }
  0x15   : > { %12044 = dma.hbm_to_vmem [thread:$0]  (!%p12531_p6), %s221_s30, 36864, %s223_s11, [#allocation8], %s14434_s21, %s14434_s21, %s14435_s22  }
  0x16   : > { %12050 = dma.hbm_to_vmem [thread:$0]  (!%p12531_p6), %s248_s14, 16, %s250_s20, [#allocation11]  }
  0x17   : > { %s275_s12 = sshll.u32 %s12433_s10, 4  ;;  %s237_s16 = sshll.u32 %s12434_s13, 4  ;;  %s276_s12 = int_to_ptr.vmem [resolvable:$true] %s275_s12  ;;  %s238_s16 = int_to_ptr.vmem [resolvable:$true] %s237_s16 }
  0x18   : > { %12056 = dma.hbm_to_vmem [thread:$0]  (!%p12531_p6), %s274_s18, 16, %s276_s12, [#allocation14]  }
  0x19   : > { %s235_s29 = sshll.u32 %s14441_s2, 4  ;;  %s258_s14 = sshll.u32 %s14430_s4, 4  ;;  %s236_s29 = int_to_ptr.hbm [resolvable:$true] %s235_s29  ;;  %s259_s14 = int_to_ptr.hbm [resolvable:$true] %s258_s14 }
  0x1a   : > { %12047 = dma.hbm_to_vmem [thread:$0]  (!%p12531_p6), %s236_s29, 16, %s238_s16, [#allocation8]  }
  0x1b   : > { %s285_s18 = sshll.u32 %s14432_s6, 4  ;;  %s12435_s20 = smov [#allocation12]   ;;  %s286_s18 = int_to_ptr.hbm [resolvable:$true] %s285_s18 }
  0x1c   : > { %s260_s23 = sshll.u32 %s12435_s20, 4  ;;  %s12436_s28 = smov [#allocation15]   ;;  %s261_s23 = int_to_ptr.vmem [resolvable:$true] %s260_s23 }
  0x1d   : > { %12053 = dma.hbm_to_vmem [thread:$0]  (!%p12531_p6), %s259_s14, 36864, %s261_s23, [#allocation11], %s14434_s21, %s14434_s21, %s14435_s22  }
  0x1e   : > { %s287_s29 = sshll.u32 %s12436_s28, 4  ;;  %s9105_s10 = sadd.s32 4294967294, %s12427_s27   ;;  %s288_s29 = int_to_ptr.vmem [resolvable:$true] %s287_s29 }
  0x1f   : > { %12059 = dma.hbm_to_vmem [thread:$0]  (!%p12531_p6), %s286_s18, 16, %s288_s29, [#allocation14]  }
  0x20   : > { %s12567_s12 = sadd.s32 1, %s12427_s27   ;;  %s33_s16 = sadd.s32 1, %s12423_s26 }
  0x21   : > { %s30_s13 = ssub.s32 %s12427_s27, %s12567_s12  ;;  %p40_p8 = scmp.ne.s32.totalorder %s12423_s26, %s12419_s25 }
  0x22   : > { %p31_p7 = scmp.eq.s32.totalorder %s30_s13, 0  ;;  %p41_p9 = scmp.eq.s32.totalorder %s12427_s27, 0 }
  0x23   : > { %p46_p10 = scmp.ne.s32.totalorder %s12419_s25, %s12415_s24  ;;  %p196_p13 = scmp.eq.s32.totalorder %s12514_s8, 1 }
  0x24   : > { %s12578_s30 = scalar_select %p31_p7, %s12423_s26, %s33_s16  }
  0x25   : > { %p12580_p11 = por %p41_p9, %p40_p8  ;;  %p12586_p12 = por %p47_p1, %p46_p10 }
  0x26   : > { %p202_p0 = scmp.eq.s32.totalorder %s9105_s10, 1  ;;  %p12074_p2 = scmp.lt.s32.totalorder %s12427_s27, 2 }
  0x27   : > { %s298_s14 = sand.u32 1, %s12423_s26   ;;  %p12593_p4 = por %p196_p13, %p40_p8 }
  0x28   : > { %p12597_p6 = por %p202_p0, %p46_p10  ;;  %s9114_s18 = sshll.u32 %s298_s14, 6 }
  0x29   : > { %s11435_s20 = sshll.u32 %s12427_s27, 6  ;;  %s302_s13 = scalar_lea.vmem [#allocation4], %s9114_s18 }
  0x2a   : > { %s307_s29 = scalar_lea.hbm %s14426_s0, %s11435_s20  ;;  %s310_s16 = sshll.u32 %s302_s13, 4  ;;  %s311_s16 = int_to_ptr.vmem [resolvable:$true] %s310_s16 }
  0x2b   : > { %s308_s21 = sshll.u32 %s307_s29, 4  ;;  %p12607_p7 = pnand %p12074_p2, %p12580_p11  ;;  %s309_s21 = int_to_ptr.hbm [resolvable:$true] %s308_s21 }
  0x2c   : > { %s299_s22 = scalar_lea.sflag [#allocation5], %s298_s14  ;;  %s12319_s1 = sshra.s32 %s309_s21, 4  ;;  %s12320_s1 = int_to_ptr.hbm [resolvable:$true] %s12319_s1 }
  0x2d   : > { %s12321_s2 = scalar_lea.hbm %s12320_s1, 64  ;;  %p12323_p9 = pneg %p12607_p7 }
  0x2e   : > { %p12322_p8 = scmp.ne.s32.totalorder %s12320_s1, %s12321_s2  ;;  %s12326_s23 = scalar_lea.hbm %s14426_s0, 128 }
  0x2f   : > { %p12327_p11 = scmp.lt.s32.totalorder %s12320_s1, %s14426_s0  ;;  %p12328_p0 = scmp.lt.s32.totalorder %s12326_s23, %s12321_s2 }
  0x30   : > { %p12324_p10 = pnand %p12323_p9, %p12322_p8 }
  0x31   : > { %p12329_p2 = por %p12328_p0, %p12327_p11 }
  0x32   : > { %p12325_p13 = pneg %p12324_p10 }
  0x34   : > { %p12330_p5 = pnand %p12329_p2, %p12325_p13 }
  0x36   : > { %12333 = shalt.err (!%p12330_p5)
}
  0x37   : > { %s14447_s14 = smov 8   ;;  %s14448_s29 = smov 128  }
  0x38   : > { %12063 = dma.hbm_to_vmem [thread:$0]  (!%p12607_p7), %s309_s21, 1024, %s311_s16, %s299_s22, %s14448_s29, %s14448_s29, %s14447_s14  }
  0x39   : > { %322 = sbr.rel (%p12519_p3) target bundleno = 2770 (0xad2), region = 48 }
  0x3e   : > { %s12627_s13 = sand.u32 1, %s12419_s25  }
  0x3f   : > { %s9118_s1 = sshll.u32 %s12627_s13, 6  ;;  %s325_s2 = scalar_lea.sflag [#allocation5], %s12627_s13 }
  0x40   : > { %s12631_s18 = scalar_lea.vmem [#allocation4], %s9118_s1 }
  0x41   : > { %12394 = dma.done.wait (%p12586_p12), %s325_s2, 1024  }
  0x42   : > { %12396 = vsyncadd (%p12586_p12), %s325_s2, 4294966272 }
  0x43   : > { %12398 = dma.done.wait (%p47_p1), [#allocation8], 36880  }
  0x44   : > { %12400 = vsyncadd (%p47_p1), [#allocation8], 4294930416 }
  0x45   : > { %12402 = dma.done.wait (%p47_p1), [#allocation11], 36880  }
  0x46   : > { %12404 = vsyncadd (%p47_p1), [#allocation11], 4294930416 }
  0x47   : > { %12406 = dma.done.wait (%p47_p1), [#allocation14], 32  }
  0x48   : > { %12408 = vsyncadd (%p47_p1), [#allocation14], 4294967264  ;;  %v530_v0 = vld [vmem:[%s12631_s18] sm:$0xff]  ;;  %v531_v1 = vld [vmem:[%s12631_s18 + $0x8] sm:$0xff]  ;;  %s12437_s9 = smov 64   ;;  %s12438_s21 = smov 96  }
  0x49   : > { %v532_v2 = vld [vmem:[%s12631_s18 + $0x10] sm:$0xff]  ;;  %v533_v3 = vld [vmem:[%s12631_s18 + $0x18] sm:$0xff]  ;;  %v534_v4 = vld [vmem:[%s12631_s18 + $0x20] sm:$0xff]  ;;  %v12654_v5 = vunpack.c.l.bf16 %v530_v0  ;;  %v12656_v6 = vunpack.c.l.bf16 %v531_v1  ;;  %v12660_v8 = vunpack.c.h.bf16 %v530_v0  ;;  %v12662_v9 = vunpack.c.h.bf16 %v531_v1  ;;  %s12439_s22 = smov 32   ;;  %s12440_s15 = smov 116  }
  0x4a   : > { %v12658_v7 = vunpack.c.l.bf16 %v532_v2  ;;  %v535_v10 = vld [vmem:[%s12631_s18 + $0x28] sm:$0xff]  ;;  %v12665_v11 = vunpack.c.l.bf16 %v533_v3  ;;  %v12669_v13 = vunpack.c.h.bf16 %v532_v2  ;;  %v536_v14 = vld [vmem:[%s12631_s18 + $0x30] sm:$0xff]  ;;  %v12672_v15 = vunpack.c.l.bf16 %v534_v4  ;;  %v537_v23 = vld [vmem:[%s12631_s18 + $0x38] sm:$0xff]  ;;  %s12441_s16 = smov 120   ;;  %s12442_s10 = smov 124  }
  0x4b   : > { %v556_v12 = vadd.f32 %v12656_v6, %v12654_v5  ;;  %v12675_v17 = vunpack.c.h.bf16 %v533_v3  ;;  %v569_v18 = vadd.f32 %v12662_v9, %v12660_v8  ;;  %v582_v19 = vmul.f32 %v12654_v5, %v12654_v5  ;;  %s12443_s20 = smov 104   ;;  %s12444_s23 = smov 112  }
  0x4c   : > { %v12681_v20 = vunpack.c.l.bf16 %v535_v10  ;;  %v584_v21 = vmul.f32 %v12656_v6, %v12656_v6  ;;  %v586_v22 = vmul.f32 %v12658_v7, %v12658_v7  ;;  %v12688_v24 = vunpack.c.l.bf16 %v536_v14  ;;  %s12445_s28 = smov 108   ;;  %s12446_s11 = smov 100  }
  0x4d   : > { %v557_v16 = vadd.f32 %v556_v12, %v12658_v7  ;;  %v12691_v26 = vunpack.c.h.bf16 %v534_v4  ;;  %v570_v27 = vadd.f32 %v569_v18, %v12669_v13  ;;  %v588_v28 = vmul.f32 %v12665_v11, %v12665_v11  ;;  %s9125_s14 = sshll.u32 %s12627_s13, 7  ;;  %s12012_s1 = sshll.u32 %s12514_s8, 7 }
  0x4e   : > { %v598_v29 = vadd.f32 %v584_v21, %v582_v19  ;;  %v583_v30 = vmul.f32 %v12660_v8, %v12660_v8  ;;  %v585_v31 = vmul.f32 %v12662_v9, %v12662_v9  ;;  %v12701_v33 = vunpack.c.h.bf16 %v535_v10  ;;  %s14342_s29 = scalar_lea.vmem [#allocation16], %s9125_s14 }
  0x4f   : > { %v558_v25 = vadd.f32 %v557_v16, %v12665_v11  ;;  %v571_v34 = vadd.f32 %v570_v27, %v12675_v17  ;;  %v587_v35 = vmul.f32 %v12669_v13, %v12669_v13  ;;  %v12706_v36 = vunpack.c.l.bf16 %v537_v23  ;;  %s8972_s8 = sshll.u32 %s14342_s29, 4  ;;  %s8973_s8 = int_to_ptr.vmem [resolvable:$true] %s8972_s8 }
  0x50   : > { %v12708_v37 = vunpack.c.h.bf16 %v536_v14  ;;  %v590_v38 = vmul.f32 %v12672_v15, %v12672_v15  ;;  %v599_v39 = vadd.f32 %v598_v29, %v586_v22  ;;  %v589_v42 = vmul.f32 %v12675_v17, %v12675_v17 }
  0x51   : > { %v559_v32 = vadd.f32 %v558_v25, %v12672_v15  ;;  %v572_v41 = vadd.f32 %v571_v34, %v12691_v26  ;;  %v611_v43 = vadd.f32 %v585_v31, %v583_v30  ;;  %v12716_v44 = vunpack.c.h.bf16 %v537_v23 }
  0x52   : > { %v592_v45 = vmul.f32 %v12681_v20, %v12681_v20  ;;  %v600_v46 = vadd.f32 %v599_v39, %v588_v28  ;;  %v591_v49 = vmul.f32 %v12691_v26, %v12691_v26  ;;  %v594_v51 = vmul.f32 %v12688_v24, %v12688_v24 }
  0x53   : > { %v560_v40 = vadd.f32 %v559_v32, %v12681_v20  ;;  %v573_v48 = vadd.f32 %v572_v41, %v12701_v33  ;;  %v612_v50 = vadd.f32 %v611_v43, %v587_v35  ;;  %v593_v55 = vmul.f32 %v12701_v33, %v12701_v33 }
  0x54   : > { %v601_v52 = vadd.f32 %v600_v46, %v590_v38  ;;  %v596_v57 = vmul.f32 %v12706_v36, %v12706_v36  ;;  %v595_v61 = vmul.f32 %v12708_v37, %v12708_v37  ;;  %v597_v12 = vmul.f32 %v12716_v44, %v12716_v44 }
  0x55   : > { %v561_v47 = vadd.f32 %v560_v40, %v12688_v24  ;;  %v574_v54 = vadd.f32 %v573_v48, %v12708_v37  ;;  %v613_v56 = vadd.f32 %v612_v50, %v589_v42  ;;  %vm678_vm0 = vcmask 24576  }
  0x56   : > { %v602_v58 = vadd.f32 %v601_v52, %v592_v45  ;;  %vm725_vm1 = vcmask 31744   ;;  %vm727_vm2 = vcmask 64512   ;;  %vm729_vm3 = vcmask 97280  }
  0x57   : > { %v562_v53 = vadd.f32 %v561_v47, %v12706_v36  ;;  %v575_v60 = vadd.f32 %v574_v54, %v12716_v44  ;;  %v614_v62 = vadd.f32 %v613_v56, %v591_v49  ;;  %vm731_vm4 = vcmask 130048  }
  0x58   : > { %v603_v63 = vadd.f32 %v602_v58, %v594_v51  ;;  %vm733_vm5 = vcmask 162816   ;;  %vm735_vm6 = vcmask 195584   ;;  %vm737_vm7 = vcmask 228352  }
  0x59   : > { %v563_v59 = vrot.slane %v562_v53, 4  ;;  %v576_v1 = vrot.slane %v575_v60, 4  ;;  %v615_v2 = vadd.f32 %v614_v62, %v593_v55  ;;  %vm821_vm11 = vcmask 261120  }
  0x5a   : > { %v604_v3 = vadd.f32 %v603_v63, %v596_v57  ;;  %vm823_vm12 = vcmask 523264   ;;  %vm825_vm13 = vcmask 785408   ;;  %vm1076_vm14 = vcmask 1046528  }
  0x5b   : > { %v564_v0 = vadd.f32 %v563_v59, %v562_v53  ;;  %v577_v10 = vadd.f32 %v576_v1, %v575_v60  ;;  %v616_v14 = vadd.f32 %v615_v2, %v595_v61 }
  0x5c   : > { %v605_v16 = vrot.slane %v604_v3, 4 }
  0x5d   : > { %v565_v4 = vrot.slane %v564_v0, 2  ;;  %v578_v19 = vrot.slane %v577_v10, 2  ;;  %v617_v25 = vadd.f32 %v616_v14, %v597_v12 }
  0x5e   : > { %v606_v23 = vadd.f32 %v605_v16, %v604_v3 }
  0x5f   : > { %v566_v18 = vadd.f32 %v565_v4, %v564_v0  ;;  %v579_v22 = vadd.f32 %v578_v19, %v577_v10  ;;  %v618_v30 = vrot.slane %v617_v25, 4 }
  0x60   : > { %v607_v29 = vrot.slane %v606_v23, 2 }
  0x61   : > { %v567_v21 = vrot.slane %v566_v18, 1  ;;  %v580_v28 = vrot.slane %v579_v22, 1  ;;  %v619_v34 = vadd.f32 %v618_v30, %v617_v25 }
  0x62   : > { %v608_v32 = vadd.f32 %v607_v29, %v606_v23 }
  0x63   : > { %v568_v27 = vadd.f32 %v567_v21, %v566_v18  ;;  %v581_v31 = vadd.f32 %v580_v28, %v579_v22  ;;  %v620_v38 = vrot.slane %v619_v34, 2 }
  0x64   : > { %v609_v35 = vrot.slane %v608_v32, 1 }
  0x65   : > { %634 = vrot.lane.b32.xlu1 %v568_v27, %s12437_s9  ;;  %625 = vrot.lane.b32.xlu0 %v568_v27, %s12438_s21  ;;  %v621_v40 = vadd.f32 %v620_v38, %v619_v34 }
  0x66   : > { %642 = vrot.lane.b32.xlu2 %v568_v27, %s12439_s22  ;;  %v610_v39 = vadd.f32 %v609_v35, %v608_v32 }
  0x67   : > { %v622_v41 = vrot.slane %v621_v40, 1 }
  0x69   : > { %v623_v42 = vadd.f32 %v622_v41, %v621_v40 }
  0x6d   : > { %670 = vrot.lane.b32.xlu1 %v581_v31, %s12439_s22  ;;  %653 = vrot.lane.b32.xlu0 %v581_v31, %s12438_s21 }
  0x6e   : > { %662 = vrot.lane.b32.xlu2 %v581_v31, %s12437_s9 }
  0x75   : > { %638 = vrot.lane.b32.xlu1 %v610_v39, %s12437_s9  ;;  %630 = vrot.lane.b32.xlu0 %v610_v39, %s12438_s21 }
  0x76   : > { %646 = vrot.lane.b32.xlu2 %v610_v39, %s12439_s22 }
  0x7d   : > { %658 = vrot.lane.b32.xlu1 %v623_v42, %s12438_s21  ;;  %666 = vrot.lane.b32.xlu0 %v623_v42, %s12437_s9 }
  0x7e   : > { %674 = vrot.lane.b32.xlu2 %v623_v42, %s12439_s22 }
  0xc0   : > { %v643_v43 = vpop.permute.xlu2 %642 }
  0xc8   : > { %v663_v51 = vpop.permute.xlu2 %662 }
  0xd0   : > { %v647_v57 = vpop.permute.xlu2 %646 }
  0xd7   : > { %v635_v45 = vpop.permute.xlu1 %634  ;;  %v626_v46 = vpop.permute.xlu0 %625 }
  0xd8   : > { %v628_v47 = vadd.f32 %v626_v46, %v568_v27  ;;  %v675_v3 = vpop.permute.xlu2 %674 }
  0xda   : > { %v637_v48 = vadd.f32 %v635_v45, %v628_v47 }
  0xdc   : > { %v645_v49 = vadd.f32 %v643_v43, %v637_v48 }
  0xde   : > { %v650_v50 = vadd.f32 %v645_v49, %v581_v31 }
  0xdf   : > { %v671_v52 = vpop.permute.xlu1 %670  ;;  %v654_v53 = vpop.permute.xlu0 %653 }
  0xe0   : > { %v656_v54 = vadd.f32 %v654_v53, %v650_v50 }
  0xe2   : > { %v665_v55 = vadd.f32 %v663_v51, %v656_v54 }
  0xe4   : > { %v673_v56 = vadd.f32 %v671_v52, %v665_v55 }
  0xe6   : > { %695 = vrot.lane.b32.xlu2 %v673_v56, %s12440_s15  ;;  %689 = vrot.lane.b32.xlu1 %v673_v56, %s12441_s16  ;;  %v679_v12 = vsel %vm678_vm0, %v673_v56, 0.0 }
  0xe7   : > { %683 = vrot.lane.b32.xlu0 %v673_v56, %s12442_s10  ;;  %v639_v58 = vpop.permute.xlu1 %638  ;;  %v631_v59 = vpop.permute.xlu0 %630 }
  0xe8   : > { %v633_v60 = vadd.f32 %v631_v59, %v610_v39 }
  0xea   : > { %v641_v61 = vadd.f32 %v639_v58, %v633_v60 }
  0xec   : > { %v649_v62 = vadd.f32 %v647_v57, %v641_v61 }
  0xee   : > { %713 = vrot.lane.b32.xlu2 %v673_v56, %s12443_s20  ;;  %701 = vrot.lane.b32.xlu1 %v673_v56, %s12444_s23  ;;  %v651_v63 = vadd.f32 %v649_v62, %v623_v42 }
  0xef   : > { %707 = vrot.lane.b32.xlu0 %v673_v56, %s12445_s28  ;;  %v659_v0 = vpop.permute.xlu1 %658  ;;  %v667_v1 = vpop.permute.xlu0 %666 }
  0xf0   : > { %v661_v2 = vadd.f32 %v659_v0, %v651_v63 }
  0xf2   : > { %v669_v4 = vadd.f32 %v667_v1, %v661_v2 }
  0xf4   : > { %v677_v10 = vadd.f32 %v675_v3, %v669_v4 }
  0xf6   : > { %719 = vrot.lane.b32.xlu1 %v673_v56, %s12446_s11  ;;  %v740_v21 = vsel %vm678_vm0, %v677_v10, 0.0 }
  0xf7   : > { %744 = vrot.lane.b32.xlu0 %v677_v10, %s12442_s10 }
  0xfe   : > { %756 = vrot.lane.b32.xlu1 %v677_v10, %s12440_s15 }
  0xff   : > { %762 = vrot.lane.b32.xlu0 %v677_v10, %s12444_s23 }
 0x106   : > { %780 = vrot.lane.b32.xlu1 %v677_v10, %s12446_s11 }
 0x107   : > { %774 = vrot.lane.b32.xlu0 %v677_v10, %s12443_s20 }
 0x117   : > { %680 = vadd.xlane.f32.xlu2 %v679_v12 }
 0x12f   : > { %750 = vrot.lane.b32.xlu2 %v677_v10, %s12441_s16 }
 0x137   : > { %768 = vrot.lane.b32.xlu2 %v677_v10, %s12445_s28 }
 0x140   : > { %v696_v27 = vpop.permute.xlu2 %695 }
 0x141   : > { %v698_v29 = vsel %vm678_vm0, %v696_v27, 0.0 }
 0x148   : > { %v714_v35 = vpop.permute.xlu2 %713 }
 0x149   : > { %v716_v38 = vsel %vm678_vm0, %v714_v35, 0.0 }
 0x158   : > { %v690_v14 = vpop.permute.xlu1 %689 }
 0x159   : > { %v684_v16 = vpop.permute.xlu0 %683  ;;  %v692_v18 = vsel %vm678_vm0, %v690_v14, 0.0 }
 0x15a   : > { %693 = vadd.xlane.f32.xlu1 %v692_v18  ;;  %v686_v19 = vsel %vm678_vm0, %v684_v16, 0.0 }
 0x15b   : > { %687 = vadd.xlane.f32.xlu0 %v686_v19 }
 0x160   : > { %v702_v22 = vpop.permute.xlu1 %701  ;;  %741 = vadd.xlane.f32.xlu2 %v740_v21 }
 0x161   : > { %v708_v23 = vpop.permute.xlu0 %707  ;;  %v704_v25 = vsel %vm678_vm0, %v702_v22, 0.0 }
 0x162   : > { %705 = vadd.xlane.f32.xlu1 %v704_v25  ;;  %v710_v28 = vsel %vm678_vm0, %v708_v23, 0.0 }
 0x163   : > { %711 = vadd.xlane.f32.xlu0 %v710_v28 }
 0x168   : > { %v720_v30 = vpop.permute.xlu1 %719  ;;  %699 = vadd.xlane.f32.xlu2 %v698_v29 }
 0x169   : > { %v745_v31 = vpop.permute.xlu0 %744  ;;  %v722_v32 = vsel %vm678_vm0, %v720_v30, 0.0 }
 0x16a   : > { %723 = vadd.xlane.f32.xlu1 %v722_v32  ;;  %v747_v34 = vsel %vm678_vm0, %v745_v31, 0.0 }
 0x16b   : > { %748 = vadd.xlane.f32.xlu0 %v747_v34 }
 0x170   : > { %717 = vadd.xlane.f32.xlu2 %v716_v38  ;;  %v757_v39 = vpop.permute.xlu1 %756 }
 0x171   : > { %v763_v40 = vpop.permute.xlu0 %762  ;;  %v759_v41 = vsel %vm678_vm0, %v757_v39, 0.0 }
 0x172   : > { %760 = vadd.xlane.f32.xlu1 %v759_v41  ;;  %v765_v42 = vsel %vm678_vm0, %v763_v40, 0.0 }
 0x173   : > { %766 = vadd.xlane.f32.xlu0 %v765_v42 }
 0x178   : > { %v781_v43 = vpop.permute.xlu1 %780 }
 0x179   : > { %v775_v45 = vpop.permute.xlu0 %774  ;;  %v783_v46 = vsel %vm678_vm0, %v781_v43, 0.0  ;;  %v554_v43 = vld [vmem:[#allocation9] sm:$0x1] }
 0x17a   : > { %784 = vadd.xlane.f32.xlu1 %v783_v46  ;;  %v777_v47 = vsel %vm678_vm0, %v775_v45, 0.0 }
 0x17b   : > { %778 = vadd.xlane.f32.xlu0 %v777_v47 }
 0x18a   : > { %v681_v48 = vpop.xlane.xlu2 %680 }
 0x192   : > { %v751_v49 = vpop.permute.xlu2 %750 }
 0x193   : > { %v753_v50 = vsel %vm678_vm0, %v751_v49, 0.0 }
 0x194   : > { %754 = vadd.xlane.f32.xlu2 %v753_v50  ;;  %v555_v50 = vld [vmem:[#allocation10] sm:$0x1] }
 0x19a   : > { %v769_v51 = vpop.permute.xlu2 %768 }
 0x19b   : > { %v771_v52 = vsel %vm678_vm0, %v769_v51, 0.0 }
 0x19c   : > { %772 = vadd.xlane.f32.xlu2 %v771_v52 }
 0x1cd   : > { %v694_v54 = vpop.xlane.xlu1 %693 }
 0x1ce   : > { %v688_v53 = vpop.xlane.xlu0 %687 }
 0x1cf   : > { %v726_v59 = vsel %vm725_vm1, %v681_v48, %v688_v53  ;;  %v9184_v53 = vld [vmem:[#allocation7 + $0x170] sm:$0xf] }
 0x1d0   : > { %v728_v63 = vsel %vm727_vm2, %v726_v59, %v694_v54  ;;  %v11483_v54 = vld [vmem:[#allocation7 + $0x174] sm:$0xf0]  ;;  %v9186_v59 = vld [vmem:[#allocation7 + $0x178] sm:$0xf0] }
 0x1d3   : > { %v742_v55 = vpop.xlane.xlu2 %741 }
 0x1d5   : > { %v706_v57 = vpop.xlane.xlu1 %705 }
 0x1d6   : > { %v712_v56 = vpop.xlane.xlu0 %711 }
 0x1db   : > { %v700_v58 = vpop.xlane.xlu2 %699 }
 0x1dc   : > { %v730_v0 = vsel %vm729_vm3, %v728_v63, %v700_v58  ;;  %v11482_v58 = vld [vmem:[#allocation7 + $0x174] sm:$0xf]  ;;  %v9250_v63 = vld [vmem:[#allocation7 + $0x1f8] sm:$0xf0] }
 0x1dd   : > { %v724_v61 = vpop.xlane.xlu1 %723  ;;  %v732_v1 = vsel %vm731_vm4, %v730_v0, %v706_v57  ;;  %v11499_v57 = vld [vmem:[#allocation7 + $0x1f4] sm:$0xf0] }
 0x1de   : > { %v749_v60 = vpop.xlane.xlu0 %748  ;;  %v734_v12 = vsel %vm733_vm5, %v732_v1, %v712_v56  ;;  %v9185_v56 = vor.u32 %v11483_v54, %v9184_v53  ;;  %v9176_v1 = vld [vmem:[#allocation7 + $0x160] sm:$0xf]  ;;  %v9226_v53 = vld [vmem:[#allocation7 + $0x1c8] sm:$0xf0]  ;;  %v9152_v54 = vld [vmem:[#allocation7 + $0x130] sm:$0xf] }
 0x1df   : > { %v786_v10 = vsel %vm725_vm1, %v742_v55, %v749_v60  ;;  %v9248_v55 = vld [vmem:[#allocation7 + $0x1f0] sm:$0xf] }
 0x1e0   : > { %v9249_v60 = vor.u32 %v11499_v57, %v9248_v55  ;;  %1342 = vmatpush.bf16.msra.mxu0 %v9185_v56  ;;  %v11475_v56 = vld [vmem:[#allocation7 + $0x134] sm:$0xf0]  ;;  %v9216_v57 = vld [vmem:[#allocation7 + $0x1b0] sm:$0xf] }
 0x1e2   : > { %1371 = vmatpush.bf16.msra.mxu1 %v9249_v60 }
 0x1e3   : > { %v718_v62 = vpop.xlane.xlu2 %717 }
 0x1e4   : > { %v736_v14 = vsel %vm735_vm6, %v734_v12, %v718_v62  ;;  %v11498_v62 = vld [vmem:[#allocation7 + $0x1f4] sm:$0xf]  ;;  %v11480_v12 = vld [vmem:[#allocation7 + $0x164] sm:$0xf] }
 0x1e5   : > { %v761_v3 = vpop.xlane.xlu1 %760  ;;  %v738_v18 = vsel %vm737_vm7, %v736_v14, %v724_v61  ;;  %v9189_v61 = vor.u32 %v11482_v58, %v9186_v59  ;;  %v9253_v0 = vor.u32 %v11498_v62, %v9250_v63  ;;  %v9178_v14 = vld [vmem:[#allocation7 + $0x168] sm:$0xf0]  ;;  %v11491_v58 = vld [vmem:[#allocation7 + $0x1b4] sm:$0xf0]  ;;  %v9153_v59 = vor.u32 %v11475_v56, %v9152_v54  ;;  %v9154_v62 = vld [vmem:[#allocation7 + $0x138] sm:$0xf0] }
 0x1e6   : > { %v767_v2 = vpop.xlane.xlu0 %766  ;;  %v739_v21 = vmul.f32 0.00048828125, %v738_v18  ;;  %v9181_v18 = vor.u32 %v11480_v12, %v9178_v14  ;;  %v9217_v60 = vor.u32 %v11491_v58, %v9216_v57  ;;  %v11490_v63 = vld [vmem:[#allocation7 + $0x1b4] sm:$0xf]  ;;  %v11489_v12 = vld [vmem:[#allocation7 + $0x1a4] sm:$0xf0] }
 0x1e7   : > { %1400 = vmatpush.bf16.msra.mxu2 %v9189_v61  ;;  %1429 = vmatpush.bf16.msra.mxu3 %v9253_v0  ;;  %v11474_v61 = vld [vmem:[#allocation7 + $0x134] sm:$0xf]  ;;  %v11472_v14 = vld [vmem:[#allocation7 + $0x124] sm:$0xf] }
 0x1e8   : > { %v794_v31 = vmul.f32 %v739_v21, %v739_v21  ;;  %v9157_v0 = vor.u32 %v11474_v61, %v9154_v62 }
 0x1eb   : > { %1401 = vmatpush.bf16.msra.mxu2 %v9181_v18  ;;  %v9146_v18 = vld [vmem:[#allocation7 + $0x128] sm:$0xf0] }
 0x1ed   : > { %v785_v28 = vpop.xlane.xlu1 %784 }
 0x1ee   : > { %v779_v25 = vpop.xlane.xlu0 %778 }
 0x207   : > { %v755_v4 = vpop.xlane.xlu2 %754 }
 0x208   : > { %v787_v16 = vsel %vm727_vm2, %v786_v10, %v755_v4  ;;  %v11497_v10 = vld [vmem:[#allocation7 + $0x1e4] sm:$0xf0] }
 0x209   : > { %v788_v19 = vsel %vm729_vm3, %v787_v16, %v761_v3  ;;  %v9240_v3 = vld [vmem:[#allocation7 + $0x1e0] sm:$0xf] }
 0x20a   : > { %v789_v23 = vsel %vm731_vm4, %v788_v19, %v767_v2  ;;  %v11481_v2 = vld [vmem:[#allocation7 + $0x164] sm:$0xf0]  ;;  %v9241_v16 = vor.u32 %v11497_v10, %v9240_v3  ;;  %v11496_v19 = vld [vmem:[#allocation7 + $0x1e4] sm:$0xf]  ;;  %v9208_v10 = vld [vmem:[#allocation7 + $0x1a0] sm:$0xf] }
 0x20b   : > { %v9177_v4 = vor.u32 %v11481_v2, %v9176_v1  ;;  %v9218_v1 = vld [vmem:[#allocation7 + $0x1b8] sm:$0xf0]  ;;  %v9144_v2 = vld [vmem:[#allocation7 + $0x120] sm:$0xf]  ;;  %v11473_v3 = vld [vmem:[#allocation7 + $0x124] sm:$0xf0] }
 0x20c   : > { %1372 = vmatpush.bf16.msra.mxu1 %v9241_v16  ;;  %v9145_v16 = vor.u32 %v11473_v3, %v9144_v2  ;;  %v9376_v2 = vld [vmem:[#allocation7 + $0xf0] sm:$0xf] }
 0x20d   : > { %1343 = vmatpush.bf16.msra.mxu0 %v9177_v4  ;;  %v9221_v4 = vor.u32 %v11490_v63, %v9218_v1  ;;  %v11451_v1 = vld [vmem:[#allocation7 + $0x74] sm:$0xf0] }
 0x20f   : > { %v773_v22 = vpop.xlane.xlu2 %772 }
 0x210   : > { %v790_v27 = vsel %vm733_vm5, %v789_v23, %v773_v22  ;;  %v9168_v22 = vld [vmem:[#allocation7 + $0x150] sm:$0xf] }
 0x211   : > { %v791_v29 = vsel %vm735_vm6, %v790_v27, %v779_v25  ;;  %v11479_v25 = vld [vmem:[#allocation7 + $0x154] sm:$0xf0]  ;;  %v9232_v27 = vld [vmem:[#allocation7 + $0x1d0] sm:$0xf] }
 0x212   : > { %v792_v30 = vsel %vm737_vm7, %v791_v29, %v785_v28  ;;  %v11495_v28 = vld [vmem:[#allocation7 + $0x1d4] sm:$0xf0]  ;;  %v9169_v29 = vor.u32 %v11479_v25, %v9168_v22  ;;  %v9209_v22 = vor.u32 %v11489_v12, %v9208_v10  ;;  %v9136_v25 = vld [vmem:[#allocation7 + $0x110] sm:$0xf]  ;;  %v9304_v10 = vld [vmem:[#allocation7 + $0x60] sm:$0xf] }
 0x213   : > { %v793_v32 = vmul.f32 0.00048828125, %v792_v30  ;;  %v9233_v30 = vor.u32 %v11495_v28, %v9232_v27  ;;  %v11471_v27 = vld [vmem:[#allocation7 + $0x114] sm:$0xf0]  ;;  %v9200_v28 = vld [vmem:[#allocation7 + $0x190] sm:$0xf] }
 0x214   : > { %1344 = vmatpush.bf16.msra.mxu0 %v9169_v29 }
 0x215   : > { %v795_v34 = vsub.f32 %v793_v32, %v794_v31  ;;  %v11478_v31 = vld [vmem:[#allocation7 + $0x154] sm:$0xf]  ;;  %v9170_v32 = vld [vmem:[#allocation7 + $0x158] sm:$0xf0]  ;;  %1373 = vmatpush.bf16.msra.mxu1 %v9233_v30  ;;  %v11487_v30 = vld [vmem:[#allocation7 + $0x194] sm:$0xf0] }
 0x217   : > { %v796_v35 = vadd.f32 1e-05, %v795_v34  ;;  %v11494_v34 = vld [vmem:[#allocation7 + $0x1d4] sm:$0xf] }
 0x219   : > { %12135 = vrsqrt.f32 %v796_v35  ;;  %vm803_vm9 = vweird.f32 %v796_v35 }
 0x21f   : > { %v12136_v38 = vpop.eup %12135 }
 0x220   : > { %v798_v39 = vmul.f32 %v12136_v38, %v796_v35  ;;  %vm804_vm8 = vweird.f32 %v12136_v38  ;;  %v9173_v35 = vor.u32 %v11478_v31, %v9170_v32  ;;  %v11470_v31 = vld [vmem:[#allocation7 + $0x114] sm:$0xf]  ;;  %v9138_v32 = vld [vmem:[#allocation7 + $0x118] sm:$0xf0] }
 0x221   : > { %vm805_vm10 = vmor %vm803_vm9, %vm804_vm8  ;;  %vm1798_vm8 = vcmask 1045504  }
 0x222   : > { %v799_v40 = vmul.f32 %v12136_v38, %v798_v39  ;;  %1402 = vmatpush.bf16.msra.mxu2 %v9173_v35  ;;  %v9202_v35 = vld [vmem:[#allocation7 + $0x198] sm:$0xf0] }
 0x224   : > { %v800_v41 = vmul.f32 0.5, %v799_v40  ;;  %v9160_v40 = vld [vmem:[#allocation7 + $0x140] sm:$0xf] }
 0x226   : > { %v801_v42 = vsub.f32 1.5, %v800_v41  ;;  %v11477_v41 = vld [vmem:[#allocation7 + $0x144] sm:$0xf0] }
 0x228   : > { %v802_v45 = vmul.f32 %v12136_v38, %v801_v42  ;;  %v9224_v42 = vld [vmem:[#allocation7 + $0x1c0] sm:$0xf] }
 0x22a   : > { %v806_v46 = vsel %vm805_vm10, %v12136_v38, %v802_v45  ;;  %v9234_v38 = vld [vmem:[#allocation7 + $0x1d8] sm:$0xf0]  ;;  %v11493_v45 = vld [vmem:[#allocation7 + $0x1c4] sm:$0xf0] }
 0x22b   : > { %v12793_v47 = vmul.f32 %v806_v46, %v554_v43  ;;  %v9237_v39 = vor.u32 %v11494_v34, %v9234_v38  ;;  %v9161_v43 = vor.u32 %v11477_v41, %v9160_v40  ;;  %v11476_v46 = vld [vmem:[#allocation7 + $0x144] sm:$0xf]  ;;  %v11486_v34 = vld [vmem:[#allocation7 + $0x194] sm:$0xf]  ;;  %v9137_v38 = vor.u32 %v11471_v27, %v9136_v25  ;;  %v9314_v25 = vld [vmem:[#allocation7 + $0x78] sm:$0xf0] }
 0x22c   : > { %v9201_v40 = vor.u32 %v11487_v30, %v9200_v28  ;;  %v9141_v41 = vor.u32 %v11470_v31, %v9138_v32  ;;  %v11466_v27 = vld [vmem:[#allocation7 + $0xf4] sm:$0xf]  ;;  %v9378_v28 = vld [vmem:[#allocation7 + $0xf8] sm:$0xf0] }
 0x22d   : > { %v811_v48 = vperm.slane %v12793_v47, 0  ;;  %v808_v49 = vmul.f32 %v12793_v47, %v739_v21  ;;  %v9242_v21 = vld [vmem:[#allocation7 + $0x1e8] sm:$0xf0]  ;;  %1345 = vmatpush.bf16.msra.mxu0 %v9161_v43  ;;  %v9192_v43 = vld [vmem:[#allocation7 + $0x180] sm:$0xf]  ;;  %v9381_v32 = vor.u32 %v11466_v27, %v9378_v28 }
 0x22e   : > { %v9245_v23 = vor.u32 %v11496_v19, %v9242_v21  ;;  %v11488_v19 = vld [vmem:[#allocation7 + $0x1a4] sm:$0xf]  ;;  %v9210_v21 = vld [vmem:[#allocation7 + $0x1a8] sm:$0xf0]  ;;  %v9352_v27 = vld [vmem:[#allocation7 + $0xc0] sm:$0xf] }
 0x22f   : > { %818 = vrot.lane.b32.xlu1 %v811_v48, %s12438_s21  ;;  %815 = vrot.lane.b32.xlu0 %v811_v48, %s12437_s9  ;;  %v12800_v51 = vsub.f32 %v555_v50, %v808_v49  ;;  %v9225_v49 = vor.u32 %v11493_v45, %v9224_v42  ;;  %v9213_v29 = vor.u32 %v11488_v19, %v9210_v21  ;;  %v11469_v42 = vld [vmem:[#allocation7 + $0x104] sm:$0xf0]  ;;  %v11450_v21 = vld [vmem:[#allocation7 + $0x74] sm:$0xf] }
 0x230   : > { %812 = vrot.lane.b32.xlu2 %v811_v48, %s12439_s22  ;;  %1430 = vmatpush.bf16.msra.mxu3 %v9245_v23  ;;  %v9162_v48 = vld [vmem:[#allocation7 + $0x148] sm:$0xf0]  ;;  %v9149_v23 = vor.u32 %v11472_v14, %v9146_v18  ;;  %v11485_v45 = vld [vmem:[#allocation7 + $0x184] sm:$0xf0]  ;;  %v9317_v31 = vor.u32 %v11450_v21, %v9314_v25 }
 0x231   : > { %v828_v52 = vperm.slane %v12800_v51, 0  ;;  %v9165_v50 = vor.u32 %v11476_v46, %v9162_v48  ;;  %1374 = vmatpush.bf16.msra.mxu1 %v9225_v49  ;;  %1346 = vmatpush.bf16.msra.mxu0 %v9153_v59  ;;  %v9205_v46 = vor.u32 %v11486_v34, %v9202_v35  ;;  %v11468_v48 = vld [vmem:[#allocation7 + $0x104] sm:$0xf]  ;;  %v9130_v49 = vld [vmem:[#allocation7 + $0x108] sm:$0xf0] }
 0x232   : > { %v9133_v56 = vor.u32 %v11468_v48, %v9130_v49  ;;  %v11449_v14 = vld [vmem:[#allocation7 + $0x64] sm:$0xf0] }
 0x233   : > { %1403 = vmatpush.bf16.msra.mxu2 %v9165_v50  ;;  %v11484_v50 = vld [vmem:[#allocation7 + $0x184] sm:$0xf]  ;;  %v9305_v18 = vor.u32 %v11449_v14, %v9304_v10  ;;  %v11465_v19 = vld [vmem:[#allocation7 + $0xe4] sm:$0xf0] }
 0x234   : > { %1431 = vmatpush.bf16.msra.mxu3 %v9237_v39  ;;  %v9128_v39 = vld [vmem:[#allocation7 + $0x100] sm:$0xf]  ;;  %v11448_v10 = vld [vmem:[#allocation7 + $0x64] sm:$0xf]  ;;  %v11461_v28 = vld [vmem:[#allocation7 + $0xc4] sm:$0xf0] }
 0x235   : > { %1375 = vmatpush.bf16.msra.mxu1 %v9217_v60  ;;  %1347 = vmatpush.bf16.msra.mxu0 %v9145_v16  ;;  %v9129_v54 = vor.u32 %v11469_v42, %v9128_v39  ;;  %v9368_v16 = vld [vmem:[#allocation7 + $0xe0] sm:$0xf] }
 0x237   : > { %835 = vrot.lane.b32.xlu1 %v828_v52, %s12438_s21  ;;  %829 = vrot.lane.b32.xlu0 %v828_v52, %s12439_s22 }
 0x238   : > { %832 = vrot.lane.b32.xlu2 %v828_v52, %s12437_s9  ;;  %v11492_v52 = vld [vmem:[#allocation7 + $0x1c4] sm:$0xf]  ;;  %1404 = vmatpush.bf16.msra.mxu2 %v9157_v0  ;;  %v9312_v0 = vld [vmem:[#allocation7 + $0x70] sm:$0xf] }
 0x239   : > { %v9229_v55 = vor.u32 %v11492_v52, %v9226_v53  ;;  %1376 = vmatpush.bf16.msra.mxu1 %v9209_v22  ;;  %v9194_v52 = vld [vmem:[#allocation7 + $0x188] sm:$0xf0]  ;;  %v12447_v53 = vmov 0.0   ;;  %1348 = vmatpush.bf16.msra.mxu0 %v9137_v38  ;;  %v9313_v3 = vor.u32 %v11451_v1, %v9312_v0  ;;  %v11447_v0 = vld [vmem:[#allocation7 + $0x54] sm:$0xf0] }
 0x23a   : > { %390 = vst [vmem:[#allocation2] sm:$0xff] %v12447_v53  ;;  %v9197_v57 = vor.u32 %v11484_v50, %v9194_v52 }
 0x23b   : > { %1432 = vmatpush.bf16.msra.mxu3 %v9229_v55  ;;  %392 = vst [vmem:[#allocation2 + $0x10] sm:$0x3] %v12447_v53  ;;  %v9193_v55 = vor.u32 %v11485_v45, %v9192_v43 }
 0x23c   : > { %1405 = vmatpush.bf16.msra.mxu2 %v9149_v23  ;;  %391 = vst [vmem:[#allocation2 + $0x8] sm:$0xff] %v12447_v53  ;;  %v9369_v23 = vor.u32 %v11465_v19, %v9368_v16  ;;  %v11464_v16 = vld [vmem:[#allocation7 + $0xe4] sm:$0xf] }
 0x23d   : > { %1377 = vmatpush.bf16.msra.mxu1 %v9201_v40  ;;  %393 = vst [vmem:[#allocation2 + $0x18] sm:$0x3] %v12447_v53  ;;  %1349 = vmatpush.bf16.msra.mxu0 %v9129_v54 }
 0x23e   : > { %395 = vst [vmem:[#allocation2 + $0x120] sm:$0xff] %v12447_v53 }
 0x23f   : > { %1433 = vmatpush.bf16.msra.mxu3 %v9221_v4  ;;  %396 = vst [vmem:[#allocation2 + $0x128] sm:$0xff] %v12447_v53  ;;  %v11467_v4 = vld [vmem:[#allocation7 + $0xf4] sm:$0xf0] }
 0x240   : > { %1406 = vmatpush.bf16.msra.mxu2 %v9141_v41  ;;  %397 = vst [vmem:[#allocation2 + $0x130] sm:$0x3] %v12447_v53  ;;  %v9377_v12 = vor.u32 %v11467_v4, %v9376_v2  ;;  %v9360_v2 = vld [vmem:[#allocation7 + $0xd0] sm:$0xf] }
 0x241   : > { %1378 = vmatpush.bf16.msra.mxu1 %v9193_v55  ;;  %398 = vst [vmem:[#allocation2 + $0x138] sm:$0x3] %v12447_v53  ;;  %1618 = vmatpush.bf16.msrb.mxu0 %v9313_v3  ;;  %v12836_v41 = vld [vmem:[#allocation2] sm:$0xfe]  ;;  %v11463_v3 = vld [vmem:[#allocation7 + $0xd4] sm:$0xf0] }
 0x242   : > { %462 = vst [vmem:[#allocation3] sm:$0xff] %v12447_v53  ;;  %v12838_v42 = vld [vmem:[#allocation2 + $0x10] sm:$0x1]  ;;  %v9361_v4 = vor.u32 %v11463_v3, %v9360_v2 }
 0x243   : > { %1434 = vmatpush.bf16.msra.mxu3 %v9213_v29  ;;  %463 = vst [vmem:[#allocation3 + $0x8] sm:$0xff] %v12447_v53  ;;  %v1078_v54 = vrot.slane %v12838_v42, 1  ;;  %v9280_v2 = vld [vmem:[#allocation7 + $0x30] sm:$0xf] }
 0x244   : > { %1407 = vmatpush.bf16.msra.mxu2 %v9133_v56  ;;  %464 = vst [vmem:[#allocation3 + $0x10] sm:$0x3] %v12447_v53 }
 0x245   : > { %465 = vst [vmem:[#allocation3 + $0x18] sm:$0x3] %v12447_v53  ;;  %1647 = vmatpush.bf16.msrb.mxu1 %v9377_v12  ;;  %1619 = vmatpush.bf16.msrb.mxu0 %v9305_v18  ;;  %v9306_v12 = vld [vmem:[#allocation7 + $0x68] sm:$0xf0] }
 0x246   : > { %467 = vst [vmem:[#allocation3 + $0x120] sm:$0xff] %v12447_v53  ;;  %v9309_v14 = vor.u32 %v11448_v10, %v9306_v12  ;;  %v9370_v18 = vld [vmem:[#allocation7 + $0xe8] sm:$0xf0] }
 0x247   : > { %1435 = vmatpush.bf16.msra.mxu3 %v9205_v46  ;;  %468 = vst [vmem:[#allocation3 + $0x128] sm:$0xff] %v12447_v53  ;;  %v12848_v46 = vld [vmem:[#allocation2 + $0x18] sm:$0x1]  ;;  %v9373_v21 = vor.u32 %v11464_v16, %v9370_v18 }
 0x248   : > { %469 = vst [vmem:[#allocation3 + $0x130] sm:$0x3] %v12447_v53  ;;  %1676 = vmatpush.bf16.msrb.mxu2 %v9317_v31  ;;  %v9353_v31 = vor.u32 %v11461_v28, %v9352_v27 }
 0x249   : > { %470 = vst [vmem:[#allocation3 + $0x138] sm:$0x3] %v12447_v53  ;;  %1648 = vmatpush.bf16.msrb.mxu1 %v9369_v23  ;;  %v11445_v23 = vld [vmem:[#allocation7 + $0x44] sm:$0xf0] }
 0x24b   : > { %1436 = vmatpush.bf16.msra.mxu3 %v9197_v57 }
 0x24c   : > { %1677 = vmatpush.bf16.msrb.mxu2 %v9309_v14 }
 0x24d   : > { %1649 = vmatpush.bf16.msrb.mxu1 %v9361_v4  ;;  %v11443_v4 = vld [vmem:[#allocation7 + $0x34] sm:$0xf0] }
 0x24f   : > { %1705 = vmatpush.bf16.msrb.mxu3 %v9381_v32  ;;  %v11446_v32 = vld [vmem:[#allocation7 + $0x54] sm:$0xf] }
 0x251   : > { %1650 = vmatpush.bf16.msrb.mxu1 %v9353_v31 }
 0x253   : > { %1706 = vmatpush.bf16.msrb.mxu3 %v9373_v21  ;;  %v9281_v21 = vor.u32 %v11443_v4, %v9280_v2  ;;  %v11455_v4 = vld [vmem:[#allocation7 + $0x94] sm:$0xf0] }
 0x28a   : > { %v813_v58 = vpop.permute.xlu2 %812 }
 0x28b   : > { %v822_v59 = vsel %vm821_vm11, %v12793_v47, %v813_v58  ;;  %v1081_v58 = vrot.slane %v12848_v46, 1 }
 0x292   : > { %v833_v29 = vpop.permute.xlu2 %832 }
 0x2a1   : > { %v819_v60 = vpop.permute.xlu1 %818  ;;  %v816_v61 = vpop.permute.xlu0 %815 }
 0x2a2   : > { %v824_v62 = vsel %vm823_vm12, %v822_v59, %v816_v61 }
 0x2a3   : > { %v826_v63 = vsel %vm825_vm13, %v824_v62, %v819_v60 }
 0x2a4   : > { %v12823_v47 = vperm.slane %v826_v63, 0  ;;  %v9296_v63 = vld [vmem:[#allocation7 + $0x50] sm:$0xf] }
 0x2a5   : > { %v9297_v1 = vor.u32 %v11447_v0, %v9296_v63 }
 0x2a6   : > { %v842_v39 = vmul.f32 %v12823_v47, %v12654_v5  ;;  %v844_v43 = vmul.f32 %v12823_v47, %v12656_v6  ;;  %v846_v45 = vmul.f32 %v12823_v47, %v12658_v7  ;;  %v12846_v5 = vld [vmem:[#allocation2 + $0x8] sm:$0xfe]  ;;  %v845_v48 = vmul.f32 %v12823_v47, %v12662_v9 }
 0x2a7   : > { %v847_v49 = vmul.f32 %v12823_v47, %v12669_v13  ;;  %v1077_v7 = vrot.slane %v12836_v41, 1  ;;  %v1080_v57 = vrot.slane %v12846_v5, 1  ;;  %1620 = vmatpush.bf16.msrb.mxu0 %v9297_v1  ;;  %v848_v19 = vmul.f32 %v12823_v47, %v12665_v11  ;;  %v9298_v11 = vld [vmem:[#allocation7 + $0x58] sm:$0xf0] }
 0x2a8   : > { %v851_v46 = vmul.f32 %v12823_v47, %v12691_v26  ;;  %v852_v10 = vmul.f32 %v12823_v47, %v12681_v20  ;;  %v854_v12 = vmul.f32 %v12823_v47, %v12688_v24  ;;  %v853_v14 = vmul.f32 %v12823_v47, %v12701_v33  ;;  %v11444_v33 = vld [vmem:[#allocation7 + $0x44] sm:$0xf] }
 0x2a9   : > { %v830_v22 = vpop.permute.xlu0 %829  ;;  %v836_v34 = vpop.permute.xlu1 %835  ;;  %v1079_v42 = vsel %vm1076_vm14, %v1077_v7, %v1078_v54 }
 0x2aa   : > { %v838_v30 = vsel %vm821_vm11, %v12800_v51, %v830_v22  ;;  %v843_v51 = vmul.f32 %v12823_v47, %v12660_v8  ;;  %v9288_v22 = vld [vmem:[#allocation7 + $0x40] sm:$0xf] }
 0x2ab   : > { %v839_v35 = vsel %vm823_vm12, %v838_v30, %v833_v29  ;;  %v9289_v25 = vor.u32 %v11445_v23, %v9288_v22  ;;  %v850_v29 = vmul.f32 %v12823_v47, %v12672_v15  ;;  %v9344_v22 = vld [vmem:[#allocation7 + $0xb0] sm:$0xf] }
 0x2ac   : > { %v840_v38 = vsel %vm825_vm13, %v839_v35, %v836_v34  ;;  %v9301_v35 = vor.u32 %v11446_v32, %v9298_v11  ;;  %v9290_v32 = vld [vmem:[#allocation7 + $0x48] sm:$0xf0]  ;;  %v855_v11 = vmul.f32 %v12823_v47, %v12708_v37 }
 0x2ad   : > { %v12834_v40 = vperm.slane %v840_v38, 0  ;;  %1621 = vmatpush.bf16.msrb.mxu0 %v9289_v25  ;;  %v11459_v25 = vld [vmem:[#allocation7 + $0xb4] sm:$0xf0] }
 0x2ae   : > { %1678 = vmatpush.bf16.msrb.mxu2 %v9301_v35  ;;  %v9345_v31 = vor.u32 %v11459_v25, %v9344_v22  ;;  %v11456_v22 = vld [vmem:[#allocation7 + $0xa4] sm:$0xf] }
 0x2af   : > { %v859_v8 = vadd.f32 %v12834_v40, %v842_v39  ;;  %v860_v50 = vadd.f32 %v12834_v40, %v843_v51  ;;  %v861_v52 = vadd.f32 %v12834_v40, %v844_v43  ;;  %v863_v6 = vadd.f32 %v12834_v40, %v846_v45  ;;  %v11462_v51 = vld [vmem:[#allocation7 + $0xd4] sm:$0xf] }
 0x2b0   : > { %v862_v55 = vadd.f32 %v12834_v40, %v845_v48  ;;  %v12862_v9 = vadd.f32 %v12834_v40, %v847_v49  ;;  %v865_v30 = vadd.f32 %v12834_v40, %v848_v19  ;;  %v867_v38 = vadd.f32 %v12834_v40, %v850_v29  ;;  %1651 = vmatpush.bf16.msrb.mxu1 %v9345_v31 }
 0x2b1   : > { %v891_v56 = vrot.slane %v859_v8, 7  ;;  %v892_v13 = vrot.slane %v860_v50, 7  ;;  %v893_v59 = vrot.slane %v861_v52, 7  ;;  %v895_v60 = vrot.slane %v863_v6, 7  ;;  %1622 = vmatpush.bf16.msrb.mxu0 %v9281_v21 }
 0x2b2   : > { %v894_v61 = vrot.slane %v862_v55, 7  ;;  %v896_v62 = vrot.slane %v12862_v9, 7  ;;  %v849_v39 = vmul.f32 %v12823_v47, %v12675_v17  ;;  %v897_v5 = vrot.slane %v865_v30, 7  ;;  %v9362_v55 = vld [vmem:[#allocation7 + $0xd8] sm:$0xf0] }
 0x2b3   : > { %924 = vst [vmem:[#allocation2 + $0x20] sm:$0xfe] %v891_v56  ;;  %v1082_v17 = vsel %vm1076_vm14, %v1080_v57, %v1081_v58  ;;  %v899_v6 = vrot.slane %v867_v38, 7  ;;  %v868_v7 = vadd.f32 %v12834_v40, %v851_v46  ;;  %v9365_v26 = vor.u32 %v11462_v51, %v9362_v55  ;;  %v9272_v46 = vld [vmem:[#allocation7 + $0x20] sm:$0xf] }
 0x2b4   : > { %926 = vst [vmem:[#allocation2 + $0x30] sm:$0x1] %v891_v56  ;;  %v866_v48 = vadd.f32 %v12834_v40, %v849_v39  ;;  %v869_v27 = vadd.f32 %v12834_v40, %v852_v10  ;;  %v871_v28 = vadd.f32 %v12834_v40, %v854_v12  ;;  %v12892_v29 = vadd.f32 %v12834_v40, %v853_v14  ;;  %v11460_v39 = vld [vmem:[#allocation7 + $0xc4] sm:$0xf] }
 0x2b5   : > { %925 = vst [vmem:[#allocation2 + $0x28] sm:$0xfe] %v892_v13  ;;  %1707 = vmatpush.bf16.msrb.mxu3 %v9365_v26  ;;  %v900_v57 = vrot.slane %v868_v7, 7  ;;  %v9293_v38 = vor.u32 %v11444_v33, %v9290_v32  ;;  %v12899_v51 = vadd.f32 %v12834_v40, %v855_v11  ;;  %v11442_v7 = vld [vmem:[#allocation7 + $0x34] sm:$0xf]  ;;  %v399_v32 = vlaneseq }
 0x2b6   : > { %927 = vst [vmem:[#allocation2 + $0x38] sm:$0x1] %v892_v13  ;;  %v898_v13 = vrot.slane %v866_v48, 7  ;;  %v902_v48 = vrot.slane %v12892_v29, 7  ;;  %v11458_v26 = vld [vmem:[#allocation7 + $0xb4] sm:$0xf] }
 0x2b7   : > { %928 = vst [vmem:[#allocation2 + $0x40] sm:$0xfe] %v893_v59  ;;  %1679 = vmatpush.bf16.msrb.mxu2 %v9293_v38  ;;  %v11453_v33 = vld [vmem:[#allocation7 + $0x84] sm:$0xf0]  ;;  %vm12915_vm15 = vcmp.lt.s32.totalorder %v399_v32, 256 }
 0x2b8   : > { %930 = vst [vmem:[#allocation2 + $0x50] sm:$0x1] %v893_v59  ;;  %v9442_v32 = vld [vmem:[#allocation7 + $0x278] sm:$0xf0] }
 0x2b9   : > { %932 = vst [vmem:[#allocation2 + $0x60] sm:$0xfe] %v895_v60 }
 0x2ba   : > { %v1016_v34 = vld [vmem:[#allocation2 + $0x20] sm:$0xfe]  ;;  %934 = vst [vmem:[#allocation2 + $0x70] sm:$0x1] %v895_v60 }
 0x2bb   : > { %v1018_v41 = vld [vmem:[#allocation2 + $0x30] sm:$0x1]  ;;  %v1083_v15 = vrot.slane %v1016_v34, 1  ;;  %929 = vst [vmem:[#allocation2 + $0x48] sm:$0xfe] %v894_v61 }
 0x2bc   : > { %v1084_v43 = vrot.slane %v1018_v41, 1  ;;  %v1017_v45 = vld [vmem:[#allocation2 + $0x28] sm:$0xfe]  ;;  %931 = vst [vmem:[#allocation2 + $0x58] sm:$0x1] %v894_v61 }
 0x2bd   : > { %v1019_v49 = vld [vmem:[#allocation2 + $0x38] sm:$0x1]  ;;  %v1086_v8 = vrot.slane %v1017_v45, 1  ;;  %933 = vst [vmem:[#allocation2 + $0x68] sm:$0xfe] %v896_v62 }
 0x2be   : > { %v1085_v50 = vsel %vm1076_vm14, %v1083_v15, %v1084_v43  ;;  %v1087_v52 = vrot.slane %v1019_v49, 1  ;;  %935 = vst [vmem:[#allocation2 + $0x78] sm:$0x1] %v896_v62  ;;  %v1020_v56 = vld [vmem:[#allocation2 + $0x40] sm:$0xfe]  ;;  %v903_v15 = vrot.slane %v871_v28, 7 }
 0x2bf   : > { %v1141_v54 = vpack.c.bf16 %v1085_v50, %v1079_v42  ;;  %936 = vst [vmem:[#allocation2 + $0x80] sm:$0xfe] %v897_v5  ;;  %v1022_v58 = vld [vmem:[#allocation2 + $0x50] sm:$0x1]  ;;  %v1089_v60 = vrot.slane %v1020_v56, 1  ;;  %v901_v42 = vrot.slane %v869_v27, 7 }
 0x2c0   : > { %v1088_v9 = vsel %vm1076_vm14, %v1086_v8, %v1087_v52  ;;  %938 = vst [vmem:[#allocation2 + $0x90] sm:$0x1] %v897_v5  ;;  %v1024_v61 = vld [vmem:[#allocation2 + $0x60] sm:$0xfe]  ;;  %v1090_v16 = vrot.slane %v1022_v58, 1 }
 0x2c1   : > { %1350 = vmatmul.bf16.vlgmr.msra.gmra.mxu0 %v1141_v54  ;;  %v1142_v59 = vpack.c.bf16 %v1088_v9, %v1082_v17  ;;  %1408 = vmatmul.bf16.vlgmr.msra.gmra.mxu2 %v1141_v54  ;;  %940 = vst [vmem:[#allocation2 + $0xa0] sm:$0xfe] %v899_v6  ;;  %v1026_v62 = vld [vmem:[#allocation2 + $0x70] sm:$0x1]  ;;  %v1095_v18 = vrot.slane %v1024_v61, 1 }
 0x2c2   : > { %942 = vst [vmem:[#allocation2 + $0xb0] sm:$0x1] %v899_v6  ;;  %v1021_v63 = vld [vmem:[#allocation2 + $0x48] sm:$0xfe]  ;;  %v1096_v19 = vrot.slane %v1026_v62, 1  ;;  %v1091_v34 = vsel %vm1076_vm14, %v1089_v60, %v1090_v16  ;;  %v904_v60 = vrot.slane %v12899_v51, 7 }
 0x2c3   : > { %1379 = vmatmul.bf16.vlgmr.msra.gmra.mxu1 %v1142_v59  ;;  %1437 = vmatmul.bf16.vlgmr.msra.gmra.mxu3 %v1142_v59  ;;  %937 = vst [vmem:[#allocation2 + $0x88] sm:$0xfe] %v898_v13  ;;  %v1023_v0 = vld [vmem:[#allocation2 + $0x58] sm:$0x1]  ;;  %v1092_v23 = vrot.slane %v1021_v63, 1 }
 0x2c4   : > { %939 = vst [vmem:[#allocation2 + $0x98] sm:$0x1] %v898_v13  ;;  %v1025_v1 = vld [vmem:[#allocation2 + $0x68] sm:$0xfe]  ;;  %v1093_v20 = vrot.slane %v1023_v0, 1  ;;  %v1097_v35 = vsel %vm1076_vm14, %v1095_v18, %v1096_v19 }
 0x2c5   : > { %941 = vst [vmem:[#allocation2 + $0xa8] sm:$0xfe] %v900_v57  ;;  %v1027_v3 = vld [vmem:[#allocation2 + $0x78] sm:$0x1]  ;;  %v1098_v30 = vrot.slane %v1025_v1, 1  ;;  %v1143_v49 = vpack.c.bf16 %v1097_v35, %v1091_v34 }
 0x2c6   : > { %943 = vst [vmem:[#allocation2 + $0xb8] sm:$0x1] %v900_v57  ;;  %v1099_v24 = vrot.slane %v1027_v3, 1  ;;  %v9354_v41 = vld [vmem:[#allocation7 + $0xc8] sm:$0xf0]  ;;  %v1094_v43 = vsel %vm1076_vm14, %v1092_v23, %v1093_v20 }
 0x2c7   : > { %v12903_v5 = vld [vmem:[#allocation2 + $0x80] sm:$0xfe]  ;;  %v9357_v37 = vor.u32 %v11460_v39, %v9354_v41  ;;  %v12906_v17 = vld [vmem:[#allocation2 + $0x90] sm:$0x1]  ;;  %v11441_v8 = vld [vmem:[#allocation7 + $0x24] sm:$0xf0] }
 0x2c8   : > { %v1100_v45 = vsel %vm1076_vm14, %v1098_v30, %v1099_v24  ;;  %v9336_v50 = vld [vmem:[#allocation7 + $0xa0] sm:$0xf]  ;;  %v9273_v52 = vor.u32 %v11441_v8, %v9272_v46  ;;  %v11457_v6 = vld [vmem:[#allocation7 + $0xa4] sm:$0xf0]  ;;  %v9282_v54 = vld [vmem:[#allocation7 + $0x38] sm:$0xf0] }
 0x2c9   : > { %1708 = vmatpush.bf16.msrb.mxu3 %v9357_v37  ;;  %v1144_v55 = vpack.c.bf16 %v1100_v45, %v1094_v43  ;;  %v9337_v9 = vor.u32 %v11457_v6, %v9336_v50  ;;  %v9285_v56 = vor.u32 %v11442_v7, %v9282_v54  ;;  %v9346_v13 = vld [vmem:[#allocation7 + $0xb8] sm:$0xf0]  ;;  %944 = vst [vmem:[#allocation2 + $0xc0] sm:$0xfe] %v901_v42  ;;  %v1101_v59 = vrot.slane %v12903_v5, 1 }
 0x2ca   : > { %v1102_v57 = vrot.slane %v12906_v17, 1  ;;  %1623 = vmatpush.bf16.msrb.mxu0 %v9273_v52  ;;  %v9349_v58 = vor.u32 %v11458_v26, %v9346_v13  ;;  %946 = vst [vmem:[#allocation2 + $0xd0] sm:$0x1] %v901_v42  ;;  %v1032_v61 = vld [vmem:[#allocation2 + $0xa0] sm:$0xfe] }
 0x2cb   : > { %v1034_v62 = vld [vmem:[#allocation2 + $0xb0] sm:$0x1]  ;;  %948 = vst [vmem:[#allocation2 + $0xe0] sm:$0xfe] %v903_v15  ;;  %v11439_v0 = vld [vmem:[#allocation7 + $0x14] sm:$0xf0]  ;;  %1652 = vmatpush.bf16.msrb.mxu1 %v9337_v9  ;;  %1680 = vmatpush.bf16.msrb.mxu2 %v9285_v56 }
 0x2cc   : > { %v9264_v63 = vld [vmem:[#allocation7 + $0x10] sm:$0xf]  ;;  %v1029_v1 = vld [vmem:[#allocation2 + $0x88] sm:$0xfe]  ;;  %950 = vst [vmem:[#allocation2 + $0xf0] sm:$0x1] %v903_v15  ;;  %v1103_v42 = vsel %vm1076_vm14, %v1101_v59, %v1102_v57 }
 0x2cd   : > { %v9265_v2 = vor.u32 %v11439_v0, %v9264_v63  ;;  %v9328_v3 = vld [vmem:[#allocation7 + $0x90] sm:$0xf]  ;;  %v1031_v10 = vld [vmem:[#allocation2 + $0x98] sm:$0x1]  ;;  %v1033_v12 = vld [vmem:[#allocation2 + $0xa8] sm:$0xfe]  ;;  %1709 = vmatpush.bf16.msrb.mxu3 %v9349_v58 }
 0x2ce   : > { %v1035_v14 = vld [vmem:[#allocation2 + $0xb8] sm:$0x1]  ;;  %945 = vst [vmem:[#allocation2 + $0xc8] sm:$0xfe] %v902_v48  ;;  %v9329_v16 = vor.u32 %v11455_v4, %v9328_v3  ;;  %v11440_v18 = vld [vmem:[#allocation7 + $0x24] sm:$0xf] }
 0x2cf   : > { %v9274_v19 = vld [vmem:[#allocation7 + $0x28] sm:$0xf0]  ;;  %947 = vst [vmem:[#allocation2 + $0xd8] sm:$0x1] %v902_v48  ;;  %1624 = vmatpush.bf16.msrb.mxu0 %v9265_v2  ;;  %v9256_v27 = vld [vmem:[#allocation7] sm:$0xf] }
 0x2d0   : > { %v9277_v21 = vor.u32 %v11440_v18, %v9274_v19  ;;  %v9338_v23 = vld [vmem:[#allocation7 + $0xa8] sm:$0xf0]  ;;  %949 = vst [vmem:[#allocation2 + $0xe8] sm:$0xfe] %v904_v60  ;;  %v11437_v28 = vld [vmem:[#allocation7 + $0x4] sm:$0xf0]  ;;  %1653 = vmatpush.bf16.msrb.mxu1 %v9329_v16 }
 0x2d1   : > { %1355 = vmatmul.bf16.gmra.mxu0 %v1143_v49  ;;  %1413 = vmatmul.bf16.gmra.mxu2 %v1143_v49  ;;  %v9341_v25 = vor.u32 %v11456_v22, %v9338_v23  ;;  %v1107_v29 = vrot.slane %v1032_v61, 1  ;;  %v1108_v20 = vrot.slane %v1034_v62, 1  ;;  %951 = vst [vmem:[#allocation2 + $0xf8] sm:$0x1] %v904_v60  ;;  %v9257_v30 = vor.u32 %v11437_v28, %v9256_v27  ;;  %v9320_v24 = vld [vmem:[#allocation7 + $0x80] sm:$0xf] }
 0x2d2   : > { %1681 = vmatpush.bf16.msrb.mxu2 %v9277_v21  ;;  %v1104_v31 = vrot.slane %v1029_v1, 1  ;;  %v1105_v11 = vrot.slane %v1031_v10, 1  ;;  %v1110_v34 = vrot.slane %v1033_v12, 1  ;;  %v1111_v35 = vrot.slane %v1035_v14, 1  ;;  %v11438_v39 = vld [vmem:[#allocation7 + $0x14] sm:$0xf] }
 0x2d3   : > { %1384 = vmatmul.bf16.gmra.mxu1 %v1144_v55  ;;  %1442 = vmatmul.bf16.gmra.mxu3 %v1144_v55  ;;  %v9321_v38 = vor.u32 %v11453_v33, %v9320_v24  ;;  %v9266_v41 = vld [vmem:[#allocation7 + $0x18] sm:$0xf0]  ;;  %v1109_v15 = vsel %vm1076_vm14, %v1107_v29, %v1108_v20  ;;  %v11454_v43 = vld [vmem:[#allocation7 + $0x94] sm:$0xf]  ;;  %v11436_v48 = vld [vmem:[#allocation7 + $0x4] sm:$0xf] }
 0x2d4   : > { %1710 = vmatpush.bf16.msrb.mxu3 %v9341_v25  ;;  %1625 = vmatpush.bf16.msrb.mxu0 %v9257_v30  ;;  %v9269_v51 = vor.u32 %v11438_v39, %v9266_v41  ;;  %v9330_v45 = vld [vmem:[#allocation7 + $0x98] sm:$0xf0]  ;;  %v1106_v5 = vsel %vm1076_vm14, %v1104_v31, %v1105_v11  ;;  %v1112_v37 = vsel %vm1076_vm14, %v1110_v34, %v1111_v35  ;;  %v9258_v8 = vld [vmem:[#allocation7 + $0x8] sm:$0xf0]  ;;  %v11452_v52 = vld [vmem:[#allocation7 + $0x84] sm:$0xf] }
 0x2d5   : > { %1654 = vmatpush.bf16.msrb.mxu1 %v9321_v38  ;;  %v9333_v46 = vor.u32 %v11454_v43, %v9330_v45  ;;  %v1145_v17 = vpack.c.bf16 %v1109_v15, %v1103_v42  ;;  %v9261_v50 = vor.u32 %v11436_v48, %v9258_v8  ;;  %v9322_v6 = vld [vmem:[#allocation7 + $0x88] sm:$0xf0]  ;;  %v1146_v7 = vpack.c.bf16 %v1112_v37, %v1106_v5  ;;  %v1036_v55 = vld [vmem:[#allocation2 + $0xc0] sm:$0xfe]  ;;  %v1038_v9 = vld [vmem:[#allocation2 + $0xd0] sm:$0x1] }
 0x2d6   : > { %1682 = vmatpush.bf16.msrb.mxu2 %v9269_v51  ;;  %v9325_v54 = vor.u32 %v11452_v52, %v9322_v6  ;;  %403 = vst.msk [vmem:[#allocation2] ss:$8 sm:$0x3] %vm12915_vm15, %v12447_v53  ;;  %v1040_v56 = vld [vmem:[#allocation2 + $0xe0] sm:$0xfe]  ;;  %v1113_v58 = vrot.slane %v1036_v55, 1 }
 0x2d7   : > { %406 = vst.msk [vmem:[#allocation2 + $0x20] ss:$8 sm:$0x3] %vm12915_vm15, %v12447_v53  ;;  %v1042_v26 = vld [vmem:[#allocation2 + $0xf0] sm:$0x1]  ;;  %v1114_v61 = vrot.slane %v1038_v9, 1 }
 0x2d8   : > { %1711 = vmatpush.bf16.msrb.mxu3 %v9333_v46  ;;  %409 = vst.msk [vmem:[#allocation2 + $0x40] ss:$8 sm:$0x3] %vm12915_vm15, %v12447_v53  ;;  %v1037_v13 = vld [vmem:[#allocation2 + $0xc8] sm:$0xfe]  ;;  %v1119_v62 = vrot.slane %v1040_v56, 1 }
 0x2d9   : > { %412 = vst.msk [vmem:[#allocation2 + $0x60] ss:$8 sm:$0x3] %vm12915_vm15, %v12447_v53  ;;  %v1039_v59 = vld [vmem:[#allocation2 + $0xd8] sm:$0x1]  ;;  %v1120_v63 = vrot.slane %v1042_v26, 1  ;;  %v1115_v12 = vsel %vm1076_vm14, %v1113_v58, %v1114_v61 }
 0x2da   : > { %1683 = vmatpush.bf16.msrb.mxu2 %v9261_v50  ;;  %415 = vst.msk [vmem:[#allocation2 + $0x80] ss:$8 sm:$0x3] %vm12915_vm15, %v12447_v53  ;;  %v1041_v57 = vld [vmem:[#allocation2 + $0xe8] sm:$0xfe]  ;;  %v1116_v0 = vrot.slane %v1037_v13, 1 }
 0x2db   : > { %418 = vst.msk [vmem:[#allocation2 + $0xa0] ss:$8 sm:$0x3] %vm12915_vm15, %v12447_v53  ;;  %v1043_v60 = vld [vmem:[#allocation2 + $0xf8] sm:$0x1]  ;;  %v1117_v1 = vrot.slane %v1039_v59, 1  ;;  %v1121_v14 = vsel %vm1076_vm14, %v1119_v62, %v1120_v63 }
 0x2dc   : > { %1712 = vmatpush.bf16.msrb.mxu3 %v9325_v54  ;;  %421 = vst.msk [vmem:[#allocation2 + $0xc0] ss:$8 sm:$0x3] %vm12915_vm15, %v12447_v53  ;;  %v1122_v2 = vrot.slane %v1041_v57, 1  ;;  %v1123_v3 = vrot.slane %v1043_v60, 1  ;;  %v1147_v27 = vpack.c.bf16 %v1121_v14, %v1115_v12 }
 0x2dd   : > { %424 = vst.msk [vmem:[#allocation2 + $0xe0] ss:$8 sm:$0x3] %vm12915_vm15, %v12447_v53  ;;  %v9440_v4 = vld [vmem:[#allocation7 + $0x270] sm:$0xf]  ;;  %v1118_v21 = vsel %vm1076_vm14, %v1116_v0, %v1117_v1  ;;  %v956_v5 = vld [vmem:[#allocation2] sm:$0xff] }
 0x2de   : > { %427 = vst.msk [vmem:[#allocation2 + $0x100] ss:$8 sm:$0x3] %vm12915_vm15, %v12447_v53  ;;  %v11515_v10 = vld [vmem:[#allocation7 + $0x274] sm:$0xf0]  ;;  %v1124_v22 = vsel %vm1076_vm14, %v1122_v2, %v1123_v3  ;;  %v958_v46 = vld [vmem:[#allocation2 + $0x20] sm:$0xff] }
 0x2df   : > { %430 = vst.msk [vmem:[#allocation2 + $0x120] ss:$8 sm:$0x3] %vm12915_vm15, %v12447_v53  ;;  %v9441_v16 = vor.u32 %v11515_v10, %v9440_v4  ;;  %v9504_v18 = vld [vmem:[#allocation7 + $0x2f0] sm:$0xf]  ;;  %v1148_v30 = vpack.c.bf16 %v1124_v22, %v1118_v21  ;;  %v957_v8 = vld [vmem:[#allocation2 + $0x8] sm:$0xff]  ;;  %v972_v54 = vpack.c.bf16 %v958_v46, %v956_v5 }
 0x2e0   : > { %433 = vst.msk [vmem:[#allocation2 + $0x11] ss:$8 sm:$0x3] %vm12915_vm15, %v12447_v53  ;;  %v11531_v19 = vld [vmem:[#allocation7 + $0x2f4] sm:$0xf0]  ;;  %v959_v52 = vld [vmem:[#allocation2 + $0x28] sm:$0xff] }
 0x2e1   : > { %1360 = vmatmul.bf16.gmra.mxu0 %v1145_v17  ;;  %1418 = vmatmul.bf16.gmra.mxu2 %v1145_v17  ;;  %436 = vst.msk [vmem:[#allocation2 + $0x31] ss:$8 sm:$0x3] %vm12915_vm15, %v12447_v53  ;;  %v9505_v23 = vor.u32 %v11531_v19, %v9504_v18  ;;  %v9432_v25 = vld [vmem:[#allocation7 + $0x260] sm:$0xf]  ;;  %v13023_v26 = vld [vmem:[#allocation2 + $0x48] sm:$0xff]  ;;  %v973_v61 = vpack.c.bf16 %v959_v52, %v957_v8 }
 0x2e2   : > { %439 = vst.msk [vmem:[#allocation2 + $0x51] ss:$8 sm:$0x3] %vm12915_vm15, %v12447_v53  ;;  %2064 = vmatpush.bf16.msra.mxu0 %v9441_v16  ;;  %v11513_v28 = vld [vmem:[#allocation7 + $0x264] sm:$0xf0]  ;;  %v13019_v9 = vld [vmem:[#allocation2 + $0x40] sm:$0xff]  ;;  %v13058_v19 = vpack.c.bf16 %v13023_v26, %v959_v52 }
 0x2e3   : > { %1389 = vmatmul.bf16.gmra.mxu1 %v1146_v7  ;;  %1447 = vmatmul.bf16.gmra.mxu3 %v1146_v7  ;;  %442 = vst.msk [vmem:[#allocation2 + $0x71] ss:$8 sm:$0x3] %vm12915_vm15, %v12447_v53  ;;  %v9433_v29 = vor.u32 %v11513_v28, %v9432_v25  ;;  %v9496_v20 = vld [vmem:[#allocation7 + $0x2e0] sm:$0xf]  ;;  %v13025_v13 = vld [vmem:[#allocation2 + $0x68] sm:$0xff]  ;;  %v13055_v18 = vpack.c.bf16 %v13019_v9, %v958_v46 }
 0x2e4   : > { %445 = vst.msk [vmem:[#allocation2 + $0x91] ss:$8 sm:$0x3] %vm12915_vm15, %v12447_v53  ;;  %2093 = vmatpush.bf16.msra.mxu1 %v9505_v23  ;;  %v11529_v24 = vld [vmem:[#allocation7 + $0x2e4] sm:$0xf0]  ;;  %v13021_v56 = vld [vmem:[#allocation2 + $0x60] sm:$0xff] }
 0x2e5   : > { %448 = vst.msk [vmem:[#allocation2 + $0xb1] ss:$8 sm:$0x3] %vm12915_vm15, %v12447_v53  ;;  %v9497_v31 = vor.u32 %v11529_v24, %v9496_v20  ;;  %v11514_v33 = vld [vmem:[#allocation7 + $0x274] sm:$0xf]  ;;  %v13027_v58 = vld [vmem:[#allocation2 + $0x80] sm:$0xff] }
 0x2e6   : > { %451 = vst.msk [vmem:[#allocation2 + $0xd1] ss:$8 sm:$0x3] %vm12915_vm15, %v12447_v53  ;;  %2065 = vmatpush.bf16.msra.mxu0 %v9433_v29  ;;  %v9445_v11 = vor.u32 %v11514_v33, %v9442_v32  ;;  %v11530_v34 = vld [vmem:[#allocation7 + $0x2f4] sm:$0xf]  ;;  %v13029_v60 = vld [vmem:[#allocation2 + $0x88] sm:$0xff]  ;;  %v13062_v21 = vpack.c.bf16 %v13027_v58, %v13021_v56 }
 0x2e7   : > { %454 = vst.msk [vmem:[#allocation2 + $0xf1] ss:$8 sm:$0x3] %vm12915_vm15, %v12447_v53  ;;  %v9506_v35 = vld [vmem:[#allocation7 + $0x2f8] sm:$0xf0]  ;;  %v13034_v63 = vld [vmem:[#allocation2 + $0xa0] sm:$0xff]  ;;  %v13066_v22 = vpack.c.bf16 %v13029_v60, %v13025_v13 }
 0x2e8   : > { %457 = vst.msk [vmem:[#allocation2 + $0x111] ss:$8 sm:$0x3] %vm12915_vm15, %v12447_v53  ;;  %2094 = vmatpush.bf16.msra.mxu1 %v9497_v31  ;;  %2122 = vmatpush.bf16.msra.mxu2 %v9445_v11  ;;  %v9509_v38 = vor.u32 %v11530_v34, %v9506_v35  ;;  %v9424_v39 = vld [vmem:[#allocation7 + $0x250] sm:$0xf]  ;;  %v13036_v0 = vld [vmem:[#allocation2 + $0xa8] sm:$0xff] }
 0x2e9   : > { %460 = vst.msk [vmem:[#allocation2 + $0x131] ss:$8 sm:$0x3] %vm12915_vm15, %v12447_v53  ;;  %v11511_v41 = vld [vmem:[#allocation7 + $0x254] sm:$0xf0]  ;;  %v13041_v3 = vld [vmem:[#allocation2 + $0xc0] sm:$0xff] }
 0x2ea   : > { %471 = vst.msk [vmem:[#allocation3] ss:$8 sm:$0x3] %vm12915_vm15, %v12447_v53  ;;  %2151 = vmatpush.bf16.msra.mxu3 %v9509_v38  ;;  %v9425_v42 = vor.u32 %v11511_v41, %v9424_v39  ;;  %v9488_v15 = vld [vmem:[#allocation7 + $0x2d0] sm:$0xf]  ;;  %v13046_v10 = vld [vmem:[#allocation2 + $0xc8] sm:$0xff] }
 0x2eb   : > { %474 = vst.msk [vmem:[#allocation3 + $0x20] ss:$8 sm:$0x3] %vm12915_vm15, %v12447_v53  ;;  %v11527_v51 = vld [vmem:[#allocation7 + $0x2d4] sm:$0xf0]  ;;  %v13077_v28 = vpack.c.bf16 %v13046_v10, %v13036_v0 }
 0x2ec   : > { %477 = vst.msk [vmem:[#allocation3 + $0x40] ss:$8 sm:$0x3] %vm12915_vm15, %v12447_v53  ;;  %2066 = vmatpush.bf16.msra.mxu0 %v9425_v42  ;;  %v9489_v43 = vor.u32 %v11527_v51, %v9488_v15  ;;  %v11512_v45 = vld [vmem:[#allocation7 + $0x264] sm:$0xf] }
 0x2ed   : > { %480 = vst.msk [vmem:[#allocation3 + $0x60] ss:$8 sm:$0x3] %vm12915_vm15, %v12447_v53  ;;  %v9434_v37 = vld [vmem:[#allocation7 + $0x268] sm:$0xf0] }
 0x2ee   : > { %483 = vst.msk [vmem:[#allocation3 + $0x80] ss:$8 sm:$0x3] %vm12915_vm15, %v12447_v53  ;;  %2095 = vmatpush.bf16.msra.mxu1 %v9489_v43  ;;  %v9437_v48 = vor.u32 %v11512_v45, %v9434_v37  ;;  %v11528_v17 = vld [vmem:[#allocation7 + $0x2e4] sm:$0xf] }
 0x2ef   : > { %486 = vst.msk [vmem:[#allocation3 + $0xa0] ss:$8 sm:$0x3] %vm12915_vm15, %v12447_v53  ;;  %v9498_v50 = vld [vmem:[#allocation7 + $0x2e8] sm:$0xf0] }
 0x2f0   : > { %489 = vst.msk [vmem:[#allocation3 + $0xc0] ss:$8 sm:$0x3] %vm12915_vm15, %v12447_v53  ;;  %2123 = vmatpush.bf16.msra.mxu2 %v9437_v48  ;;  %v9501_v6 = vor.u32 %v11528_v17, %v9498_v50  ;;  %v9416_v7 = vld [vmem:[#allocation7 + $0x240] sm:$0xf]  ;;  %v974_v48 = vpack.c.bf16 %v13021_v56, %v13019_v9  ;;  %v975_v17 = vpack.c.bf16 %v13025_v13, %v13023_v26 }
 0x2f1   : > { %1365 = vmatmul.bf16.gmra.mxu0 %v1147_v27  ;;  %1423 = vmatmul.bf16.gmra.mxu2 %v1147_v27  ;;  %492 = vst.msk [vmem:[#allocation3 + $0xe0] ss:$8 sm:$0x3] %vm12915_vm15, %v12447_v53  ;;  %v11509_v55 = vld [vmem:[#allocation7 + $0x244] sm:$0xf0]  ;;  %v13073_v27 = vpack.c.bf16 %v13041_v3, %v13034_v63 }
 0x2f2   : > { %495 = vst.msk [vmem:[#allocation3 + $0x100] ss:$8 sm:$0x3] %vm12915_vm15, %v12447_v53  ;;  %2152 = vmatpush.bf16.msra.mxu3 %v9501_v6  ;;  %v9417_v59 = vor.u32 %v11509_v55, %v9416_v7  ;;  %v9480_v57 = vld [vmem:[#allocation7 + $0x2c0] sm:$0xf] }
 0x2f3   : > { %1394 = vmatmul.bf16.gmra.mxu1 %v1148_v30  ;;  %1452 = vmatmul.bf16.gmra.mxu3 %v1148_v30  ;;  %498 = vst.msk [vmem:[#allocation3 + $0x120] ss:$8 sm:$0x3] %vm12915_vm15, %v12447_v53  ;;  %v11525_v62 = vld [vmem:[#allocation7 + $0x2c4] sm:$0xf0] }
 0x2f4   : > { %501 = vst.msk [vmem:[#allocation3 + $0x11] ss:$8 sm:$0x3] %vm12915_vm15, %v12447_v53  ;;  %2067 = vmatpush.bf16.msra.mxu0 %v9417_v59  ;;  %v9481_v1 = vor.u32 %v11525_v62, %v9480_v57  ;;  %v11510_v2 = vld [vmem:[#allocation7 + $0x254] sm:$0xf] }
 0x2f5   : > { %504 = vst.msk [vmem:[#allocation3 + $0x31] ss:$8 sm:$0x3] %vm12915_vm15, %v12447_v53  ;;  %v9426_v4 = vld [vmem:[#allocation7 + $0x258] sm:$0xf0] }
 0x2f6   : > { %507 = vst.msk [vmem:[#allocation3 + $0x51] ss:$8 sm:$0x3] %vm12915_vm15, %v12447_v53  ;;  %2096 = vmatpush.bf16.msra.mxu1 %v9481_v1  ;;  %v9429_v12 = vor.u32 %v11510_v2, %v9426_v4  ;;  %v11526_v14 = vld [vmem:[#allocation7 + $0x2d4] sm:$0xf] }
 0x2f7   : > { %510 = vst.msk [vmem:[#allocation3 + $0x71] ss:$8 sm:$0x3] %vm12915_vm15, %v12447_v53  ;;  %v9490_v16 = vld [vmem:[#allocation7 + $0x2d8] sm:$0xf0] }
 0x2f8   : > { %513 = vst.msk [vmem:[#allocation3 + $0x91] ss:$8 sm:$0x3] %vm12915_vm15, %v12447_v53  ;;  %2124 = vmatpush.bf16.msra.mxu2 %v9429_v12  ;;  %v9493_v23 = vor.u32 %v11526_v14, %v9490_v16  ;;  %v9408_v25 = vld [vmem:[#allocation7 + $0x230] sm:$0xf] }
 0x2f9   : > { %516 = vst.msk [vmem:[#allocation3 + $0xb1] ss:$8 sm:$0x3] %vm12915_vm15, %v12447_v53  ;;  %v11507_v29 = vld [vmem:[#allocation7 + $0x234] sm:$0xf0] }
 0x2fa   : > { %519 = vst.msk [vmem:[#allocation3 + $0xd1] ss:$8 sm:$0x3] %vm12915_vm15, %v12447_v53  ;;  %2153 = vmatpush.bf16.msra.mxu3 %v9493_v23  ;;  %v9409_v20 = vor.u32 %v11507_v29, %v9408_v25  ;;  %v9472_v30 = vld [vmem:[#allocation7 + $0x2b0] sm:$0xf] }
 0x2fb   : > { %522 = vst.msk [vmem:[#allocation3 + $0xf1] ss:$8 sm:$0x3] %vm12915_vm15, %v12447_v53  ;;  %v11523_v24 = vld [vmem:[#allocation7 + $0x2b4] sm:$0xf0] }
 0x2fc   : > { %525 = vst.msk [vmem:[#allocation3 + $0x111] ss:$8 sm:$0x3] %vm12915_vm15, %v12447_v53  ;;  %v11508_v31 = vld [vmem:[#allocation7 + $0x244] sm:$0xf]  ;;  %2068 = vmatpush.bf16.msra.mxu0 %v9409_v20  ;;  %v9473_v32 = vor.u32 %v11523_v24, %v9472_v30  ;;  %v856_v20 = vmul.f32 %v12823_v47, %v12706_v36  ;;  %v857_v24 = vmul.f32 %v12823_v47, %v12716_v44 }
 0x2fd   : > { %528 = vst.msk [vmem:[#allocation3 + $0x131] ss:$8 sm:$0x3] %vm12915_vm15, %v12447_v53  ;;  %v9418_v33 = vld [vmem:[#allocation7 + $0x248] sm:$0xf0] }
 0x2fe   : > { %v9421_v11 = vor.u32 %v11508_v31, %v9418_v33  ;;  %v11524_v34 = vld [vmem:[#allocation7 + $0x2c4] sm:$0xf]  ;;  %v9482_v35 = vld [vmem:[#allocation7 + $0x2c8] sm:$0xf0]  ;;  %v9400_v38 = vld [vmem:[#allocation7 + $0x220] sm:$0xf]  ;;  %2097 = vmatpush.bf16.msra.mxu1 %v9473_v32  ;;  %v873_v30 = vadd.f32 %v12834_v40, %v856_v20  ;;  %v874_v31 = vadd.f32 %v12834_v40, %v857_v24  ;;  %v976_v33 = vpack.c.bf16 %v13034_v63, %v13027_v58 }
 0x2ff   : > { %v9485_v39 = vor.u32 %v11524_v34, %v9482_v35  ;;  %v11505_v41 = vld [vmem:[#allocation7 + $0x224] sm:$0xf0]  ;;  %v9464_v42 = vld [vmem:[#allocation7 + $0x2a0] sm:$0xf]  ;;  %v11506_v51 = vld [vmem:[#allocation7 + $0x234] sm:$0xf] }
 0x300   : > { %v11521_v15 = vld [vmem:[#allocation7 + $0x2a4] sm:$0xf0]  ;;  %2125 = vmatpush.bf16.msra.mxu2 %v9421_v11  ;;  %v9401_v49 = vor.u32 %v11505_v41, %v9400_v38  ;;  %v9410_v43 = vld [vmem:[#allocation7 + $0x238] sm:$0xf0]  ;;  %v11522_v45 = vld [vmem:[#allocation7 + $0x2b4] sm:$0xf]  ;;  %v977_v11 = vpack.c.bf16 %v13036_v0, %v13029_v60 }
 0x301   : > { %1626 = vmatmul.bf16.vlgmr.msrb.gmra.mxu0 %v972_v54  ;;  %1684 = vmatmul.bf16.vlgmr.msrb.gmra.mxu2 %v972_v54  ;;  %v9465_v53 = vor.u32 %v11521_v15, %v9464_v42  ;;  %v9413_v5 = vor.u32 %v11506_v51, %v9410_v43  ;;  %v9474_v37 = vld [vmem:[#allocation7 + $0x2b8] sm:$0xf0]  ;;  %v9392_v8 = vld [vmem:[#allocation7 + $0x210] sm:$0xf]  ;;  %v11503_v50 = vld [vmem:[#allocation7 + $0x214] sm:$0xf0] }
 0x302   : > { %2154 = vmatpush.bf16.msra.mxu3 %v9485_v39  ;;  %2069 = vmatpush.bf16.msra.mxu0 %v9401_v49  ;;  %v9477_v46 = vor.u32 %v11522_v45, %v9474_v37  ;;  %v9456_v52 = vld [vmem:[#allocation7 + $0x290] sm:$0xf]  ;;  %v9393_v6 = vor.u32 %v11503_v50, %v9392_v8  ;;  %v11519_v7 = vld [vmem:[#allocation7 + $0x294] sm:$0xf0]  ;;  %v11504_v54 = vld [vmem:[#allocation7 + $0x224] sm:$0xf] }
 0x303   : > { %1655 = vmatmul.bf16.vlgmr.msrb.gmra.mxu1 %v973_v61  ;;  %1713 = vmatmul.bf16.vlgmr.msrb.gmra.mxu3 %v973_v61  ;;  %v9402_v55 = vld [vmem:[#allocation7 + $0x228] sm:$0xf0]  ;;  %v9457_v59 = vor.u32 %v11519_v7, %v9456_v52  ;;  %v11520_v9 = vld [vmem:[#allocation7 + $0x2a4] sm:$0xf]  ;;  %v9384_v61 = vld [vmem:[#allocation7 + $0x200] sm:$0xf] }
 0x304   : > { %2098 = vmatpush.bf16.msra.mxu1 %v9465_v53  ;;  %2126 = vmatpush.bf16.msra.mxu2 %v9413_v5  ;;  %v9405_v57 = vor.u32 %v11504_v54, %v9402_v55  ;;  %v9466_v56 = vld [vmem:[#allocation7 + $0x2a8] sm:$0xf0]  ;;  %v11501_v1 = vld [vmem:[#allocation7 + $0x204] sm:$0xf0]  ;;  %v9448_v26 = vld [vmem:[#allocation7 + $0x280] sm:$0xf] }
 0x305   : > { %v9469_v62 = vor.u32 %v11520_v9, %v9466_v56  ;;  %v11517_v13 = vld [vmem:[#allocation7 + $0x284] sm:$0xf0]  ;;  %v9385_v2 = vor.u32 %v11501_v1, %v9384_v61  ;;  %v11502_v12 = vld [vmem:[#allocation7 + $0x214] sm:$0xf]  ;;  %v9394_v14 = vld [vmem:[#allocation7 + $0x218] sm:$0xf0] }
 0x306   : > { %2155 = vmatpush.bf16.msra.mxu3 %v9477_v46  ;;  %2070 = vmatpush.bf16.msra.mxu0 %v9393_v6  ;;  %v9449_v4 = vor.u32 %v11517_v13, %v9448_v26  ;;  %v11518_v16 = vld [vmem:[#allocation7 + $0x294] sm:$0xf]  ;;  %v9397_v23 = vor.u32 %v11502_v12, %v9394_v14  ;;  %v9458_v25 = vld [vmem:[#allocation7 + $0x298] sm:$0xf0]  ;;  %v905_v32 = vrot.slane %v873_v30, 7  ;;  %v906_v41 = vrot.slane %v874_v31, 7 }
 0x307   : > { %v9461_v29 = vor.u32 %v11518_v16, %v9458_v25  ;;  %v11500_v36 = vld [vmem:[#allocation7 + $0x204] sm:$0xf]  ;;  %v9386_v34 = vld [vmem:[#allocation7 + $0x208] sm:$0xf0]  ;;  %v9568_v47 = vld [vmem:[#allocation7 + $0x370] sm:$0xf] }
 0x308   : > { %2099 = vmatpush.bf16.msra.mxu1 %v9457_v59  ;;  %2127 = vmatpush.bf16.msra.mxu2 %v9405_v57  ;;  %v11516_v35 = vld [vmem:[#allocation7 + $0x284] sm:$0xf]  ;;  %v9389_v38 = vor.u32 %v11500_v36, %v9386_v34  ;;  %v9450_v39 = vld [vmem:[#allocation7 + $0x288] sm:$0xf0]  ;;  %v11547_v40 = vld [vmem:[#allocation7 + $0x374] sm:$0xf0] }
 0x309   : > { %v9453_v44 = vor.u32 %v11516_v35, %v9450_v39  ;;  %v9632_v42 = vld [vmem:[#allocation7 + $0x3f0] sm:$0xf]  ;;  %v9569_v58 = vor.u32 %v11547_v40, %v9568_v47  ;;  %v11563_v63 = vld [vmem:[#allocation7 + $0x3f4] sm:$0xf0]  ;;  %952 = vst [vmem:[#allocation2 + $0x100] sm:$0xfe] %v905_v32 }
 0x30a   : > { %2156 = vmatpush.bf16.msra.mxu3 %v9469_v62  ;;  %2071 = vmatpush.bf16.msra.mxu0 %v9385_v2  ;;  %v9633_v15 = vor.u32 %v11563_v63, %v9632_v42  ;;  %954 = vst [vmem:[#allocation2 + $0x110] sm:$0x1] %v905_v32  ;;  %v9560_v60 = vld [vmem:[#allocation7 + $0x360] sm:$0xf]  ;;  %v11545_v0 = vld [vmem:[#allocation7 + $0x364] sm:$0xf0] }
 0x30b   : > { %953 = vst [vmem:[#allocation2 + $0x108] sm:$0xfe] %v906_v41  ;;  %v9624_v49 = vld [vmem:[#allocation7 + $0x3e0] sm:$0xf]  ;;  %v9561_v53 = vor.u32 %v11545_v0, %v9560_v60  ;;  %v11561_v51 = vld [vmem:[#allocation7 + $0x3e4] sm:$0xf0] }
 0x30c   : > { %2100 = vmatpush.bf16.msra.mxu1 %v9449_v4  ;;  %2128 = vmatpush.bf16.msra.mxu2 %v9397_v23  ;;  %955 = vst [vmem:[#allocation2 + $0x118] sm:$0x1] %v906_v41  ;;  %v11546_v43 = vld [vmem:[#allocation7 + $0x374] sm:$0xf]  ;;  %v9570_v45 = vld [vmem:[#allocation7 + $0x378] sm:$0xf0]  ;;  %v9625_v5 = vor.u32 %v11561_v51, %v9624_v49 }
 0x30d   : > { %v9573_v37 = vor.u32 %v11546_v43, %v9570_v45  ;;  %v11562_v46 = vld [vmem:[#allocation7 + $0x3f4] sm:$0xf]  ;;  %v13101_v50 = vld [vmem:[#allocation2 + $0xe8] sm:$0xff]  ;;  %v1734_v7 = vld [vmem:[#allocation2] sm:$0xfc] }
 0x30e   : > { %2157 = vmatpush.bf16.msra.mxu3 %v9461_v29  ;;  %2413 = vmatpush.bf16.msrb.mxu0 %v9569_v58  ;;  %v979_v6 = vpack.c.bf16 %v13101_v50, %v13046_v10  ;;  %v1736_v54 = vld [vmem:[#allocation2 + $0x10] sm:$0x3]  ;;  %v1738_v55 = vld [vmem:[#allocation2 + $0x20] sm:$0xfc]  ;;  %v1735_v57 = vld [vmem:[#allocation2 + $0x8] sm:$0xfc] }
 0x30f   : > { %v1740_v59 = vld [vmem:[#allocation2 + $0x30] sm:$0x3]  ;;  %v1737_v9 = vld [vmem:[#allocation2 + $0x18] sm:$0x3]  ;;  %v1739_v56 = vld [vmem:[#allocation2 + $0x28] sm:$0xfc] }
 0x310   : > { %2129 = vmatpush.bf16.msra.mxu2 %v9389_v38  ;;  %2442 = vmatpush.bf16.msrb.mxu1 %v9633_v15  ;;  %v9552_v61 = vld [vmem:[#allocation7 + $0x350] sm:$0xf]  ;;  %v11543_v62 = vld [vmem:[#allocation7 + $0x354] sm:$0xf0]  ;;  %v9562_v2 = vld [vmem:[#allocation7 + $0x368] sm:$0xf0] }
 0x311   : > { %1631 = vmatmul.bf16.gmra.mxu0 %v974_v48  ;;  %1689 = vmatmul.bf16.gmra.mxu2 %v974_v48  ;;  %v9634_v48 = vld [vmem:[#allocation7 + $0x3f8] sm:$0xf0]  ;;  %v9616_v1 = vld [vmem:[#allocation7 + $0x3d0] sm:$0xf]  ;;  %v9553_v26 = vor.u32 %v11543_v62, %v9552_v61  ;;  %v11559_v13 = vld [vmem:[#allocation7 + $0x3d4] sm:$0xf0] }
 0x312   : > { %2158 = vmatpush.bf16.msra.mxu3 %v9453_v44  ;;  %2414 = vmatpush.bf16.msrb.mxu0 %v9561_v53  ;;  %v9637_v8 = vor.u32 %v11562_v46, %v9634_v48  ;;  %v1741_v4 = vld [vmem:[#allocation2 + $0x38] sm:$0x3]  ;;  %v9617_v12 = vor.u32 %v11559_v13, %v9616_v1  ;;  %v11560_v14 = vld [vmem:[#allocation7 + $0x3e4] sm:$0xf]  ;;  %v9626_v16 = vld [vmem:[#allocation7 + $0x3e8] sm:$0xf0] }
 0x313   : > { %1660 = vmatmul.bf16.gmra.mxu1 %v975_v17  ;;  %1718 = vmatmul.bf16.gmra.mxu3 %v975_v17  ;;  %v13099_v17 = vld [vmem:[#allocation2 + $0xe0] sm:$0xff]  ;;  %v9629_v23 = vor.u32 %v11560_v14, %v9626_v16  ;;  %v1799_v25 = vrot.slane %v1734_v7, 2  ;;  %v1800_v29 = vrot.slane %v1736_v54, 2  ;;  %v1805_v20 = vrot.slane %v1738_v55, 2  ;;  %v11541_v36 = vld [vmem:[#allocation7 + $0x344] sm:$0xf0] }
 0x314   : > { %2443 = vmatpush.bf16.msrb.mxu1 %v9625_v5  ;;  %2471 = vmatpush.bf16.msrb.mxu2 %v9573_v37  ;;  %v978_v52 = vpack.c.bf16 %v13099_v17, %v13041_v3  ;;  %v11544_v3 = vld [vmem:[#allocation7 + $0x364] sm:$0xf]  ;;  %v1806_v30 = vrot.slane %v1740_v59, 2  ;;  %v1802_v24 = vrot.slane %v1735_v57, 2  ;;  %v1803_v31 = vrot.slane %v1737_v9, 2 }
 0x315   : > { %v9565_v10 = vor.u32 %v11544_v3, %v9562_v2  ;;  %v1809_v32 = vrot.slane %v1741_v4, 2  ;;  %v9608_v34 = vld [vmem:[#allocation7 + $0x3c0] sm:$0xf]  ;;  %v11557_v38 = vld [vmem:[#allocation7 + $0x3c4] sm:$0xf0]  ;;  %v1801_v58 = vsel %vm1798_vm8, %v1799_v25, %v1800_v29 }
 0x316   : > { %2500 = vmatpush.bf16.msrb.mxu3 %v9637_v8  ;;  %2415 = vmatpush.bf16.msrb.mxu0 %v9553_v26  ;;  %v11542_v39 = vld [vmem:[#allocation7 + $0x354] sm:$0xf]  ;;  %v9554_v41 = vld [vmem:[#allocation7 + $0x358] sm:$0xf0]  ;;  %v9609_v44 = vor.u32 %v11557_v38, %v9608_v34  ;;  %v1807_v63 = vsel %vm1798_vm8, %v1805_v20, %v1806_v30  ;;  %v1804_v0 = vsel %vm1798_vm8, %v1802_v24, %v1803_v31  ;;  %v1742_v5 = vld [vmem:[#allocation2 + $0x40] sm:$0xfc] }
 0x317   : > { %v9557_v47 = vor.u32 %v11542_v39, %v9554_v41  ;;  %v11558_v40 = vld [vmem:[#allocation7 + $0x3d4] sm:$0xf]  ;;  %v9618_v42 = vld [vmem:[#allocation7 + $0x3d8] sm:$0xf0]  ;;  %v1863_v53 = vpack.c.bf16 %v1807_v63, %v1801_v58  ;;  %v1744_v37 = vld [vmem:[#allocation2 + $0x50] sm:$0x3] }
 0x318   : > { %2444 = vmatpush.bf16.msrb.mxu1 %v9617_v12  ;;  %2472 = vmatpush.bf16.msrb.mxu2 %v9565_v10  ;;  %v9621_v15 = vor.u32 %v11558_v40, %v9618_v42  ;;  %v1746_v46 = vld [vmem:[#allocation2 + $0x60] sm:$0xfc]  ;;  %v1748_v48 = vld [vmem:[#allocation2 + $0x70] sm:$0x3]  ;;  %v1743_v8 = vld [vmem:[#allocation2 + $0x48] sm:$0xfc] }
 0x319   : > { %v9536_v7 = vld [vmem:[#allocation7 + $0x330] sm:$0xf]  ;;  %v11539_v54 = vld [vmem:[#allocation7 + $0x334] sm:$0xf0]  ;;  %v9546_v61 = vld [vmem:[#allocation7 + $0x348] sm:$0xf0] }
 0x31a   : > { %2501 = vmatpush.bf16.msrb.mxu3 %v9629_v23  ;;  %v9600_v55 = vld [vmem:[#allocation7 + $0x3b0] sm:$0xf]  ;;  %v9537_v57 = vor.u32 %v11539_v54, %v9536_v7  ;;  %v11555_v9 = vld [vmem:[#allocation7 + $0x3b4] sm:$0xf0]  ;;  %v11556_v13 = vld [vmem:[#allocation7 + $0x3c4] sm:$0xf] }
 0x31b   : > { %v1749_v62 = vld [vmem:[#allocation2 + $0x78] sm:$0x3]  ;;  %v9601_v1 = vor.u32 %v11555_v9, %v9600_v55  ;;  %v9610_v3 = vld [vmem:[#allocation7 + $0x3c8] sm:$0xf0]  ;;  %v1811_v12 = vrot.slane %v1742_v5, 2  ;;  %v1812_v16 = vrot.slane %v1744_v37, 2 }
 0x31c   : > { %2445 = vmatpush.bf16.msrb.mxu1 %v9609_v44  ;;  %2473 = vmatpush.bf16.msrb.mxu2 %v9557_v47  ;;  %v9613_v10 = vor.u32 %v11556_v13, %v9610_v3  ;;  %v1817_v23 = vrot.slane %v1746_v46, 2  ;;  %v1818_v25 = vrot.slane %v1748_v48, 2  ;;  %v1814_v20 = vrot.slane %v1743_v8, 2  ;;  %v11538_v38 = vld [vmem:[#allocation7 + $0x334] sm:$0xf] }
 0x31d   : > { %v1821_v31 = vrot.slane %v1749_v62, 2  ;;  %v9538_v39 = vld [vmem:[#allocation7 + $0x338] sm:$0xf0]  ;;  %v11554_v47 = vld [vmem:[#allocation7 + $0x3b4] sm:$0xf]  ;;  %v1813_v58 = vsel %vm1798_vm8, %v1811_v12, %v1812_v16 }
 0x31e   : > { %2502 = vmatpush.bf16.msrb.mxu3 %v9621_v15  ;;  %v9541_v44 = vor.u32 %v11538_v38, %v9538_v39  ;;  %v9602_v40 = vld [vmem:[#allocation7 + $0x3b8] sm:$0xf0]  ;;  %v1819_v63 = vsel %vm1798_vm8, %v1817_v23, %v1818_v25  ;;  %v1750_v48 = vld [vmem:[#allocation2 + $0x80] sm:$0xfc]  ;;  %v1752_v8 = vld [vmem:[#allocation2 + $0x90] sm:$0x3] }
 0x31f   : > { %v9605_v15 = vor.u32 %v11554_v47, %v9602_v40  ;;  %v1751_v7 = vld [vmem:[#allocation2 + $0x88] sm:$0xfc]  ;;  %v1753_v54 = vld [vmem:[#allocation2 + $0x98] sm:$0x3]  ;;  %v9584_v9 = vld [vmem:[#allocation7 + $0x390] sm:$0xf] }
 0x320   : > { %2446 = vmatpush.bf16.msrb.mxu1 %v9601_v1  ;;  %v1755_v55 = vld [vmem:[#allocation2 + $0xa8] sm:$0xfc]  ;;  %v11551_v62 = vld [vmem:[#allocation7 + $0x394] sm:$0xf0]  ;;  %v11536_v1 = vld [vmem:[#allocation7 + $0x324] sm:$0xf] }
 0x321   : > { %1636 = vmatmul.bf16.gmra.mxu0 %v976_v33  ;;  %1694 = vmatmul.bf16.gmra.mxu2 %v976_v33  ;;  %v1808_v33 = vrot.slane %v1739_v56, 2  ;;  %v11540_v56 = vld [vmem:[#allocation7 + $0x344] sm:$0xf]  ;;  %v1757_v13 = vld [vmem:[#allocation2 + $0xb8] sm:$0x3]  ;;  %v9585_v3 = vor.u32 %v11551_v62, %v9584_v9  ;;  %v1823_v23 = vrot.slane %v1750_v48, 2 }
 0x322   : > { %v9549_v26 = vor.u32 %v11540_v56, %v9546_v61  ;;  %2503 = vmatpush.bf16.msrb.mxu3 %v9613_v10  ;;  %v9594_v12 = vld [vmem:[#allocation7 + $0x3a8] sm:$0xf0]  ;;  %v9512_v38 = vld [vmem:[#allocation7 + $0x300] sm:$0xf]  ;;  %v11533_v39 = vld [vmem:[#allocation7 + $0x304] sm:$0xf0] }
 0x323   : > { %1665 = vmatmul.bf16.gmra.mxu1 %v977_v11  ;;  %1723 = vmatmul.bf16.gmra.mxu3 %v977_v11  ;;  %v9544_v11 = vld [vmem:[#allocation7 + $0x340] sm:$0xf]  ;;  %v1810_v49 = vsel %vm1798_vm8, %v1808_v33, %v1809_v32  ;;  %v11549_v47 = vld [vmem:[#allocation7 + $0x384] sm:$0xf0]  ;;  %v11534_v40 = vld [vmem:[#allocation7 + $0x314] sm:$0xf] }
 0x324   : > { %v9545_v35 = vor.u32 %v11541_v36, %v9544_v11  ;;  %v1864_v45 = vpack.c.bf16 %v1810_v49, %v1804_v0  ;;  %2474 = vmatpush.bf16.msrb.mxu2 %v9549_v26  ;;  %v9528_v32 = vld [vmem:[#allocation7 + $0x320] sm:$0xf]  ;;  %v11537_v11 = vld [vmem:[#allocation7 + $0x324] sm:$0xf0]  ;;  %v9530_v26 = vld [vmem:[#allocation7 + $0x328] sm:$0xf0] }
 0x325   : > { %v9592_v36 = vld [vmem:[#allocation7 + $0x3a0] sm:$0xf]  ;;  %v9529_v34 = vor.u32 %v11537_v11, %v9528_v32  ;;  %v1826_v32 = vrot.slane %v1751_v7, 2  ;;  %v1827_v11 = vrot.slane %v1753_v54, 2  ;;  %v9514_v9 = vld [vmem:[#allocation7 + $0x308] sm:$0xf0] }
 0x326   : > { %2416 = vmatpush.bf16.msrb.mxu0 %v9545_v35  ;;  %v11553_v35 = vld [vmem:[#allocation7 + $0x3a4] sm:$0xf0]  ;;  %2504 = vmatpush.bf16.msrb.mxu3 %v9605_v15  ;;  %v11550_v15 = vld [vmem:[#allocation7 + $0x394] sm:$0xf]  ;;  %v1762_v62 = vld [vmem:[#allocation2 + $0xe0] sm:$0xfc] }
 0x327   : > { %v9593_v41 = vor.u32 %v11553_v35, %v9592_v36  ;;  %v1832_v36 = vrot.slane %v1755_v55, 2  ;;  %v1828_v48 = vsel %vm1798_vm8, %v1826_v32, %v1827_v11 }
 0x328   : > { %2475 = vmatpush.bf16.msrb.mxu2 %v9541_v44  ;;  %v9513_v44 = vor.u32 %v11533_v39, %v9512_v38  ;;  %v1841_v39 = vrot.slane %v1762_v62, 2 }
 0x329   : > { %2447 = vmatpush.bf16.msrb.mxu1 %v9593_v41  ;;  %v9576_v41 = vld [vmem:[#allocation7 + $0x380] sm:$0xf] }
 0x32a   : > { %2417 = vmatpush.bf16.msrb.mxu0 %v9537_v57  ;;  %v11535_v57 = vld [vmem:[#allocation7 + $0x314] sm:$0xf0] }
 0x32d   : > { %2448 = vmatpush.bf16.msrb.mxu1 %v9585_v3  ;;  %v9696_v3 = vld [vmem:[#allocation7 + $0x470] sm:$0xf] }
 0x32e   : > { %2418 = vmatpush.bf16.msrb.mxu0 %v9529_v34  ;;  %v1833_v34 = vrot.slane %v1757_v13, 2 }
 0x331   : > { %1641 = vmatmul.bf16.gmra.mxu0 %v978_v52  ;;  %1699 = vmatmul.bf16.gmra.mxu2 %v978_v52  ;;  %v1745_v52 = vld [vmem:[#allocation2 + $0x58] sm:$0x3] }
 0x332   : > { %v1815_v30 = vrot.slane %v1745_v52, 2  ;;  %v1754_v52 = vld [vmem:[#allocation2 + $0xa0] sm:$0xfc] }
 0x333   : > { %1670 = vmatmul.bf16.gmra.mxu1 %v979_v6  ;;  %1728 = vmatmul.bf16.gmra.mxu3 %v979_v6  ;;  %v1747_v6 = vld [vmem:[#allocation2 + $0x68] sm:$0xfc] }
 0x334   : > { %v1820_v24 = vrot.slane %v1747_v6, 2  ;;  %v1816_v49 = vsel %vm1798_vm8, %v1814_v20, %v1815_v30  ;;  %v1756_v6 = vld [vmem:[#allocation2 + $0xb0] sm:$0x3]  ;;  %v1824_v20 = vrot.slane %v1752_v8, 2  ;;  %v1829_v30 = vrot.slane %v1754_v52, 2 }
 0x335   : > { %v1834_v8 = vsel %vm1798_vm8, %v1832_v36, %v1833_v34 }
 0x336   : > { %v1868_v55 = vpack.c.bf16 %v1834_v8, %v1828_v48  ;;  %v11594_v8 = vld [vmem:[#allocation7 + $0x4f4] sm:$0xf] }
 0x33e   : > { %v1351_v60 = vpop.f32.mrf.mxu0 }
 0x340   : > { %v1380_v51 = vpop.f32.mrf.mxu1 }
 0x341   : > { %v13111_v43 = vadd.f32 %v1380_v51, %v1351_v60  ;;  %2072 = vmatmul.bf16.vlgmr.msra.gmra.mxu0 %v1863_v53  ;;  %2130 = vmatmul.bf16.vlgmr.msra.gmra.mxu2 %v1863_v53  ;;  %v1822_v53 = vsel %vm1798_vm8, %v1820_v24, %v1821_v31  ;;  %v1830_v24 = vrot.slane %v1756_v6, 2 }
 0x342   : > { %v1866_v46 = vpack.c.bf16 %v1822_v53, %v1816_v49  ;;  %v1825_v49 = vsel %vm1798_vm8, %v1823_v23, %v1824_v20  ;;  %v1761_v20 = vld [vmem:[#allocation2 + $0xd8] sm:$0x3] }
 0x343   : > { %2101 = vmatmul.bf16.vlgmr.msra.gmra.mxu1 %v1864_v45  ;;  %2159 = vmatmul.bf16.vlgmr.msra.gmra.mxu3 %v1864_v45  ;;  %v1865_v45 = vpack.c.bf16 %v1819_v63, %v1813_v58  ;;  %v9577_v58 = vor.u32 %v11549_v47, %v9576_v41  ;;  %v1831_v53 = vsel %vm1798_vm8, %v1829_v30, %v1830_v24  ;;  %v1763_v30 = vld [vmem:[#allocation2 + $0xe8] sm:$0xfc]  ;;  %v1765_v24 = vld [vmem:[#allocation2 + $0xf8] sm:$0x3] }
 0x344   : > { %v1409_v59 = vpop.f32.mrf.mxu2  ;;  %v1867_v6 = vpack.c.bf16 %v1831_v53, %v1825_v49  ;;  %v11593_v53 = vld [vmem:[#allocation7 + $0x4e4] sm:$0xf0] }
 0x345   : > { %2449 = vmatpush.bf16.msrb.mxu1 %v9577_v58  ;;  %v1845_v58 = vrot.slane %v1765_v24, 2 }
 0x346   : > { %v1438_v2 = vpop.f32.mrf.mxu3  ;;  %v1353_v4 = vpop.f32.mrf.mxu0 }
 0x347   : > { %v13113_v14 = vadd.f32 %v1438_v2, %v1409_v59  ;;  %v9520_v59 = vld [vmem:[#allocation7 + $0x310] sm:$0xf]  ;;  %v9533_v2 = vor.u32 %v11536_v1, %v9530_v26  ;;  %v9578_v26 = vld [vmem:[#allocation7 + $0x388] sm:$0xf0] }
 0x348   : > { %v1382_v29 = vpop.f32.mrf.mxu1  ;;  %v9521_v61 = vor.u32 %v11535_v57, %v9520_v59  ;;  %v1758_v59 = vld [vmem:[#allocation2 + $0xc0] sm:$0xfc] }
 0x349   : > { %v13115_v33 = vadd.f32 %v1382_v29, %v1353_v4  ;;  %v11552_v4 = vld [vmem:[#allocation7 + $0x3a4] sm:$0xf]  ;;  %2476 = vmatpush.bf16.msrb.mxu2 %v9533_v2  ;;  %v11579_v2 = vld [vmem:[#allocation7 + $0x474] sm:$0xf0]  ;;  %v1835_v36 = vrot.slane %v1758_v59, 2 }
 0x34a   : > { %2419 = vmatpush.bf16.msrb.mxu0 %v9521_v61  ;;  %v9597_v25 = vor.u32 %v11552_v4, %v9594_v12  ;;  %v11532_v57 = vld [vmem:[#allocation7 + $0x304] sm:$0xf]  ;;  %v1760_v61 = vld [vmem:[#allocation2 + $0xd0] sm:$0x3]  ;;  %v9697_v23 = vor.u32 %v11579_v2, %v9696_v3 }
 0x34b   : > { %v9517_v1 = vor.u32 %v11532_v57, %v9514_v9  ;;  %v9760_v4 = vld [vmem:[#allocation7 + $0x4f0] sm:$0xf]  ;;  %v1836_v38 = vrot.slane %v1760_v61, 2 }
 0x34c   : > { %v1411_v42 = vpop.f32.mrf.mxu2  ;;  %2505 = vmatpush.bf16.msrb.mxu3 %v9597_v25  ;;  %v11595_v25 = vld [vmem:[#allocation7 + $0x4f4] sm:$0xf0] }
 0x34e   : > { %v1440_v60 = vpop.f32.mrf.mxu3  ;;  %v1356_v0 = vpop.f32.mrf.mxu0  ;;  %2420 = vmatpush.bf16.msrb.mxu0 %v9513_v44 }
 0x34f   : > { %v13121_v51 = vadd.f32 %v1440_v60, %v1411_v42  ;;  %v9522_v42 = vld [vmem:[#allocation7 + $0x318] sm:$0xf0] }
 0x350   : > { %v1385_v5 = vpop.f32.mrf.mxu1  ;;  %v9525_v63 = vor.u32 %v11534_v40, %v9522_v42  ;;  %v9586_v60 = vld [vmem:[#allocation7 + $0x398] sm:$0xf0]  ;;  %v1839_v40 = vrot.slane %v1761_v20, 2  ;;  %v1844_v42 = vrot.slane %v1763_v30, 2  ;;  %v11576_v20 = vld [vmem:[#allocation7 + $0x464] sm:$0xf] }
 0x351   : > { %v13123_v37 = vadd.f32 %v1385_v5, %v1356_v0  ;;  %2077 = vmatmul.bf16.gmra.mxu0 %v1865_v45  ;;  %2135 = vmatmul.bf16.gmra.mxu2 %v1865_v45  ;;  %v9589_v45 = vor.u32 %v11550_v15, %v9586_v60  ;;  %v9688_v15 = vld [vmem:[#allocation7 + $0x460] sm:$0xf]  ;;  %v11577_v60 = vld [vmem:[#allocation7 + $0x464] sm:$0xf0]  ;;  %v9690_v30 = vld [vmem:[#allocation7 + $0x468] sm:$0xf0] }
 0x352   : > { %2477 = vmatpush.bf16.msrb.mxu2 %v9525_v63  ;;  %2874 = vmatpush.bf16.msra.mxu0 %v9697_v23  ;;  %v9689_v49 = vor.u32 %v11577_v60, %v9688_v15  ;;  %v1846_v62 = vsel %vm1798_vm8, %v1844_v42, %v1845_v58  ;;  %v11573_v42 = vld [vmem:[#allocation7 + $0x444] sm:$0xf0]  ;;  %v9736_v58 = vld [vmem:[#allocation7 + $0x4c0] sm:$0xf] }
 0x353   : > { %2106 = vmatmul.bf16.gmra.mxu1 %v1866_v46  ;;  %2164 = vmatmul.bf16.gmra.mxu3 %v1866_v46  ;;  %v11589_v60 = vld [vmem:[#allocation7 + $0x4c4] sm:$0xf0] }
 0x354   : > { %v1414_v56 = vpop.f32.mrf.mxu2  ;;  %2506 = vmatpush.bf16.msrb.mxu3 %v9589_v45  ;;  %v11578_v45 = vld [vmem:[#allocation7 + $0x474] sm:$0xf] }
 0x356   : > { %v1443_v10 = vpop.f32.mrf.mxu3  ;;  %v1358_v16 = vpop.f32.mrf.mxu0  ;;  %2478 = vmatpush.bf16.msrb.mxu2 %v9517_v1  ;;  %2875 = vmatpush.bf16.msra.mxu0 %v9689_v49  ;;  %v9682_v49 = vld [vmem:[#allocation7 + $0x458] sm:$0xf0] }
 0x357   : > { %v13125_v29 = vadd.f32 %v1443_v10, %v1414_v56  ;;  %v11548_v56 = vld [vmem:[#allocation7 + $0x384] sm:$0xf]  ;;  %v1764_v10 = vld [vmem:[#allocation2 + $0xf0] sm:$0x3] }
 0x358   : > { %v1387_v31 = vpop.f32.mrf.mxu1  ;;  %v9581_v13 = vor.u32 %v11548_v56, %v9578_v26  ;;  %v1842_v41 = vrot.slane %v1764_v10, 2  ;;  %v9744_v10 = vld [vmem:[#allocation7 + $0x4d0] sm:$0xf] }
 0x359   : > { %v13127_v35 = vadd.f32 %v1387_v31, %v1358_v16  ;;  %v1759_v16 = vld [vmem:[#allocation2 + $0xc8] sm:$0xfc]  ;;  %v9761_v31 = vor.u32 %v11595_v25, %v9760_v4  ;;  %v9680_v4 = vld [vmem:[#allocation7 + $0x450] sm:$0xf]  ;;  %v11591_v25 = vld [vmem:[#allocation7 + $0x4d4] sm:$0xf0] }
 0x35a   : > { %2507 = vmatpush.bf16.msrb.mxu3 %v9581_v13  ;;  %v1838_v47 = vrot.slane %v1759_v16, 2  ;;  %v1843_v59 = vsel %vm1798_vm8, %v1841_v39, %v1842_v41  ;;  %v9745_v24 = vor.u32 %v11591_v25, %v9744_v10  ;;  %v9738_v25 = vld [vmem:[#allocation7 + $0x4c8] sm:$0xf0] }
 0x35b   : > { %2903 = vmatpush.bf16.msra.mxu1 %v9761_v31  ;;  %v9693_v31 = vor.u32 %v11576_v20, %v9690_v30 }
 0x35c   : > { %v1416_v0 = vpop.f32.mrf.mxu2  ;;  %v1840_v61 = vsel %vm1798_vm8, %v1838_v47, %v1839_v40  ;;  %v9672_v40 = vld [vmem:[#allocation7 + $0x440] sm:$0xf] }
 0x35d   : > { %v1870_v2 = vpack.c.bf16 %v1846_v62, %v1840_v61  ;;  %v9673_v15 = vor.u32 %v11573_v42, %v9672_v40  ;;  %v11571_v61 = vld [vmem:[#allocation7 + $0x434] sm:$0xf0]  ;;  %v9728_v62 = vld [vmem:[#allocation7 + $0x4b0] sm:$0xf]  ;;  %v9666_v40 = vld [vmem:[#allocation7 + $0x438] sm:$0xf0] }
 0x35e   : > { %v1445_v5 = vpop.f32.mrf.mxu3  ;;  %v1361_v46 = vpop.f32.mrf.mxu0 }
 0x35f   : > { %v13133_v52 = vadd.f32 %v1445_v5, %v1416_v0  ;;  %v9752_v0 = vld [vmem:[#allocation7 + $0x4e0] sm:$0xf]  ;;  %v9698_v5 = vld [vmem:[#allocation7 + $0x478] sm:$0xf0] }
 0x360   : > { %v1390_v7 = vpop.f32.mrf.mxu1  ;;  %v9701_v48 = vor.u32 %v11578_v45, %v9698_v5  ;;  %v11590_v5 = vld [vmem:[#allocation7 + $0x4d4] sm:$0xf] }
 0x361   : > { %v13135_v54 = vadd.f32 %v1390_v7, %v1361_v46  ;;  %2082 = vmatmul.bf16.gmra.mxu0 %v1867_v6  ;;  %2140 = vmatmul.bf16.gmra.mxu2 %v1867_v6  ;;  %v9753_v46 = vor.u32 %v11593_v53, %v9752_v0  ;;  %v9762_v6 = vld [vmem:[#allocation7 + $0x4f8] sm:$0xf0]  ;;  %v11574_v0 = vld [vmem:[#allocation7 + $0x454] sm:$0xf]  ;;  %v9737_v53 = vor.u32 %v11589_v60, %v9736_v58 }
 0x362   : > { %v9765_v57 = vor.u32 %v11594_v8, %v9762_v6  ;;  %2932 = vmatpush.bf16.msra.mxu2 %v9701_v48  ;;  %v9685_v45 = vor.u32 %v11574_v0, %v9682_v49  ;;  %v9730_v60 = vld [vmem:[#allocation7 + $0x4b8] sm:$0xf0] }
 0x363   : > { %2111 = vmatmul.bf16.gmra.mxu1 %v1868_v55  ;;  %2169 = vmatmul.bf16.gmra.mxu3 %v1868_v55  ;;  %v1837_v55 = vsel %vm1798_vm8, %v1835_v36, %v1836_v38 }
 0x364   : > { %v1419_v12 = vpop.f32.mrf.mxu2  ;;  %2904 = vmatpush.bf16.msra.mxu1 %v9753_v46  ;;  %2961 = vmatpush.bf16.msra.mxu3 %v9765_v57  ;;  %v1869_v26 = vpack.c.bf16 %v1843_v59, %v1837_v55  ;;  %v9746_v46 = vld [vmem:[#allocation7 + $0x4d8] sm:$0xf0] }
 0x365   : > { %v9749_v8 = vor.u32 %v11590_v5, %v9746_v46 }
 0x366   : > { %v1448_v32 = vpop.f32.mrf.mxu3  ;;  %v1363_v11 = vpop.f32.mrf.mxu0  ;;  %2933 = vmatpush.bf16.msra.mxu2 %v9693_v31 }
 0x367   : > { %v13137_v34 = vadd.f32 %v1448_v32, %v1419_v12  ;;  %v11575_v12 = vld [vmem:[#allocation7 + $0x454] sm:$0xf0]  ;;  %v11592_v32 = vld [vmem:[#allocation7 + $0x4e4] sm:$0xf] }
 0x368   : > { %v1392_v44 = vpop.f32.mrf.mxu1  ;;  %v9681_v23 = vor.u32 %v11575_v12, %v9680_v4  ;;  %2905 = vmatpush.bf16.msra.mxu1 %v9745_v24  ;;  %v11572_v4 = vld [vmem:[#allocation7 + $0x444] sm:$0xf]  ;;  %v9674_v12 = vld [vmem:[#allocation7 + $0x448] sm:$0xf0] }
 0x369   : > { %v13139_v63 = vadd.f32 %v1392_v44, %v1363_v11  ;;  %v9754_v11 = vld [vmem:[#allocation7 + $0x4e8] sm:$0xf0] }
 0x36a   : > { %2876 = vmatpush.bf16.msra.mxu0 %v9681_v23  ;;  %v9757_v39 = vor.u32 %v11592_v32, %v9754_v11  ;;  %2934 = vmatpush.bf16.msra.mxu2 %v9685_v45  ;;  %v11588_v23 = vld [vmem:[#allocation7 + $0x4c4] sm:$0xf]  ;;  %v9656_v11 = vld [vmem:[#allocation7 + $0x420] sm:$0xf] }
 0x36b   : > { %v9741_v30 = vor.u32 %v11588_v23, %v9738_v25  ;;  %v9640_v25 = vld [vmem:[#allocation7 + $0x400] sm:$0xf] }
 0x36c   : > { %v1421_v7 = vpop.f32.mrf.mxu2  ;;  %2962 = vmatpush.bf16.msra.mxu3 %v9757_v39  ;;  %2906 = vmatpush.bf16.msra.mxu1 %v9737_v53  ;;  %v11585_v39 = vld [vmem:[#allocation7 + $0x4a4] sm:$0xf0] }
 0x36e   : > { %v1450_v9 = vpop.f32.mrf.mxu3  ;;  %v1366_v56 = vpop.f32.mrf.mxu0  ;;  %2877 = vmatpush.bf16.msra.mxu0 %v9673_v15  ;;  %v11586_v15 = vld [vmem:[#allocation7 + $0x4b4] sm:$0xf] }
 0x36f   : > { %v13145_v1 = vadd.f32 %v1450_v9, %v1421_v7 }
 0x370   : > { %v1395_v13 = vpop.f32.mrf.mxu1  ;;  %2963 = vmatpush.bf16.msra.mxu3 %v9749_v8 }
 0x371   : > { %v13147_v3 = vadd.f32 %v1395_v13, %v1366_v56  ;;  %2087 = vmatmul.bf16.gmra.mxu0 %v1869_v26  ;;  %2145 = vmatmul.bf16.gmra.mxu2 %v1869_v26  ;;  %v9664_v56 = vld [vmem:[#allocation7 + $0x430] sm:$0xf] }
 0x372   : > { %v9665_v13 = vor.u32 %v11571_v61, %v9664_v56  ;;  %v11583_v56 = vld [vmem:[#allocation7 + $0x494] sm:$0xf0]  ;;  %v11568_v61 = vld [vmem:[#allocation7 + $0x424] sm:$0xf] }
 0x373   : > { %2116 = vmatmul.bf16.gmra.mxu1 %v1870_v2  ;;  %2174 = vmatmul.bf16.gmra.mxu3 %v1870_v2  ;;  %v11587_v2 = vld [vmem:[#allocation7 + $0x4b4] sm:$0xf0] }
 0x374   : > { %v1424_v16 = vpop.f32.mrf.mxu2  ;;  %v9729_v10 = vor.u32 %v11587_v2, %v9728_v62  ;;  %2878 = vmatpush.bf16.msra.mxu0 %v9665_v13  ;;  %2964 = vmatpush.bf16.msra.mxu3 %v9741_v30  ;;  %v9658_v62 = vld [vmem:[#allocation7 + $0x428] sm:$0xf0]  ;;  %v11584_v2 = vld [vmem:[#allocation7 + $0x4a4] sm:$0xf]  ;;  %v11581_v30 = vld [vmem:[#allocation7 + $0x484] sm:$0xf0] }
 0x375   : > { %v9661_v13 = vor.u32 %v11568_v61, %v9658_v62 }
 0x376   : > { %v1453_v36 = vpop.f32.mrf.mxu3  ;;  %v1368_v38 = vpop.f32.mrf.mxu0  ;;  %2907 = vmatpush.bf16.msra.mxu1 %v9729_v10 }
 0x377   : > { %v13149_v41 = vadd.f32 %v1453_v36, %v1424_v16  ;;  %v9677_v16 = vor.u32 %v11572_v4, %v9674_v12  ;;  %v9720_v36 = vld [vmem:[#allocation7 + $0x4a0] sm:$0xf]  ;;  %v9722_v4 = vld [vmem:[#allocation7 + $0x4a8] sm:$0xf0] }
 0x378   : > { %v1397_v44 = vpop.f32.mrf.mxu1  ;;  %v9721_v42 = vor.u32 %v11585_v39, %v9720_v36  ;;  %v11582_v36 = vld [vmem:[#allocation7 + $0x494] sm:$0xf] }
 0x379   : > { %v13151_v47 = vadd.f32 %v1397_v44, %v1368_v38  ;;  %2935 = vmatpush.bf16.msra.mxu2 %v9677_v16  ;;  %v11570_v44 = vld [vmem:[#allocation7 + $0x434] sm:$0xf] }
 0x37a   : > { %v9669_v58 = vor.u32 %v11570_v44, %v9666_v40  ;;  %2908 = vmatpush.bf16.msra.mxu1 %v9721_v42 }
 0x37c   : > { %v1426_v48 = vpop.f32.mrf.mxu2 }
 0x37d   : > { %2936 = vmatpush.bf16.msra.mxu2 %v9669_v58 }
 0x37e   : > { %v1455_v6 = vpop.f32.mrf.mxu3  ;;  %v1627_v7 = vpop.f32.mrf.mxu0 }
 0x37f   : > { %v13153_v55 = vadd.f32 %v1455_v6, %v1426_v48  ;;  %v1628_v59 = vadd.f32 %v1627_v7, %v13111_v43  ;;  %v11567_v6 = vld [vmem:[#allocation7 + $0x414] sm:$0xf0]  ;;  %v9712_v7 = vld [vmem:[#allocation7 + $0x490] sm:$0xf] }
 0x380   : > { %v1656_v57 = vpop.f32.mrf.mxu1 }
 0x381   : > { %v13156_v9 = vadd.f32 %v1656_v57, %v1628_v59  ;;  %2421 = vmatmul.bf16.vlgmr.msrb.gmra.mxu0 %v13055_v18  ;;  %2479 = vmatmul.bf16.vlgmr.msrb.gmra.mxu2 %v13055_v18 }
 0x382   : > { %2937 = vmatpush.bf16.msra.mxu2 %v9661_v13  ;;  %v2210_v13 = vld [vmem:[#allocation2 + $0x100] sm:$0xff] }
 0x383   : > { %2450 = vmatmul.bf16.vlgmr.msrb.gmra.mxu1 %v13058_v19  ;;  %2508 = vmatmul.bf16.vlgmr.msrb.gmra.mxu3 %v13058_v19 }
 0x384   : > { %v1685_v26 = vpop.f32.mrf.mxu2 }
 0x385   : > { %v1686_v43 = vadd.f32 %v1685_v26, %v13113_v14  ;;  %v11569_v14 = vld [vmem:[#allocation7 + $0x424] sm:$0xf0]  ;;  %v9713_v26 = vor.u32 %v11583_v56, %v9712_v7 }
 0x386   : > { %v1714_v20 = vpop.f32.mrf.mxu3  ;;  %v1629_v18 = vpop.f32.mrf.mxu0  ;;  %v9657_v38 = vor.u32 %v11569_v14, %v9656_v11 }
 0x387   : > { %v13163_v24 = vadd.f32 %v1714_v20, %v1686_v43  ;;  %v1630_v19 = vadd.f32 %v1629_v18, %v13115_v33  ;;  %v9733_v33 = vor.u32 %v11586_v15, %v9730_v60  ;;  %v9725_v43 = vor.u32 %v11584_v2, %v9722_v4  ;;  %2909 = vmatpush.bf16.msra.mxu1 %v9713_v26  ;;  %v9704_v20 = vld [vmem:[#allocation7 + $0x480] sm:$0xf]  ;;  %v11609_v2 = vld [vmem:[#allocation7 + $0x564] sm:$0xf0] }
 0x388   : > { %v1658_v31 = vpop.f32.mrf.mxu1  ;;  %2879 = vmatpush.bf16.msra.mxu0 %v9657_v38  ;;  %v9705_v11 = vor.u32 %v11581_v30, %v9704_v20  ;;  %v9714_v38 = vld [vmem:[#allocation7 + $0x498] sm:$0xf0]  ;;  %v9880_v4 = vld [vmem:[#allocation7 + $0x5e0] sm:$0xf] }
 0x389   : > { %v13166_v32 = vadd.f32 %v1658_v31, %v1630_v19  ;;  %2965 = vmatpush.bf16.msra.mxu3 %v9733_v33  ;;  %v11566_v19 = vld [vmem:[#allocation7 + $0x414] sm:$0xf]  ;;  %v9650_v31 = vld [vmem:[#allocation7 + $0x418] sm:$0xf0]  ;;  %v9642_v33 = vld [vmem:[#allocation7 + $0x408] sm:$0xf0] }
 0x38a   : > { %v9653_v14 = vor.u32 %v11566_v19, %v9650_v31  ;;  %v2211_v31 = vld [vmem:[#allocation2 + $0x108] sm:$0xff] }
 0x38b   : > { %2910 = vmatpush.bf16.msra.mxu1 %v9705_v11 }
 0x38c   : > { %v1687_v0 = vpop.f32.mrf.mxu2  ;;  %2938 = vmatpush.bf16.msra.mxu2 %v9653_v14 }
 0x38d   : > { %v1688_v49 = vadd.f32 %v1687_v0, %v13121_v51  ;;  %v9648_v51 = vld [vmem:[#allocation7 + $0x410] sm:$0xf]  ;;  %2966 = vmatpush.bf16.msra.mxu3 %v9725_v43  ;;  %v11625_v43 = vld [vmem:[#allocation7 + $0x5e4] sm:$0xf0] }
 0x38e   : > { %v1716_v53 = vpop.f32.mrf.mxu3  ;;  %v1632_v45 = vpop.f32.mrf.mxu0  ;;  %v9649_v57 = vor.u32 %v11567_v6, %v9648_v51  ;;  %v11611_v51 = vld [vmem:[#allocation7 + $0x574] sm:$0xf0] }
 0x38f   : > { %v13169_v5 = vadd.f32 %v1716_v53, %v1688_v49  ;;  %v1633_v46 = vadd.f32 %v1632_v45, %v13123_v37  ;;  %v11580_v49 = vld [vmem:[#allocation7 + $0x484] sm:$0xf] }
 0x390   : > { %v1661_v48 = vpop.f32.mrf.mxu1  ;;  %2880 = vmatpush.bf16.msra.mxu0 %v9649_v57  ;;  %v11627_v57 = vld [vmem:[#allocation7 + $0x5f4] sm:$0xf0] }
 0x391   : > { %v13172_v8 = vadd.f32 %v1661_v48, %v1633_v46  ;;  %2426 = vmatmul.bf16.gmra.mxu0 %v13062_v21  ;;  %2484 = vmatmul.bf16.gmra.mxu2 %v13062_v21  ;;  %v9706_v46 = vld [vmem:[#allocation7 + $0x488] sm:$0xf0]  ;;  %v9824_v48 = vld [vmem:[#allocation7 + $0x570] sm:$0xf] }
 0x392   : > { %v9709_v6 = vor.u32 %v11580_v49, %v9706_v46  ;;  %v9825_v7 = vor.u32 %v11611_v51, %v9824_v48  ;;  %v11608_v49 = vld [vmem:[#allocation7 + $0x564] sm:$0xf]  ;;  %v2551_v46 = vld [vmem:[#allocation2 + $0x50] sm:$0x1] }
 0x393   : > { %2455 = vmatmul.bf16.gmra.mxu1 %v13066_v22  ;;  %2513 = vmatmul.bf16.gmra.mxu3 %v13066_v22 }
 0x394   : > { %v1690_v59 = vpop.f32.mrf.mxu2 }
 0x395   : > { %v1691_v37 = vadd.f32 %v1690_v59, %v13125_v29  ;;  %v11565_v29 = vld [vmem:[#allocation7 + $0x404] sm:$0xf0]  ;;  %v9888_v59 = vld [vmem:[#allocation7 + $0x5f0] sm:$0xf] }
 0x396   : > { %v1719_v12 = vpop.f32.mrf.mxu3  ;;  %v1634_v21 = vpop.f32.mrf.mxu0  ;;  %v9641_v18 = vor.u32 %v11565_v29, %v9640_v25  ;;  %v9889_v61 = vor.u32 %v11627_v57, %v9888_v59  ;;  %v9881_v29 = vor.u32 %v11625_v43, %v9880_v4  ;;  %v2546_v59 = vld [vmem:[#allocation2 + $0x28] sm:$0xfe]  ;;  %v2616_v4 = vrot.slane %v2551_v46, 1  ;;  %v2555_v46 = vld [vmem:[#allocation2 + $0x70] sm:$0x1] }
 0x397   : > { %v13179_v10 = vadd.f32 %v1719_v12, %v1691_v37  ;;  %v1635_v22 = vadd.f32 %v1634_v21, %v13127_v35  ;;  %v9717_v35 = vor.u32 %v11582_v36, %v9714_v38  ;;  %v2218_v38 = vpack.c.bf16 %v2210_v13, %v13099_v17 }
 0x398   : > { %v1663_v16 = vpop.f32.mrf.mxu1  ;;  %2881 = vmatpush.bf16.msra.mxu0 %v9641_v18  ;;  %3364 = vmatpush.bf16.msrb.mxu1 %v9889_v61  ;;  %v9890_v18 = vld [vmem:[#allocation7 + $0x5f8] sm:$0xf0]  ;;  %v2548_v61 = vld [vmem:[#allocation2 + $0x38] sm:$0x1] }
 0x399   : > { %v13182_v23 = vadd.f32 %v1663_v16, %v1635_v22  ;;  %2967 = vmatpush.bf16.msra.mxu3 %v9717_v35  ;;  %v11610_v22 = vld [vmem:[#allocation7 + $0x574] sm:$0xf]  ;;  %v9826_v16 = vld [vmem:[#allocation7 + $0x578] sm:$0xf0]  ;;  %v2219_v35 = vpack.c.bf16 %v2211_v31, %v13101_v50  ;;  %v11624_v50 = vld [vmem:[#allocation7 + $0x5e4] sm:$0xf] }
 0x39a   : > { %v9829_v20 = vor.u32 %v11610_v22, %v9826_v16  ;;  %v2613_v43 = vrot.slane %v2548_v61, 1  ;;  %v11606_v31 = vld [vmem:[#allocation7 + $0x554] sm:$0xf]  ;;  %v2559_v61 = vld [vmem:[#allocation2 + $0x90] sm:$0x1] }
 0x39c   : > { %v1692_v39 = vpop.f32.mrf.mxu2  ;;  %3335 = vmatpush.bf16.msrb.mxu0 %v9825_v7  ;;  %3365 = vmatpush.bf16.msrb.mxu1 %v9881_v29  ;;  %v11605_v29 = vld [vmem:[#allocation7 + $0x544] sm:$0xf0] }
 0x39d   : > { %v1693_v44 = vadd.f32 %v1692_v39, %v13133_v52  ;;  %v11564_v52 = vld [vmem:[#allocation7 + $0x404] sm:$0xf]  ;;  %2968 = vmatpush.bf16.msra.mxu3 %v9709_v6 }
 0x39e   : > { %v1721_v40 = vpop.f32.mrf.mxu3  ;;  %v1637_v42 = vpop.f32.mrf.mxu0  ;;  %v9645_v45 = vor.u32 %v11564_v52, %v9642_v33  ;;  %v11623_v33 = vld [vmem:[#allocation7 + $0x5d4] sm:$0xf0] }
 0x39f   : > { %v13185_v58 = vadd.f32 %v1721_v40, %v1693_v44  ;;  %v1638_v15 = vadd.f32 %v1637_v42, %v13135_v54  ;;  %v2545_v44 = vld [vmem:[#allocation2 + $0x20] sm:$0xfe]  ;;  %v2547_v40 = vld [vmem:[#allocation2 + $0x30] sm:$0x1] }
 0x3a0   : > { %v1666_v60 = vpop.f32.mrf.mxu1  ;;  %2939 = vmatpush.bf16.msra.mxu2 %v9645_v45  ;;  %v2549_v42 = vld [vmem:[#allocation2 + $0x40] sm:$0xfe]  ;;  %v2609_v13 = vrot.slane %v2545_v44, 1  ;;  %v9874_v44 = vld [vmem:[#allocation7 + $0x5d8] sm:$0xf0] }
 0x3a1   : > { %v13188_v0 = vadd.f32 %v1666_v60, %v1638_v15  ;;  %2431 = vmatmul.bf16.gmra.mxu0 %v13073_v27  ;;  %2489 = vmatmul.bf16.gmra.mxu2 %v13073_v27  ;;  %v9808_v15 = vld [vmem:[#allocation7 + $0x550] sm:$0xf]  ;;  %v11607_v60 = vld [vmem:[#allocation7 + $0x554] sm:$0xf0] }
 0x3a2   : > { %v9809_v17 = vor.u32 %v11607_v60, %v9808_v15 }
 0x3a3   : > { %2460 = vmatmul.bf16.gmra.mxu1 %v13077_v28  ;;  %2518 = vmatmul.bf16.gmra.mxu3 %v13077_v28 }
 0x3a4   : > { %v1695_v53 = vpop.f32.mrf.mxu2  ;;  %3393 = vmatpush.bf16.msrb.mxu2 %v9829_v20 }
 0x3a5   : > { %v1696_v54 = vadd.f32 %v1695_v53, %v13137_v34  ;;  %v9816_v34 = vld [vmem:[#allocation7 + $0x560] sm:$0xf]  ;;  %v9818_v53 = vld [vmem:[#allocation7 + $0x568] sm:$0xf0] }
 0x3a6   : > { %v1724_v56 = vpop.f32.mrf.mxu3  ;;  %v1639_v27 = vpop.f32.mrf.mxu0  ;;  %v9817_v21 = vor.u32 %v11609_v2, %v9816_v34  ;;  %v9821_v51 = vor.u32 %v11608_v49, %v9818_v53  ;;  %v2610_v34 = vrot.slane %v2547_v40, 1  ;;  %v2615_v2 = vrot.slane %v2549_v42, 1 }
 0x3a7   : > { %v13195_v62 = vadd.f32 %v1724_v56, %v1696_v54  ;;  %v1640_v28 = vadd.f32 %v1639_v27, %v13139_v63  ;;  %v11626_v63 = vld [vmem:[#allocation7 + $0x5f4] sm:$0xf]  ;;  %v9882_v54 = vld [vmem:[#allocation7 + $0x5e8] sm:$0xf0] }
 0x3a8   : > { %v1668_v37 = vpop.f32.mrf.mxu1  ;;  %3336 = vmatpush.bf16.msrb.mxu0 %v9817_v21  ;;  %v9893_v11 = vor.u32 %v11626_v63, %v9890_v18  ;;  %v9885_v57 = vor.u32 %v11624_v50, %v9882_v54  ;;  %3394 = vmatpush.bf16.msrb.mxu2 %v9821_v51  ;;  %v2612_v21 = vrot.slane %v2546_v59, 1  ;;  %v2611_v63 = vsel %vm1076_vm14, %v2609_v13, %v2610_v34  ;;  %v9792_v51 = vld [vmem:[#allocation7 + $0x530] sm:$0xf]  ;;  %v11603_v50 = vld [vmem:[#allocation7 + $0x534] sm:$0xf0] }
 0x3a9   : > { %v13198_v26 = vadd.f32 %v1668_v37, %v1640_v28  ;;  %v2550_v28 = vld [vmem:[#allocation2 + $0x48] sm:$0xfe]  ;;  %v2552_v37 = vld [vmem:[#allocation2 + $0x58] sm:$0x1]  ;;  %v2617_v18 = vsel %vm1076_vm14, %v2615_v2, %v2616_v4  ;;  %v9856_v54 = vld [vmem:[#allocation7 + $0x5b0] sm:$0xf] }
 0x3aa   : > { %3422 = vmatpush.bf16.msrb.mxu3 %v9893_v11  ;;  %v2618_v22 = vrot.slane %v2550_v28, 1  ;;  %v2619_v16 = vrot.slane %v2552_v37, 1  ;;  %v9810_v11 = vld [vmem:[#allocation7 + $0x558] sm:$0xf0]  ;;  %v2614_v15 = vsel %vm1076_vm14, %v2612_v21, %v2613_v43  ;;  %v11619_v59 = vld [vmem:[#allocation7 + $0x5b4] sm:$0xf0] }
 0x3ab   : > { %v9857_v28 = vor.u32 %v11619_v59, %v9856_v54  ;;  %v9866_v13 = vld [vmem:[#allocation7 + $0x5c8] sm:$0xf0]  ;;  %v2556_v43 = vld [vmem:[#allocation2 + $0x78] sm:$0x1] }
 0x3ac   : > { %v1697_v12 = vpop.f32.mrf.mxu2  ;;  %3337 = vmatpush.bf16.msrb.mxu0 %v9809_v17  ;;  %v2620_v60 = vsel %vm1076_vm14, %v2618_v22, %v2619_v16  ;;  %v2673_v17 = vpack.c.bf16 %v2617_v18, %v2611_v63  ;;  %v2554_v2 = vld [vmem:[#allocation2 + $0x68] sm:$0xfe]  ;;  %v2560_v16 = vld [vmem:[#allocation2 + $0x98] sm:$0x1]  ;;  %v2628_v63 = vrot.slane %v2559_v61, 1 }
 0x3ad   : > { %v1698_v25 = vadd.f32 %v1697_v12, %v13145_v1  ;;  %v2674_v49 = vpack.c.bf16 %v2620_v60, %v2614_v15  ;;  %v2558_v22 = vld [vmem:[#allocation2 + $0x88] sm:$0xfe] }
 0x3ae   : > { %v1726_v30 = vpop.f32.mrf.mxu3  ;;  %v1642_v19 = vpop.f32.mrf.mxu0  ;;  %3423 = vmatpush.bf16.msrb.mxu3 %v9885_v57  ;;  %v11604_v57 = vld [vmem:[#allocation7 + $0x544] sm:$0xf] }
 0x3af   : > { %v13201_v14 = vadd.f32 %v1726_v30, %v1698_v25  ;;  %v1643_v36 = vadd.f32 %v1642_v19, %v13147_v3  ;;  %v9872_v3 = vld [vmem:[#allocation7 + $0x5d0] sm:$0xf]  ;;  %v9800_v25 = vld [vmem:[#allocation7 + $0x540] sm:$0xf]  ;;  %v11621_v19 = vld [vmem:[#allocation7 + $0x5c4] sm:$0xf0] }
 0x3b0   : > { %v1671_v39 = vpop.f32.mrf.mxu1  ;;  %v9873_v48 = vor.u32 %v11623_v33, %v9872_v3  ;;  %v9801_v30 = vor.u32 %v11605_v29, %v9800_v25 }
 0x3b1   : > { %v13205_v1 = vadd.f32 %v1671_v39, %v1643_v36  ;;  %2436 = vmatmul.bf16.gmra.mxu0 %v2218_v38  ;;  %2494 = vmatmul.bf16.gmra.mxu2 %v2218_v38  ;;  %v9813_v39 = vor.u32 %v11606_v31, %v9810_v11  ;;  %v2625_v31 = vrot.slane %v2556_v43, 1  ;;  %v2630_v11 = vrot.slane %v2558_v22, 1  ;;  %v9786_v43 = vld [vmem:[#allocation7 + $0x528] sm:$0xf0]  ;;  %v2567_v22 = vld [vmem:[#allocation2 + $0xd0] sm:$0x1] }
 0x3b2   : > { %3366 = vmatpush.bf16.msrb.mxu1 %v9873_v48  ;;  %3338 = vmatpush.bf16.msrb.mxu0 %v9801_v30  ;;  %v2557_v48 = vld [vmem:[#allocation2 + $0x80] sm:$0xfe] }
 0x3b3   : > { %2465 = vmatmul.bf16.gmra.mxu1 %v2219_v35  ;;  %2523 = vmatmul.bf16.gmra.mxu3 %v2219_v35  ;;  %v11622_v35 = vld [vmem:[#allocation7 + $0x5d4] sm:$0xf] }
 0x3b4   : > { %v1700_v52 = vpop.f32.mrf.mxu2  ;;  %v9877_v3 = vor.u32 %v11622_v35, %v9874_v44  ;;  %3395 = vmatpush.bf16.msrb.mxu2 %v9813_v39  ;;  %v9784_v39 = vld [vmem:[#allocation7 + $0x520] sm:$0xf]  ;;  %v11601_v35 = vld [vmem:[#allocation7 + $0x524] sm:$0xf0] }
 0x3b5   : > { %v1701_v45 = vadd.f32 %v1700_v52, %v13149_v41  ;;  %v9848_v44 = vld [vmem:[#allocation7 + $0x5a0] sm:$0xf]  ;;  %v9785_v60 = vor.u32 %v11601_v35, %v9784_v39 }
 0x3b6   : > { %v1729_v6 = vpop.f32.mrf.mxu3  ;;  %v1644_v7 = vpop.f32.mrf.mxu0  ;;  %3424 = vmatpush.bf16.msrb.mxu3 %v9877_v3  ;;  %v11617_v3 = vld [vmem:[#allocation7 + $0x5a4] sm:$0xf0] }
 0x3b7   : > { %v13209_v56 = vadd.f32 %v1729_v6, %v1701_v45  ;;  %v1645_v27 = vadd.f32 %v1644_v7, %v13151_v47  ;;  %v9864_v47 = vld [vmem:[#allocation7 + $0x5c0] sm:$0xf]  ;;  %v9793_v7 = vor.u32 %v11603_v50, %v9792_v51 }
 0x3b8   : > { %v1673_v41 = vpop.f32.mrf.mxu1  ;;  %v9865_v38 = vor.u32 %v11621_v19, %v9864_v47  ;;  %v2553_v45 = vld [vmem:[#allocation2 + $0x60] sm:$0xfe]  ;;  %v2622_v47 = vrot.slane %v2555_v46, 1  ;;  %v2624_v19 = vrot.slane %v2554_v2, 1 }
 0x3b9   : > { %v13212_v12 = vadd.f32 %v1673_v41, %v1645_v27  ;;  %v9802_v27 = vld [vmem:[#allocation7 + $0x548] sm:$0xf0]  ;;  %v11620_v41 = vld [vmem:[#allocation7 + $0x5c4] sm:$0xf]  ;;  %3339 = vmatpush.bf16.msrb.mxu0 %v9793_v7  ;;  %v2621_v29 = vrot.slane %v2553_v45, 1 }
 0x3ba   : > { %3367 = vmatpush.bf16.msrb.mxu1 %v9865_v38  ;;  %v9805_v37 = vor.u32 %v11604_v57, %v9802_v27  ;;  %v9869_v4 = vor.u32 %v11620_v41, %v9866_v13  ;;  %v9858_v45 = vld [vmem:[#allocation7 + $0x5b8] sm:$0xf0]  ;;  %v2565_v41 = vld [vmem:[#allocation2 + $0xc0] sm:$0xfe]  ;;  %v9776_v13 = vld [vmem:[#allocation7 + $0x510] sm:$0xf] }
 0x3bc   : > { %v1702_v20 = vpop.f32.mrf.mxu2  ;;  %3396 = vmatpush.bf16.msrb.mxu2 %v9805_v37  ;;  %3425 = vmatpush.bf16.msrb.mxu3 %v9869_v4  ;;  %v2563_v37 = vld [vmem:[#allocation2 + $0xb0] sm:$0x1] }
 0x3bd   : > { %v1703_v36 = vadd.f32 %v1702_v20, %v13153_v55  ;;  %v2627_v20 = vrot.slane %v2557_v48, 1  ;;  %3340 = vmatpush.bf16.msrb.mxu0 %v9785_v60 }
 0x3be   : > { %v1731_v40 = vpop.f32.mrf.mxu3  ;;  %v2073_v42 = vpop.f32.mrf.mxu0  ;;  %3368 = vmatpush.bf16.msrb.mxu1 %v9857_v28  ;;  %v2561_v28 = vld [vmem:[#allocation2 + $0xa0] sm:$0xfe] }
 0x3bf   : > { %v13219_v52 = vadd.f32 %v1731_v40, %v1703_v36  ;;  %v2631_v36 = vrot.slane %v2560_v16, 1  ;;  %v2629_v15 = vsel %vm1076_vm14, %v2627_v20, %v2628_v63  ;;  %v2562_v63 = vld [vmem:[#allocation2 + $0xa8] sm:$0xfe]  ;;  %v2633_v35 = vrot.slane %v2561_v28, 1  ;;  %v9842_v28 = vld [vmem:[#allocation7 + $0x598] sm:$0xf0] }
 0x3c0   : > { %v2102_v33 = vpop.f32.mrf.mxu1 }
 0x3c1   : > { %v2103_v55 = vadd.f32 %v2102_v33, %v2073_v42  ;;  %2882 = vmatmul.bf16.vlgmr.msra.gmra.mxu0 %v2673_v17  ;;  %2940 = vmatmul.bf16.vlgmr.msra.gmra.mxu2 %v2673_v17  ;;  %v2623_v42 = vsel %vm1076_vm14, %v2621_v29, %v2622_v47  ;;  %v9794_v17 = vld [vmem:[#allocation7 + $0x538] sm:$0xf0]  ;;  %v9849_v33 = vor.u32 %v11617_v3, %v9848_v44  ;;  %v11616_v29 = vld [vmem:[#allocation7 + $0x5a4] sm:$0xf]  ;;  %v9850_v47 = vld [vmem:[#allocation7 + $0x5a8] sm:$0xf0] }
 0x3c2   : > { %v2632_v51 = vsel %vm1076_vm14, %v2630_v11, %v2631_v36  ;;  %v2566_v11 = vld [vmem:[#allocation2 + $0xc8] sm:$0xfe]  ;;  %v2568_v36 = vld [vmem:[#allocation2 + $0xd8] sm:$0x1]  ;;  %v2634_v44 = vrot.slane %v2563_v37, 1  ;;  %v2636_v3 = vrot.slane %v2562_v63, 1 }
 0x3c3   : > { %v13222_v53 = vadd.f32 %v2103_v55, %v13156_v9  ;;  %2911 = vmatmul.bf16.vlgmr.msra.gmra.mxu1 %v2674_v49  ;;  %2969 = vmatmul.bf16.vlgmr.msra.gmra.mxu3 %v2674_v49  ;;  %v11618_v49 = vld [vmem:[#allocation7 + $0x5b4] sm:$0xf] }
 0x3c4   : > { %v2131_v6 = vpop.f32.mrf.mxu2  ;;  %v9861_v50 = vor.u32 %v11618_v49, %v9858_v45  ;;  %3369 = vmatpush.bf16.msrb.mxu1 %v9849_v33  ;;  %v2643_v33 = vrot.slane %v2568_v36, 1  ;;  %v9768_v49 = vld [vmem:[#allocation7 + $0x500] sm:$0xf]  ;;  %v11597_v45 = vld [vmem:[#allocation7 + $0x504] sm:$0xf0] }
 0x3c6   : > { %v2160_v9 = vpop.f32.mrf.mxu3  ;;  %v2075_v34 = vpop.f32.mrf.mxu0  ;;  %3426 = vmatpush.bf16.msrb.mxu3 %v9861_v50  ;;  %v9769_v50 = vor.u32 %v11597_v45, %v9768_v49 }
 0x3c7   : > { %v2161_v21 = vadd.f32 %v2160_v9, %v2131_v6  ;;  %v2675_v6 = vpack.c.bf16 %v2629_v15, %v2623_v42  ;;  %v11599_v9 = vld [vmem:[#allocation7 + $0x514] sm:$0xf0]  ;;  %v2640_v42 = vrot.slane %v2567_v22, 1 }
 0x3c8   : > { %v2104_v25 = vpop.f32.mrf.mxu1  ;;  %v9777_v4 = vor.u32 %v11599_v9, %v9776_v13 }
 0x3c9   : > { %v13225_v18 = vadd.f32 %v2161_v21, %v13163_v24  ;;  %v2105_v30 = vadd.f32 %v2104_v25, %v2075_v34  ;;  %v11602_v24 = vld [vmem:[#allocation7 + $0x534] sm:$0xf]  ;;  %v9840_v34 = vld [vmem:[#allocation7 + $0x590] sm:$0xf]  ;;  %v11615_v21 = vld [vmem:[#allocation7 + $0x594] sm:$0xf0] }
 0x3ca   : > { %v9797_v55 = vor.u32 %v11602_v24, %v9794_v17  ;;  %v9841_v16 = vor.u32 %v11615_v21, %v9840_v34  ;;  %3341 = vmatpush.bf16.msrb.mxu0 %v9777_v4  ;;  %v2642_v17 = vrot.slane %v2566_v11, 1  ;;  %v2575_v11 = vld [vmem:[#allocation2 + $0x110] sm:$0x1] }
 0x3cb   : > { %v13228_v38 = vadd.f32 %v2105_v30, %v13166_v32  ;;  %v2626_v32 = vsel %vm1076_vm14, %v2624_v19, %v2625_v31  ;;  %v9853_v30 = vor.u32 %v11616_v29, %v9850_v47  ;;  %v2564_v31 = vld [vmem:[#allocation2 + $0xb8] sm:$0x1]  ;;  %v2573_v29 = vld [vmem:[#allocation2 + $0x100] sm:$0xfe] }
 0x3cc   : > { %v2133_v40 = vpop.f32.mrf.mxu2  ;;  %3397 = vmatpush.bf16.msrb.mxu2 %v9797_v55  ;;  %v2676_v27 = vpack.c.bf16 %v2632_v51, %v2626_v32  ;;  %3370 = vmatpush.bf16.msrb.mxu1 %v9841_v16  ;;  %v2637_v24 = vrot.slane %v2564_v31, 1  ;;  %v2635_v32 = vsel %vm1076_vm14, %v2633_v35, %v2634_v44  ;;  %v2644_v13 = vsel %vm1076_vm14, %v2642_v17, %v2643_v33  ;;  %v2569_v16 = vld [vmem:[#allocation2 + $0xe0] sm:$0xfe]  ;;  %v11643_v31 = vld [vmem:[#allocation7 + $0x674] sm:$0xf0] }
 0x3cd   : > { %3427 = vmatpush.bf16.msrb.mxu3 %v9853_v30  ;;  %v11596_v47 = vld [vmem:[#allocation7 + $0x504] sm:$0xf]  ;;  %v10016_v35 = vld [vmem:[#allocation7 + $0x6f0] sm:$0xf]  ;;  %v11659_v44 = vld [vmem:[#allocation7 + $0x6f4] sm:$0xf0] }
 0x3ce   : > { %v2162_v46 = vpop.f32.mrf.mxu3  ;;  %v2078_v48 = vpop.f32.mrf.mxu0  ;;  %3342 = vmatpush.bf16.msrb.mxu0 %v9769_v50  ;;  %v2574_v17 = vld [vmem:[#allocation2 + $0x108] sm:$0xfe]  ;;  %v2576_v33 = vld [vmem:[#allocation2 + $0x118] sm:$0x1]  ;;  %v2645_v45 = vrot.slane %v2569_v16, 1 }
 0x3cf   : > { %v2163_v54 = vadd.f32 %v2162_v46, %v2133_v40  ;;  %v2639_v40 = vrot.slane %v2565_v41, 1  ;;  %v9832_v46 = vld [vmem:[#allocation7 + $0x580] sm:$0xf]  ;;  %v10018_v16 = vld [vmem:[#allocation7 + $0x6f8] sm:$0xf0] }
 0x3d0   : > { %v2107_v7 = vpop.f32.mrf.mxu1 }
 0x3d1   : > { %v13235_v59 = vadd.f32 %v2163_v54, %v13169_v5  ;;  %v2108_v57 = vadd.f32 %v2107_v7, %v2078_v48  ;;  %2887 = vmatmul.bf16.gmra.mxu0 %v2675_v6  ;;  %2945 = vmatmul.bf16.gmra.mxu2 %v2675_v6  ;;  %v11600_v5 = vld [vmem:[#allocation7 + $0x524] sm:$0xf]  ;;  %v2641_v51 = vsel %vm1076_vm14, %v2639_v40, %v2640_v42  ;;  %v11613_v54 = vld [vmem:[#allocation7 + $0x584] sm:$0xf0]  ;;  %v9778_v6 = vld [vmem:[#allocation7 + $0x518] sm:$0xf0] }
 0x3d2   : > { %v9789_v25 = vor.u32 %v11600_v5, %v9786_v43  ;;  %v9833_v7 = vor.u32 %v11613_v54, %v9832_v46  ;;  %v2570_v42 = vld [vmem:[#allocation2 + $0xe8] sm:$0xfe] }
 0x3d3   : > { %v13238_v61 = vadd.f32 %v2108_v57, %v13172_v8  ;;  %2916 = vmatmul.bf16.gmra.mxu1 %v2676_v27  ;;  %2974 = vmatmul.bf16.gmra.mxu3 %v2676_v27  ;;  %v11614_v27 = vld [vmem:[#allocation7 + $0x594] sm:$0xf]  ;;  %v2648_v54 = vrot.slane %v2570_v42, 1 }
 0x3d4   : > { %v2136_v2 = vpop.f32.mrf.mxu2  ;;  %3398 = vmatpush.bf16.msrb.mxu2 %v9789_v25  ;;  %v9845_v9 = vor.u32 %v11614_v27, %v9842_v28  ;;  %3371 = vmatpush.bf16.msrb.mxu1 %v9833_v7  ;;  %v2571_v25 = vld [vmem:[#allocation2 + $0xf0] sm:$0x1]  ;;  %v2655_v7 = vrot.slane %v2576_v33, 1  ;;  %v9944_v27 = vld [vmem:[#allocation7 + $0x660] sm:$0xf] }
 0x3d5   : > { %v2646_v46 = vrot.slane %v2571_v25, 1  ;;  %v11641_v28 = vld [vmem:[#allocation7 + $0x664] sm:$0xf0] }
 0x3d6   : > { %v2165_v8 = vpop.f32.mrf.mxu3  ;;  %v2080_v20 = vpop.f32.mrf.mxu0  ;;  %3428 = vmatpush.bf16.msrb.mxu3 %v9845_v9  ;;  %v9945_v9 = vor.u32 %v11641_v28, %v9944_v27 }
 0x3d7   : > { %v2166_v19 = vadd.f32 %v2165_v8, %v2136_v2  ;;  %v2677_v2 = vpack.c.bf16 %v2641_v51, %v2635_v32  ;;  %v9770_v8 = vld [vmem:[#allocation7 + $0x508] sm:$0xf0]  ;;  %v2652_v32 = vrot.slane %v2575_v11, 1 }
 0x3d8   : > { %v2109_v39 = vpop.f32.mrf.mxu1  ;;  %v9773_v30 = vor.u32 %v11596_v47, %v9770_v8 }
 0x3d9   : > { %v13241_v15 = vadd.f32 %v2166_v19, %v13179_v10  ;;  %v2110_v60 = vadd.f32 %v2109_v39, %v2080_v20  ;;  %v11598_v10 = vld [vmem:[#allocation7 + $0x514] sm:$0xf]  ;;  %v11612_v20 = vld [vmem:[#allocation7 + $0x584] sm:$0xf]  ;;  %v9834_v19 = vld [vmem:[#allocation7 + $0x588] sm:$0xf0] }
 0x3da   : > { %v9781_v57 = vor.u32 %v11598_v10, %v9778_v6  ;;  %v9837_v36 = vor.u32 %v11612_v20, %v9834_v19  ;;  %v2654_v6 = vrot.slane %v2574_v17, 1  ;;  %v3012_v17 = vld [vmem:[#allocation2 + $0x50] sm:$0x3] }
 0x3db   : > { %v13244_v55 = vadd.f32 %v2110_v60, %v13182_v23  ;;  %v2638_v23 = vsel %vm1076_vm14, %v2636_v3, %v2637_v24  ;;  %v10017_v60 = vor.u32 %v11659_v44, %v10016_v35  ;;  %v2572_v24 = vld [vmem:[#allocation2 + $0xf8] sm:$0x1]  ;;  %v3010_v35 = vld [vmem:[#allocation2 + $0x40] sm:$0xfc]  ;;  %v9936_v44 = vld [vmem:[#allocation7 + $0x650] sm:$0xf] }
 0x3dc   : > { %v2138_v48 = vpop.f32.mrf.mxu2  ;;  %3399 = vmatpush.bf16.msrb.mxu2 %v9781_v57  ;;  %v2678_v43 = vpack.c.bf16 %v2644_v13, %v2638_v23  ;;  %3429 = vmatpush.bf16.msrb.mxu3 %v9837_v36  ;;  %v2649_v10 = vrot.slane %v2572_v24, 1  ;;  %v2647_v23 = vsel %vm1076_vm14, %v2645_v45, %v2646_v46  ;;  %v2656_v47 = vsel %vm1076_vm14, %v2654_v6, %v2655_v7  ;;  %v3006_v36 = vld [vmem:[#allocation2 + $0x20] sm:$0xfc]  ;;  %v9946_v24 = vld [vmem:[#allocation7 + $0x668] sm:$0xf0] }
 0x3dd   : > { %3714 = vmatpush.bf16.msra.mxu1 %v10017_v60  ;;  %v11656_v45 = vld [vmem:[#allocation7 + $0x6e4] sm:$0xf]  ;;  %v10010_v46 = vld [vmem:[#allocation7 + $0x6e8] sm:$0xf0]  ;;  %v3013_v7 = vld [vmem:[#allocation2 + $0x58] sm:$0x3] }
 0x3de   : > { %v2167_v37 = vpop.f32.mrf.mxu3  ;;  %v2083_v41 = vpop.f32.mrf.mxu0  ;;  %v3011_v6 = vld [vmem:[#allocation2 + $0x48] sm:$0xfc]  ;;  %v3070_v28 = vrot.slane %v3006_v36, 2  ;;  %v10002_v36 = vld [vmem:[#allocation7 + $0x6d8] sm:$0xf0] }
 0x3df   : > { %v2168_v34 = vadd.f32 %v2167_v37, %v2138_v48  ;;  %v2651_v48 = vrot.slane %v2573_v29, 1  ;;  %v10008_v37 = vld [vmem:[#allocation7 + $0x6e0] sm:$0xf] }
 0x3e0   : > { %v2112_v4 = vpop.f32.mrf.mxu1  ;;  %3400 = vmatpush.bf16.msrb.mxu2 %v9773_v30 }
 0x3e1   : > { %v13251_v21 = vadd.f32 %v2168_v34, %v13185_v58  ;;  %v2113_v5 = vadd.f32 %v2112_v4, %v2083_v41  ;;  %2892 = vmatmul.bf16.gmra.mxu0 %v2677_v2  ;;  %2950 = vmatmul.bf16.gmra.mxu2 %v2677_v2  ;;  %v9952_v58 = vld [vmem:[#allocation7 + $0x670] sm:$0xf]  ;;  %v2653_v13 = vsel %vm1076_vm14, %v2651_v48, %v2652_v32  ;;  %v11657_v34 = vld [vmem:[#allocation7 + $0x6e4] sm:$0xf0]  ;;  %v9954_v2 = vld [vmem:[#allocation7 + $0x678] sm:$0xf0] }
 0x3e2   : > { %v9953_v39 = vor.u32 %v11643_v31, %v9952_v58  ;;  %v10009_v4 = vor.u32 %v11657_v34, %v10008_v37  ;;  %v3007_v32 = vld [vmem:[#allocation2 + $0x28] sm:$0xfc] }
 0x3e3   : > { %v13254_v22 = vadd.f32 %v2113_v5, %v13188_v0  ;;  %2921 = vmatmul.bf16.gmra.mxu1 %v2678_v43  ;;  %2979 = vmatmul.bf16.gmra.mxu3 %v2678_v43  ;;  %v11658_v43 = vld [vmem:[#allocation7 + $0x6f4] sm:$0xf]  ;;  %v3073_v34 = vrot.slane %v3007_v32, 2 }
 0x3e4   : > { %v2141_v63 = vpop.f32.mrf.mxu2  ;;  %3685 = vmatpush.bf16.msra.mxu0 %v9953_v39  ;;  %v10021_v8 = vor.u32 %v11658_v43, %v10018_v16  ;;  %3715 = vmatpush.bf16.msra.mxu1 %v10009_v4  ;;  %v3008_v39 = vld [vmem:[#allocation2 + $0x30] sm:$0x3]  ;;  %v3080_v4 = vrot.slane %v3013_v7, 2  ;;  %v9928_v43 = vld [vmem:[#allocation7 + $0x640] sm:$0xf] }
 0x3e5   : > { %v3071_v37 = vrot.slane %v3008_v39, 2  ;;  %v11637_v16 = vld [vmem:[#allocation7 + $0x644] sm:$0xf0] }
 0x3e6   : > { %v2170_v0 = vpop.f32.mrf.mxu3  ;;  %v2085_v40 = vpop.f32.mrf.mxu0  ;;  %3772 = vmatpush.bf16.msra.mxu3 %v10021_v8  ;;  %v9929_v8 = vor.u32 %v11637_v16, %v9928_v43 }
 0x3e7   : > { %v2171_v3 = vadd.f32 %v2170_v0, %v2141_v63  ;;  %v2679_v63 = vpack.c.bf16 %v2653_v13, %v2647_v23  ;;  %v11639_v0 = vld [vmem:[#allocation7 + $0x654] sm:$0xf0]  ;;  %v3077_v23 = vrot.slane %v3012_v17, 2 }
 0x3e8   : > { %v2114_v49 = vpop.f32.mrf.mxu1  ;;  %3686 = vmatpush.bf16.msra.mxu0 %v9945_v9  ;;  %v9937_v60 = vor.u32 %v11639_v0, %v9936_v44 }
 0x3e9   : > { %v13257_v51 = vadd.f32 %v2171_v3, %v13195_v62  ;;  %v2115_v50 = vadd.f32 %v2114_v49, %v2085_v40  ;;  %v11642_v62 = vld [vmem:[#allocation7 + $0x674] sm:$0xf]  ;;  %v10000_v40 = vld [vmem:[#allocation7 + $0x6d0] sm:$0xf]  ;;  %v11655_v3 = vld [vmem:[#allocation7 + $0x6d4] sm:$0xf0] }
 0x3ea   : > { %v9957_v5 = vor.u32 %v11642_v62, %v9954_v2  ;;  %v10001_v33 = vor.u32 %v11655_v3, %v10000_v40  ;;  %v3079_v2 = vrot.slane %v3011_v6, 2  ;;  %v3020_v6 = vld [vmem:[#allocation2 + $0x90] sm:$0x3] }
 0x3eb   : > { %v13260_v57 = vadd.f32 %v2115_v50, %v13198_v26  ;;  %v2650_v26 = vsel %vm1076_vm14, %v2648_v54, %v2649_v10  ;;  %v10013_v50 = vor.u32 %v11656_v45, %v10010_v46  ;;  %v3009_v10 = vld [vmem:[#allocation2 + $0x38] sm:$0x3]  ;;  %v3018_v45 = vld [vmem:[#allocation2 + $0x80] sm:$0xfc]  ;;  %v9920_v46 = vld [vmem:[#allocation7 + $0x630] sm:$0xf] }
 0x3ec   : > { %v2143_v41 = vpop.f32.mrf.mxu2  ;;  %3743 = vmatpush.bf16.msra.mxu2 %v9957_v5  ;;  %v2680_v31 = vpack.c.bf16 %v2656_v47, %v2650_v26  ;;  %3687 = vmatpush.bf16.msra.mxu0 %v9937_v60  ;;  %v3074_v62 = vrot.slane %v3009_v10, 2  ;;  %v3072_v26 = vsel %vm1798_vm8, %v3070_v28, %v3071_v37  ;;  %v3081_v44 = vsel %vm1798_vm8, %v3079_v2, %v3080_v4  ;;  %v9930_v10 = vld [vmem:[#allocation7 + $0x648] sm:$0xf0]  ;;  %v11652_v28 = vld [vmem:[#allocation7 + $0x6c4] sm:$0xf] }
 0x3ed   : > { %3716 = vmatpush.bf16.msra.mxu1 %v10001_v33  ;;  %3773 = vmatpush.bf16.msra.mxu3 %v10013_v50  ;;  %v3014_v33 = vld [vmem:[#allocation2 + $0x60] sm:$0xfc]  ;;  %v9994_v37 = vld [vmem:[#allocation7 + $0x6c8] sm:$0xf0]  ;;  %v3021_v4 = vld [vmem:[#allocation2 + $0x98] sm:$0x3] }
 0x3ee   : > { %v2172_v25 = vpop.f32.mrf.mxu3  ;;  %v2088_v29 = vpop.f32.mrf.mxu0  ;;  %v3019_v2 = vld [vmem:[#allocation2 + $0x88] sm:$0xfc]  ;;  %v3082_v16 = vrot.slane %v3014_v33, 2  ;;  %v9986_v33 = vld [vmem:[#allocation7 + $0x6b8] sm:$0xf0] }
 0x3ef   : > { %v2173_v20 = vadd.f32 %v2172_v25, %v2143_v41  ;;  %v3076_v41 = vrot.slane %v3010_v35, 2  ;;  %v9992_v25 = vld [vmem:[#allocation7 + $0x6c0] sm:$0xf] }
 0x3f0   : > { %v2117_v30 = vpop.f32.mrf.mxu1  ;;  %3688 = vmatpush.bf16.msra.mxu0 %v9929_v8 }
 0x3f1   : > { %v13267_v19 = vadd.f32 %v2173_v20, %v13201_v14  ;;  %v2118_v58 = vadd.f32 %v2117_v30, %v2088_v29  ;;  %2897 = vmatmul.bf16.gmra.mxu0 %v2679_v63  ;;  %2955 = vmatmul.bf16.gmra.mxu2 %v2679_v63  ;;  %v11640_v14 = vld [vmem:[#allocation7 + $0x664] sm:$0xf]  ;;  %v3078_v47 = vsel %vm1798_vm8, %v3076_v41, %v3077_v23  ;;  %v11653_v20 = vld [vmem:[#allocation7 + $0x6c4] sm:$0xf0]  ;;  %v9938_v63 = vld [vmem:[#allocation7 + $0x658] sm:$0xf0] }
 0x3f2   : > { %v9949_v49 = vor.u32 %v11640_v14, %v9946_v24  ;;  %v9993_v30 = vor.u32 %v11653_v20, %v9992_v25  ;;  %v3015_v23 = vld [vmem:[#allocation2 + $0x68] sm:$0xfc] }
 0x3f3   : > { %v13270_v11 = vadd.f32 %v2118_v58, %v13205_v1  ;;  %2926 = vmatmul.bf16.gmra.mxu1 %v2680_v31  ;;  %2984 = vmatmul.bf16.gmra.mxu3 %v2680_v31  ;;  %v11654_v31 = vld [vmem:[#allocation7 + $0x6d4] sm:$0xf]  ;;  %v3085_v20 = vrot.slane %v3015_v23, 2 }
 0x3f4   : > { %v2146_v42 = vpop.f32.mrf.mxu2  ;;  %3744 = vmatpush.bf16.msra.mxu2 %v9949_v49  ;;  %v10005_v0 = vor.u32 %v11654_v31, %v10002_v36  ;;  %3717 = vmatpush.bf16.msra.mxu1 %v9993_v30  ;;  %v3016_v49 = vld [vmem:[#allocation2 + $0x70] sm:$0x3]  ;;  %v3092_v30 = vrot.slane %v3021_v4, 2  ;;  %v9912_v31 = vld [vmem:[#allocation7 + $0x620] sm:$0xf] }
 0x3f5   : > { %v3083_v25 = vrot.slane %v3016_v49, 2  ;;  %v11633_v36 = vld [vmem:[#allocation7 + $0x624] sm:$0xf0] }
 0x3f6   : > { %v2175_v1 = vpop.f32.mrf.mxu3  ;;  %v2090_v48 = vpop.f32.mrf.mxu0  ;;  %3774 = vmatpush.bf16.msra.mxu3 %v10005_v0  ;;  %v9913_v0 = vor.u32 %v11633_v36, %v9912_v31 }
 0x3f7   : > { %v2176_v54 = vadd.f32 %v2175_v1, %v2146_v42  ;;  %v3134_v42 = vpack.c.bf16 %v3078_v47, %v3072_v26  ;;  %v11635_v1 = vld [vmem:[#allocation7 + $0x634] sm:$0xf0]  ;;  %v3089_v26 = vrot.slane %v3020_v6, 2 }
 0x3f8   : > { %v2119_v27 = vpop.f32.mrf.mxu1  ;;  %v9921_v50 = vor.u32 %v11635_v1, %v9920_v46 }
 0x3f9   : > { %v13273_v13 = vadd.f32 %v2176_v54, %v13209_v56  ;;  %v2120_v9 = vadd.f32 %v2119_v27, %v2090_v48  ;;  %v11638_v56 = vld [vmem:[#allocation7 + $0x654] sm:$0xf]  ;;  %v9984_v48 = vld [vmem:[#allocation7 + $0x6b0] sm:$0xf]  ;;  %v11651_v54 = vld [vmem:[#allocation7 + $0x6b4] sm:$0xf0] }
 0x3fa   : > { %v9941_v58 = vor.u32 %v11638_v56, %v9938_v63  ;;  %v9985_v7 = vor.u32 %v11651_v54, %v9984_v48  ;;  %3689 = vmatpush.bf16.msra.mxu0 %v9921_v50  ;;  %v3091_v63 = vrot.slane %v3019_v2, 2  ;;  %v3028_v2 = vld [vmem:[#allocation2 + $0xd0] sm:$0x3] }
 0x3fb   : > { %v13276_v5 = vadd.f32 %v2120_v9, %v13212_v12  ;;  %v3075_v12 = vsel %vm1798_vm8, %v3073_v34, %v3074_v62  ;;  %v9997_v9 = vor.u32 %v11652_v28, %v9994_v37  ;;  %v3017_v62 = vld [vmem:[#allocation2 + $0x78] sm:$0x3]  ;;  %v3026_v28 = vld [vmem:[#allocation2 + $0xc0] sm:$0xfc]  ;;  %v9904_v37 = vld [vmem:[#allocation7 + $0x610] sm:$0xf] }
 0x3fc   : > { %v2148_v29 = vpop.f32.mrf.mxu2  ;;  %3745 = vmatpush.bf16.msra.mxu2 %v9941_v58  ;;  %v3135_v24 = vpack.c.bf16 %v3081_v44, %v3075_v12  ;;  %3718 = vmatpush.bf16.msra.mxu1 %v9985_v7  ;;  %v3086_v56 = vrot.slane %v3017_v62, 2  ;;  %v3084_v12 = vsel %vm1798_vm8, %v3082_v16, %v3083_v25  ;;  %v3093_v46 = vsel %vm1798_vm8, %v3091_v63, %v3092_v30  ;;  %v3022_v7 = vld [vmem:[#allocation2 + $0xa0] sm:$0xfc]  ;;  %v9914_v62 = vld [vmem:[#allocation7 + $0x628] sm:$0xf0] }
 0x3fd   : > { %3775 = vmatpush.bf16.msra.mxu3 %v9997_v9  ;;  %v11648_v16 = vld [vmem:[#allocation7 + $0x6a4] sm:$0xf]  ;;  %v9978_v25 = vld [vmem:[#allocation7 + $0x6a8] sm:$0xf0]  ;;  %v3029_v30 = vld [vmem:[#allocation2 + $0xd8] sm:$0x3] }
 0x3fe   : > { %v2177_v39 = vpop.f32.mrf.mxu3  ;;  %v2422_v35 = vpop.f32.mrf.mxu0  ;;  %3690 = vmatpush.bf16.msra.mxu0 %v9913_v0  ;;  %v3027_v63 = vld [vmem:[#allocation2 + $0xc8] sm:$0xfc]  ;;  %v3094_v36 = vrot.slane %v3022_v7, 2  ;;  %v9970_v7 = vld [vmem:[#allocation7 + $0x698] sm:$0xf0] }
 0x3ff   : > { %v2178_v40 = vadd.f32 %v2177_v39, %v2148_v29  ;;  %v3088_v29 = vrot.slane %v3018_v45, 2  ;;  %v9976_v39 = vld [vmem:[#allocation7 + $0x6a0] sm:$0xf] }
 0x400   : > { %v2451_v60 = vpop.f32.mrf.mxu1 }
 0x401   : > { %v13283_v3 = vadd.f32 %v2178_v40, %v13219_v52  ;;  %v2452_v14 = vadd.f32 %v2451_v60, %v2422_v35  ;;  %3343 = vmatmul.bf16.vlgmr.msrb.gmra.mxu0 %v3134_v42  ;;  %3401 = vmatmul.bf16.vlgmr.msrb.gmra.mxu2 %v3134_v42  ;;  %v11636_v52 = vld [vmem:[#allocation7 + $0x644] sm:$0xf]  ;;  %v3090_v44 = vsel %vm1798_vm8, %v3088_v29, %v3089_v26  ;;  %v11649_v40 = vld [vmem:[#allocation7 + $0x6a4] sm:$0xf0]  ;;  %v9922_v42 = vld [vmem:[#allocation7 + $0x638] sm:$0xf0] }
 0x402   : > { %v9933_v27 = vor.u32 %v11636_v52, %v9930_v10  ;;  %v9977_v60 = vor.u32 %v11649_v40, %v9976_v39  ;;  %v3023_v26 = vld [vmem:[#allocation2 + $0xa8] sm:$0xfc] }
 0x403   : > { %v13286_v17 = vadd.f32 %v2452_v14, %v13222_v53  ;;  %3372 = vmatmul.bf16.vlgmr.msrb.gmra.mxu1 %v3135_v24  ;;  %3430 = vmatmul.bf16.vlgmr.msrb.gmra.mxu3 %v3135_v24  ;;  %v11650_v24 = vld [vmem:[#allocation7 + $0x6b4] sm:$0xf]  ;;  %v3097_v40 = vrot.slane %v3023_v26, 2 }
 0x404   : > { %v2480_v32 = vpop.f32.mrf.mxu2  ;;  %3746 = vmatpush.bf16.msra.mxu2 %v9933_v27  ;;  %v9989_v1 = vor.u32 %v11650_v24, %v9986_v33  ;;  %3719 = vmatpush.bf16.msra.mxu1 %v9977_v60  ;;  %v3024_v27 = vld [vmem:[#allocation2 + $0xb0] sm:$0x3]  ;;  %v3104_v60 = vrot.slane %v3029_v30, 2  ;;  %v9896_v24 = vld [vmem:[#allocation7 + $0x600] sm:$0xf] }
 0x405   : > { %v3095_v39 = vrot.slane %v3024_v27, 2  ;;  %v11629_v33 = vld [vmem:[#allocation7 + $0x604] sm:$0xf0] }
 0x406   : > { %v2509_v53 = vpop.f32.mrf.mxu3  ;;  %v2424_v41 = vpop.f32.mrf.mxu0  ;;  %3776 = vmatpush.bf16.msra.mxu3 %v9989_v1  ;;  %v9897_v1 = vor.u32 %v11629_v33, %v9896_v24 }
 0x407   : > { %v2510_v34 = vadd.f32 %v2509_v53, %v2480_v32  ;;  %v3136_v32 = vpack.c.bf16 %v3090_v44, %v3084_v12  ;;  %v11631_v53 = vld [vmem:[#allocation7 + $0x614] sm:$0xf0]  ;;  %v3101_v12 = vrot.slane %v3028_v2, 2 }
 0x408   : > { %v2453_v43 = vpop.f32.mrf.mxu1  ;;  %v9905_v9 = vor.u32 %v11631_v53, %v9904_v37 }
 0x409   : > { %v13289_v47 = vadd.f32 %v2510_v34, %v13225_v18  ;;  %v2454_v8 = vadd.f32 %v2453_v43, %v2424_v41  ;;  %v11634_v18 = vld [vmem:[#allocation7 + $0x634] sm:$0xf]  ;;  %v9968_v41 = vld [vmem:[#allocation7 + $0x690] sm:$0xf]  ;;  %v11647_v34 = vld [vmem:[#allocation7 + $0x694] sm:$0xf0] }
 0x40a   : > { %v9925_v14 = vor.u32 %v11634_v18, %v9922_v42  ;;  %v9969_v4 = vor.u32 %v11647_v34, %v9968_v41  ;;  %3691 = vmatpush.bf16.msra.mxu0 %v9905_v9  ;;  %v3103_v42 = vrot.slane %v3027_v63, 2  ;;  %v3036_v63 = vld [vmem:[#allocation2 + $0x110] sm:$0x3] }
 0x40b   : > { %v13292_v58 = vadd.f32 %v2454_v8, %v13228_v38  ;;  %v3087_v38 = vsel %vm1798_vm8, %v3085_v20, %v3086_v56  ;;  %v9981_v8 = vor.u32 %v11648_v16, %v9978_v25  ;;  %v3025_v56 = vld [vmem:[#allocation2 + $0xb8] sm:$0x3]  ;;  %v3034_v16 = vld [vmem:[#allocation2 + $0x100] sm:$0xfc] }
 0x40c   : > { %v2482_v35 = vpop.f32.mrf.mxu2  ;;  %3747 = vmatpush.bf16.msra.mxu2 %v9925_v14  ;;  %v3137_v10 = vpack.c.bf16 %v3093_v46, %v3087_v38  ;;  %3720 = vmatpush.bf16.msra.mxu1 %v9969_v4  ;;  %v3098_v18 = vrot.slane %v3025_v56, 2  ;;  %v3096_v38 = vsel %vm1798_vm8, %v3094_v36, %v3095_v39  ;;  %v3105_v37 = vsel %vm1798_vm8, %v3103_v42, %v3104_v60  ;;  %v3030_v4 = vld [vmem:[#allocation2 + $0xe0] sm:$0xfc]  ;;  %v11675_v56 = vld [vmem:[#allocation7 + $0x774] sm:$0xf0] }
 0x40d   : > { %3777 = vmatpush.bf16.msra.mxu3 %v9981_v8  ;;  %v11628_v25 = vld [vmem:[#allocation7 + $0x604] sm:$0xf]  ;;  %v10144_v36 = vld [vmem:[#allocation7 + $0x7f0] sm:$0xf]  ;;  %v11691_v39 = vld [vmem:[#allocation7 + $0x7f4] sm:$0xf0] }
 0x40e   : > { %v2511_v49 = vpop.f32.mrf.mxu3  ;;  %v2427_v45 = vpop.f32.mrf.mxu0  ;;  %3692 = vmatpush.bf16.msra.mxu0 %v9897_v1  ;;  %v3035_v42 = vld [vmem:[#allocation2 + $0x108] sm:$0xfc]  ;;  %v3037_v60 = vld [vmem:[#allocation2 + $0x118] sm:$0x3]  ;;  %v3106_v33 = vrot.slane %v3030_v4, 2 }
 0x40f   : > { %v2512_v48 = vadd.f32 %v2511_v49, %v2482_v35  ;;  %v3100_v35 = vrot.slane %v3026_v28, 2  ;;  %v9960_v49 = vld [vmem:[#allocation7 + $0x680] sm:$0xf]  ;;  %v10146_v4 = vld [vmem:[#allocation7 + $0x7f8] sm:$0xf0] }
 0x410   : > { %v2456_v50 = vpop.f32.mrf.mxu1 }
 0x411   : > { %v13299_v54 = vadd.f32 %v2512_v48, %v13235_v59  ;;  %v2457_v52 = vadd.f32 %v2456_v50, %v2427_v45  ;;  %3348 = vmatmul.bf16.gmra.mxu0 %v3136_v32  ;;  %3406 = vmatmul.bf16.gmra.mxu2 %v3136_v32  ;;  %v11632_v59 = vld [vmem:[#allocation7 + $0x624] sm:$0xf]  ;;  %v3102_v46 = vsel %vm1798_vm8, %v3100_v35, %v3101_v12  ;;  %v11645_v48 = vld [vmem:[#allocation7 + $0x684] sm:$0xf0]  ;;  %v9906_v32 = vld [vmem:[#allocation7 + $0x618] sm:$0xf0] }
 0x412   : > { %v9917_v43 = vor.u32 %v11632_v59, %v9914_v62  ;;  %v9961_v50 = vor.u32 %v11645_v48, %v9960_v49  ;;  %v3031_v12 = vld [vmem:[#allocation2 + $0xe8] sm:$0xfc] }
 0x413   : > { %v13302_v6 = vadd.f32 %v2457_v52, %v13238_v61  ;;  %3377 = vmatmul.bf16.gmra.mxu1 %v3137_v10  ;;  %3435 = vmatmul.bf16.gmra.mxu3 %v3137_v10  ;;  %v11646_v10 = vld [vmem:[#allocation7 + $0x694] sm:$0xf]  ;;  %v3109_v48 = vrot.slane %v3031_v12, 2  ;;  %v11672_v12 = vld [vmem:[#allocation7 + $0x764] sm:$0xf] }
 0x414   : > { %v2485_v23 = vpop.f32.mrf.mxu2  ;;  %3748 = vmatpush.bf16.msra.mxu2 %v9917_v43  ;;  %v9973_v53 = vor.u32 %v11646_v10, %v9970_v7  ;;  %3721 = vmatpush.bf16.msra.mxu1 %v9961_v50  ;;  %v3032_v43 = vld [vmem:[#allocation2 + $0xf0] sm:$0x3]  ;;  %v3116_v50 = vrot.slane %v3037_v60, 2  ;;  %v10072_v10 = vld [vmem:[#allocation7 + $0x760] sm:$0xf] }
 0x415   : > { %v3107_v49 = vrot.slane %v3032_v43, 2  ;;  %v11673_v7 = vld [vmem:[#allocation7 + $0x764] sm:$0xf0] }
 0x416   : > { %v2514_v61 = vpop.f32.mrf.mxu3  ;;  %v2429_v29 = vpop.f32.mrf.mxu0  ;;  %3778 = vmatpush.bf16.msra.mxu3 %v9973_v53  ;;  %v10073_v53 = vor.u32 %v11673_v7, %v10072_v10  ;;  %v10120_v10 = vld [vmem:[#allocation7 + $0x7c0] sm:$0xf] }
 0x417   : > { %v2515_v20 = vadd.f32 %v2514_v61, %v2485_v23  ;;  %v3138_v23 = vpack.c.bf16 %v3102_v46, %v3096_v38  ;;  %v9898_v61 = vld [vmem:[#allocation7 + $0x608] sm:$0xf0]  ;;  %v3113_v38 = vrot.slane %v3036_v63, 2 }
 0x418   : > { %v2458_v31 = vpop.f32.mrf.mxu1  ;;  %v9901_v8 = vor.u32 %v11628_v25, %v9898_v61 }
 0x419   : > { %v13305_v44 = vadd.f32 %v2515_v20, %v13241_v15  ;;  %v2459_v0 = vadd.f32 %v2458_v31, %v2429_v29  ;;  %v11630_v15 = vld [vmem:[#allocation7 + $0x614] sm:$0xf]  ;;  %v11644_v29 = vld [vmem:[#allocation7 + $0x684] sm:$0xf]  ;;  %v9962_v20 = vld [vmem:[#allocation7 + $0x688] sm:$0xf0] }
 0x41a   : > { %v9909_v52 = vor.u32 %v11630_v15, %v9906_v32  ;;  %v9965_v30 = vor.u32 %v11644_v29, %v9962_v20  ;;  %v3115_v32 = vrot.slane %v3035_v42, 2  ;;  %v10138_v42 = vld [vmem:[#allocation7 + $0x7e8] sm:$0xf0] }
 0x41b   : > { %v13308_v14 = vadd.f32 %v2459_v0, %v13244_v55  ;;  %v3099_v55 = vsel %vm1798_vm8, %v3097_v40, %v3098_v18  ;;  %v10145_v0 = vor.u32 %v11691_v39, %v10144_v36  ;;  %v3033_v18 = vld [vmem:[#allocation2 + $0xf8] sm:$0x3]  ;;  %v10128_v36 = vld [vmem:[#allocation7 + $0x7d0] sm:$0xf] }
 0x41c   : > { %v2487_v45 = vpop.f32.mrf.mxu2  ;;  %3749 = vmatpush.bf16.msra.mxu2 %v9909_v52  ;;  %v3139_v62 = vpack.c.bf16 %v3105_v37, %v3099_v55  ;;  %3779 = vmatpush.bf16.msra.mxu3 %v9965_v30  ;;  %v3110_v15 = vrot.slane %v3033_v18, 2  ;;  %v3108_v55 = vsel %vm1798_vm8, %v3106_v33, %v3107_v49  ;;  %v3117_v25 = vsel %vm1798_vm8, %v3115_v32, %v3116_v50  ;;  %v10064_v30 = vld [vmem:[#allocation7 + $0x750] sm:$0xf]  ;;  %v11688_v18 = vld [vmem:[#allocation7 + $0x7e4] sm:$0xf] }
 0x41d   : > { %4175 = vmatpush.bf16.msrb.mxu1 %v10145_v0  ;;  %v10074_v0 = vld [vmem:[#allocation7 + $0x768] sm:$0xf0]  ;;  %v10141_v33 = vor.u32 %v11688_v18, %v10138_v42  ;;  %v10056_v32 = vld [vmem:[#allocation7 + $0x740] sm:$0xf]  ;;  %v11669_v50 = vld [vmem:[#allocation7 + $0x744] sm:$0xf0] }
 0x41e   : > { %v2516_v27 = vpop.f32.mrf.mxu3  ;;  %v2432_v28 = vpop.f32.mrf.mxu0 }
 0x41f   : > { %v2517_v41 = vadd.f32 %v2516_v27, %v2487_v45  ;;  %v3112_v45 = vrot.slane %v3034_v16, 2  ;;  %v10136_v27 = vld [vmem:[#allocation7 + $0x7e0] sm:$0xf] }
 0x420   : > { %v2461_v9 = vpop.f32.mrf.mxu1  ;;  %3750 = vmatpush.bf16.msra.mxu2 %v9901_v8 }
 0x421   : > { %v13315_v34 = vadd.f32 %v2517_v41, %v13251_v21  ;;  %v2462_v59 = vadd.f32 %v2461_v9, %v2432_v28  ;;  %3353 = vmatmul.bf16.gmra.mxu0 %v3138_v23  ;;  %3411 = vmatmul.bf16.gmra.mxu2 %v3138_v23  ;;  %v10080_v21 = vld [vmem:[#allocation7 + $0x770] sm:$0xf]  ;;  %v3114_v37 = vsel %vm1798_vm8, %v3112_v45, %v3113_v38  ;;  %v11689_v41 = vld [vmem:[#allocation7 + $0x7e4] sm:$0xf0]  ;;  %v10082_v23 = vld [vmem:[#allocation7 + $0x778] sm:$0xf0] }
 0x422   : > { %v10081_v31 = vor.u32 %v11675_v56, %v10080_v21  ;;  %v10137_v9 = vor.u32 %v11689_v41, %v10136_v27  ;;  %v10057_v27 = vor.u32 %v11669_v50, %v10056_v32  ;;  %v11681_v50 = vld [vmem:[#allocation7 + $0x7a4] sm:$0xf0] }
 0x423   : > { %v13318_v2 = vadd.f32 %v2462_v59, %v13254_v22  ;;  %3382 = vmatmul.bf16.gmra.mxu1 %v3139_v62  ;;  %3440 = vmatmul.bf16.gmra.mxu3 %v3139_v62  ;;  %v11690_v62 = vld [vmem:[#allocation7 + $0x7f4] sm:$0xf] }
 0x424   : > { %v2490_v26 = vpop.f32.mrf.mxu2  ;;  %4146 = vmatpush.bf16.msrb.mxu0 %v10081_v31  ;;  %v10149_v61 = vor.u32 %v11690_v62, %v10146_v4  ;;  %4176 = vmatpush.bf16.msrb.mxu1 %v10137_v9  ;;  %v11671_v31 = vld [vmem:[#allocation7 + $0x754] sm:$0xf0]  ;;  %v3471_v62 = vld [vmem:[#allocation2 + $0x68] sm:$0xff] }
 0x426   : > { %v2519_v22 = vpop.f32.mrf.mxu3  ;;  %v2434_v35 = vpop.f32.mrf.mxu0  ;;  %4233 = vmatpush.bf16.msrb.mxu3 %v10149_v61 }
 0x427   : > { %v2520_v40 = vadd.f32 %v2519_v22, %v2490_v26  ;;  %v3140_v26 = vpack.c.bf16 %v3114_v37, %v3108_v55  ;;  %v10065_v22 = vor.u32 %v11671_v31, %v10064_v30  ;;  %v11670_v55 = vld [vmem:[#allocation7 + $0x754] sm:$0xf]  ;;  %v10066_v37 = vld [vmem:[#allocation7 + $0x758] sm:$0xf0]  ;;  %v11683_v31 = vld [vmem:[#allocation7 + $0x7b4] sm:$0xf0] }
 0x428   : > { %v2463_v24 = vpop.f32.mrf.mxu1  ;;  %4147 = vmatpush.bf16.msrb.mxu0 %v10073_v53  ;;  %v10069_v41 = vor.u32 %v11670_v55, %v10066_v37  ;;  %v11682_v55 = vld [vmem:[#allocation7 + $0x7b4] sm:$0xf]  ;;  %v10114_v37 = vld [vmem:[#allocation7 + $0x7b8] sm:$0xf0] }
 0x429   : > { %v13321_v46 = vadd.f32 %v2520_v40, %v13257_v51  ;;  %v2464_v1 = vadd.f32 %v2463_v24, %v2434_v35  ;;  %v11674_v51 = vld [vmem:[#allocation7 + $0x774] sm:$0xf]  ;;  %v11687_v35 = vld [vmem:[#allocation7 + $0x7d4] sm:$0xf0] }
 0x42a   : > { %v10085_v59 = vor.u32 %v11674_v51, %v10082_v23  ;;  %v10129_v40 = vor.u32 %v11687_v35, %v10128_v36  ;;  %4234 = vmatpush.bf16.msrb.mxu3 %v10141_v33  ;;  %v11686_v51 = vld [vmem:[#allocation7 + $0x7d4] sm:$0xf]  ;;  %v10130_v23 = vld [vmem:[#allocation7 + $0x7d8] sm:$0xf0]  ;;  %v11668_v36 = vld [vmem:[#allocation7 + $0x744] sm:$0xf] }
 0x42b   : > { %v13324_v52 = vadd.f32 %v2464_v1, %v13260_v57  ;;  %v3111_v57 = vsel %vm1798_vm8, %v3109_v48, %v3110_v15  ;;  %v3468_v1 = vld [vmem:[#allocation2 + $0x40] sm:$0xff]  ;;  %v10133_v4 = vor.u32 %v11686_v51, %v10130_v23  ;;  %v3475_v51 = vld [vmem:[#allocation2 + $0xa8] sm:$0xff]  ;;  %v10117_v23 = vor.u32 %v11682_v55, %v10114_v37 }
 0x42c   : > { %v2492_v28 = vpop.f32.mrf.mxu2  ;;  %4204 = vmatpush.bf16.msrb.mxu2 %v10085_v59  ;;  %v3141_v56 = vpack.c.bf16 %v3117_v25, %v3111_v57  ;;  %4148 = vmatpush.bf16.msrb.mxu0 %v10065_v22  ;;  %v3470_v48 = vld [vmem:[#allocation2 + $0x60] sm:$0xff]  ;;  %v3469_v59 = vld [vmem:[#allocation2 + $0x48] sm:$0xff] }
 0x42d   : > { %4177 = vmatpush.bf16.msrb.mxu1 %v10129_v40  ;;  %v3485_v61 = vpack.c.bf16 %v3471_v62, %v3469_v59  ;;  %v11684_v35 = vld [vmem:[#allocation7 + $0x7c4] sm:$0xf]  ;;  %v3479_v55 = vld [vmem:[#allocation2 + $0xe8] sm:$0xff] }
 0x42e   : > { %v2521_v43 = vpop.f32.mrf.mxu3  ;;  %v2437_v16 = vpop.f32.mrf.mxu0  ;;  %4235 = vmatpush.bf16.msrb.mxu3 %v10133_v4  ;;  %v3474_v33 = vld [vmem:[#allocation2 + $0xa0] sm:$0xff] }
 0x42f   : > { %v2522_v29 = vadd.f32 %v2521_v43, %v2492_v28  ;;  %v11685_v28 = vld [vmem:[#allocation7 + $0x7c4] sm:$0xf0]  ;;  %v3484_v43 = vpack.c.bf16 %v3470_v48, %v3468_v1  ;;  %v10104_v1 = vld [vmem:[#allocation7 + $0x7a0] sm:$0xf] }
 0x430   : > { %v2466_v8 = vpop.f32.mrf.mxu1  ;;  %v10121_v53 = vor.u32 %v11685_v28, %v10120_v10  ;;  %4149 = vmatpush.bf16.msrb.mxu0 %v10057_v27  ;;  %v11666_v10 = vld [vmem:[#allocation7 + $0x734] sm:$0xf]  ;;  %v10105_v27 = vor.u32 %v11681_v50, %v10104_v1 }
 0x431   : > { %v13331_v20 = vadd.f32 %v2522_v29, %v13267_v19  ;;  %v2467_v21 = vadd.f32 %v2466_v8, %v2437_v16  ;;  %3358 = vmatmul.bf16.gmra.mxu0 %v3140_v26  ;;  %3416 = vmatmul.bf16.gmra.mxu2 %v3140_v26  ;;  %v10077_v19 = vor.u32 %v11672_v12, %v10074_v0  ;;  %v10048_v26 = vld [vmem:[#allocation7 + $0x730] sm:$0xf]  ;;  %v11667_v8 = vld [vmem:[#allocation7 + $0x734] sm:$0xf0]  ;;  %v10122_v12 = vld [vmem:[#allocation7 + $0x7c8] sm:$0xf0] }
 0x432   : > { %4178 = vmatpush.bf16.msrb.mxu1 %v10121_v53  ;;  %v10049_v30 = vor.u32 %v11667_v8, %v10048_v26  ;;  %v11679_v8 = vld [vmem:[#allocation7 + $0x794] sm:$0xf0]  ;;  %v11662_v1 = vld [vmem:[#allocation7 + $0x714] sm:$0xf] }
 0x433   : > { %v13334_v63 = vadd.f32 %v2467_v21, %v13270_v11  ;;  %3387 = vmatmul.bf16.gmra.mxu1 %v3141_v56  ;;  %3445 = vmatmul.bf16.gmra.mxu3 %v3141_v56  ;;  %v10112_v21 = vld [vmem:[#allocation7 + $0x7b0] sm:$0xf] }
 0x434   : > { %v2495_v39 = vpop.f32.mrf.mxu2  ;;  %4205 = vmatpush.bf16.msrb.mxu2 %v10077_v19  ;;  %v10113_v22 = vor.u32 %v11683_v31, %v10112_v21  ;;  %4150 = vmatpush.bf16.msrb.mxu0 %v10049_v30  ;;  %v10125_v19 = vor.u32 %v11684_v35, %v10122_v12  ;;  %v11664_v21 = vld [vmem:[#allocation7 + $0x724] sm:$0xf] }
 0x435   : > { %v11680_v31 = vld [vmem:[#allocation7 + $0x7a4] sm:$0xf] }
 0x436   : > { %v2524_v60 = vpop.f32.mrf.mxu3  ;;  %v2439_v24 = vpop.f32.mrf.mxu0  ;;  %4179 = vmatpush.bf16.msrb.mxu1 %v10113_v22  ;;  %4236 = vmatpush.bf16.msrb.mxu3 %v10125_v19  ;;  %v3478_v19 = vld [vmem:[#allocation2 + $0xe0] sm:$0xff] }
 0x437   : > { %v2525_v11 = vadd.f32 %v2524_v60, %v2495_v39  ;;  %v10058_v39 = vld [vmem:[#allocation7 + $0x748] sm:$0xf0] }
 0x438   : > { %v2468_v49 = vpop.f32.mrf.mxu1  ;;  %4206 = vmatpush.bf16.msrb.mxu2 %v10069_v41  ;;  %v3473_v41 = vld [vmem:[#allocation2 + $0x88] sm:$0xff] }
 0x439   : > { %v13337_v45 = vadd.f32 %v2525_v11, %v13273_v13  ;;  %v2469_v38 = vadd.f32 %v2468_v49, %v2439_v24  ;;  %v3472_v24 = vld [vmem:[#allocation2 + $0x80] sm:$0xff]  ;;  %v3487_v4 = vpack.c.bf16 %v3475_v51, %v3473_v41 }
 0x43a   : > { %v10040_v49 = vld [vmem:[#allocation7 + $0x720] sm:$0xf]  ;;  %4180 = vmatpush.bf16.msrb.mxu1 %v10105_v27  ;;  %4237 = vmatpush.bf16.msrb.mxu3 %v10117_v23 }
 0x43b   : > { %v13340_v15 = vadd.f32 %v2469_v38, %v13276_v5  ;;  %v11665_v38 = vld [vmem:[#allocation7 + $0x724] sm:$0xf0] }
 0x43c   : > { %v2497_v7 = vpop.f32.mrf.mxu2  ;;  %v10041_v32 = vor.u32 %v11665_v38, %v10040_v49  ;;  %v11677_v38 = vld [vmem:[#allocation7 + $0x784] sm:$0xf0] }
 0x43e   : > { %v2526_v13 = vpop.f32.mrf.mxu3  ;;  %v2883_v9 = vpop.f32.mrf.mxu0  ;;  %4151 = vmatpush.bf16.msrb.mxu0 %v10041_v32 }
 0x43f   : > { %v2527_v5 = vadd.f32 %v2526_v13, %v2497_v7  ;;  %v10050_v7 = vld [vmem:[#allocation7 + $0x738] sm:$0xf0]  ;;  %v3486_v13 = vpack.c.bf16 %v3474_v33, %v3472_v24  ;;  %v10088_v24 = vld [vmem:[#allocation7 + $0x780] sm:$0xf] }
 0x440   : > { %v2912_v16 = vpop.f32.mrf.mxu1  ;;  %v10053_v28 = vor.u32 %v11666_v10, %v10050_v7  ;;  %v10089_v32 = vor.u32 %v11677_v38, %v10088_v24  ;;  %v11678_v10 = vld [vmem:[#allocation7 + $0x794] sm:$0xf]  ;;  %v10098_v7 = vld [vmem:[#allocation7 + $0x798] sm:$0xf0] }
 0x441   : > { %v13343_v57 = vadd.f32 %v2527_v5, %v13283_v3  ;;  %v2913_v25 = vadd.f32 %v2912_v16, %v2883_v9  ;;  %3693 = vmatmul.bf16.vlgmr.msra.gmra.mxu0 %v3484_v43  ;;  %3751 = vmatmul.bf16.vlgmr.msra.gmra.mxu2 %v3484_v43  ;;  %v10061_v3 = vor.u32 %v11668_v36, %v10058_v39  ;;  %v10032_v43 = vld [vmem:[#allocation7 + $0x710] sm:$0xf]  ;;  %v11663_v16 = vld [vmem:[#allocation7 + $0x714] sm:$0xf0]  ;;  %v10106_v36 = vld [vmem:[#allocation7 + $0x7a8] sm:$0xf0] }
 0x442   : > { %v10033_v26 = vor.u32 %v11663_v16, %v10032_v43  ;;  %v10101_v37 = vor.u32 %v11678_v10, %v10098_v7  ;;  %v10090_v16 = vld [vmem:[#allocation7 + $0x788] sm:$0xf0]  ;;  %v11706_v24 = vld [vmem:[#allocation7 + $0x874] sm:$0xf] }
 0x443   : > { %v13346_v29 = vadd.f32 %v2913_v25, %v13286_v17  ;;  %3722 = vmatmul.bf16.vlgmr.msra.gmra.mxu1 %v3485_v61  ;;  %3780 = vmatmul.bf16.vlgmr.msra.gmra.mxu3 %v3485_v61  ;;  %v10096_v25 = vld [vmem:[#allocation7 + $0x790] sm:$0xf]  ;;  %v3483_v10 = vld [vmem:[#allocation2 + $0x128] sm:$0xff] }
 0x444   : > { %v2941_v56 = vpop.f32.mrf.mxu2  ;;  %4207 = vmatpush.bf16.msrb.mxu2 %v10061_v3  ;;  %v10097_v30 = vor.u32 %v11679_v8, %v10096_v25  ;;  %4152 = vmatpush.bf16.msrb.mxu0 %v10033_v26  ;;  %v10109_v3 = vor.u32 %v11680_v31, %v10106_v36  ;;  %v10208_v25 = vld [vmem:[#allocation7 + $0x870] sm:$0xf] }
 0x445   : > { %v10272_v8 = vld [vmem:[#allocation7 + $0x8f0] sm:$0xf] }
 0x446   : > { %v2970_v0 = vpop.f32.mrf.mxu3  ;;  %v2885_v40 = vpop.f32.mrf.mxu0  ;;  %4181 = vmatpush.bf16.msrb.mxu1 %v10097_v30  ;;  %4238 = vmatpush.bf16.msrb.mxu3 %v10109_v3  ;;  %v3482_v3 = vld [vmem:[#allocation2 + $0x120] sm:$0xff] }
 0x447   : > { %v2971_v17 = vadd.f32 %v2970_v0, %v2941_v56  ;;  %v10042_v56 = vld [vmem:[#allocation7 + $0x728] sm:$0xf0] }
 0x448   : > { %v2914_v18 = vpop.f32.mrf.mxu1  ;;  %4208 = vmatpush.bf16.msrb.mxu2 %v10053_v28  ;;  %v3477_v28 = vld [vmem:[#allocation2 + $0xc8] sm:$0xff] }
 0x449   : > { %v13349_v42 = vadd.f32 %v2971_v17, %v13289_v47  ;;  %v2915_v60 = vadd.f32 %v2914_v18, %v2885_v40  ;;  %v3476_v40 = vld [vmem:[#allocation2 + $0xc0] sm:$0xff]  ;;  %v3489_v23 = vpack.c.bf16 %v3479_v55, %v3477_v28 }
 0x44a   : > { %v10024_v18 = vld [vmem:[#allocation7 + $0x700] sm:$0xf]  ;;  %4182 = vmatpush.bf16.msrb.mxu1 %v10089_v32  ;;  %4239 = vmatpush.bf16.msrb.mxu3 %v10101_v37 }
 0x44b   : > { %v13352_v11 = vadd.f32 %v2915_v60, %v13292_v58  ;;  %v11661_v60 = vld [vmem:[#allocation7 + $0x704] sm:$0xf0] }
 0x44c   : > { %v2943_v48 = vpop.f32.mrf.mxu2  ;;  %v10025_v49 = vor.u32 %v11661_v60, %v10024_v18  ;;  %v11721_v60 = vld [vmem:[#allocation7 + $0x8e4] sm:$0xf0] }
 0x44e   : > { %v2972_v47 = vpop.f32.mrf.mxu3  ;;  %v2888_v53 = vpop.f32.mrf.mxu0  ;;  %4153 = vmatpush.bf16.msrb.mxu0 %v10025_v49 }
 0x44f   : > { %v2973_v58 = vadd.f32 %v2972_v47, %v2943_v48  ;;  %v10034_v48 = vld [vmem:[#allocation7 + $0x718] sm:$0xf0]  ;;  %v3488_v47 = vpack.c.bf16 %v3478_v19, %v3476_v40  ;;  %v10264_v40 = vld [vmem:[#allocation7 + $0x8e0] sm:$0xf] }
 0x450   : > { %v2917_v9 = vpop.f32.mrf.mxu1  ;;  %v10037_v50 = vor.u32 %v11662_v1, %v10034_v48  ;;  %v10265_v49 = vor.u32 %v11721_v60, %v10264_v40  ;;  %v11722_v1 = vld [vmem:[#allocation7 + $0x8f4] sm:$0xf]  ;;  %v10274_v48 = vld [vmem:[#allocation7 + $0x8f8] sm:$0xf0] }
 0x451   : > { %v13355_v59 = vadd.f32 %v2973_v58, %v13299_v54  ;;  %v2918_v62 = vadd.f32 %v2917_v9, %v2888_v53  ;;  %3698 = vmatmul.bf16.gmra.mxu0 %v3486_v13  ;;  %3756 = vmatmul.bf16.gmra.mxu2 %v3486_v13  ;;  %v10045_v54 = vor.u32 %v11664_v21, %v10042_v56  ;;  %v11660_v13 = vld [vmem:[#allocation7 + $0x704] sm:$0xf]  ;;  %v10026_v9 = vld [vmem:[#allocation7 + $0x708] sm:$0xf0]  ;;  %v11723_v21 = vld [vmem:[#allocation7 + $0x8f4] sm:$0xf0] }
 0x452   : > { %v10029_v43 = vor.u32 %v11660_v13, %v10026_v9  ;;  %v10277_v7 = vor.u32 %v11722_v1, %v10274_v48  ;;  %v11703_v13 = vld [vmem:[#allocation7 + $0x854] sm:$0xf0]  ;;  %v10256_v9 = vld [vmem:[#allocation7 + $0x8d0] sm:$0xf]  ;;  %v10184_v1 = vld [vmem:[#allocation7 + $0x840] sm:$0xf] }
 0x453   : > { %v13358_v5 = vadd.f32 %v2918_v62, %v13302_v6  ;;  %3727 = vmatmul.bf16.gmra.mxu1 %v3487_v4  ;;  %3785 = vmatmul.bf16.gmra.mxu3 %v3487_v4  ;;  %v11676_v62 = vld [vmem:[#allocation7 + $0x784] sm:$0xf]  ;;  %v11701_v48 = vld [vmem:[#allocation7 + $0x844] sm:$0xf0] }
 0x454   : > { %v2946_v61 = vpop.f32.mrf.mxu2  ;;  %4209 = vmatpush.bf16.msrb.mxu2 %v10045_v54  ;;  %v10093_v26 = vor.u32 %v11676_v62, %v10090_v16  ;;  %v10273_v54 = vor.u32 %v11723_v21, %v10272_v8  ;;  %v10202_v16 = vld [vmem:[#allocation7 + $0x868] sm:$0xf0] }
 0x455   : > { %v10266_v8 = vld [vmem:[#allocation7 + $0x8e8] sm:$0xf0] }
 0x456   : > { %v2975_v39 = vpop.f32.mrf.mxu3  ;;  %v2890_v22 = vpop.f32.mrf.mxu0  ;;  %4240 = vmatpush.bf16.msrb.mxu3 %v10093_v26  ;;  %4636 = vmatpush.bf16.msra.mxu1 %v10273_v54 }
 0x457   : > { %v2976_v6 = vadd.f32 %v2975_v39, %v2946_v61  ;;  %v11707_v61 = vld [vmem:[#allocation7 + $0x874] sm:$0xf0] }
 0x458   : > { %v2919_v35 = vpop.f32.mrf.mxu1  ;;  %4210 = vmatpush.bf16.msrb.mxu2 %v10037_v50  ;;  %v3481_v50 = vld [vmem:[#allocation2 + $0x108] sm:$0xff] }
 0x459   : > { %v13361_v12 = vadd.f32 %v2976_v6, %v13305_v44  ;;  %v2920_v0 = vadd.f32 %v2919_v35, %v2890_v22  ;;  %v3480_v22 = vld [vmem:[#allocation2 + $0x100] sm:$0xff]  ;;  %v3491_v37 = vpack.c.bf16 %v3483_v10, %v3481_v50 }
 0x45a   : > { %v10200_v35 = vld [vmem:[#allocation7 + $0x860] sm:$0xf]  ;;  %4637 = vmatpush.bf16.msra.mxu1 %v10265_v49  ;;  %4694 = vmatpush.bf16.msra.mxu3 %v10277_v7  ;;  %v10185_v7 = vor.u32 %v11701_v48, %v10184_v1 }
 0x45b   : > { %v13364_v17 = vadd.f32 %v2920_v0, %v13308_v14  ;;  %v11705_v0 = vld [vmem:[#allocation7 + $0x864] sm:$0xf0] }
 0x45c   : > { %v2948_v33 = vpop.f32.mrf.mxu2  ;;  %4211 = vmatpush.bf16.msrb.mxu2 %v10029_v43  ;;  %v10201_v18 = vor.u32 %v11705_v0, %v10200_v35  ;;  %v11719_v43 = vld [vmem:[#allocation7 + $0x8d4] sm:$0xf0] }
 0x45e   : > { %v2977_v44 = vpop.f32.mrf.mxu3  ;;  %v2893_v27 = vpop.f32.mrf.mxu0 }
 0x45f   : > { %v2978_v14 = vadd.f32 %v2977_v44, %v2948_v33  ;;  %v10210_v33 = vld [vmem:[#allocation7 + $0x878] sm:$0xf0]  ;;  %v3490_v44 = vpack.c.bf16 %v3482_v3, %v3480_v22 }
 0x460   : > { %v2922_v53 = vpop.f32.mrf.mxu1  ;;  %v10213_v38 = vor.u32 %v11706_v24, %v10210_v33 }
 0x461   : > { %v13367_v41 = vadd.f32 %v2978_v14, %v13315_v34  ;;  %v2923_v51 = vadd.f32 %v2922_v53, %v2893_v27  ;;  %3703 = vmatmul.bf16.gmra.mxu0 %v3488_v47  ;;  %3761 = vmatmul.bf16.gmra.mxu2 %v3488_v47  ;;  %v10209_v34 = vor.u32 %v11707_v61, %v10208_v25  ;;  %v3817_v47 = vld [vmem:[#allocation2 + $0x40] sm:$0xfe]  ;;  %v3819_v53 = vld [vmem:[#allocation2 + $0x50] sm:$0x1] }
 0x462   : > { %4665 = vmatpush.bf16.msra.mxu2 %v10213_v38  ;;  %v3823_v25 = vld [vmem:[#allocation2 + $0x70] sm:$0x1]  ;;  %v10257_v61 = vor.u32 %v11719_v43, %v10256_v9  ;;  %v3881_v3 = vrot.slane %v3817_v47, 1  ;;  %v3882_v35 = vrot.slane %v3819_v53, 1  ;;  %v10258_v47 = vld [vmem:[#allocation7 + $0x8d8] sm:$0xf0] }
 0x463   : > { %v13370_v58 = vadd.f32 %v2923_v51, %v13318_v2  ;;  %3732 = vmatmul.bf16.gmra.mxu1 %v3489_v23  ;;  %3790 = vmatmul.bf16.gmra.mxu3 %v3489_v23  ;;  %v3821_v51 = vld [vmem:[#allocation2 + $0x60] sm:$0xfe]  ;;  %v10192_v23 = vld [vmem:[#allocation7 + $0x850] sm:$0xf]  ;;  %v3888_v40 = vrot.slane %v3823_v25, 1 }
 0x464   : > { %v2951_v4 = vpop.f32.mrf.mxu2  ;;  %4607 = vmatpush.bf16.msra.mxu0 %v10209_v34  ;;  %v11720_v34 = vld [vmem:[#allocation7 + $0x8e4] sm:$0xf]  ;;  %4638 = vmatpush.bf16.msra.mxu1 %v10257_v61  ;;  %v3887_v0 = vrot.slane %v3821_v51, 1  ;;  %v3883_v50 = vsel %vm1076_vm14, %v3881_v3, %v3882_v35  ;;  %v10250_v35 = vld [vmem:[#allocation7 + $0x8c8] sm:$0xf0] }
 0x465   : > { %v3825_v61 = vld [vmem:[#allocation2 + $0x80] sm:$0xfe] }
 0x466   : > { %v2980_v56 = vpop.f32.mrf.mxu3  ;;  %v2895_v30 = vpop.f32.mrf.mxu0  ;;  %v3889_v10 = vsel %vm1076_vm14, %v3887_v0, %v3888_v40  ;;  %v11716_v3 = vld [vmem:[#allocation7 + $0x8c4] sm:$0xf]  ;;  %v3826_v40 = vld [vmem:[#allocation2 + $0x88] sm:$0xfe]  ;;  %v3893_v48 = vrot.slane %v3825_v61, 1 }
 0x467   : > { %v2981_v2 = vadd.f32 %v2980_v56, %v2951_v4  ;;  %v10193_v4 = vor.u32 %v11703_v13, %v10192_v23  ;;  %v3818_v56 = vld [vmem:[#allocation2 + $0x48] sm:$0xfe]  ;;  %v10242_v61 = vld [vmem:[#allocation7 + $0x8b8] sm:$0xf0] }
 0x468   : > { %v2924_v31 = vpop.f32.mrf.mxu1  ;;  %4608 = vmatpush.bf16.msra.mxu0 %v10201_v18  ;;  %v3884_v60 = vrot.slane %v3818_v56, 1 }
 0x469   : > { %v13373_v36 = vadd.f32 %v2981_v2, %v13321_v46  ;;  %v2925_v39 = vadd.f32 %v2924_v31, %v2895_v30  ;;  %v10269_v30 = vor.u32 %v11720_v34, %v10266_v8  ;;  %v3820_v2 = vld [vmem:[#allocation2 + $0x58] sm:$0x1]  ;;  %v3822_v31 = vld [vmem:[#allocation2 + $0x68] sm:$0xfe]  ;;  %v3829_v34 = vld [vmem:[#allocation2 + $0xa0] sm:$0xfe] }
 0x46a   : > { %v3885_v24 = vrot.slane %v3820_v2, 1  ;;  %v3890_v33 = vrot.slane %v3822_v31, 1  ;;  %v10176_v8 = vld [vmem:[#allocation7 + $0x830] sm:$0xf]  ;;  %v10186_v2 = vld [vmem:[#allocation7 + $0x848] sm:$0xf0] }
 0x46b   : > { %v13376_v6 = vadd.f32 %v2925_v39, %v13324_v52  ;;  %v3824_v39 = vld [vmem:[#allocation2 + $0x78] sm:$0x1]  ;;  %4695 = vmatpush.bf16.msra.mxu3 %v10269_v30  ;;  %v3831_v31 = vld [vmem:[#allocation2 + $0xb0] sm:$0x1] }
 0x46c   : > { %v2953_v19 = vpop.f32.mrf.mxu2  ;;  %4609 = vmatpush.bf16.msra.mxu0 %v10193_v4  ;;  %v3891_v49 = vrot.slane %v3824_v39, 1 }
 0x46e   : > { %v2982_v46 = vpop.f32.mrf.mxu3  ;;  %v2898_v32 = vpop.f32.mrf.mxu0  ;;  %v3892_v23 = vsel %vm1076_vm14, %v3890_v33, %v3891_v49  ;;  %v3830_v33 = vld [vmem:[#allocation2 + $0xa8] sm:$0xfe]  ;;  %v3832_v49 = vld [vmem:[#allocation2 + $0xb8] sm:$0x1] }
 0x46f   : > { %v2983_v52 = vadd.f32 %v2982_v46, %v2953_v19  ;;  %v10248_v46 = vld [vmem:[#allocation7 + $0x8c0] sm:$0xf] }
 0x470   : > { %v2927_v27 = vpop.f32.mrf.mxu1  ;;  %4610 = vmatpush.bf16.msra.mxu0 %v10185_v7 }
 0x471   : > { %v13379_v28 = vadd.f32 %v2983_v52, %v13331_v20  ;;  %v2928_v55 = vadd.f32 %v2927_v27, %v2898_v32  ;;  %3708 = vmatmul.bf16.gmra.mxu0 %v3490_v44  ;;  %3766 = vmatmul.bf16.gmra.mxu2 %v3490_v44  ;;  %v11704_v20 = vld [vmem:[#allocation7 + $0x864] sm:$0xf]  ;;  %v11717_v52 = vld [vmem:[#allocation7 + $0x8c4] sm:$0xf0]  ;;  %v10194_v44 = vld [vmem:[#allocation7 + $0x858] sm:$0xf0] }
 0x472   : > { %v10205_v26 = vor.u32 %v11704_v20, %v10202_v16  ;;  %v10249_v27 = vor.u32 %v11717_v52, %v10248_v46  ;;  %v3896_v52 = vrot.slane %v3826_v40, 1 }
 0x473   : > { %v13382_v14 = vadd.f32 %v2928_v55, %v13334_v63  ;;  %3737 = vmatmul.bf16.gmra.mxu1 %v3491_v37  ;;  %3795 = vmatmul.bf16.gmra.mxu3 %v3491_v37  ;;  %v11718_v37 = vld [vmem:[#allocation7 + $0x8d4] sm:$0xf] }
 0x474   : > { %v2956_v62 = vpop.f32.mrf.mxu2  ;;  %4666 = vmatpush.bf16.msra.mxu2 %v10205_v26  ;;  %v10261_v13 = vor.u32 %v11718_v37, %v10258_v47  ;;  %4639 = vmatpush.bf16.msra.mxu1 %v10249_v27  ;;  %v3827_v26 = vld [vmem:[#allocation2 + $0x90] sm:$0x1]  ;;  %v3903_v27 = vrot.slane %v3832_v49, 1  ;;  %v10168_v37 = vld [vmem:[#allocation7 + $0x820] sm:$0xf] }
 0x475   : > { %v3894_v46 = vrot.slane %v3827_v26, 1  ;;  %v11697_v47 = vld [vmem:[#allocation7 + $0x824] sm:$0xf0] }
 0x476   : > { %v2985_v63 = vpop.f32.mrf.mxu3  ;;  %v2900_v21 = vpop.f32.mrf.mxu0  ;;  %4696 = vmatpush.bf16.msra.mxu3 %v10261_v13  ;;  %v10169_v13 = vor.u32 %v11697_v47, %v10168_v37 }
 0x477   : > { %v2986_v54 = vadd.f32 %v2985_v63, %v2956_v62  ;;  %v3945_v62 = vpack.c.bf16 %v3889_v10, %v3883_v50  ;;  %v11699_v63 = vld [vmem:[#allocation7 + $0x834] sm:$0xf0]  ;;  %v3900_v50 = vrot.slane %v3831_v31, 1 }
 0x478   : > { %v2929_v22 = vpop.f32.mrf.mxu1  ;;  %v10177_v30 = vor.u32 %v11699_v63, %v10176_v8 }
 0x479   : > { %v13385_v19 = vadd.f32 %v2986_v54, %v13337_v45  ;;  %v2930_v18 = vadd.f32 %v2929_v22, %v2900_v21  ;;  %v11702_v45 = vld [vmem:[#allocation7 + $0x854] sm:$0xf]  ;;  %v10240_v21 = vld [vmem:[#allocation7 + $0x8b0] sm:$0xf]  ;;  %v11715_v54 = vld [vmem:[#allocation7 + $0x8b4] sm:$0xf0] }
 0x47a   : > { %v10197_v55 = vor.u32 %v11702_v45, %v10194_v44  ;;  %v10241_v39 = vor.u32 %v11715_v54, %v10240_v21  ;;  %4611 = vmatpush.bf16.msra.mxu0 %v10177_v30  ;;  %v3902_v44 = vrot.slane %v3830_v33, 1  ;;  %v3839_v33 = vld [vmem:[#allocation2 + $0xf0] sm:$0x1] }
 0x47b   : > { %v13388_v38 = vadd.f32 %v2930_v18, %v13340_v15  ;;  %v3886_v15 = vsel %vm1076_vm14, %v3884_v60, %v3885_v24  ;;  %v10253_v18 = vor.u32 %v11716_v3, %v10250_v35  ;;  %v3828_v24 = vld [vmem:[#allocation2 + $0x98] sm:$0x1]  ;;  %v3837_v3 = vld [vmem:[#allocation2 + $0xe0] sm:$0xfe]  ;;  %v10160_v35 = vld [vmem:[#allocation7 + $0x810] sm:$0xf] }
 0x47c   : > { %v2958_v32 = vpop.f32.mrf.mxu2  ;;  %4667 = vmatpush.bf16.msra.mxu2 %v10197_v55  ;;  %v3946_v16 = vpack.c.bf16 %v3892_v23, %v3886_v15  ;;  %4640 = vmatpush.bf16.msra.mxu1 %v10241_v39  ;;  %v3897_v45 = vrot.slane %v3828_v24, 1  ;;  %v3895_v15 = vsel %vm1076_vm14, %v3893_v48, %v3894_v46  ;;  %v3904_v8 = vsel %vm1076_vm14, %v3902_v44, %v3903_v27  ;;  %v3833_v39 = vld [vmem:[#allocation2 + $0xc0] sm:$0xfe]  ;;  %v10170_v24 = vld [vmem:[#allocation7 + $0x828] sm:$0xf0] }
 0x47d   : > { %4697 = vmatpush.bf16.msra.mxu3 %v10253_v18  ;;  %v11712_v48 = vld [vmem:[#allocation7 + $0x8a4] sm:$0xf]  ;;  %v10234_v46 = vld [vmem:[#allocation7 + $0x8a8] sm:$0xf0]  ;;  %v3840_v27 = vld [vmem:[#allocation2 + $0xf8] sm:$0x1] }
 0x47e   : > { %v2987_v53 = vpop.f32.mrf.mxu3  ;;  %v3344_v51 = vpop.f32.mrf.mxu0  ;;  %4612 = vmatpush.bf16.msra.mxu0 %v10169_v13  ;;  %v3838_v44 = vld [vmem:[#allocation2 + $0xe8] sm:$0xfe]  ;;  %v3905_v47 = vrot.slane %v3833_v39, 1  ;;  %v10226_v39 = vld [vmem:[#allocation7 + $0x898] sm:$0xf0] }
 0x47f   : > { %v2988_v9 = vadd.f32 %v2987_v53, %v2958_v32  ;;  %v3899_v32 = vrot.slane %v3829_v34, 1  ;;  %v10232_v53 = vld [vmem:[#allocation7 + $0x8a0] sm:$0xf] }
 0x480   : > { %v3373_v4 = vpop.f32.mrf.mxu1 }
 0x481   : > { %v13395_v43 = vadd.f32 %v2988_v9, %v13343_v57  ;;  %v3374_v20 = vadd.f32 %v3373_v4, %v3344_v51  ;;  %4154 = vmatmul.bf16.vlgmr.msrb.gmra.mxu0 %v3945_v62  ;;  %4212 = vmatmul.bf16.vlgmr.msrb.gmra.mxu2 %v3945_v62  ;;  %v11700_v57 = vld [vmem:[#allocation7 + $0x844] sm:$0xf]  ;;  %v3901_v23 = vsel %vm1076_vm14, %v3899_v32, %v3900_v50  ;;  %v11713_v9 = vld [vmem:[#allocation7 + $0x8a4] sm:$0xf0]  ;;  %v10178_v62 = vld [vmem:[#allocation7 + $0x838] sm:$0xf0] }
 0x482   : > { %v10189_v22 = vor.u32 %v11700_v57, %v10186_v2  ;;  %v10233_v4 = vor.u32 %v11713_v9, %v10232_v53  ;;  %v3834_v50 = vld [vmem:[#allocation2 + $0xc8] sm:$0xfe] }
 0x483   : > { %v13398_v25 = vadd.f32 %v3374_v20, %v13346_v29  ;;  %4183 = vmatmul.bf16.vlgmr.msrb.gmra.mxu1 %v3946_v16  ;;  %4241 = vmatmul.bf16.vlgmr.msrb.gmra.mxu3 %v3946_v16  ;;  %v11714_v16 = vld [vmem:[#allocation7 + $0x8b4] sm:$0xf]  ;;  %v3908_v9 = vrot.slane %v3834_v50, 1  ;;  %v10218_v50 = vld [vmem:[#allocation7 + $0x888] sm:$0xf0] }
 0x484   : > { %v3402_v56 = vpop.f32.mrf.mxu2  ;;  %4668 = vmatpush.bf16.msra.mxu2 %v10189_v22  ;;  %v10245_v63 = vor.u32 %v11714_v16, %v10242_v61  ;;  %4641 = vmatpush.bf16.msra.mxu1 %v10233_v4  ;;  %v3835_v22 = vld [vmem:[#allocation2 + $0xd0] sm:$0x1]  ;;  %v3915_v4 = vrot.slane %v3840_v27, 1  ;;  %v10152_v16 = vld [vmem:[#allocation7 + $0x800] sm:$0xf] }
 0x485   : > { %v3906_v53 = vrot.slane %v3835_v22, 1  ;;  %v11693_v61 = vld [vmem:[#allocation7 + $0x804] sm:$0xf0] }
 0x486   : > { %v3431_v29 = vpop.f32.mrf.mxu3  ;;  %v3346_v0 = vpop.f32.mrf.mxu0  ;;  %4698 = vmatpush.bf16.msra.mxu3 %v10245_v63  ;;  %v10153_v63 = vor.u32 %v11693_v61, %v10152_v16 }
 0x487   : > { %v3432_v60 = vadd.f32 %v3431_v29, %v3402_v56  ;;  %v3947_v56 = vpack.c.bf16 %v3901_v23, %v3895_v15  ;;  %v11695_v29 = vld [vmem:[#allocation7 + $0x814] sm:$0xf0]  ;;  %v3912_v15 = vrot.slane %v3839_v33, 1 }
 0x488   : > { %v3375_v1 = vpop.f32.mrf.mxu1  ;;  %v10161_v18 = vor.u32 %v11695_v29, %v10160_v35 }
 0x489   : > { %v13401_v10 = vadd.f32 %v3432_v60, %v13349_v42  ;;  %v3376_v7 = vadd.f32 %v3375_v1, %v3346_v0  ;;  %v11698_v42 = vld [vmem:[#allocation7 + $0x834] sm:$0xf]  ;;  %v10224_v0 = vld [vmem:[#allocation7 + $0x890] sm:$0xf]  ;;  %v11711_v60 = vld [vmem:[#allocation7 + $0x894] sm:$0xf0] }
 0x48a   : > { %v10181_v20 = vor.u32 %v11698_v42, %v10178_v62  ;;  %v10225_v49 = vor.u32 %v11711_v60, %v10224_v0  ;;  %4613 = vmatpush.bf16.msra.mxu0 %v10161_v18  ;;  %v3914_v62 = vrot.slane %v3838_v44, 1 }
 0x48b   : > { %v13404_v55 = vadd.f32 %v3376_v7, %v13352_v11  ;;  %v3898_v11 = vsel %vm1076_vm14, %v3896_v52, %v3897_v45  ;;  %v10237_v7 = vor.u32 %v11712_v48, %v10234_v46  ;;  %v3836_v45 = vld [vmem:[#allocation2 + $0xd8] sm:$0x1]  ;;  %v11708_v48 = vld [vmem:[#allocation7 + $0x884] sm:$0xf] }
 0x48c   : > { %v3404_v51 = vpop.f32.mrf.mxu2  ;;  %4669 = vmatpush.bf16.msra.mxu2 %v10181_v20  ;;  %v3948_v2 = vpack.c.bf16 %v3904_v8, %v3898_v11  ;;  %4642 = vmatpush.bf16.msra.mxu1 %v10225_v49  ;;  %v3909_v42 = vrot.slane %v3836_v45, 1  ;;  %v3907_v11 = vsel %vm1076_vm14, %v3905_v47, %v3906_v53  ;;  %v3916_v35 = vsel %vm1076_vm14, %v3914_v62, %v3915_v4  ;;  %v11692_v49 = vld [vmem:[#allocation7 + $0x804] sm:$0xf]  ;;  %v3846_v53 = vld [vmem:[#allocation2 + $0x128] sm:$0xfe] }
 0x48d   : > { %4699 = vmatpush.bf16.msra.mxu3 %v10237_v7  ;;  %v3843_v7 = vld [vmem:[#allocation2 + $0x110] sm:$0x1]  ;;  %v10221_v45 = vor.u32 %v11708_v48, %v10218_v50 }
 0x48e   : > { %v3433_v26 = vpop.f32.mrf.mxu3  ;;  %v3349_v34 = vpop.f32.mrf.mxu0  ;;  %4614 = vmatpush.bf16.msra.mxu0 %v10153_v63 }
 0x48f   : > { %v3434_v21 = vadd.f32 %v3433_v26, %v3404_v51  ;;  %v3911_v51 = vrot.slane %v3837_v3, 1  ;;  %v10216_v26 = vld [vmem:[#allocation7 + $0x880] sm:$0xf] }
 0x490   : > { %v3378_v30 = vpop.f32.mrf.mxu1 }
 0x491   : > { %v13411_v54 = vadd.f32 %v3434_v21, %v13355_v59  ;;  %v3379_v57 = vadd.f32 %v3378_v30, %v3349_v34  ;;  %4159 = vmatmul.bf16.gmra.mxu0 %v3947_v56  ;;  %4217 = vmatmul.bf16.gmra.mxu2 %v3947_v56  ;;  %v11696_v59 = vld [vmem:[#allocation7 + $0x824] sm:$0xf]  ;;  %v3913_v8 = vsel %vm1076_vm14, %v3911_v51, %v3912_v15  ;;  %v11709_v21 = vld [vmem:[#allocation7 + $0x884] sm:$0xf0]  ;;  %v10162_v56 = vld [vmem:[#allocation7 + $0x818] sm:$0xf0] }
 0x492   : > { %v10173_v1 = vor.u32 %v11696_v59, %v10170_v24  ;;  %v10217_v30 = vor.u32 %v11709_v21, %v10216_v26  ;;  %v3848_v51 = vld [vmem:[#allocation2 + $0x138] sm:$0x1] }
 0x493   : > { %v13414_v31 = vadd.f32 %v3379_v57, %v13358_v5  ;;  %4188 = vmatmul.bf16.gmra.mxu1 %v3948_v2  ;;  %4246 = vmatmul.bf16.gmra.mxu3 %v3948_v2  ;;  %v11710_v2 = vld [vmem:[#allocation7 + $0x894] sm:$0xf] }
 0x494   : > { %v3407_v40 = vpop.f32.mrf.mxu2  ;;  %4670 = vmatpush.bf16.msra.mxu2 %v10173_v1  ;;  %v10229_v29 = vor.u32 %v11710_v2, %v10226_v39  ;;  %4643 = vmatpush.bf16.msra.mxu1 %v10217_v30  ;;  %v10154_v1 = vld [vmem:[#allocation7 + $0x808] sm:$0xf0] }
 0x496   : > { %v3436_v5 = vpop.f32.mrf.mxu3  ;;  %v3351_v32 = vpop.f32.mrf.mxu0  ;;  %4700 = vmatpush.bf16.msra.mxu3 %v10229_v29 }
 0x497   : > { %v3437_v52 = vadd.f32 %v3436_v5, %v3407_v40  ;;  %v3949_v40 = vpack.c.bf16 %v3913_v8, %v3907_v11  ;;  %v3841_v5 = vld [vmem:[#allocation2 + $0x100] sm:$0xfe]  ;;  %v3927_v11 = vrot.slane %v3848_v51, 1 }
 0x498   : > { %v3380_v37 = vpop.f32.mrf.mxu1 }
 0x499   : > { %v13417_v23 = vadd.f32 %v3437_v52, %v13361_v12  ;;  %v3381_v13 = vadd.f32 %v3380_v37, %v3351_v32  ;;  %v11694_v12 = vld [vmem:[#allocation7 + $0x814] sm:$0xf]  ;;  %v10157_v32 = vor.u32 %v11692_v49, %v10154_v1  ;;  %v3845_v52 = vld [vmem:[#allocation2 + $0x120] sm:$0xfe]  ;;  %v3842_v37 = vld [vmem:[#allocation2 + $0x108] sm:$0xfe] }
 0x49a   : > { %v10165_v57 = vor.u32 %v11694_v12, %v10162_v56  ;;  %4701 = vmatpush.bf16.msra.mxu3 %v10221_v45  ;;  %v3920_v61 = vrot.slane %v3842_v37, 1  ;;  %v4279_v1 = vld [vmem:[#allocation2 + $0x48] sm:$0xfc] }
 0x49b   : > { %v13420_v20 = vadd.f32 %v3381_v13, %v13364_v17  ;;  %v3910_v17 = vsel %vm1076_vm14, %v3908_v9, %v3909_v42  ;;  %v3917_v13 = vrot.slane %v3841_v5, 1  ;;  %v3918_v9 = vrot.slane %v3843_v7, 1  ;;  %v4285_v5 = vld [vmem:[#allocation2 + $0x78] sm:$0x3] }
 0x49c   : > { %v3409_v34 = vpop.f32.mrf.mxu2  ;;  %4671 = vmatpush.bf16.msra.mxu2 %v10165_v57  ;;  %v3950_v24 = vpack.c.bf16 %v3916_v35, %v3910_v17  ;;  %v3923_v42 = vrot.slane %v3845_v52, 1 }
 0x49d   : > { %v3919_v21 = vsel %vm1076_vm14, %v3917_v13, %v3918_v9 }
 0x49e   : > { %v3438_v22 = vpop.f32.mrf.mxu3  ;;  %v3354_v3 = vpop.f32.mrf.mxu0 }
 0x49f   : > { %v3439_v0 = vadd.f32 %v3438_v22, %v3409_v34  ;;  %v3926_v34 = vrot.slane %v3846_v53, 1 }
 0x4a0   : > { %v3383_v18 = vpop.f32.mrf.mxu1  ;;  %4672 = vmatpush.bf16.msra.mxu2 %v10157_v32 }
 0x4a1   : > { %v13427_v60 = vadd.f32 %v3439_v0, %v13367_v41  ;;  %v3384_v59 = vadd.f32 %v3383_v18, %v3354_v3  ;;  %4164 = vmatmul.bf16.gmra.mxu0 %v3949_v40  ;;  %4222 = vmatmul.bf16.gmra.mxu2 %v3949_v40  ;;  %v3847_v41 = vld [vmem:[#allocation2 + $0x130] sm:$0x1]  ;;  %v4278_v0 = vld [vmem:[#allocation2 + $0x40] sm:$0xfc] }
 0x4a2   : > { %v3924_v62 = vrot.slane %v3847_v41, 1  ;;  %v4280_v40 = vld [vmem:[#allocation2 + $0x50] sm:$0x3]  ;;  %v4282_v18 = vld [vmem:[#allocation2 + $0x60] sm:$0xfc]  ;;  %v4342_v50 = vrot.slane %v4278_v0, 2 }
 0x4a3   : > { %v13430_v33 = vadd.f32 %v3384_v59, %v13370_v58  ;;  %4193 = vmatmul.bf16.gmra.mxu1 %v3950_v24  ;;  %4251 = vmatmul.bf16.gmra.mxu3 %v3950_v24  ;;  %v3844_v58 = vld [vmem:[#allocation2 + $0x118] sm:$0x1]  ;;  %v4284_v59 = vld [vmem:[#allocation2 + $0x70] sm:$0x3]  ;;  %v4343_v7 = vrot.slane %v4280_v40, 2  ;;  %v4348_v52 = vrot.slane %v4282_v18, 2 }
 0x4a4   : > { %v3412_v46 = vpop.f32.mrf.mxu2  ;;  %v3921_v26 = vrot.slane %v3844_v58, 1  ;;  %v3925_v12 = vsel %vm1076_vm14, %v3923_v42, %v3924_v62 }
 0x4a5   : > { %v3951_v39 = vpack.c.bf16 %v3925_v12, %v3919_v21  ;;  %v4344_v51 = vsel %vm1798_vm8, %v4342_v50, %v4343_v7  ;;  %v4286_v21 = vld [vmem:[#allocation2 + $0x80] sm:$0xfc]  ;;  %v4288_v12 = vld [vmem:[#allocation2 + $0x90] sm:$0x3] }
 0x4a6   : > { %v3441_v44 = vpop.f32.mrf.mxu3  ;;  %v3356_v27 = vpop.f32.mrf.mxu0  ;;  %v3922_v57 = vsel %vm1076_vm14, %v3920_v61, %v3921_v26 }
 0x4a7   : > { %v3442_v47 = vadd.f32 %v3441_v44, %v3412_v46  ;;  %v4283_v46 = vld [vmem:[#allocation2 + $0x68] sm:$0xfc]  ;;  %v4345_v44 = vrot.slane %v4279_v1, 2 }
 0x4a8   : > { %v3385_v15 = vpop.f32.mrf.mxu1  ;;  %v4351_v37 = vrot.slane %v4283_v46, 2 }
 0x4a9   : > { %v13433_v4 = vadd.f32 %v3442_v47, %v13373_v36  ;;  %v3386_v16 = vadd.f32 %v3385_v15, %v3356_v27  ;;  %v3928_v36 = vsel %vm1076_vm14, %v3926_v34, %v3927_v11  ;;  %v4352_v47 = vrot.slane %v4285_v5, 2 }
 0x4ab   : > { %v13436_v8 = vadd.f32 %v3386_v16, %v13376_v6  ;;  %v3952_v6 = vpack.c.bf16 %v3928_v36, %v3922_v57 }
 0x4ac   : > { %v3414_v63 = vpop.f32.mrf.mxu2 }
 0x4ae   : > { %v3443_v56 = vpop.f32.mrf.mxu3  ;;  %v3359_v30 = vpop.f32.mrf.mxu0 }
 0x4af   : > { %v3444_v2 = vadd.f32 %v3443_v56, %v3414_v63  ;;  %v4290_v56 = vld [vmem:[#allocation2 + $0xa0] sm:$0xfc] }
 0x4b0   : > { %v3388_v22 = vpop.f32.mrf.mxu1  ;;  %v4360_v0 = vrot.slane %v4290_v56, 2 }
 0x4b1   : > { %v13443_v3 = vadd.f32 %v3444_v2, %v13379_v28  ;;  %v3389_v17 = vadd.f32 %v3388_v22, %v3359_v30  ;;  %4169 = vmatmul.bf16.gmra.mxu0 %v3951_v39  ;;  %4227 = vmatmul.bf16.gmra.mxu2 %v3951_v39  ;;  %v4281_v28 = vld [vmem:[#allocation2 + $0x58] sm:$0x3]  ;;  %v4292_v30 = vld [vmem:[#allocation2 + $0xb0] sm:$0x3]  ;;  %v4287_v2 = vld [vmem:[#allocation2 + $0x88] sm:$0xfc] }
 0x4b2   : > { %v4346_v27 = vrot.slane %v4281_v28, 2  ;;  %v4289_v39 = vld [vmem:[#allocation2 + $0x98] sm:$0x3]  ;;  %v4291_v22 = vld [vmem:[#allocation2 + $0xa8] sm:$0xfc]  ;;  %v4361_v40 = vrot.slane %v4292_v30, 2 }
 0x4b3   : > { %v13446_v35 = vadd.f32 %v3389_v17, %v13382_v14  ;;  %4198 = vmatmul.bf16.gmra.mxu1 %v3952_v6  ;;  %4256 = vmatmul.bf16.gmra.mxu3 %v3952_v6  ;;  %v4349_v14 = vrot.slane %v4284_v59, 2  ;;  %v4293_v17 = vld [vmem:[#allocation2 + $0xb8] sm:$0x3]  ;;  %v4357_v59 = vrot.slane %v4287_v2, 2 }
 0x4b4   : > { %v3417_v29 = vpop.f32.mrf.mxu2  ;;  %v4347_v42 = vsel %vm1798_vm8, %v4345_v44, %v4346_v27  ;;  %v4364_v1 = vrot.slane %v4293_v17, 2  ;;  %v4362_v46 = vsel %vm1798_vm8, %v4360_v0, %v4361_v40 }
 0x4b5   : > { %v4350_v15 = vsel %vm1798_vm8, %v4348_v52, %v4349_v14 }
 0x4b6   : > { %v3446_v24 = vpop.f32.mrf.mxu3  ;;  %v3361_v49 = vpop.f32.mrf.mxu0  ;;  %v4406_v16 = vpack.c.bf16 %v4350_v15, %v4344_v51  ;;  %v4300_v51 = vld [vmem:[#allocation2 + $0xf0] sm:$0x3] }
 0x4b7   : > { %v3447_v48 = vadd.f32 %v3446_v24, %v3417_v29  ;;  %v4354_v29 = vrot.slane %v4286_v21, 2  ;;  %v4358_v24 = vrot.slane %v4289_v39, 2 }
 0x4b8   : > { %v3390_v32 = vpop.f32.mrf.mxu1 }
 0x4b9   : > { %v13449_v41 = vadd.f32 %v3447_v48, %v13385_v19  ;;  %v3391_v45 = vadd.f32 %v3390_v32, %v3361_v49  ;;  %v4353_v19 = vsel %vm1798_vm8, %v4351_v37, %v4352_v47  ;;  %v4363_v49 = vrot.slane %v4291_v22, 2  ;;  %v4294_v37 = vld [vmem:[#allocation2 + $0xc0] sm:$0xfc]  ;;  %v4296_v47 = vld [vmem:[#allocation2 + $0xd0] sm:$0x3] }
 0x4ba   : > { %v4359_v50 = vsel %vm1798_vm8, %v4357_v59, %v4358_v24 }
 0x4bb   : > { %v13452_v58 = vadd.f32 %v3391_v45, %v13388_v38  ;;  %v4407_v38 = vpack.c.bf16 %v4353_v19, %v4347_v42  ;;  %v4365_v7 = vsel %vm1798_vm8, %v4363_v49, %v4364_v1  ;;  %v4297_v19 = vld [vmem:[#allocation2 + $0xd8] sm:$0x3]  ;;  %v4302_v1 = vld [vmem:[#allocation2 + $0x100] sm:$0xfc] }
 0x4bc   : > { %v3419_v53 = vpop.f32.mrf.mxu2  ;;  %v4409_v45 = vpack.c.bf16 %v4365_v7, %v4359_v50  ;;  %v4370_v56 = vrot.slane %v4297_v19, 2 }
 0x4bd   : > { %14451 = vst [vmem:[#allocation22_spill] sm:$0xff] %v13452_v58 }
 0x4be   : > { %v3448_v13 = vpop.f32.mrf.mxu3  ;;  %v3694_v9 = vpop.f32.mrf.mxu0 }
 0x4bf   : > { %v3449_v62 = vadd.f32 %v3448_v13, %v3419_v53  ;;  %v4298_v53 = vld [vmem:[#allocation2 + $0xe0] sm:$0xfc] }
 0x4c0   : > { %v3723_v61 = vpop.f32.mrf.mxu1 }
 0x4c1   : > { %v13459_v26 = vadd.f32 %v3449_v62, %v13395_v43  ;;  %v3724_v34 = vadd.f32 %v3723_v61, %v3694_v9  ;;  %4615 = vmatmul.bf16.vlgmr.msra.gmra.mxu0 %v4406_v16  ;;  %4673 = vmatmul.bf16.vlgmr.msra.gmra.mxu2 %v4406_v16  ;;  %v4295_v9 = vld [vmem:[#allocation2 + $0xc8] sm:$0xfc]  ;;  %v4301_v16 = vld [vmem:[#allocation2 + $0xf8] sm:$0x3] }
 0x4c2   : > { %v4299_v62 = vld [vmem:[#allocation2 + $0xe8] sm:$0xfc] }
 0x4c3   : > { %14452 = vst [vmem:[#allocation23_spill] sm:$0xff] %v13459_v26  ;;  %v13462_v11 = vadd.f32 %v3724_v34, %v13398_v25  ;;  %4644 = vmatmul.bf16.vlgmr.msra.gmra.mxu1 %v4407_v38  ;;  %4702 = vmatmul.bf16.vlgmr.msra.gmra.mxu3 %v4407_v38  ;;  %v4355_v25 = vrot.slane %v4288_v12, 2  ;;  %v4366_v34 = vrot.slane %v4294_v37, 2  ;;  %v4372_v38 = vrot.slane %v4298_v53, 2 }
 0x4c4   : > { %v3752_v63 = vpop.f32.mrf.mxu2  ;;  %v4369_v12 = vrot.slane %v4295_v9, 2  ;;  %v4375_v30 = vrot.slane %v4299_v62, 2 }
 0x4c5   : > { %v4356_v28 = vsel %vm1798_vm8, %v4354_v29, %v4355_v25 }
 0x4c6   : > { %v3781_v57 = vpop.f32.mrf.mxu3  ;;  %v13464_v36 = vpop.f32.mrf.mxu0  ;;  %v4408_v52 = vpack.c.bf16 %v4362_v46, %v4356_v28  ;;  %v4371_v29 = vsel %vm1798_vm8, %v4369_v12, %v4370_v56  ;;  %v4304_v28 = vld [vmem:[#allocation2 + $0x110] sm:$0x3]  ;;  %v4306_v46 = vld [vmem:[#allocation2 + $0x120] sm:$0xfc] }
 0x4c7   : > { %v3782_v43 = vadd.f32 %v3781_v57, %v3752_v63  ;;  %v4373_v63 = vrot.slane %v4300_v51, 2  ;;  %v4376_v57 = vrot.slane %v4301_v16, 2  ;;  %v4384_v53 = vrot.slane %v4306_v46, 2 }
 0x4c8   : > { %v13466_v6 = vpop.f32.mrf.mxu1 }
 0x4c9   : > { %v13469_v18 = vadd.f32 %v3782_v43, %v13401_v10  ;;  %v4374_v39 = vsel %vm1798_vm8, %v4372_v38, %v4373_v63  ;;  %v4377_v25 = vsel %vm1798_vm8, %v4375_v30, %v4376_v57  ;;  %v3726_v26 = vadd.f32 %v13466_v6, %v13464_v36 }
 0x4ca   : > { %v4411_v59 = vpack.c.bf16 %v4377_v25, %v4371_v29 }
 0x4cc   : > { %v13471_v48 = vpop.f32.mrf.mxu2 }
 0x4ce   : > { %v13475_v5 = vpop.f32.mrf.mxu3  ;;  %v3699_v32 = vpop.f32.mrf.mxu0 }
 0x4d0   : > { %v3728_v10 = vpop.f32.mrf.mxu1 }
 0x4d1   : > { %v3729_v14 = vadd.f32 %v3728_v10, %v3699_v32  ;;  %4620 = vmatmul.bf16.gmra.mxu0 %v4408_v52  ;;  %4678 = vmatmul.bf16.gmra.mxu2 %v4408_v52  ;;  %v4308_v32 = vld [vmem:[#allocation2 + $0x130] sm:$0x3]  ;;  %v4303_v52 = vld [vmem:[#allocation2 + $0x108] sm:$0xfc] }
 0x4d2   : > { %v4385_v51 = vrot.slane %v4308_v32, 2  ;;  %v4381_v9 = vrot.slane %v4303_v52, 2 }
 0x4d3   : > { %v13480_v44 = vadd.f32 %v3729_v14, %v13414_v31  ;;  %4649 = vmatmul.bf16.gmra.mxu1 %v4409_v45  ;;  %4707 = vmatmul.bf16.gmra.mxu3 %v4409_v45  ;;  %v4367_v31 = vrot.slane %v4296_v47, 2  ;;  %v4305_v14 = vld [vmem:[#allocation2 + $0x118] sm:$0x3]  ;;  %v4307_v45 = vld [vmem:[#allocation2 + $0x128] sm:$0xfc]  ;;  %v4378_v47 = vrot.slane %v4302_v1, 2 }
 0x4d4   : > { %v3757_v27 = vpop.f32.mrf.mxu2  ;;  %v4387_v19 = vrot.slane %v4307_v45, 2 }
 0x4d5   : > { %v4368_v43 = vsel %vm1798_vm8, %v4366_v34, %v4367_v31  ;;  %v4386_v31 = vsel %vm1798_vm8, %v4384_v53, %v4385_v51 }
 0x4d6   : > { %v3786_v15 = vpop.f32.mrf.mxu3  ;;  %v13482_v13 = vpop.f32.mrf.mxu0  ;;  %v4410_v0 = vpack.c.bf16 %v4374_v39, %v4368_v43 }
 0x4d7   : > { %v3787_v42 = vadd.f32 %v3786_v15, %v3757_v27  ;;  %v4309_v27 = vld [vmem:[#allocation2 + $0x138] sm:$0x3] }
 0x4d8   : > { %v13484_v61 = vpop.f32.mrf.mxu1  ;;  %v4388_v62 = vrot.slane %v4309_v27, 2 }
 0x4d9   : > { %v13487_v21 = vadd.f32 %v3787_v42, %v13417_v23  ;;  %v4382_v42 = vrot.slane %v4305_v14, 2 }
 0x4da   : > { %v4389_v56 = vsel %vm1798_vm8, %v4387_v19, %v4388_v62 }
 0x4db   : > { %v4383_v12 = vsel %vm1798_vm8, %v4381_v9, %v4382_v42 }
 0x4dc   : > { %v13489_v2 = vpop.f32.mrf.mxu2  ;;  %v4413_v43 = vpack.c.bf16 %v4389_v56, %v4383_v12 }
 0x4de   : > { %v13493_v22 = vpop.f32.mrf.mxu3  ;;  %v3704_v17 = vpop.f32.mrf.mxu0 }
 0x4df   : > { %v3789_v58 = vadd.f32 %v13493_v22, %v13489_v2 }
 0x4e0   : > { %v3733_v23 = vpop.f32.mrf.mxu1 }
 0x4e1   : > { %v3734_v40 = vadd.f32 %v3733_v23, %v3704_v17  ;;  %4625 = vmatmul.bf16.gmra.mxu0 %v4410_v0  ;;  %4683 = vmatmul.bf16.gmra.mxu2 %v4410_v0 }
 0x4e3   : > { %v13498_v24 = vadd.f32 %v3734_v40, %v13430_v33  ;;  %4654 = vmatmul.bf16.gmra.mxu1 %v4411_v59  ;;  %4712 = vmatmul.bf16.gmra.mxu3 %v4411_v59  ;;  %v4379_v33 = vrot.slane %v4304_v28, 2 }
 0x4e4   : > { %v3762_v49 = vpop.f32.mrf.mxu2 }
 0x4e5   : > { %v4380_v34 = vsel %vm1798_vm8, %v4378_v47, %v4379_v33 }
 0x4e6   : > { %v3791_v50 = vpop.f32.mrf.mxu3  ;;  %v13500_v7 = vpop.f32.mrf.mxu0  ;;  %v4412_v30 = vpack.c.bf16 %v4386_v31, %v4380_v34 }
 0x4e7   : > { %v3792_v10 = vadd.f32 %v3791_v50, %v3762_v49 }
 0x4e8   : > { %v13502_v37 = vpop.f32.mrf.mxu1 }
 0x4e9   : > { %v3810_v15 = vadd.f32 %v3792_v10, %v13433_v4 }
 0x4ec   : > { %v13505_v16 = vpop.f32.mrf.mxu2 }
 0x4ee   : > { %v13509_v38 = vpop.f32.mrf.mxu3  ;;  %v3709_v63 = vpop.f32.mrf.mxu0 }
 0x4f0   : > { %v3738_v57 = vpop.f32.mrf.mxu1 }
 0x4f1   : > { %v3739_v4 = vadd.f32 %v3738_v57, %v3709_v63  ;;  %4630 = vmatmul.bf16.gmra.mxu0 %v4412_v30  ;;  %4688 = vmatmul.bf16.gmra.mxu2 %v4412_v30 }
 0x4f3   : > { %v3813_v39 = vadd.f32 %v3739_v4, %v13446_v35  ;;  %4659 = vmatmul.bf16.gmra.mxu1 %v4413_v43  ;;  %4717 = vmatmul.bf16.gmra.mxu3 %v4413_v43 }
 0x4f4   : > { %v3767_v17 = vpop.f32.mrf.mxu2 }
 0x4f6   : > { %v3796_v29 = vpop.f32.mrf.mxu3  ;;  %v13514_v25 = vpop.f32.mrf.mxu0 }
 0x4f7   : > { %v3797_v0 = vadd.f32 %v3796_v29, %v3767_v17 }
 0x4f8   : > { %v13516_v23 = vpop.f32.mrf.mxu1 }
 0x4f9   : > { %v3814_v40 = vadd.f32 %v3797_v0, %v13449_v41 }
 0x4fc   : > { %v13519_v59 = vpop.f32.mrf.mxu2 }
 0x4fd   : > { %14453 = vst [vmem:[#allocation24_spill] sm:$0xff] %v13519_v59 }
 0x4fe   : > { %v13521_v49 = vpop.f32.mrf.mxu3  ;;  %v4155_v1 = vpop.f32.mrf.mxu0 }
 0x4ff   : > { %14454 = vst [vmem:[#allocation25_spill] sm:$0xff] %v13521_v49 }
 0x500   : > { %v4184_v28 = vpop.f32.mrf.mxu1 }
 0x501   : > { %v4185_v46 = vadd.f32 %v4184_v28, %v4155_v1 }
 0x503   : > { %v13524_v35 = vadd.f32 %v4185_v46, %v13462_v11 }
 0x504   : > { %v4213_v32 = vpop.f32.mrf.mxu2 }
 0x506   : > { %v4242_v50 = vpop.f32.mrf.mxu3  ;;  %v4157_v52 = vpop.f32.mrf.mxu0 }
 0x507   : > { %v4243_v10 = vadd.f32 %v4242_v50, %v4213_v32 }
 0x508   : > { %v4186_v14 = vpop.f32.mrf.mxu1 }
 0x509   : > { %v13527_v45 = vadd.f32 %v4243_v10, %v13469_v18 }
 0x50b   : > { %14455 = vst [vmem:[#allocation26_spill] sm:$0xff] %v13527_v45 }
 0x50c   : > { %v13529_v27 = vpop.f32.mrf.mxu2 }
 0x50e   : > { %v13531_v41 = vpop.f32.mrf.mxu3  ;;  %v4160_v47 = vpop.f32.mrf.mxu0 }
 0x510   : > { %v4189_v33 = vpop.f32.mrf.mxu1 }
 0x511   : > { %v4190_v53 = vadd.f32 %v4189_v33, %v4160_v47 }
 0x513   : > { %v13534_v51 = vadd.f32 %v4190_v53, %v13480_v44 }
 0x514   : > { %v4218_v11 = vpop.f32.mrf.mxu2 }
 0x516   : > { %v4247_v9 = vpop.f32.mrf.mxu3  ;;  %v4162_v42 = vpop.f32.mrf.mxu0 }
 0x517   : > { %v4248_v19 = vadd.f32 %v4247_v9, %v4218_v11 }
 0x518   : > { %v4191_v62 = vpop.f32.mrf.mxu1 }
 0x519   : > { %v13537_v34 = vadd.f32 %v4248_v19, %v13487_v21 }
 0x51b   : > { %14456 = vst [vmem:[#allocation27_spill] sm:$0xff] %v13537_v34  ;;  %v3784_v34 = vadd.f32 %v13475_v5, %v13471_v48 }
 0x51c   : > { %v13539_v18 = vpop.f32.mrf.mxu2 }
 0x51d   : > { %v3804_v5 = vadd.f32 %v3784_v34, %v13411_v54 }
 0x51e   : > { %v13541_v31 = vpop.f32.mrf.mxu3  ;;  %v4165_v63 = vpop.f32.mrf.mxu0 }
 0x51f   : > { %v4250_v54 = vadd.f32 %v13541_v31, %v13539_v18 }
 0x520   : > { %v4194_v12 = vpop.f32.mrf.mxu1 }
 0x521   : > { %v4195_v56 = vadd.f32 %v4194_v12, %v4165_v63 }
 0x523   : > { %v13544_v30 = vadd.f32 %v4195_v56, %v13498_v24 }
 0x524   : > { %v4223_v44 = vpop.f32.mrf.mxu2 }
 0x525   : > { %14457 = vst [vmem:[#allocation28_spill] sm:$0xff] %v13544_v30  ;;  %v4192_v30 = vadd.f32 %v4191_v62, %v4162_v42  ;;  %v3808_v42 = vadd.f32 %v3789_v58, %v13427_v60 }
 0x526   : > { %v4252_v57 = vpop.f32.mrf.mxu3  ;;  %v4167_v4 = vpop.f32.mrf.mxu0 }
 0x527   : > { %v4253_v43 = vadd.f32 %v4252_v57, %v4223_v44 }
 0x528   : > { %v4196_v17 = vpop.f32.mrf.mxu1 }
 0x529   : > { %v13546_v29 = vadd.f32 %v4253_v43, %v3810_v15 }
 0x52b   : > { %14458 = vst [vmem:[#allocation29_spill] sm:$0xff] %v13546_v29  ;;  %v3803_v29 = vadd.f32 %v3726_v26, %v13404_v55  ;;  %v3736_v55 = vadd.f32 %v13502_v37, %v13500_v7  ;;  %v4197_v37 = vadd.f32 %v4196_v17, %v4167_v4  ;;  %v14467_v17 = vld [vmem:[#allocation24_spill] sm:$0xff] }
 0x52c   : > { %v13548_v0 = vpop.f32.mrf.mxu2  ;;  %v14465_v34 = vld [vmem:[#allocation28_spill] sm:$0xff] }
 0x52e   : > { %v13550_v21 = vpop.f32.mrf.mxu3  ;;  %v4170_v1 = vpop.f32.mrf.mxu0 }
 0x530   : > { %v4199_v28 = vpop.f32.mrf.mxu1 }
 0x531   : > { %v4200_v46 = vadd.f32 %v4199_v28, %v4170_v1 }
 0x533   : > { %v13552_v32 = vadd.f32 %v4200_v46, %v3813_v39 }
 0x534   : > { %v4228_v50 = vpop.f32.mrf.mxu2 }
 0x535   : > { %14459 = vst [vmem:[#allocation30_spill] sm:$0xff] %v13552_v32 }
 0x536   : > { %v4257_v10 = vpop.f32.mrf.mxu3  ;;  %v13554_v24 = vpop.f32.mrf.mxu0 }
 0x537   : > { %14460 = vst [vmem:[#allocation31_spill] sm:$0xff] %v13554_v24  ;;  %v4258_v47 = vadd.f32 %v4257_v10, %v4228_v50 }
 0x538   : > { %v13556_v33 = vpop.f32.mrf.mxu1 }
 0x539   : > { %14461 = vst [vmem:[#allocation32_spill] sm:$0xff] %v13556_v33  ;;  %v13558_v53 = vadd.f32 %v4258_v47, %v3814_v40  ;;  %v3731_v33 = vadd.f32 %v13484_v61, %v13482_v13  ;;  %v3794_v13 = vadd.f32 %v13509_v38, %v13505_v16  ;;  %v3741_v16 = vadd.f32 %v13516_v23, %v13514_v25 }
 0x53a   : > { %v4255_v25 = vadd.f32 %v13550_v21, %v13548_v0 }
 0x53b   : > { %14462 = vst [vmem:[#allocation33_spill] sm:$0xff] %v13558_v53 }
 0x53c   : > { %v13560_v15 = vpop.f32.mrf.mxu2 }
 0x53d   : > { %14463 = vst [vmem:[#allocation34_spill] sm:$0xff] %v13560_v15  ;;  %v4187_v15 = vadd.f32 %v4186_v14, %v4157_v52  ;;  %v3807_v52 = vadd.f32 %v3731_v33, %v13420_v20  ;;  %v4245_v14 = vadd.f32 %v13531_v41, %v13529_v27  ;;  %v3811_v20 = vadd.f32 %v3736_v55, %v13436_v8 }
 0x53e   : > { %v13562_v11 = vpop.f32.mrf.mxu3  ;;  %v4616_v9 = vpop.f32.mrf.mxu0  ;;  %v3812_v27 = vadd.f32 %v3794_v13, %v13443_v3  ;;  %v14466_v3 = vld [vmem:[#allocation22_spill] sm:$0xff]  ;;  %v4269_v33 = vadd.f32 %v4250_v54, %v3808_v42  ;;  %v14474_v42 = vld [vmem:[#allocation29_spill] sm:$0xff] }
 0x53f   : > { %14464 = vst [vmem:[#allocation35_spill] sm:$0xff] %v13562_v11  ;;  %v4264_v45 = vadd.f32 %v4187_v15, %v3803_v29  ;;  %v4268_v7 = vadd.f32 %v4192_v30, %v3807_v52  ;;  %v4265_v60 = vadd.f32 %v4245_v14, %v3804_v5  ;;  %v4272_v8 = vadd.f32 %v4197_v37, %v3811_v20  ;;  %v14468_v29 = vld [vmem:[#allocation25_spill] sm:$0xff] }
 0x540   : > { %v4645_v19 = vpop.f32.mrf.mxu1  ;;  %v3815_v4 = vadd.f32 %v3741_v16, %v14466_v3 }
 0x541   : > { %v4646_v49 = vadd.f32 %v4645_v19, %v4616_v9 }
 0x543   : > { %v4723_v2 = vadd.f32 %v4646_v49, %v13524_v35 }
 0x544   : > { %v4674_v63 = vpop.f32.mrf.mxu2  ;;  %v14475_v54 = vld [vmem:[#allocation34_spill] sm:$0xff] }
 0x545   : > { %v13592_v58 = vmax.f32 %v4723_v2, 0.0 }
 0x546   : > { %v4703_v12 = vpop.f32.mrf.mxu3  ;;  %v4618_v56 = vpop.f32.mrf.mxu0 }
 0x547   : > { %v4783_v21 = vmul.f32 %v13592_v58, %v13592_v58 }
 0x548   : > { %v4647_v39 = vpop.f32.mrf.mxu1 }
 0x549   : > { %v4648_v32 = vadd.f32 %v4647_v39, %v4618_v56 }
 0x54b   : > { %v4725_v26 = vadd.f32 %v4648_v32, %v4264_v45  ;;  %v3799_v32 = vadd.f32 %v14468_v29, %v14467_v17  ;;  %v14477_v29 = vld [vmem:[#allocation23_spill] sm:$0xff] }
 0x54c   : > { %v4676_v44 = vpop.f32.mrf.mxu2 }
 0x54d   : > { %v13589_v38 = vmax.f32 %v4725_v26, 0.0 }
 0x54e   : > { %v4705_v57 = vpop.f32.mrf.mxu3  ;;  %v4621_v43 = vpop.f32.mrf.mxu0 }
 0x54f   : > { %v4706_v49 = vadd.f32 %v4705_v57, %v4676_v44  ;;  %v4273_v44 = vadd.f32 %v4255_v25, %v3812_v27  ;;  %v14470_v57 = vld [vmem:[#allocation27_spill] sm:$0xff] }
 0x550   : > { %v4650_v1 = vpop.f32.mrf.mxu1  ;;  %v14476_v27 = vld [vmem:[#allocation35_spill] sm:$0xff] }
 0x551   : > { %v4651_v59 = vadd.f32 %v4650_v1, %v4621_v43  ;;  %v4726_v15 = vadd.f32 %v4706_v49, %v4265_v60  ;;  %v4260_v49 = vadd.f32 %v14476_v27, %v14475_v54 }
 0x553   : > { %v4727_v22 = vadd.f32 %v4651_v59, %v13534_v51  ;;  %v4704_v51 = vadd.f32 %v4703_v12, %v4674_v63  ;;  %v14469_v63 = vld [vmem:[#allocation26_spill] sm:$0xff]  ;;  %v13619_v26 = vmax.f32 %v4726_v15, 0.0  ;;  %v14478_v15 = vld [vmem:[#allocation33_spill] sm:$0xff] }
 0x554   : > { %v4679_v28 = vpop.f32.mrf.mxu2 }
 0x555   : > { %v13594_v62 = vmax.f32 %v4727_v22, 0.0  ;;  %v4724_v12 = vadd.f32 %v4704_v51, %v14469_v63 }
 0x556   : > { %v4708_v46 = vpop.f32.mrf.mxu3  ;;  %v4623_v50 = vpop.f32.mrf.mxu0 }
 0x557   : > { %v4709_v23 = vadd.f32 %v4708_v46, %v4679_v28  ;;  %v4787_v56 = vmul.f32 %v13594_v62, %v13594_v62  ;;  %v14471_v46 = vld [vmem:[#allocation31_spill] sm:$0xff]  ;;  %v13625_v5 = vmax.f32 %v4724_v12, 0.0 }
 0x558   : > { %v4652_v10 = vpop.f32.mrf.mxu1 }
 0x559   : > { %v4653_v61 = vadd.f32 %v4652_v10, %v4623_v50  ;;  %v4728_v43 = vadd.f32 %v4709_v23, %v14470_v57  ;;  %v14472_v50 = vld [vmem:[#allocation32_spill] sm:$0xff]  ;;  %v4786_v23 = vmul.f32 %v13619_v26, %v13619_v26 }
 0x55a   : > { %v4202_v10 = vadd.f32 %v14472_v50, %v14471_v46 }
 0x55b   : > { %v4729_v35 = vadd.f32 %v4653_v61, %v4268_v7  ;;  %v13628_v2 = vmax.f32 %v4728_v43, 0.0 }
 0x55c   : > { %v4681_v40 = vpop.f32.mrf.mxu2  ;;  %v4276_v16 = vadd.f32 %v4202_v10, %v3815_v4 }
 0x55e   : > { %v4710_v47 = vpop.f32.mrf.mxu3  ;;  %v4626_v53 = vpop.f32.mrf.mxu0 }
 0x55f   : > { %v4711_v9 = vadd.f32 %v4710_v47, %v4681_v40  ;;  %v4757_v40 = vadd.f32 %v13589_v38, %v13592_v58 }
 0x560   : > { %v4655_v11 = vpop.f32.mrf.mxu1 }
 0x561   : > { %v4656_v45 = vadd.f32 %v4655_v11, %v4626_v53  ;;  %v4785_v53 = vmul.f32 %v13589_v38, %v13589_v38  ;;  %v13604_v11 = vmax.f32 %v4729_v35, 0.0  ;;  %v4730_v13 = vadd.f32 %v4711_v9, %v4269_v33 }
 0x562   : > { %v3816_v33 = vadd.f32 %v3799_v32, %v14477_v29 }
 0x563   : > { %v4731_v18 = vadd.f32 %v4656_v45, %v14465_v34  ;;  %v4799_v47 = vadd.f32 %v4785_v53, %v4783_v21  ;;  %v4789_v52 = vmul.f32 %v13604_v11, %v13604_v11  ;;  %v13640_v51 = vmax.f32 %v4730_v13, 0.0 }
 0x564   : > { %v4684_v24 = vpop.f32.mrf.mxu2  ;;  %v4788_v21 = vmul.f32 %v13628_v2, %v13628_v2 }
 0x565   : > { %v13612_v1 = vmax.f32 %v4731_v18, 0.0 }
 0x566   : > { %v4713_v36 = vpop.f32.mrf.mxu3  ;;  %v4628_v6 = vpop.f32.mrf.mxu0 }
 0x567   : > { %v4714_v28 = vadd.f32 %v4713_v36, %v4684_v24  ;;  %v4758_v24 = vadd.f32 %v4757_v40, %v13594_v62  ;;  %v4800_v36 = vadd.f32 %v4799_v47, %v4787_v56  ;;  %v4791_v22 = vmul.f32 %v13612_v1, %v13612_v1 }
 0x568   : > { %v4657_v48 = vpop.f32.mrf.mxu1 }
 0x569   : > { %v4658_v59 = vadd.f32 %v4657_v48, %v4628_v6  ;;  %v14473_v6 = vld [vmem:[#allocation30_spill] sm:$0xff]  ;;  %v4732_v7 = vadd.f32 %v4714_v28, %v14474_v42  ;;  %v4759_v35 = vadd.f32 %v4758_v24, %v13604_v11  ;;  %v4801_v60 = vadd.f32 %v4800_v36, %v4789_v52 }
 0x56a   : > { %v4790_v28 = vmul.f32 %v13640_v51, %v13640_v51 }
 0x56b   : > { %v4733_v19 = vadd.f32 %v4658_v59, %v4272_v8  ;;  %v4760_v34 = vadd.f32 %v4759_v35, %v13612_v1  ;;  %v4802_v3 = vadd.f32 %v4801_v60, %v4791_v22  ;;  %v13648_v4 = vmax.f32 %v4732_v7, 0.0 }
 0x56c   : > { %v4686_v41 = vpop.f32.mrf.mxu2 }
 0x56d   : > { %v13623_v61 = vmax.f32 %v4733_v19, 0.0  ;;  %v4792_v13 = vmul.f32 %v13648_v4, %v13648_v4 }
 0x56e   : > { %v4715_v31 = vpop.f32.mrf.mxu3  ;;  %v4631_v30 = vpop.f32.mrf.mxu0 }
 0x56f   : > { %v4716_v14 = vadd.f32 %v4715_v31, %v4686_v41  ;;  %v4770_v41 = vadd.f32 %v13619_v26, %v13625_v5  ;;  %v4793_v8 = vmul.f32 %v13623_v61, %v13623_v61  ;;  %v4761_v53 = vadd.f32 %v4760_v34, %v13623_v61 }
 0x570   : > { %v4660_v0 = vpop.f32.mrf.mxu1 }
 0x571   : > { %v4661_v39 = vadd.f32 %v4660_v0, %v4631_v30  ;;  %v4734_v18 = vadd.f32 %v4716_v14, %v4273_v44  ;;  %v4771_v30 = vadd.f32 %v4770_v41, %v13628_v2  ;;  %v4784_v0 = vmul.f32 %v13625_v5, %v13625_v5 }
 0x572   : > { %v4803_v12 = vadd.f32 %v4802_v3, %v4793_v8 }
 0x573   : > { %v4735_v55 = vadd.f32 %v4661_v39, %v14473_v6  ;;  %v4772_v63 = vadd.f32 %v4771_v30, %v13640_v51  ;;  %v4277_v39 = vadd.f32 %v4260_v49, %v3816_v33  ;;  %v13660_v44 = vmax.f32 %v4734_v18, 0.0 }
 0x574   : > { %v4689_v48 = vpop.f32.mrf.mxu2  ;;  %v4812_v43 = vadd.f32 %v4786_v23, %v4784_v0 }
 0x575   : > { %v13633_v37 = vmax.f32 %v4735_v55, 0.0  ;;  %v4773_v46 = vadd.f32 %v4772_v63, %v13648_v4  ;;  %v4794_v42 = vmul.f32 %v13660_v44, %v13660_v44 }
 0x576   : > { %v4718_v45 = vpop.f32.mrf.mxu3  ;;  %v4633_v20 = vpop.f32.mrf.mxu0  ;;  %v4813_v52 = vadd.f32 %v4812_v43, %v4788_v21 }
 0x577   : > { %v4719_v59 = vadd.f32 %v4718_v45, %v4689_v48  ;;  %v4795_v17 = vmul.f32 %v13633_v37, %v13633_v37  ;;  %v4762_v32 = vadd.f32 %v4761_v53, %v13633_v37  ;;  %v4774_v48 = vadd.f32 %v4773_v46, %v13660_v44 }
 0x578   : > { %v4662_v25 = vpop.f32.mrf.mxu1  ;;  %v4814_v22 = vadd.f32 %v4813_v52, %v4790_v28 }
 0x579   : > { %v4663_v31 = vadd.f32 %v4662_v25, %v4633_v20  ;;  %v4736_v9 = vadd.f32 %v4719_v59, %v14478_v15  ;;  %v4804_v50 = vadd.f32 %v4803_v12, %v4795_v17 }
 0x57a   : > { %v4815_v54 = vadd.f32 %v4814_v22, %v4792_v13 }
 0x57b   : > { %v4737_v19 = vadd.f32 %v4663_v31, %v4276_v16  ;;  %v13668_v40 = vmax.f32 %v4736_v9, 0.0 }
 0x57c   : > { %v4691_v56 = vpop.f32.mrf.mxu2  ;;  %v4816_v41 = vadd.f32 %v4815_v54, %v4794_v42 }
 0x57d   : > { %v13663_v57 = vmax.f32 %v4737_v19, 0.0  ;;  %v4775_v7 = vadd.f32 %v4774_v48, %v13668_v40  ;;  %v4796_v27 = vmul.f32 %v13668_v40, %v13668_v40 }
 0x57e   : > { %v4720_v10 = vpop.f32.mrf.mxu3 }
 0x57f   : > { %v4763_v47 = vadd.f32 %v4762_v32, %v13663_v57  ;;  %v4797_v6 = vmul.f32 %v13663_v57, %v13663_v57  ;;  %v4721_v55 = vadd.f32 %v4720_v10, %v4691_v56  ;;  %v4817_v34 = vadd.f32 %v4816_v41, %v4796_v27 }
 0x581   : > { %v4764_v24 = vrot.slane %v4763_v47, 4  ;;  %v4805_v36 = vadd.f32 %v4804_v50, %v4797_v6  ;;  %v4738_v14 = vadd.f32 %v4721_v55, %v4277_v39 }
 0x583   : > { %v4765_v45 = vadd.f32 %v4764_v24, %v4763_v47  ;;  %v4806_v20 = vrot.slane %v4805_v36, 4  ;;  %v13679_v16 = vmax.f32 %v4738_v14, 0.0 }
 0x585   : > { %v4776_v49 = vadd.f32 %v4775_v7, %v13679_v16  ;;  %v4766_v35 = vrot.slane %v4765_v45, 2  ;;  %v4807_v59 = vadd.f32 %v4806_v20, %v4805_v36  ;;  %v4798_v8 = vmul.f32 %v13679_v16, %v13679_v16 }
 0x587   : > { %v4777_v60 = vrot.slane %v4776_v49, 4  ;;  %v4767_v25 = vadd.f32 %v4766_v35, %v4765_v45  ;;  %v4808_v23 = vrot.slane %v4807_v59, 2  ;;  %v4818_v30 = vadd.f32 %v4817_v34, %v4798_v8 }
 0x589   : > { %v4768_v18 = vrot.slane %v4767_v25, 1  ;;  %v4778_v31 = vadd.f32 %v4777_v60, %v4776_v49  ;;  %v4809_v17 = vadd.f32 %v4808_v23, %v4807_v59  ;;  %v4819_v29 = vrot.slane %v4818_v30, 4 }
 0x58b   : > { %v4769_v3 = vadd.f32 %v4768_v18, %v4767_v25  ;;  %v4810_v33 = vrot.slane %v4809_v17, 1  ;;  %v4779_v53 = vrot.slane %v4778_v31, 2  ;;  %v4820_v19 = vadd.f32 %v4819_v29, %v4818_v30 }
 0x58d   : > { %4843 = vrot.lane.b32.xlu2 %v4769_v3, %s12439_s22  ;;  %4835 = vrot.lane.b32.xlu1 %v4769_v3, %s12437_s9  ;;  %v4811_v15 = vadd.f32 %v4810_v33, %v4809_v17  ;;  %v4780_v9 = vadd.f32 %v4779_v53, %v4778_v31  ;;  %v4821_v21 = vrot.slane %v4820_v19, 2 }
 0x58e   : > { %4826 = vrot.lane.b32.xlu0 %v4769_v3, %s12438_s21 }
 0x58f   : > { %v4781_v0 = vrot.slane %v4780_v9, 1  ;;  %v4822_v12 = vadd.f32 %v4821_v21, %v4820_v19 }
 0x591   : > { %v4782_v63 = vadd.f32 %v4781_v0, %v4780_v9  ;;  %v4823_v56 = vrot.slane %v4822_v12, 1 }
 0x593   : > { %v4824_v39 = vadd.f32 %v4823_v56, %v4822_v12 }
 0x595   : > { %4831 = vrot.lane.b32.xlu2 %v4811_v15, %s12438_s21  ;;  %4847 = vrot.lane.b32.xlu1 %v4811_v15, %s12439_s22 }
 0x596   : > { %4839 = vrot.lane.b32.xlu0 %v4811_v15, %s12437_s9 }
 0x59d   : > { %4871 = vrot.lane.b32.xlu2 %v4782_v63, %s12439_s22  ;;  %4863 = vrot.lane.b32.xlu1 %v4782_v63, %s12437_s9 }
 0x59e   : > { %4854 = vrot.lane.b32.xlu0 %v4782_v63, %s12438_s21 }
 0x5a5   : > { %4859 = vrot.lane.b32.xlu2 %v4824_v39, %s12438_s21  ;;  %4875 = vrot.lane.b32.xlu1 %v4824_v39, %s12439_s22 }
 0x5a6   : > { %4867 = vrot.lane.b32.xlu0 %v4824_v39, %s12437_s9 }
 0x5e7   : > { %v4844_v43 = vpop.permute.xlu2 %4843 }
 0x5ef   : > { %v4832_v6 = vpop.permute.xlu2 %4831 }
 0x5f0   : > { %v4834_v24 = vadd.f32 %v4832_v6, %v4811_v15 }
 0x5f7   : > { %v4872_v22 = vpop.permute.xlu2 %4871 }
 0x5ff   : > { %v4836_v32 = vpop.permute.xlu1 %4835  ;;  %v4860_v54 = vpop.permute.xlu2 %4859 }
 0x600   : > { %v4827_v28 = vpop.permute.xlu0 %4826 }
 0x601   : > { %v4829_v46 = vadd.f32 %v4827_v28, %v4769_v3 }
 0x603   : > { %v4838_v50 = vadd.f32 %v4836_v32, %v4829_v46 }
 0x605   : > { %v4846_v55 = vadd.f32 %v4844_v43, %v4838_v50 }
 0x607   : > { %v4848_v10 = vpop.permute.xlu1 %4847  ;;  %v4851_v52 = vadd.f32 %v4846_v55, %v4782_v63 }
 0x608   : > { %v4840_v47 = vpop.permute.xlu0 %4839 }
 0x609   : > { %v4842_v42 = vadd.f32 %v4840_v47, %v4834_v24 }
 0x60b   : > { %v4850_v45 = vadd.f32 %v4848_v10, %v4842_v42 }
 0x60d   : > { %v4852_v20 = vadd.f32 %v4850_v45, %v4824_v39 }
 0x60f   : > { %v4864_v36 = vpop.permute.xlu1 %4863  ;;  %v4862_v49 = vadd.f32 %v4860_v54, %v4852_v20 }
 0x610   : > { %v4855_v13 = vpop.permute.xlu0 %4854 }
 0x611   : > { %v4857_v48 = vadd.f32 %v4855_v13, %v4851_v52 }
 0x613   : > { %v4866_v14 = vadd.f32 %v4864_v36, %v4857_v48 }
 0x615   : > { %v4874_v7 = vadd.f32 %v4872_v22, %v4866_v14 }
 0x617   : > { %4895 = vrot.lane.b32.xlu1 %v4874_v7, %s12440_s15  ;;  %4889 = vrot.lane.b32.xlu2 %v4874_v7, %s12441_s16  ;;  %v4876_v59 = vpop.permute.xlu1 %4875  ;;  %v4879_v60 = vsel %vm678_vm0, %v4874_v7, 0.0 }
 0x618   : > { %4883 = vrot.lane.b32.xlu0 %v4874_v7, %s12442_s10  ;;  %v4868_v27 = vpop.permute.xlu0 %4867 }
 0x619   : > { %v4870_v35 = vadd.f32 %v4868_v27, %v4862_v49 }
 0x61b   : > { %v4878_v41 = vadd.f32 %v4876_v59, %v4870_v35 }
 0x61d   : > { %v4933_v8 = vsel %vm678_vm0, %v4878_v41, 0.0 }
 0x61f   : > { %4913 = vrot.lane.b32.xlu1 %v4874_v7, %s12443_s20  ;;  %4901 = vrot.lane.b32.xlu2 %v4874_v7, %s12444_s23 }
 0x620   : > { %4907 = vrot.lane.b32.xlu0 %v4874_v7, %s12445_s28 }
 0x627   : > { %4919 = vrot.lane.b32.xlu2 %v4874_v7, %s12446_s11 }
 0x628   : > { %4937 = vrot.lane.b32.xlu0 %v4878_v41, %s12442_s10 }
 0x62f   : > { %4949 = vrot.lane.b32.xlu2 %v4878_v41, %s12440_s15 }
 0x630   : > { %4955 = vrot.lane.b32.xlu0 %v4878_v41, %s12444_s23  ;;  %s12369_s23 = scalar_lea.hbm %s14433_s7, 256 }
 0x637   : > { %4973 = vrot.lane.b32.xlu2 %v4878_v41, %s12446_s11 }
 0x638   : > { %4967 = vrot.lane.b32.xlu0 %v4878_v41, %s12443_s20 }
 0x649   : > { %4880 = vadd.xlane.f32.xlu1 %v4879_v60 }
 0x662   : > { %4934 = vadd.xlane.f32.xlu0 %v4933_v8  ;;  %4943 = vrot.lane.b32.xlu1 %v4878_v41, %s12441_s16 }
 0x66a   : > { %4961 = vrot.lane.b32.xlu1 %v4878_v41, %s12445_s28 }
 0x671   : > { %v4890_v25 = vpop.permute.xlu2 %4889 }
 0x672   : > { %v4892_v23 = vsel %vm678_vm0, %v4890_v25, 0.0 }
 0x673   : > { %4893 = vadd.xlane.f32.xlu2 %v4892_v23 }
 0x679   : > { %v4902_v29 = vpop.permute.xlu2 %4901 }
 0x67a   : > { %v4904_v19 = vsel %vm678_vm0, %v4902_v29, 0.0 }
 0x681   : > { %v4920_v0 = vpop.permute.xlu2 %4919 }
 0x682   : > { %v4922_v12 = vsel %vm678_vm0, %v4920_v0, 0.0 }
 0x689   : > { %v4896_v34 = vpop.permute.xlu1 %4895  ;;  %v4950_v56 = vpop.permute.xlu2 %4949 }
 0x68a   : > { %v4884_v18 = vpop.permute.xlu0 %4883  ;;  %v4898_v53 = vsel %vm678_vm0, %v4896_v34, 0.0  ;;  %v4952_v43 = vsel %vm678_vm0, %v4950_v56, 0.0  ;;  %v10338_v56 = vld [vmem:[#allocation12 + $0x178] sm:$0xf0] }
 0x68b   : > { %v4886_v31 = vsel %vm678_vm0, %v4884_v18, 0.0 }
 0x68c   : > { %4887 = vadd.xlane.f32.xlu0 %v4886_v31 }
 0x691   : > { %v4914_v30 = vpop.permute.xlu1 %4913  ;;  %v4974_v28 = vpop.permute.xlu2 %4973 }
 0x692   : > { %v4908_v3 = vpop.permute.xlu0 %4907  ;;  %v4916_v17 = vsel %vm678_vm0, %v4914_v30, 0.0  ;;  %v4976_v46 = vsel %vm678_vm0, %v4974_v28, 0.0 }
 0x693   : > { %v4910_v33 = vsel %vm678_vm0, %v4908_v3, 0.0 }
 0x694   : > { %4917 = vadd.xlane.f32.xlu0 %v4916_v17  ;;  %4911 = vadd.xlane.f32.xlu2 %v4910_v33 }
 0x695   : > { %4899 = vadd.xlane.f32.xlu1 %v4898_v53 }
 0x69a   : > { %v4938_v15 = vpop.permute.xlu0 %4937 }
 0x69b   : > { %v4940_v9 = vsel %vm678_vm0, %v4938_v15, 0.0 }
 0x69c   : > { %4941 = vadd.xlane.f32.xlu2 %v4940_v9 }
 0x69d   : > { %4905 = vadd.xlane.f32.xlu1 %v4904_v19 }
 0x6a2   : > { %v4956_v21 = vpop.permute.xlu0 %4955 }
 0x6a3   : > { %v4958_v63 = vsel %vm678_vm0, %v4956_v21, 0.0 }
 0x6a4   : > { %4959 = vadd.xlane.f32.xlu2 %v4958_v63 }
 0x6a5   : > { %4923 = vadd.xlane.f32.xlu1 %v4922_v12  ;;  %v11770_v12 = vld [vmem:[#allocation12 + $0x174] sm:$0xf] }
 0x6aa   : > { %v4968_v39 = vpop.permute.xlu0 %4967 }
 0x6ab   : > { %v4970_v32 = vsel %vm678_vm0, %v4968_v39, 0.0  ;;  %v11786_v39 = vld [vmem:[#allocation12 + $0x1f4] sm:$0xf] }
 0x6ac   : > { %4971 = vadd.xlane.f32.xlu2 %v4970_v32  ;;  %v10341_v32 = vor.u32 %v11770_v12, %v10338_v56  ;;  %v11764_v12 = vld [vmem:[#allocation12 + $0x144] sm:$0xf]  ;;  %v10314_v56 = vld [vmem:[#allocation12 + $0x148] sm:$0xf0] }
 0x6ad   : > { %4953 = vadd.xlane.f32.xlu1 %v4952_v43  ;;  %v10402_v43 = vld [vmem:[#allocation12 + $0x1f8] sm:$0xf0] }
 0x6ae   : > { %5589 = vmatpush.bf16.msrb.mxu2 %v10341_v32  ;;  %v10317_v32 = vor.u32 %v11764_v12, %v10314_v56 }
 0x6b5   : > { %4977 = vadd.xlane.f32.xlu1 %v4976_v46  ;;  %v10405_v46 = vor.u32 %v11786_v39, %v10402_v43  ;;  %v11780_v39 = vld [vmem:[#allocation12 + $0x1c4] sm:$0xf]  ;;  %v10378_v43 = vld [vmem:[#allocation12 + $0x1c8] sm:$0xf0] }
 0x6b7   : > { %5618 = vmatpush.bf16.msrb.mxu3 %v10405_v46  ;;  %v10312_v46 = vld [vmem:[#allocation12 + $0x140] sm:$0xf] }
 0x6bc   : > { %v4881_v50 = vpop.xlane.xlu1 %4880 }
 0x6d4   : > { %v4944_v10 = vpop.permute.xlu1 %4943 }
 0x6d5   : > { %v4946_v47 = vsel %vm678_vm0, %v4944_v10, 0.0  ;;  %v4935_v48 = vpop.xlane.xlu0 %4934 }
 0x6d6   : > { %4947 = vadd.xlane.f32.xlu0 %v4946_v47  ;;  %v4755_v47 = vld [vmem:[#allocation13] sm:$0x1] }
 0x6dc   : > { %v4962_v6 = vpop.permute.xlu1 %4961 }
 0x6dd   : > { %v4964_v55 = vsel %vm678_vm0, %v4962_v6, 0.0 }
 0x6de   : > { %4965 = vadd.xlane.f32.xlu0 %v4964_v55 }
 0x6e6   : > { %v4894_v13 = vpop.xlane.xlu2 %4893 }
 0x6ff   : > { %v4888_v14 = vpop.xlane.xlu0 %4887 }
 0x700   : > { %v4925_v45 = vsel %vm725_vm1, %v4881_v50, %v4888_v14 }
 0x701   : > { %v4926_v20 = vsel %vm727_vm2, %v4925_v45, %v4894_v13 }
 0x707   : > { %v4912_v24 = vpop.xlane.xlu2 %4911  ;;  %v4918_v7 = vpop.xlane.xlu0 %4917 }
 0x708   : > { %v4900_v52 = vpop.xlane.xlu1 %4899 }
 0x709   : > { %v4927_v54 = vsel %vm729_vm3, %v4926_v20, %v4900_v52  ;;  %v11787_v20 = vld [vmem:[#allocation12 + $0x1f4] sm:$0xf0] }
 0x70f   : > { %v4942_v22 = vpop.xlane.xlu2 %4941 }
 0x710   : > { %v4906_v36 = vpop.xlane.xlu1 %4905  ;;  %v4979_v41 = vsel %vm725_vm1, %v4935_v48, %v4942_v22  ;;  %v10336_v22 = vld [vmem:[#allocation12 + $0x170] sm:$0xf] }
 0x711   : > { %v4928_v27 = vsel %vm731_vm4, %v4927_v54, %v4906_v36  ;;  %v11768_v54 = vld [vmem:[#allocation12 + $0x164] sm:$0xf] }
 0x712   : > { %v4929_v60 = vsel %vm733_vm5, %v4928_v27, %v4912_v24  ;;  %v4756_v24 = vld [vmem:[#allocation15] sm:$0x1]  ;;  %v10330_v27 = vld [vmem:[#allocation12 + $0x168] sm:$0xf0] }
 0x713   : > { %v4930_v25 = vsel %vm735_vm6, %v4929_v60, %v4918_v7  ;;  %v10400_v7 = vld [vmem:[#allocation12 + $0x1f0] sm:$0xf] }
 0x717   : > { %v4960_v49 = vpop.xlane.xlu2 %4959 }
 0x718   : > { %v4924_v42 = vpop.xlane.xlu1 %4923 }
 0x719   : > { %v4931_v23 = vsel %vm737_vm7, %v4930_v25, %v4924_v42  ;;  %v11771_v42 = vld [vmem:[#allocation12 + $0x174] sm:$0xf0]  ;;  %v11769_v25 = vld [vmem:[#allocation12 + $0x164] sm:$0xf0] }
 0x71a   : > { %v4932_v18 = vmul.f32 0.00048828125, %v4931_v23  ;;  %v10337_v45 = vor.u32 %v11771_v42, %v10336_v22  ;;  %v10392_v23 = vld [vmem:[#allocation12 + $0x1e0] sm:$0xf]  ;;  %v10370_v22 = vld [vmem:[#allocation12 + $0x1b8] sm:$0xf0] }
 0x71c   : > { %v4987_v15 = vmul.f32 %v4932_v18, %v4932_v18  ;;  %5531 = vmatpush.bf16.msrb.mxu0 %v10337_v45  ;;  %v11763_v45 = vld [vmem:[#allocation12 + $0x134] sm:$0xf0] }
 0x71f   : > { %v4972_v3 = vpop.xlane.xlu2 %4971 }
 0x720   : > { %v4954_v35 = vpop.xlane.xlu1 %4953 }
 0x728   : > { %v4978_v29 = vpop.xlane.xlu1 %4977 }
 0x749   : > { %v4948_v59 = vpop.xlane.xlu0 %4947 }
 0x74a   : > { %v4980_v8 = vsel %vm727_vm2, %v4979_v41, %v4948_v59  ;;  %v11784_v59 = vld [vmem:[#allocation12 + $0x1e4] sm:$0xf]  ;;  %v10394_v41 = vld [vmem:[#allocation12 + $0x1e8] sm:$0xf0] }
 0x74b   : > { %v4981_v34 = vsel %vm729_vm3, %v4980_v8, %v4954_v35  ;;  %v10333_v35 = vor.u32 %v11768_v54, %v10330_v27  ;;  %v10397_v60 = vor.u32 %v11784_v59, %v10394_v41  ;;  %v10328_v8 = vld [vmem:[#allocation12 + $0x160] sm:$0xf]  ;;  %v11779_v27 = vld [vmem:[#allocation12 + $0x1b4] sm:$0xf0] }
 0x74c   : > { %v4982_v31 = vsel %vm731_vm4, %v4981_v34, %v4960_v49  ;;  %v10401_v49 = vor.u32 %v11787_v20, %v10400_v7  ;;  %v10329_v34 = vor.u32 %v11769_v25, %v10328_v8  ;;  %v10304_v7 = vld [vmem:[#allocation12 + $0x130] sm:$0xf]  ;;  %v10362_v8 = vld [vmem:[#allocation12 + $0x1a8] sm:$0xf0] }
 0x74d   : > { %5590 = vmatpush.bf16.msrb.mxu2 %v10333_v35  ;;  %5619 = vmatpush.bf16.msrb.mxu3 %v10397_v60  ;;  %v10368_v20 = vld [vmem:[#allocation12 + $0x1b0] sm:$0xf]  ;;  %v10305_v54 = vor.u32 %v11763_v45, %v10304_v7  ;;  %v10298_v35 = vld [vmem:[#allocation12 + $0x128] sm:$0xf0]  ;;  %v11776_v60 = vld [vmem:[#allocation12 + $0x1a4] sm:$0xf] }
 0x74e   : > { %5560 = vmatpush.bf16.msrb.mxu1 %v10401_v49  ;;  %5532 = vmatpush.bf16.msrb.mxu0 %v10329_v34  ;;  %v11760_v49 = vld [vmem:[#allocation12 + $0x124] sm:$0xf]  ;;  %v10369_v59 = vor.u32 %v11779_v27, %v10368_v20  ;;  %v10365_v25 = vor.u32 %v11776_v60, %v10362_v8  ;;  %v11761_v34 = vld [vmem:[#allocation12 + $0x124] sm:$0xf0]  ;;  %v11738_v45 = vld [vmem:[#allocation12 + $0x74] sm:$0xf] }
 0x74f   : > { %v10301_v41 = vor.u32 %v11760_v49, %v10298_v35  ;;  %v10466_v20 = vld [vmem:[#allocation12 + $0x78] sm:$0xf0] }
 0x750   : > { %v10469_v49 = vor.u32 %v11738_v45, %v10466_v20  ;;  %v10530_v35 = vld [vmem:[#allocation12 + $0xf8] sm:$0xf0] }
 0x751   : > { %v4966_v30 = vpop.xlane.xlu0 %4965 }
 0x752   : > { %v4983_v17 = vsel %vm733_vm5, %v4982_v31, %v4966_v30  ;;  %v11766_v31 = vld [vmem:[#allocation12 + $0x154] sm:$0xf]  ;;  %v10322_v30 = vld [vmem:[#allocation12 + $0x158] sm:$0xf0] }
 0x753   : > { %v4984_v33 = vsel %vm735_vm6, %v4983_v17, %v4972_v3  ;;  %v10325_v17 = vor.u32 %v11766_v31, %v10322_v30  ;;  %v11777_v30 = vld [vmem:[#allocation12 + $0x1a4] sm:$0xf0] }
 0x754   : > { %v4985_v53 = vsel %vm737_vm7, %v4984_v33, %v4978_v29  ;;  %v11782_v29 = vld [vmem:[#allocation12 + $0x1d4] sm:$0xf]  ;;  %v10386_v33 = vld [vmem:[#allocation12 + $0x1d8] sm:$0xf0] }
 0x755   : > { %v4986_v9 = vmul.f32 0.00048828125, %v4985_v53  ;;  %v10320_v53 = vld [vmem:[#allocation12 + $0x150] sm:$0xf]  ;;  %5591 = vmatpush.bf16.msrb.mxu2 %v10325_v17  ;;  %v10290_v17 = vld [vmem:[#allocation12 + $0x118] sm:$0xf0] }
 0x757   : > { %v4988_v19 = vsub.f32 %v4986_v9, %v4987_v15  ;;  %v10389_v15 = vor.u32 %v11782_v29, %v10386_v33  ;;  %v11767_v9 = vld [vmem:[#allocation12 + $0x154] sm:$0xf0] }
 0x759   : > { %v4989_v0 = vadd.f32 1e-05, %v4988_v19  ;;  %v10384_v19 = vld [vmem:[#allocation12 + $0x1d0] sm:$0xf]  ;;  %5620 = vmatpush.bf16.msrb.mxu3 %v10389_v15  ;;  %5592 = vmatpush.bf16.msrb.mxu2 %v10317_v32  ;;  %v10354_v15 = vld [vmem:[#allocation12 + $0x198] sm:$0xf0] }
 0x75a   : > { %v10282_v32 = vld [vmem:[#allocation12 + $0x108] sm:$0xf0] }
 0x75b   : > { %12137 = vrsqrt.f32 %v4989_v0  ;;  %vm4996_vm1 = vweird.f32 %v4989_v0 }
 0x761   : > { %v12138_v21 = vpop.eup %12137 }
 0x762   : > { %v4991_v63 = vmul.f32 %v12138_v21, %v4989_v0  ;;  %vm4997_vm0 = vweird.f32 %v12138_v21  ;;  %v11783_v0 = vld [vmem:[#allocation12 + $0x1d4] sm:$0xf0] }
 0x763   : > { %vm4998_vm2 = vmor %vm4996_vm1, %vm4997_vm0 }
 0x764   : > { %v4992_v28 = vmul.f32 %v12138_v21, %v4991_v63  ;;  %v10385_v63 = vor.u32 %v11783_v0, %v10384_v19  ;;  %v11759_v0 = vld [vmem:[#allocation12 + $0x114] sm:$0xf0] }
 0x766   : > { %v4993_v50 = vmul.f32 0.5, %v4992_v28  ;;  %v10381_v28 = vor.u32 %v11780_v39, %v10378_v43  ;;  %v11756_v39 = vld [vmem:[#allocation12 + $0x104] sm:$0xf] }
 0x767   : > { %v11772_v43 = vld [vmem:[#allocation12 + $0x184] sm:$0xf] }
 0x768   : > { %v4994_v10 = vsub.f32 1.5, %v4993_v50  ;;  %5621 = vmatpush.bf16.msrb.mxu3 %v10381_v28  ;;  %v11765_v50 = vld [vmem:[#allocation12 + $0x144] sm:$0xf0]  ;;  %v10285_v28 = vor.u32 %v11756_v39, %v10282_v32 }
 0x76a   : > { %v4995_v6 = vmul.f32 %v12138_v21, %v4994_v10  ;;  %v10376_v10 = vld [vmem:[#allocation12 + $0x1c0] sm:$0xf] }
 0x76c   : > { %v4999_v55 = vsel %vm4998_vm2, %v12138_v21, %v4995_v6  ;;  %v10321_v21 = vor.u32 %v11767_v9, %v10320_v53  ;;  %v11781_v6 = vld [vmem:[#allocation12 + $0x1c4] sm:$0xf0]  ;;  %v11774_v53 = vld [vmem:[#allocation12 + $0x194] sm:$0xf]  ;;  %v10288_v9 = vld [vmem:[#allocation12 + $0x110] sm:$0xf] }
 0x76d   : > { %v13742_v52 = vmul.f32 %v4999_v55, %v4755_v47  ;;  %v10313_v47 = vor.u32 %v11765_v50, %v10312_v46  ;;  %v11762_v55 = vld [vmem:[#allocation12 + $0x134] sm:$0xf]  ;;  %v10357_v19 = vor.u32 %v11774_v53, %v10354_v15  ;;  %v10289_v12 = vor.u32 %v11759_v0, %v10288_v9  ;;  %v10346_v46 = vld [vmem:[#allocation12 + $0x188] sm:$0xf0]  ;;  %v10280_v50 = vld [vmem:[#allocation12 + $0x100] sm:$0xf] }
 0x76e   : > { %5533 = vmatpush.bf16.msrb.mxu0 %v10321_v21  ;;  %v10352_v21 = vld [vmem:[#allocation12 + $0x190] sm:$0xf]  ;;  %v11737_v53 = vld [vmem:[#allocation12 + $0x64] sm:$0xf0]  ;;  %v10520_v15 = vld [vmem:[#allocation12 + $0xe0] sm:$0xf] }
 0x76f   : > { %v5004_v13 = vperm.slane %v13742_v52, 0  ;;  %v5001_v48 = vmul.f32 %v13742_v52, %v4932_v18  ;;  %v11785_v18 = vld [vmem:[#allocation12 + $0x1e4] sm:$0xf0] }
 0x770   : > { %v10393_v3 = vor.u32 %v11785_v18, %v10392_v23  ;;  %v10296_v23 = vld [vmem:[#allocation12 + $0x120] sm:$0xf] }
 0x771   : > { %5011 = vrot.lane.b32.xlu1 %v5004_v13, %s12438_s21  ;;  %5008 = vrot.lane.b32.xlu2 %v5004_v13, %s12437_s9  ;;  %v13749_v36 = vsub.f32 %v4756_v24, %v5001_v48  ;;  %v10377_v48 = vor.u32 %v11781_v6, %v10376_v10  ;;  %v10360_v18 = vld [vmem:[#allocation12 + $0x1a0] sm:$0xf]  ;;  %v10297_v31 = vor.u32 %v11761_v34, %v10296_v23  ;;  %v11757_v10 = vld [vmem:[#allocation12 + $0x104] sm:$0xf0]  ;;  %v10528_v23 = vld [vmem:[#allocation12 + $0xf0] sm:$0xf] }
 0x772   : > { %5005 = vrot.lane.b32.xlu0 %v5004_v13, %s12439_s22  ;;  %5561 = vmatpush.bf16.msrb.mxu1 %v10393_v3  ;;  %v10306_v13 = vld [vmem:[#allocation12 + $0x138] sm:$0xf0]  ;;  %v11758_v3 = vld [vmem:[#allocation12 + $0x114] sm:$0xf]  ;;  %v10361_v29 = vor.u32 %v11777_v30, %v10360_v18  ;;  %v10344_v6 = vld [vmem:[#allocation12 + $0x180] sm:$0xf] }
 0x773   : > { %v5018_v14 = vperm.slane %v13749_v36, 0  ;;  %v10309_v24 = vor.u32 %v11762_v55, %v10306_v13  ;;  %5534 = vmatpush.bf16.msrb.mxu0 %v10313_v47  ;;  %v10293_v33 = vor.u32 %v11758_v3, %v10290_v17  ;;  %v10349_v47 = vor.u32 %v11772_v43, %v10346_v46  ;;  %v11773_v55 = vld [vmem:[#allocation12 + $0x184] sm:$0xf0]  ;;  %v11755_v34 = vld [vmem:[#allocation12 + $0xf4] sm:$0xf0] }
 0x774   : > { %v10281_v13 = vor.u32 %v11757_v10, %v10280_v50  ;;  %v11736_v18 = vld [vmem:[#allocation12 + $0x64] sm:$0xf]  ;;  %v10522_v3 = vld [vmem:[#allocation12 + $0xe8] sm:$0xf0] }
 0x775   : > { %5593 = vmatpush.bf16.msrb.mxu2 %v10309_v24  ;;  %v11752_v30 = vld [vmem:[#allocation12 + $0xe4] sm:$0xf]  ;;  %v13771_v46 = vld [vmem:[#allocation3 + $0x10] sm:$0x1] }
 0x776   : > { %5562 = vmatpush.bf16.msrb.mxu1 %v10385_v63  ;;  %v11775_v63 = vld [vmem:[#allocation12 + $0x194] sm:$0xf0] }
 0x777   : > { %5535 = vmatpush.bf16.msrb.mxu0 %v10305_v54  ;;  %v10353_v56 = vor.u32 %v11775_v63, %v10352_v21  ;;  %v11754_v54 = vld [vmem:[#allocation12 + $0xf4] sm:$0xf]  ;;  %v11753_v21 = vld [vmem:[#allocation12 + $0xe4] sm:$0xf0] }
 0x778   : > { %v10533_v8 = vor.u32 %v11754_v54, %v10530_v35  ;;  %v10521_v63 = vor.u32 %v11753_v21, %v10520_v15  ;;  %v10506_v15 = vld [vmem:[#allocation12 + $0xc8] sm:$0xf0] }
 0x779   : > { %5022 = vrot.lane.b32.xlu2 %v5018_v14, %s12437_s9  ;;  %5594 = vmatpush.bf16.msrb.mxu2 %v10301_v41  ;;  %v11739_v41 = vld [vmem:[#allocation12 + $0x74] sm:$0xf0]  ;;  %s8971_s9 = scalar_lea.hbm %s14433_s7, %s12012_s1 }
 0x77a   : > { %5019 = vrot.lane.b32.xlu0 %v5018_v14, %s12439_s22  ;;  %5563 = vmatpush.bf16.msrb.mxu1 %v10377_v48  ;;  %v10345_v48 = vor.u32 %v11773_v55, %v10344_v6  ;;  %v13779_v6 = vld [vmem:[#allocation3 + $0x8] sm:$0xfe]  ;;  %v13781_v55 = vld [vmem:[#allocation3 + $0x18] sm:$0x1]  ;;  %s8960_s22 = scalar_lea.sflag [#allocation6], %s12627_s13 }
 0x77b   : > { %5536 = vmatpush.bf16.msrb.mxu0 %v10297_v31  ;;  %v10458_v31 = vld [vmem:[#allocation12 + $0x68] sm:$0xf0] }
 0x77c   : > { %v10461_v17 = vor.u32 %v11736_v18, %v10458_v31  ;;  %v11751_v31 = vld [vmem:[#allocation12 + $0xd4] sm:$0xf0] }
 0x77d   : > { %5595 = vmatpush.bf16.msrb.mxu2 %v10293_v33  ;;  %v10456_v33 = vld [vmem:[#allocation12 + $0x60] sm:$0xf] }
 0x77e   : > { %5564 = vmatpush.bf16.msrb.mxu1 %v10369_v59  ;;  %v10464_v59 = vld [vmem:[#allocation12 + $0x70] sm:$0xf]  ;;  %v10457_v0 = vor.u32 %v11737_v53, %v10456_v33  ;;  %v11748_v33 = vld [vmem:[#allocation12 + $0xc4] sm:$0xf] }
 0x77f   : > { %5537 = vmatpush.bf16.msrb.mxu0 %v10289_v12 }
 0x781   : > { %5596 = vmatpush.bf16.msrb.mxu2 %v10285_v28 }
 0x782   : > { %5025 = vrot.lane.b32.xlu0 %v5018_v14, %s12438_s21  ;;  %v11778_v14 = vld [vmem:[#allocation12 + $0x1b4] sm:$0xf]  ;;  %5565 = vmatpush.bf16.msrb.mxu1 %v10361_v29  ;;  %v10525_v29 = vor.u32 %v11752_v30, %v10522_v3  ;;  %v11732_v30 = vld [vmem:[#allocation12 + $0x44] sm:$0xf]  ;;  %s8974_s21 = sshll.u32 %s8971_s9, 4  ;;  %s8975_s21 = int_to_ptr.hbm [resolvable:$true] %s8974_s21 }
 0x783   : > { %v10373_v42 = vor.u32 %v11778_v14, %v10370_v22  ;;  %5538 = vmatpush.bf16.msrb.mxu0 %v10281_v13  ;;  %s12363_s15 = sshra.s32 %s8975_s21, 4  ;;  %s12364_s15 = int_to_ptr.hbm [resolvable:$true] %s12363_s15 }
 0x784   : > { %s12365_s16 = scalar_lea.hbm %s12364_s15, 128  ;;  %p12370_p12 = scmp.lt.s32.totalorder %s12364_s15, %s14433_s7 }
 0x785   : > { %5622 = vmatpush.bf16.msrb.mxu3 %v10373_v42  ;;  %5865 = vmatpush.bf16.msra.mxu2 %v10469_v49  ;;  %v10450_v49 = vld [vmem:[#allocation12 + $0x58] sm:$0xf0]  ;;  %p12366_p1 = scmp.ne.s32.totalorder %s12364_s15, %s12365_s16  ;;  %p12371_p7 = scmp.lt.s32.totalorder %s12369_s23, %s12365_s16 }
 0x786   : > { %5566 = vmatpush.bf16.msrb.mxu1 %v10353_v56 }
 0x787   : > { %p12367_p3 = pnand %p12366_p1, %p12593_p4  ;;  %p12372_p8 = por %p12371_p7, %p12370_p12 }
 0x789   : > { %5623 = vmatpush.bf16.msrb.mxu3 %v10365_v25  ;;  %v10465_v25 = vor.u32 %v11739_v41, %v10464_v59  ;;  %5866 = vmatpush.bf16.msra.mxu2 %v10461_v17  ;;  %p12368_p5 = pneg %p12367_p3 }
 0x78a   : > { %5567 = vmatpush.bf16.msrb.mxu1 %v10345_v48 }
 0x78b   : > { %5807 = vmatpush.bf16.msra.mxu0 %v10465_v25  ;;  %p12373_p9 = pnand %p12372_p8, %p12368_p5 }
 0x78d   : > { %5624 = vmatpush.bf16.msrb.mxu3 %v10357_v19 }
 0x78f   : > { %5808 = vmatpush.bf16.msra.mxu0 %v10457_v0 }
 0x791   : > { %5625 = vmatpush.bf16.msrb.mxu3 %v10349_v47 }
 0x795   : > { %5894 = vmatpush.bf16.msra.mxu3 %v10533_v8  ;;  %v10514_v8 = vld [vmem:[#allocation12 + $0xd8] sm:$0xf0] }
 0x799   : > { %5895 = vmatpush.bf16.msra.mxu3 %v10525_v29  ;;  %v10442_v29 = vld [vmem:[#allocation12 + $0x48] sm:$0xf0] }
 0x79a   : > { %v10445_v53 = vor.u32 %v11732_v30, %v10442_v29  ;;  %v10498_v30 = vld [vmem:[#allocation12 + $0xb8] sm:$0xf0] }
 0x7cb   : > { %v5009_v22 = vpop.permute.xlu2 %5008 }
 0x7d3   : > { %v5023_v12 = vpop.permute.xlu2 %5022 }
 0x7e3   : > { %v5012_v27 = vpop.permute.xlu1 %5011 }
 0x7e4   : > { %v5006_v24 = vpop.permute.xlu0 %5005 }
 0x7e5   : > { %v5014_v14 = vsel %vm821_vm11, %v13742_v52, %v5006_v24  ;;  %v10529_v52 = vor.u32 %v11755_v34, %v10528_v23  ;;  %v10448_v23 = vld [vmem:[#allocation12 + $0x50] sm:$0xf]  ;;  %v11735_v34 = vld [vmem:[#allocation12 + $0x54] sm:$0xf0] }
 0x7e6   : > { %v5015_v42 = vsel %vm823_vm12, %v5014_v14, %v5009_v22  ;;  %v5267_v14 = vrot.slane %v13771_v46, 1 }
 0x7e7   : > { %v5016_v60 = vsel %vm825_vm13, %v5015_v42, %v5012_v27  ;;  %5836 = vmatpush.bf16.msra.mxu1 %v10529_v52  ;;  %v5270_v42 = vrot.slane %v13781_v55, 1  ;;  %v11734_v27 = vld [vmem:[#allocation12 + $0x54] sm:$0xf]  ;;  %v10512_v52 = vld [vmem:[#allocation12 + $0xd0] sm:$0xf] }
 0x7e8   : > { %v13759_v9 = vperm.slane %v5016_v60, 0  ;;  %v10453_v41 = vor.u32 %v11734_v27, %v10450_v49  ;;  %v11750_v60 = vld [vmem:[#allocation12 + $0xd4] sm:$0xf]  ;;  %v10513_v17 = vor.u32 %v11751_v31, %v10512_v52 }
 0x7e9   : > { %v10517_v25 = vor.u32 %v11750_v60, %v10514_v8  ;;  %v11746_v31 = vld [vmem:[#allocation12 + $0xb4] sm:$0xf] }
 0x7ea   : > { %v5032_v43 = vmul.f32 %v13759_v9, %v13592_v58  ;;  %v5033_v50 = vmul.f32 %v13759_v9, %v13625_v5  ;;  %v5034_v10 = vmul.f32 %v13759_v9, %v13589_v38  ;;  %v5036_v47 = vmul.f32 %v13759_v9, %v13594_v62  ;;  %5867 = vmatpush.bf16.msra.mxu2 %v10453_v41 }
 0x7eb   : > { %5837 = vmatpush.bf16.msra.mxu1 %v10521_v63  ;;  %v5269_v62 = vrot.slane %v13779_v6, 1  ;;  %v5035_v20 = vmul.f32 %v13759_v9, %v13619_v26  ;;  %v5037_v54 = vmul.f32 %v13759_v9, %v13628_v2  ;;  %v10449_v2 = vor.u32 %v11735_v34, %v10448_v23  ;;  %5896 = vmatpush.bf16.msra.mxu3 %v10517_v25 }
 0x7ec   : > { %v5020_v7 = vpop.permute.xlu0 %5019  ;;  %v5038_v3 = vmul.f32 %v13759_v9, %v13604_v11  ;;  %v5040_v0 = vmul.f32 %v13759_v9, %v13612_v1  ;;  %v5039_v6 = vmul.f32 %v13759_v9, %v13640_v51  ;;  %v5041_v55 = vmul.f32 %v13759_v9, %v13648_v4  ;;  %v11730_v51 = vld [vmem:[#allocation12 + $0x34] sm:$0xf] }
 0x7ed   : > { %v5028_v19 = vsel %vm821_vm11, %v13749_v36, %v5020_v7  ;;  %v13769_v36 = vld [vmem:[#allocation3] sm:$0xfe]  ;;  %5809 = vmatpush.bf16.msra.mxu0 %v10449_v2  ;;  %v5044_v2 = vmul.f32 %v13759_v9, %v13633_v37  ;;  %v10501_v29 = vor.u32 %v11746_v31, %v10498_v30 }
 0x7ee   : > { %v5029_v56 = vsel %vm823_vm12, %v5028_v19, %v5023_v12  ;;  %v5266_v5 = vrot.slane %v13769_v36, 1  ;;  %v10440_v19 = vld [vmem:[#allocation12 + $0x40] sm:$0xf]  ;;  %v10509_v12 = vor.u32 %v11748_v33, %v10506_v15  ;;  %5868 = vmatpush.bf16.msra.mxu2 %v10445_v53  ;;  %v11731_v33 = vld [vmem:[#allocation12 + $0x34] sm:$0xf0] }
 0x7ef   : > { %5838 = vmatpush.bf16.msra.mxu1 %v10513_v17 }
 0x7f0   : > { %v5268_v36 = vsel %vm1076_vm14, %v5266_v5, %v5267_v14  ;;  %5897 = vmatpush.bf16.msra.mxu3 %v10509_v12  ;;  %v10504_v5 = vld [vmem:[#allocation12 + $0xc0] sm:$0xf] }
 0x7f4   : > { %v5026_v39 = vpop.permute.xlu0 %5025  ;;  %5898 = vmatpush.bf16.msra.mxu3 %v10501_v29 }
 0x7f5   : > { %v5030_v32 = vsel %vm825_vm13, %v5029_v56, %v5026_v39  ;;  %v11733_v56 = vld [vmem:[#allocation12 + $0x44] sm:$0xf0] }
 0x7f6   : > { %v13767_v28 = vperm.slane %v5030_v32, 0  ;;  %v10441_v32 = vor.u32 %v11733_v56, %v10440_v19  ;;  %v10496_v56 = vld [vmem:[#allocation12 + $0xb0] sm:$0xf] }
 0x7f8   : > { %v5049_v58 = vadd.f32 %v13767_v28, %v5032_v43  ;;  %v5050_v13 = vadd.f32 %v13767_v28, %v5033_v50  ;;  %v5051_v48 = vadd.f32 %v13767_v28, %v5034_v10  ;;  %v5053_v24 = vadd.f32 %v13767_v28, %v5036_v47  ;;  %5810 = vmatpush.bf16.msra.mxu0 %v10441_v32 }
 0x7f9   : > { %v5052_v35 = vadd.f32 %v13767_v28, %v5035_v20  ;;  %v5054_v59 = vadd.f32 %v13767_v28, %v5037_v54  ;;  %v5055_v21 = vadd.f32 %v13767_v28, %v5038_v3  ;;  %v5057_v43 = vadd.f32 %v13767_v28, %v5040_v0  ;;  %v10432_v3 = vld [vmem:[#allocation12 + $0x30] sm:$0xf] }
 0x7fa   : > { %v5081_v38 = vrot.slane %v5049_v58, 7  ;;  %v5082_v22 = vrot.slane %v5050_v13, 7  ;;  %v5083_v7 = vrot.slane %v5051_v48, 7  ;;  %v5085_v45 = vrot.slane %v5053_v24, 7 }
 0x7fb   : > { %v5084_v26 = vrot.slane %v5052_v35, 7  ;;  %v5086_v18 = vrot.slane %v5054_v59, 7  ;;  %v5087_v47 = vrot.slane %v5055_v21, 7  ;;  %v5271_v13 = vsel %vm1076_vm14, %v5269_v62, %v5270_v42 }
 0x7fc   : > { %5114 = vst [vmem:[#allocation3 + $0x20] sm:$0xfe] %v5081_v38  ;;  %v5089_v14 = vrot.slane %v5057_v43, 7  ;;  %v5056_v59 = vadd.f32 %v13767_v28, %v5039_v6  ;;  %v5058_v41 = vadd.f32 %v13767_v28, %v5041_v55  ;;  %v5061_v15 = vadd.f32 %v13767_v28, %v5044_v2  ;;  %v11743_v2 = vld [vmem:[#allocation12 + $0x94] sm:$0xf0] }
 0x7fd   : > { %5116 = vst [vmem:[#allocation3 + $0x30] sm:$0x1] %v5081_v38  ;;  %v10433_v19 = vor.u32 %v11731_v33, %v10432_v3 }
 0x7fe   : > { %5115 = vst [vmem:[#allocation3 + $0x28] sm:$0xfe] %v5082_v22  ;;  %v5088_v34 = vrot.slane %v5056_v59, 7  ;;  %v5090_v4 = vrot.slane %v5058_v41, 7  ;;  %v5093_v32 = vrot.slane %v5061_v15, 7 }
 0x7ff   : > { %5117 = vst [vmem:[#allocation3 + $0x38] sm:$0x1] %v5082_v22  ;;  %5811 = vmatpush.bf16.msra.mxu0 %v10433_v19  ;;  %v11742_v59 = vld [vmem:[#allocation12 + $0x94] sm:$0xf]  ;;  %v10482_v41 = vld [vmem:[#allocation12 + $0x98] sm:$0xf0] }
 0x800   : > { %5118 = vst [vmem:[#allocation3 + $0x40] sm:$0xfe] %v5083_v7 }
 0x801   : > { %5120 = vst [vmem:[#allocation3 + $0x50] sm:$0x1] %v5083_v7  ;;  %v11749_v7 = vld [vmem:[#allocation12 + $0xc4] sm:$0xf0] }
 0x802   : > { %5122 = vst [vmem:[#allocation3 + $0x60] sm:$0xfe] %v5085_v45  ;;  %v10505_v27 = vor.u32 %v11749_v7, %v10504_v5 }
 0x803   : > { %v5206_v63 = vld [vmem:[#allocation3 + $0x20] sm:$0xfe]  ;;  %5124 = vst [vmem:[#allocation3 + $0x70] sm:$0x1] %v5085_v45 }
 0x804   : > { %v5208_v11 = vld [vmem:[#allocation3 + $0x30] sm:$0x1]  ;;  %v5272_v39 = vrot.slane %v5206_v63, 1  ;;  %5119 = vst [vmem:[#allocation3 + $0x48] sm:$0xfe] %v5084_v26  ;;  %5839 = vmatpush.bf16.msra.mxu1 %v10505_v27 }
 0x805   : > { %v5273_v46 = vrot.slane %v5208_v11, 1  ;;  %v5207_v50 = vld [vmem:[#allocation3 + $0x28] sm:$0xfe]  ;;  %5121 = vst [vmem:[#allocation3 + $0x58] sm:$0x1] %v5084_v26 }
 0x806   : > { %v5209_v1 = vld [vmem:[#allocation3 + $0x38] sm:$0x1]  ;;  %v5275_v10 = vrot.slane %v5207_v50, 1  ;;  %5123 = vst [vmem:[#allocation3 + $0x68] sm:$0xfe] %v5086_v18 }
 0x807   : > { %v5274_v58 = vsel %vm1076_vm14, %v5272_v39, %v5273_v46  ;;  %v5276_v48 = vrot.slane %v5209_v1, 1  ;;  %5125 = vst [vmem:[#allocation3 + $0x78] sm:$0x1] %v5086_v18  ;;  %v5210_v22 = vld [vmem:[#allocation3 + $0x40] sm:$0xfe]  ;;  %v5042_v18 = vmul.f32 %v13759_v9, %v13623_v61 }
 0x808   : > { %v5330_v24 = vpack.c.bf16 %v5274_v58, %v5268_v36  ;;  %v5212_v20 = vld [vmem:[#allocation3 + $0x50] sm:$0x1]  ;;  %5126 = vst [vmem:[#allocation3 + $0x80] sm:$0xfe] %v5087_v47  ;;  %v5278_v62 = vrot.slane %v5210_v22, 1 }
 0x809   : > { %v5277_v38 = vsel %vm1076_vm14, %v5275_v10, %v5276_v48  ;;  %v5214_v54 = vld [vmem:[#allocation3 + $0x60] sm:$0xfe]  ;;  %5128 = vst [vmem:[#allocation3 + $0x90] sm:$0x1] %v5087_v47  ;;  %v5279_v49 = vrot.slane %v5212_v20, 1  ;;  %v5059_v53 = vadd.f32 %v13767_v28, %v5042_v18  ;;  %v5043_v20 = vmul.f32 %v13759_v9, %v13660_v44 }
 0x80a   : > { %5539 = vmatmul.bf16.vlgmr.msrb.gmra.mxu0 %v5330_v24  ;;  %v5331_v45 = vpack.c.bf16 %v5277_v38, %v5271_v13  ;;  %5597 = vmatmul.bf16.vlgmr.msrb.gmra.mxu2 %v5330_v24  ;;  %5130 = vst [vmem:[#allocation3 + $0xa0] sm:$0xfe] %v5089_v14  ;;  %v5216_v42 = vld [vmem:[#allocation3 + $0x70] sm:$0x1]  ;;  %v5284_v35 = vrot.slane %v5214_v54, 1  ;;  %v5045_v54 = vmul.f32 %v13759_v9, %v13668_v40 }
 0x80b   : > { %5132 = vst [vmem:[#allocation3 + $0xb0] sm:$0x1] %v5089_v14  ;;  %v5211_v60 = vld [vmem:[#allocation3 + $0x48] sm:$0xfe]  ;;  %v10434_v26 = vld [vmem:[#allocation12 + $0x38] sm:$0xf0]  ;;  %v5280_v37 = vsel %vm1076_vm14, %v5278_v62, %v5279_v49 }
 0x80c   : > { %5568 = vmatmul.bf16.vlgmr.msrb.gmra.mxu1 %v5331_v45  ;;  %5626 = vmatmul.bf16.vlgmr.msrb.gmra.mxu3 %v5331_v45  ;;  %v5213_v8 = vld [vmem:[#allocation3 + $0x58] sm:$0x1]  ;;  %v10437_v52 = vor.u32 %v11730_v51, %v10434_v26  ;;  %v5285_v17 = vrot.slane %v5216_v42, 1  ;;  %5127 = vst [vmem:[#allocation3 + $0x88] sm:$0xfe] %v5088_v34  ;;  %v5281_v0 = vrot.slane %v5211_v60, 1  ;;  %v5060_v42 = vadd.f32 %v13767_v28, %v5043_v20 }
 0x80d   : > { %v5215_v25 = vld [vmem:[#allocation3 + $0x68] sm:$0xfe]  ;;  %5129 = vst [vmem:[#allocation3 + $0x98] sm:$0x1] %v5088_v34  ;;  %v5282_v61 = vrot.slane %v5213_v8, 1  ;;  %v5091_v39 = vrot.slane %v5059_v53, 7  ;;  %v10485_v51 = vor.u32 %v11742_v59, %v10482_v41 }
 0x80e   : > { %v5217_v23 = vld [vmem:[#allocation3 + $0x78] sm:$0x1]  ;;  %5869 = vmatpush.bf16.msra.mxu2 %v10437_v52  ;;  %v5287_v21 = vrot.slane %v5215_v25, 1  ;;  %5131 = vst [vmem:[#allocation3 + $0xa8] sm:$0xfe] %v5090_v4  ;;  %v5286_v12 = vsel %vm1076_vm14, %v5284_v35, %v5285_v17  ;;  %v5062_v35 = vadd.f32 %v13767_v28, %v5045_v54  ;;  %v5092_v25 = vrot.slane %v5060_v42, 7 }
 0x80f   : > { %v5288_v63 = vrot.slane %v5217_v23, 1  ;;  %5133 = vst [vmem:[#allocation3 + $0xb8] sm:$0x1] %v5090_v4  ;;  %v11747_v11 = vld [vmem:[#allocation12 + $0xb4] sm:$0xf0]  ;;  %v5283_v1 = vsel %vm1076_vm14, %v5281_v0, %v5282_v61  ;;  %v5332_v24 = vpack.c.bf16 %v5286_v12, %v5280_v37 }
 0x810   : > { %v10497_v43 = vor.u32 %v11747_v11, %v10496_v56  ;;  %v11728_v36 = vld [vmem:[#allocation12 + $0x24] sm:$0xf]  ;;  %v10426_v46 = vld [vmem:[#allocation12 + $0x28] sm:$0xf0]  ;;  %v10424_v13 = vld [vmem:[#allocation12 + $0x20] sm:$0xf] }
 0x811   : > { %v11744_v50 = vld [vmem:[#allocation12 + $0xa4] sm:$0xf]  ;;  %v5289_v10 = vsel %vm1076_vm14, %v5287_v21, %v5288_v63  ;;  %v10429_v47 = vor.u32 %v11728_v36, %v10426_v46  ;;  %v10490_v58 = vld [vmem:[#allocation12 + $0xa8] sm:$0xf0]  ;;  %v11729_v48 = vld [vmem:[#allocation12 + $0x24] sm:$0xf0] }
 0x812   : > { %5840 = vmatpush.bf16.msra.mxu1 %v10497_v43  ;;  %v10493_v5 = vor.u32 %v11744_v50, %v10490_v58  ;;  %v10425_v14 = vor.u32 %v11729_v48, %v10424_v13  ;;  %v10488_v38 = vld [vmem:[#allocation12 + $0xa0] sm:$0xf]  ;;  %v11745_v22 = vld [vmem:[#allocation12 + $0xa4] sm:$0xf0]  ;;  %5134 = vst [vmem:[#allocation3 + $0xc0] sm:$0xfe] %v5091_v39  ;;  %v5333_v45 = vpack.c.bf16 %v5289_v10, %v5283_v1 }
 0x813   : > { %5870 = vmatpush.bf16.msra.mxu2 %v10429_v47  ;;  %v10489_v7 = vor.u32 %v11745_v22, %v10488_v38  ;;  %5136 = vst [vmem:[#allocation3 + $0xd0] sm:$0x1] %v5091_v39  ;;  %v5218_v27 = vld [vmem:[#allocation3 + $0x80] sm:$0xfe]  ;;  %v5220_v6 = vld [vmem:[#allocation3 + $0x90] sm:$0x1] }
 0x814   : > { %5899 = vmatpush.bf16.msra.mxu3 %v10493_v5  ;;  %5812 = vmatpush.bf16.msra.mxu0 %v10425_v14  ;;  %5138 = vst [vmem:[#allocation3 + $0xe0] sm:$0xfe] %v5093_v32  ;;  %v5222_v55 = vld [vmem:[#allocation3 + $0xa0] sm:$0xfe]  ;;  %v5224_v62 = vld [vmem:[#allocation3 + $0xb0] sm:$0x1] }
 0x815   : > { %5140 = vst [vmem:[#allocation3 + $0xf0] sm:$0x1] %v5093_v32  ;;  %v11726_v49 = vld [vmem:[#allocation12 + $0x14] sm:$0xf]  ;;  %v10418_v44 = vld [vmem:[#allocation12 + $0x18] sm:$0xf0] }
 0x816   : > { %5841 = vmatpush.bf16.msra.mxu1 %v10489_v7  ;;  %v5219_v60 = vld [vmem:[#allocation3 + $0x88] sm:$0xfe]  ;;  %v5221_v8 = vld [vmem:[#allocation3 + $0x98] sm:$0x1]  ;;  %v10421_v40 = vor.u32 %v11726_v49, %v10418_v44  ;;  %v10416_v23 = vld [vmem:[#allocation12 + $0x10] sm:$0xf] }
 0x817   : > { %v11727_v34 = vld [vmem:[#allocation12 + $0x14] sm:$0xf0]  ;;  %v5094_v4 = vrot.slane %v5062_v35, 7  ;;  %v10480_v18 = vld [vmem:[#allocation12 + $0x90] sm:$0xf]  ;;  %v5290_v3 = vrot.slane %v5218_v27, 1 }
 0x818   : > { %v10417_v26 = vor.u32 %v11727_v34, %v10416_v23  ;;  %v5223_v52 = vld [vmem:[#allocation3 + $0xa8] sm:$0xfe]  ;;  %v5225_v31 = vld [vmem:[#allocation3 + $0xb8] sm:$0x1]  ;;  %5135 = vst [vmem:[#allocation3 + $0xc8] sm:$0xfe] %v5092_v25  ;;  %5871 = vmatpush.bf16.msra.mxu2 %v10421_v40  ;;  %5900 = vmatpush.bf16.msra.mxu3 %v10485_v51  ;;  %v10481_v30 = vor.u32 %v11743_v2, %v10480_v18 }
 0x819   : > { %v5291_v17 = vrot.slane %v5220_v6, 1  ;;  %v5296_v29 = vrot.slane %v5222_v55, 1  ;;  %v5297_v33 = vrot.slane %v5224_v62, 1  ;;  %5137 = vst [vmem:[#allocation3 + $0xd8] sm:$0x1] %v5092_v25  ;;  %v5293_v15 = vrot.slane %v5219_v60, 1 }
 0x81a   : > { %5544 = vmatmul.bf16.gmra.mxu0 %v5332_v24  ;;  %5602 = vmatmul.bf16.gmra.mxu2 %v5332_v24  ;;  %5139 = vst [vmem:[#allocation3 + $0xe8] sm:$0xfe] %v5094_v4  ;;  %v11724_v53 = vld [vmem:[#allocation12 + $0x4] sm:$0xf]  ;;  %v5294_v19 = vrot.slane %v5221_v8, 1  ;;  %v5299_v0 = vrot.slane %v5223_v52, 1 }
 0x81b   : > { %5813 = vmatpush.bf16.msra.mxu0 %v10417_v26  ;;  %5842 = vmatpush.bf16.msra.mxu1 %v10481_v30  ;;  %v5300_v61 = vrot.slane %v5225_v31, 1  ;;  %5141 = vst [vmem:[#allocation3 + $0xf8] sm:$0x1] %v5094_v4  ;;  %v10410_v21 = vld [vmem:[#allocation12 + $0x8] sm:$0xf0]  ;;  %v5292_v37 = vsel %vm1076_vm14, %v5290_v3, %v5291_v17  ;;  %v5298_v12 = vsel %vm1076_vm14, %v5296_v29, %v5297_v33 }
 0x81c   : > { %5573 = vmatmul.bf16.gmra.mxu1 %v5333_v45  ;;  %5631 = vmatmul.bf16.gmra.mxu3 %v5333_v45  ;;  %v11740_v63 = vld [vmem:[#allocation12 + $0x84] sm:$0xf]  ;;  %v10413_v56 = vor.u32 %v11724_v53, %v10410_v21  ;;  %v10474_v11 = vld [vmem:[#allocation12 + $0x88] sm:$0xf0]  ;;  %v10408_v39 = vld [vmem:[#allocation12] sm:$0xf]  ;;  %v5295_v1 = vsel %vm1076_vm14, %v5293_v15, %v5294_v19  ;;  %v5334_v58 = vpack.c.bf16 %v5298_v12, %v5292_v37 }
 0x81d   : > { %v11725_v32 = vld [vmem:[#allocation12 + $0x4] sm:$0xf0]  ;;  %v10477_v43 = vor.u32 %v11740_v63, %v10474_v11  ;;  %v10472_v46 = vld [vmem:[#allocation12 + $0x80] sm:$0xf]  ;;  %v5301_v10 = vsel %vm1076_vm14, %v5299_v0, %v5300_v61  ;;  %v5228_v5 = vld [vmem:[#allocation3 + $0xd0] sm:$0x1] }
 0x81e   : > { %v10409_v36 = vor.u32 %v11725_v32, %v10408_v39  ;;  %v11741_v50 = vld [vmem:[#allocation12 + $0x84] sm:$0xf0]  ;;  %5872 = vmatpush.bf16.msra.mxu2 %v10413_v56  ;;  %v5226_v13 = vld [vmem:[#allocation3 + $0xc0] sm:$0xfe]  ;;  %v5335_v48 = vpack.c.bf16 %v5301_v10, %v5295_v1  ;;  %v5232_v38 = vld [vmem:[#allocation3 + $0xf0] sm:$0x1] }
 0x81f   : > { %v10473_v47 = vor.u32 %v11741_v50, %v10472_v46  ;;  %5901 = vmatpush.bf16.msra.mxu3 %v10477_v43  ;;  %v5302_v24 = vrot.slane %v5226_v13, 1  ;;  %v5230_v14 = vld [vmem:[#allocation3 + $0xe0] sm:$0xfe]  ;;  %v11802_v22 = vld [vmem:[#allocation12 + $0x274] sm:$0xf]  ;;  %v5303_v2 = vrot.slane %v5228_v5, 1 }
 0x820   : > { %5814 = vmatpush.bf16.msra.mxu0 %v10409_v36  ;;  %v10594_v7 = vld [vmem:[#allocation12 + $0x278] sm:$0xf0]  ;;  %v11818_v45 = vld [vmem:[#allocation12 + $0x2f4] sm:$0xf]  ;;  %v10592_v27 = vld [vmem:[#allocation12 + $0x270] sm:$0xf] }
 0x821   : > { %5843 = vmatpush.bf16.msra.mxu1 %v10473_v47  ;;  %v10597_v20 = vor.u32 %v11802_v22, %v10594_v7  ;;  %v10658_v54 = vld [vmem:[#allocation12 + $0x2f8] sm:$0xf0]  ;;  %v11803_v6 = vld [vmem:[#allocation12 + $0x274] sm:$0xf0]  ;;  %v5227_v55 = vld [vmem:[#allocation3 + $0xc8] sm:$0xfe]  ;;  %v5304_v19 = vsel %vm1076_vm14, %v5302_v24, %v5303_v2 }
 0x822   : > { %v5229_v62 = vld [vmem:[#allocation3 + $0xd8] sm:$0x1]  ;;  %v5231_v42 = vld [vmem:[#allocation3 + $0xe8] sm:$0xfe]  ;;  %v10661_v35 = vor.u32 %v11818_v45, %v10658_v54  ;;  %v10593_v44 = vor.u32 %v11803_v6, %v10592_v27  ;;  %v10656_v59 = vld [vmem:[#allocation12 + $0x2f0] sm:$0xf] }
 0x823   : > { %v5233_v49 = vld [vmem:[#allocation3 + $0xf8] sm:$0x1]  ;;  %v11819_v41 = vld [vmem:[#allocation12 + $0x2f4] sm:$0xf0]  ;;  %v11800_v60 = vld [vmem:[#allocation12 + $0x264] sm:$0xf]  ;;  %6310 = vmatpush.bf16.msrb.mxu2 %v10597_v20 }
 0x824   : > { %v10657_v8 = vor.u32 %v11819_v41, %v10656_v59  ;;  %v10586_v25 = vld [vmem:[#allocation12 + $0x268] sm:$0xf0]  ;;  %v11816_v40 = vld [vmem:[#allocation12 + $0x2e4] sm:$0xf]  ;;  %6339 = vmatpush.bf16.msrb.mxu3 %v10661_v35  ;;  %6252 = vmatpush.bf16.msrb.mxu0 %v10593_v44  ;;  %v10584_v4 = vld [vmem:[#allocation12 + $0x260] sm:$0xf] }
 0x825   : > { %v10650_v51 = vld [vmem:[#allocation12 + $0x2e8] sm:$0xf0]  ;;  %v10589_v23 = vor.u32 %v11800_v60, %v10586_v25  ;;  %v11801_v26 = vld [vmem:[#allocation12 + $0x264] sm:$0xf0]  ;;  %v10648_v18 = vld [vmem:[#allocation12 + $0x2e0] sm:$0xf] }
 0x826   : > { %v10653_v34 = vor.u32 %v11816_v40, %v10650_v51  ;;  %v5308_v52 = vrot.slane %v5230_v14, 1  ;;  %v5309_v31 = vrot.slane %v5232_v38, 1  ;;  %6281 = vmatpush.bf16.msrb.mxu1 %v10657_v8  ;;  %v10585_v30 = vor.u32 %v11801_v26, %v10584_v4  ;;  %v11817_v3 = vld [vmem:[#allocation12 + $0x2e4] sm:$0xf0]  ;;  %v11798_v12 = vld [vmem:[#allocation12 + $0x254] sm:$0xf] }
 0x827   : > { %v10649_v17 = vor.u32 %v11817_v3, %v10648_v18  ;;  %v5305_v29 = vrot.slane %v5227_v55, 1  ;;  %v5306_v33 = vrot.slane %v5229_v62, 1  ;;  %v5311_v53 = vrot.slane %v5231_v42, 1  ;;  %6311 = vmatpush.bf16.msrb.mxu2 %v10589_v23  ;;  %v10578_v56 = vld [vmem:[#allocation12 + $0x258] sm:$0xf0]  ;;  %v5147_v55 = vld [vmem:[#allocation3 + $0x8] sm:$0xff] }
 0x828   : > { %v5312_v15 = vrot.slane %v5233_v49, 1  ;;  %6340 = vmatpush.bf16.msrb.mxu3 %v10653_v34  ;;  %6253 = vmatpush.bf16.msrb.mxu0 %v10585_v30  ;;  %v5310_v0 = vsel %vm1076_vm14, %v5308_v52, %v5309_v31  ;;  %v11814_v11 = vld [vmem:[#allocation12 + $0x2d4] sm:$0xf]  ;;  %v10581_v39 = vor.u32 %v11798_v12, %v10578_v56  ;;  %v10642_v32 = vld [vmem:[#allocation12 + $0x2d8] sm:$0xf0]  ;;  %v13843_v62 = vld [vmem:[#allocation3 + $0x28] sm:$0xff] }
 0x829   : > { %v5307_v61 = vsel %vm1076_vm14, %v5305_v29, %v5306_v33  ;;  %v5336_v63 = vpack.c.bf16 %v5310_v0, %v5304_v19  ;;  %v10576_v43 = vld [vmem:[#allocation12 + $0x250] sm:$0xf]  ;;  %v11799_v36 = vld [vmem:[#allocation12 + $0x254] sm:$0xf0]  ;;  %v10645_v46 = vor.u32 %v11814_v11, %v10642_v32  ;;  %v11796_v47 = vld [vmem:[#allocation12 + $0x244] sm:$0xf]  ;;  %v5163_v49 = vpack.c.bf16 %v13843_v62, %v5147_v55 }
 0x82a   : > { %5549 = vmatmul.bf16.gmra.mxu0 %v5334_v58  ;;  %5607 = vmatmul.bf16.gmra.mxu2 %v5334_v58  ;;  %v5313_v21 = vsel %vm1076_vm14, %v5311_v53, %v5312_v15  ;;  %v10577_v50 = vor.u32 %v11799_v36, %v10576_v43  ;;  %v10640_v1 = vld [vmem:[#allocation12 + $0x2d0] sm:$0xf]  ;;  %v11815_v10 = vld [vmem:[#allocation12 + $0x2d4] sm:$0xf0]  ;;  %v10570_v13 = vld [vmem:[#allocation12 + $0x248] sm:$0xf0] }
 0x82b   : > { %6282 = vmatpush.bf16.msrb.mxu1 %v10649_v17  ;;  %v5337_v37 = vpack.c.bf16 %v5313_v21, %v5307_v61  ;;  %6312 = vmatpush.bf16.msrb.mxu2 %v10581_v39  ;;  %v10641_v58 = vor.u32 %v11815_v10, %v10640_v1  ;;  %v10634_v24 = vld [vmem:[#allocation12 + $0x2c8] sm:$0xf0]  ;;  %v10573_v5 = vor.u32 %v11796_v47, %v10570_v13  ;;  %v10568_v38 = vld [vmem:[#allocation12 + $0x240] sm:$0xf]  ;;  %v11797_v22 = vld [vmem:[#allocation12 + $0x244] sm:$0xf0] }
 0x82c   : > { %5578 = vmatmul.bf16.gmra.mxu1 %v5335_v48  ;;  %5636 = vmatmul.bf16.gmra.mxu3 %v5335_v48  ;;  %v11812_v48 = vld [vmem:[#allocation12 + $0x2c4] sm:$0xf]  ;;  %v10632_v7 = vld [vmem:[#allocation12 + $0x2c0] sm:$0xf]  ;;  %v10569_v45 = vor.u32 %v11797_v22, %v10568_v38  ;;  %v11813_v20 = vld [vmem:[#allocation12 + $0x2c4] sm:$0xf0] }
 0x82d   : > { %6341 = vmatpush.bf16.msrb.mxu3 %v10645_v46  ;;  %6254 = vmatpush.bf16.msrb.mxu0 %v10577_v50  ;;  %v10637_v14 = vor.u32 %v11812_v48, %v10634_v24  ;;  %v10633_v54 = vor.u32 %v11813_v20, %v10632_v7  ;;  %v5146_v27 = vld [vmem:[#allocation3] sm:$0xff]  ;;  %v11794_v35 = vld [vmem:[#allocation12 + $0x234] sm:$0xf]  ;;  %v10560_v8 = vld [vmem:[#allocation12 + $0x230] sm:$0xf] }
 0x82e   : > { %v13841_v6 = vld [vmem:[#allocation3 + $0x20] sm:$0xff]  ;;  %v11810_v59 = vld [vmem:[#allocation12 + $0x2b4] sm:$0xf]  ;;  %v11795_v25 = vld [vmem:[#allocation12 + $0x234] sm:$0xf0] }
 0x82f   : > { %6283 = vmatpush.bf16.msrb.mxu1 %v10641_v58  ;;  %6313 = vmatpush.bf16.msrb.mxu2 %v10573_v5  ;;  %v5162_v42 = vpack.c.bf16 %v13841_v6, %v5146_v27  ;;  %v10562_v44 = vld [vmem:[#allocation12 + $0x238] sm:$0xf0]  ;;  %v10561_v51 = vor.u32 %v11795_v25, %v10560_v8  ;;  %v10624_v23 = vld [vmem:[#allocation12 + $0x2b0] sm:$0xf]  ;;  %v11811_v34 = vld [vmem:[#allocation12 + $0x2b4] sm:$0xf0] }
 0x830   : > { %v10565_v41 = vor.u32 %v11794_v35, %v10562_v44  ;;  %v10626_v60 = vld [vmem:[#allocation12 + $0x2b8] sm:$0xf0]  ;;  %v11792_v4 = vld [vmem:[#allocation12 + $0x224] sm:$0xf]  ;;  %v10625_v26 = vor.u32 %v11811_v34, %v10624_v23  ;;  %v10554_v18 = vld [vmem:[#allocation12 + $0x228] sm:$0xf0] }
 0x831   : > { %6342 = vmatpush.bf16.msrb.mxu3 %v10637_v14  ;;  %6255 = vmatpush.bf16.msrb.mxu0 %v10569_v45  ;;  %v10629_v40 = vor.u32 %v11810_v59, %v10626_v60  ;;  %v11808_v2 = vld [vmem:[#allocation12 + $0x2a4] sm:$0xf]  ;;  %v10618_v52 = vld [vmem:[#allocation12 + $0x2a8] sm:$0xf0]  ;;  %v10557_v31 = vor.u32 %v11792_v4, %v10554_v18  ;;  %v10552_v3 = vld [vmem:[#allocation12 + $0x220] sm:$0xf] }
 0x832   : > { %v10621_v30 = vor.u32 %v11808_v2, %v10618_v52  ;;  %v11793_v17 = vld [vmem:[#allocation12 + $0x224] sm:$0xf0]  ;;  %v10616_v29 = vld [vmem:[#allocation12 + $0x2a0] sm:$0xf]  ;;  %v11790_v12 = vld [vmem:[#allocation12 + $0x214] sm:$0xf] }
 0x833   : > { %6284 = vmatpush.bf16.msrb.mxu1 %v10633_v54  ;;  %6314 = vmatpush.bf16.msrb.mxu2 %v10565_v41  ;;  %v10553_v33 = vor.u32 %v11793_v17, %v10552_v3  ;;  %v11809_v53 = vld [vmem:[#allocation12 + $0x2a4] sm:$0xf0]  ;;  %v13847_v19 = vld [vmem:[#allocation3 + $0x40] sm:$0xff]  ;;  %v11806_v11 = vld [vmem:[#allocation12 + $0x294] sm:$0xf] }
 0x834   : > { %v10617_v15 = vor.u32 %v11809_v53, %v10616_v29  ;;  %v13849_v0 = vld [vmem:[#allocation3 + $0x60] sm:$0xff]  ;;  %v13851_v61 = vld [vmem:[#allocation3 + $0x48] sm:$0xff]  ;;  %v10544_v43 = vld [vmem:[#allocation12 + $0x210] sm:$0xf] }
 0x835   : > { %6343 = vmatpush.bf16.msrb.mxu3 %v10629_v40  ;;  %6256 = vmatpush.bf16.msrb.mxu0 %v10561_v51  ;;  %v13853_v21 = vld [vmem:[#allocation3 + $0x68] sm:$0xff]  ;;  %v10546_v56 = vld [vmem:[#allocation12 + $0x218] sm:$0xf0]  ;;  %v11791_v36 = vld [vmem:[#allocation12 + $0x214] sm:$0xf0] }
 0x836   : > { %v10549_v39 = vor.u32 %v11790_v12, %v10546_v56  ;;  %v10610_v32 = vld [vmem:[#allocation12 + $0x298] sm:$0xf0]  ;;  %v10545_v50 = vor.u32 %v11791_v36, %v10544_v43  ;;  %v10608_v1 = vld [vmem:[#allocation12 + $0x290] sm:$0xf]  ;;  %v11807_v10 = vld [vmem:[#allocation12 + $0x294] sm:$0xf0] }
 0x837   : > { %6285 = vmatpush.bf16.msrb.mxu1 %v10625_v26  ;;  %6315 = vmatpush.bf16.msrb.mxu2 %v10557_v31  ;;  %v10613_v46 = vor.u32 %v11806_v11, %v10610_v32  ;;  %v11788_v47 = vld [vmem:[#allocation12 + $0x204] sm:$0xf]  ;;  %v10609_v58 = vor.u32 %v11807_v10, %v10608_v1  ;;  %v10538_v13 = vld [vmem:[#allocation12 + $0x208] sm:$0xf0]  ;;  %v13859_v38 = vld [vmem:[#allocation3 + $0x80] sm:$0xff] }
 0x838   : > { %v11804_v48 = vld [vmem:[#allocation12 + $0x284] sm:$0xf]  ;;  %v10602_v24 = vld [vmem:[#allocation12 + $0x288] sm:$0xf0]  ;;  %v10541_v5 = vor.u32 %v11788_v47, %v10538_v13  ;;  %v13861_v22 = vld [vmem:[#allocation3 + $0xa0] sm:$0xff] }
 0x839   : > { %6344 = vmatpush.bf16.msrb.mxu3 %v10621_v30  ;;  %6257 = vmatpush.bf16.msrb.mxu0 %v10553_v33  ;;  %v10605_v14 = vor.u32 %v11804_v48, %v10602_v24  ;;  %v13863_v7 = vld [vmem:[#allocation3 + $0x88] sm:$0xff]  ;;  %v5166_v20 = vpack.c.bf16 %v13861_v22, %v13859_v38  ;;  %v10536_v27 = vld [vmem:[#allocation12 + $0x200] sm:$0xf]  ;;  %v11834_v59 = vld [vmem:[#allocation12 + $0x374] sm:$0xf] }
 0x83a   : > { %5554 = vmatmul.bf16.gmra.mxu0 %v5336_v63  ;;  %5612 = vmatmul.bf16.gmra.mxu2 %v5336_v63  ;;  %v5164_v63 = vpack.c.bf16 %v13849_v0, %v13847_v19  ;;  %v13865_v45 = vld [vmem:[#allocation3 + $0xa8] sm:$0xff]  ;;  %v10722_v41 = vld [vmem:[#allocation12 + $0x378] sm:$0xf0]  ;;  %v11850_v8 = vld [vmem:[#allocation12 + $0x3f4] sm:$0xf] }
 0x83b   : > { %6286 = vmatpush.bf16.msrb.mxu1 %v10617_v15  ;;  %6316 = vmatpush.bf16.msrb.mxu2 %v10549_v39  ;;  %v5167_v54 = vpack.c.bf16 %v13865_v45, %v13863_v7  ;;  %v11789_v55 = vld [vmem:[#allocation12 + $0x204] sm:$0xf0]  ;;  %v10725_v60 = vor.u32 %v11834_v59, %v10722_v41  ;;  %v10786_v25 = vld [vmem:[#allocation12 + $0x3f8] sm:$0xf0]  ;;  %v10720_v51 = vld [vmem:[#allocation12 + $0x370] sm:$0xf] }
 0x83c   : > { %5583 = vmatmul.bf16.gmra.mxu1 %v5337_v37  ;;  %5641 = vmatmul.bf16.gmra.mxu3 %v5337_v37  ;;  %v5165_v37 = vpack.c.bf16 %v13853_v21, %v13851_v61  ;;  %v11805_v35 = vld [vmem:[#allocation12 + $0x284] sm:$0xf0]  ;;  %v10789_v40 = vor.u32 %v11850_v8, %v10786_v25  ;;  %v11835_v23 = vld [vmem:[#allocation12 + $0x374] sm:$0xf0]  ;;  %v10784_v34 = vld [vmem:[#allocation12 + $0x3f0] sm:$0xf] }
 0x83d   : > { %6345 = vmatpush.bf16.msrb.mxu3 %v10613_v46  ;;  %6258 = vmatpush.bf16.msrb.mxu0 %v10545_v50  ;;  %v10721_v4 = vor.u32 %v11835_v23, %v10720_v51  ;;  %v11851_v26 = vld [vmem:[#allocation12 + $0x3f4] sm:$0xf0]  ;;  %v11832_v18 = vld [vmem:[#allocation12 + $0x364] sm:$0xf]  ;;  %v10714_v2 = vld [vmem:[#allocation12 + $0x368] sm:$0xf0] }
 0x83e   : > { %v10785_v52 = vor.u32 %v11851_v26, %v10784_v34  ;;  %v10717_v31 = vor.u32 %v11832_v18, %v10714_v2  ;;  %v11848_v30 = vld [vmem:[#allocation12 + $0x3e4] sm:$0xf]  ;;  %v10778_v3 = vld [vmem:[#allocation12 + $0x3e8] sm:$0xf0]  ;;  %v13871_v17 = vld [vmem:[#allocation3 + $0xc0] sm:$0xff] }
 0x83f   : > { %6287 = vmatpush.bf16.msrb.mxu1 %v10609_v58  ;;  %6317 = vmatpush.bf16.msrb.mxu2 %v10541_v5  ;;  %v13873_v29 = vld [vmem:[#allocation3 + $0xe0] sm:$0xff]  ;;  %v10781_v33 = vor.u32 %v11848_v30, %v10778_v3  ;;  %v13875_v53 = vld [vmem:[#allocation3 + $0xc8] sm:$0xff]  ;;  %v5925_v36 = vld [vmem:[#allocation3 + $0x10] sm:$0x3] }
 0x840   : > { %v13877_v15 = vld [vmem:[#allocation3 + $0xe8] sm:$0xff]  ;;  %v10712_v56 = vld [vmem:[#allocation12 + $0x360] sm:$0xf]  ;;  %v5929_v1 = vld [vmem:[#allocation3 + $0x30] sm:$0x3]  ;;  %v5988_v24 = vrot.slane %v5925_v36, 2 }
 0x841   : > { %6346 = vmatpush.bf16.msrb.mxu3 %v10605_v14  ;;  %v5169_v12 = vpack.c.bf16 %v13877_v15, %v13875_v53  ;;  %v11833_v11 = vld [vmem:[#allocation12 + $0x364] sm:$0xf0]  ;;  %v10776_v39 = vld [vmem:[#allocation12 + $0x3e0] sm:$0xf]  ;;  %v5926_v58 = vld [vmem:[#allocation3 + $0x18] sm:$0x3] }
 0x842   : > { %v10713_v32 = vor.u32 %v11833_v11, %v10712_v56  ;;  %v11849_v43 = vld [vmem:[#allocation12 + $0x3e4] sm:$0xf0]  ;;  %v5927_v46 = vld [vmem:[#allocation3 + $0x20] sm:$0xfc]  ;;  %v5930_v48 = vld [vmem:[#allocation3 + $0x38] sm:$0x3] }
 0x843   : > { %v10777_v50 = vor.u32 %v11849_v43, %v10776_v39  ;;  %v5924_v47 = vld [vmem:[#allocation3 + $0x8] sm:$0xfc]  ;;  %v5993_v5 = vrot.slane %v5927_v46, 2  ;;  %v11830_v14 = vld [vmem:[#allocation12 + $0x354] sm:$0xf]  ;;  %v5997_v59 = vrot.slane %v5930_v48, 2 }
 0x844   : > { %v5928_v13 = vld [vmem:[#allocation3 + $0x28] sm:$0xfc]  ;;  %v11831_v8 = vld [vmem:[#allocation12 + $0x354] sm:$0xf0]  ;;  %v10768_v25 = vld [vmem:[#allocation12 + $0x3d0] sm:$0xf] }
 0x845   : > { %v11847_v51 = vld [vmem:[#allocation12 + $0x3d4] sm:$0xf0]  ;;  %v11828_v23 = vld [vmem:[#allocation12 + $0x344] sm:$0xf]  ;;  %v10698_v34 = vld [vmem:[#allocation12 + $0x348] sm:$0xf0] }
 0x846   : > { %v10701_v26 = vor.u32 %v11828_v23, %v10698_v34  ;;  %v11844_v18 = vld [vmem:[#allocation12 + $0x3c4] sm:$0xf]  ;;  %v10762_v2 = vld [vmem:[#allocation12 + $0x3c8] sm:$0xf0]  ;;  %v5931_v56 = vld [vmem:[#allocation3 + $0x40] sm:$0xfc] }
 0x847   : > { %v10765_v30 = vor.u32 %v11844_v18, %v10762_v2  ;;  %v11829_v43 = vld [vmem:[#allocation12 + $0x344] sm:$0xf0]  ;;  %v10760_v36 = vld [vmem:[#allocation12 + $0x3c0] sm:$0xf]  ;;  %v5999_v48 = vrot.slane %v5931_v56, 2 }
 0x848   : > { %v10688_v18 = vld [vmem:[#allocation12 + $0x330] sm:$0xf]  ;;  %v11827_v2 = vld [vmem:[#allocation12 + $0x334] sm:$0xf0]  ;;  %v10746_v56 = vld [vmem:[#allocation12 + $0x3a8] sm:$0xf0] }
 0x84a   : > { %5815 = vmatmul.bf16.vlgmr.msra.gmra.mxu0 %v5162_v42  ;;  %5873 = vmatmul.bf16.vlgmr.msra.gmra.mxu2 %v5162_v42  ;;  %v10600_v42 = vld [vmem:[#allocation12 + $0x280] sm:$0xf] }
 0x84b   : > { %v10601_v44 = vor.u32 %v11805_v35, %v10600_v42  ;;  %6659 = vmatpush.bf16.msra.mxu2 %v10725_v60  ;;  %v11846_v42 = vld [vmem:[#allocation12 + $0x3d4] sm:$0xf]  ;;  %v5991_v35 = vrot.slane %v5926_v58, 2  ;;  %v10704_v60 = vld [vmem:[#allocation12 + $0x350] sm:$0xf] }
 0x84c   : > { %5844 = vmatmul.bf16.vlgmr.msra.gmra.mxu1 %v5163_v49  ;;  %5902 = vmatmul.bf16.vlgmr.msra.gmra.mxu3 %v5163_v49  ;;  %v10537_v49 = vor.u32 %v11789_v55, %v10536_v27  ;;  %v5990_v27 = vrot.slane %v5924_v47, 2 }
 0x84d   : > { %6288 = vmatpush.bf16.msrb.mxu1 %v10601_v44  ;;  %6688 = vmatpush.bf16.msra.mxu3 %v10789_v40  ;;  %v5996_v44 = vrot.slane %v5928_v13, 2  ;;  %v10705_v40 = vor.u32 %v11831_v8, %v10704_v60  ;;  %v5937_v13 = vld [vmem:[#allocation3 + $0x70] sm:$0x3]  ;;  %v11842_v8 = vld [vmem:[#allocation12 + $0x3b4] sm:$0xf] }
 0x84e   : > { %6259 = vmatpush.bf16.msrb.mxu0 %v10537_v49  ;;  %v10770_v49 = vld [vmem:[#allocation12 + $0x3d8] sm:$0xf0] }
 0x84f   : > { %6660 = vmatpush.bf16.msra.mxu2 %v10717_v31  ;;  %v10773_v41 = vor.u32 %v11846_v42, %v10770_v49  ;;  %v11826_v49 = vld [vmem:[#allocation12 + $0x334] sm:$0xf] }
 0x851   : > { %6630 = vmatpush.bf16.msra.mxu1 %v10785_v52  ;;  %6689 = vmatpush.bf16.msra.mxu3 %v10781_v33  ;;  %v5992_v33 = vsel %vm1798_vm8, %v5990_v27, %v5991_v35  ;;  %v10690_v35 = vld [vmem:[#allocation12 + $0x338] sm:$0xf0] }
 0x852   : > { %6601 = vmatpush.bf16.msra.mxu0 %v10721_v4  ;;  %v10769_v4 = vor.u32 %v11847_v51, %v10768_v25  ;;  %v10693_v60 = vor.u32 %v11826_v49, %v10690_v35  ;;  %v10754_v25 = vld [vmem:[#allocation12 + $0x3b8] sm:$0xf0] }
 0x853   : > { %v5943_v49 = vld [vmem:[#allocation3 + $0xa0] sm:$0xfc] }
 0x855   : > { %6631 = vmatpush.bf16.msra.mxu1 %v10777_v50  ;;  %6690 = vmatpush.bf16.msra.mxu3 %v10773_v41  ;;  %v11845_v50 = vld [vmem:[#allocation12 + $0x3c4] sm:$0xf0] }
 0x856   : > { %6602 = vmatpush.bf16.msra.mxu0 %v10713_v32  ;;  %v10696_v32 = vld [vmem:[#allocation12 + $0x340] sm:$0xf]  ;;  %v10761_v47 = vor.u32 %v11845_v50, %v10760_v36 }
 0x857   : > { %v10697_v46 = vor.u32 %v11829_v43, %v10696_v32 }
 0x859   : > { %6632 = vmatpush.bf16.msra.mxu1 %v10769_v4  ;;  %6691 = vmatpush.bf16.msra.mxu3 %v10765_v30  ;;  %v10757_v4 = vor.u32 %v11842_v8, %v10754_v25  ;;  %v11843_v30 = vld [vmem:[#allocation12 + $0x3b4] sm:$0xf0]  ;;  %v5940_v8 = vld [vmem:[#allocation3 + $0x88] sm:$0xfc]  ;;  %v5942_v25 = vld [vmem:[#allocation3 + $0x98] sm:$0x3] }
 0x85a   : > { %5820 = vmatmul.bf16.gmra.mxu0 %v5164_v63  ;;  %5878 = vmatmul.bf16.gmra.mxu2 %v5164_v63  ;;  %v5168_v63 = vpack.c.bf16 %v13873_v29, %v13871_v17 }
 0x85b   : > { %6603 = vmatpush.bf16.msra.mxu0 %v10705_v40 }
 0x85c   : > { %5849 = vmatmul.bf16.gmra.mxu1 %v5165_v37  ;;  %5907 = vmatmul.bf16.gmra.mxu3 %v5165_v37  ;;  %v5923_v37 = vld [vmem:[#allocation3] sm:$0xfc] }
 0x85d   : > { %v5987_v10 = vrot.slane %v5923_v37, 2  ;;  %6633 = vmatpush.bf16.msra.mxu1 %v10761_v47  ;;  %6692 = vmatpush.bf16.msra.mxu3 %v10757_v4 }
 0x85f   : > { %v5989_v52 = vsel %vm1798_vm8, %v5987_v10, %v5988_v24  ;;  %v5935_v10 = vld [vmem:[#allocation3 + $0x60] sm:$0xfc]  ;;  %v5932_v24 = vld [vmem:[#allocation3 + $0x48] sm:$0xfc]  ;;  %6604 = vmatpush.bf16.msra.mxu0 %v10697_v46 }
 0x860   : > { %v6005_v42 = vrot.slane %v5935_v10, 2  ;;  %v6002_v41 = vrot.slane %v5932_v24, 2  ;;  %v5939_v24 = vld [vmem:[#allocation3 + $0x80] sm:$0xfc] }
 0x86a   : > { %5825 = vmatmul.bf16.gmra.mxu0 %v5166_v20  ;;  %5883 = vmatmul.bf16.gmra.mxu2 %v5166_v20  ;;  %v10706_v20 = vld [vmem:[#allocation12 + $0x358] sm:$0xf0] }
 0x86b   : > { %v10709_v55 = vor.u32 %v11830_v14, %v10706_v20  ;;  %v5936_v14 = vld [vmem:[#allocation3 + $0x68] sm:$0xfc]  ;;  %v5938_v20 = vld [vmem:[#allocation3 + $0x78] sm:$0x3] }
 0x86c   : > { %5854 = vmatmul.bf16.gmra.mxu1 %v5167_v54  ;;  %5912 = vmatmul.bf16.gmra.mxu3 %v5167_v54  ;;  %v5994_v54 = vrot.slane %v5929_v1, 2  ;;  %v5933_v1 = vld [vmem:[#allocation3 + $0x50] sm:$0x3]  ;;  %v6008_v23 = vrot.slane %v5936_v14, 2  ;;  %v6009_v34 = vrot.slane %v5938_v20, 2 }
 0x86d   : > { %6661 = vmatpush.bf16.msra.mxu2 %v10709_v55  ;;  %v6000_v55 = vrot.slane %v5933_v1, 2  ;;  %v10680_v14 = vld [vmem:[#allocation12 + $0x320] sm:$0xf]  ;;  %v11825_v20 = vld [vmem:[#allocation12 + $0x324] sm:$0xf0] }
 0x86e   : > { %v5995_v31 = vsel %vm1798_vm8, %v5993_v5, %v5994_v54  ;;  %v5934_v5 = vld [vmem:[#allocation3 + $0x58] sm:$0x3]  ;;  %v6010_v10 = vsel %vm1798_vm8, %v6008_v23, %v6009_v34 }
 0x86f   : > { %v6051_v37 = vpack.c.bf16 %v5995_v31, %v5989_v52  ;;  %v6003_v51 = vrot.slane %v5934_v5, 2  ;;  %v10752_v52 = vld [vmem:[#allocation12 + $0x3b0] sm:$0xf]  ;;  %v10689_v31 = vor.u32 %v11827_v2, %v10688_v18  ;;  %v6001_v32 = vsel %vm1798_vm8, %v5999_v48, %v6000_v55  ;;  %v11841_v55 = vld [vmem:[#allocation12 + $0x3a4] sm:$0xf0] }
 0x870   : > { %v6017_v18 = vrot.slane %v5943_v49, 2  ;;  %v11822_v2 = vld [vmem:[#allocation12 + $0x314] sm:$0xf] }
 0x871   : > { %6662 = vmatpush.bf16.msra.mxu2 %v10701_v26  ;;  %6605 = vmatpush.bf16.msra.mxu0 %v10689_v31  ;;  %v6004_v1 = vsel %vm1798_vm8, %v6002_v41, %v6003_v51  ;;  %v5945_v41 = vld [vmem:[#allocation3 + $0xb0] sm:$0x3]  ;;  %v5946_v51 = vld [vmem:[#allocation3 + $0xb8] sm:$0x3] }
 0x872   : > { %v6054_v48 = vpack.c.bf16 %v6010_v10, %v6004_v1  ;;  %v10736_v1 = vld [vmem:[#allocation12 + $0x390] sm:$0xf] }
 0x875   : > { %6663 = vmatpush.bf16.msra.mxu2 %v10693_v60  ;;  %v6011_v60 = vrot.slane %v5939_v24, 2  ;;  %v10666_v24 = vld [vmem:[#allocation12 + $0x308] sm:$0xf0] }
 0x87a   : > { %5830 = vmatmul.bf16.gmra.mxu0 %v5168_v63  ;;  %5888 = vmatmul.bf16.gmra.mxu2 %v5168_v63  ;;  %v5998_v63 = vsel %vm1798_vm8, %v5996_v44, %v5997_v59  ;;  %v6006_v59 = vrot.slane %v5937_v13, 2 }
 0x87b   : > { %v6052_v39 = vpack.c.bf16 %v5998_v63, %v5992_v33  ;;  %v10682_v33 = vld [vmem:[#allocation12 + $0x328] sm:$0xf0]  ;;  %v10753_v63 = vor.u32 %v11843_v30, %v10752_v52  ;;  %v10674_v52 = vld [vmem:[#allocation12 + $0x318] sm:$0xf0]  ;;  %v6018_v30 = vrot.slane %v5945_v41, 2 }
 0x87c   : > { %5859 = vmatmul.bf16.gmra.mxu1 %v5169_v12  ;;  %5917 = vmatmul.bf16.gmra.mxu3 %v5169_v12  ;;  %v6007_v43 = vsel %vm1798_vm8, %v6005_v42, %v6006_v59  ;;  %v5941_v42 = vld [vmem:[#allocation3 + $0x90] sm:$0x3] }
 0x87d   : > { %6634 = vmatpush.bf16.msra.mxu1 %v10753_v63  ;;  %v6012_v4 = vrot.slane %v5941_v42, 2  ;;  %v11838_v63 = vld [vmem:[#allocation12 + $0x394] sm:$0xf]  ;;  %v6019_v42 = vsel %vm1798_vm8, %v6017_v18, %v6018_v30  ;;  %v10664_v30 = vld [vmem:[#allocation12 + $0x300] sm:$0xf] }
 0x887   : > { %v5540_v3 = vpop.f32.mrf.mxu0 }
 0x889   : > { %v5569_v12 = vpop.f32.mrf.mxu1 }
 0x88a   : > { %v13887_v11 = vadd.f32 %v5569_v12, %v5540_v3  ;;  %6260 = vmatmul.bf16.vlgmr.msrb.gmra.mxu0 %v6051_v37  ;;  %6318 = vmatmul.bf16.vlgmr.msrb.gmra.mxu2 %v6051_v37  ;;  %v11824_v3 = vld [vmem:[#allocation12 + $0x324] sm:$0xf] }
 0x88b   : > { %v10685_v37 = vor.u32 %v11824_v3, %v10682_v33  ;;  %v11840_v12 = vld [vmem:[#allocation12 + $0x3a4] sm:$0xf]  ;;  %v6014_v3 = vrot.slane %v5940_v8, 2  ;;  %v10677_v33 = vor.u32 %v11822_v2, %v10674_v52  ;;  %v5947_v52 = vld [vmem:[#allocation3 + $0xc0] sm:$0xfc] }
 0x88c   : > { %6289 = vmatmul.bf16.vlgmr.msrb.gmra.mxu1 %v6052_v39  ;;  %6347 = vmatmul.bf16.vlgmr.msrb.gmra.mxu3 %v6052_v39  ;;  %v10749_v36 = vor.u32 %v11840_v12, %v10746_v56  ;;  %v6015_v56 = vrot.slane %v5942_v25, 2  ;;  %v5046_v25 = vmul.f32 %v13759_v9, %v13663_v57  ;;  %v10728_v57 = vld [vmem:[#allocation12 + $0x380] sm:$0xf] }
 0x88d   : > { %v5598_v58 = vpop.f32.mrf.mxu2  ;;  %6664 = vmatpush.bf16.msra.mxu2 %v10685_v37  ;;  %v10738_v37 = vld [vmem:[#allocation12 + $0x398] sm:$0xf0] }
 0x88e   : > { %6693 = vmatpush.bf16.msra.mxu3 %v10749_v36  ;;  %v6016_v41 = vsel %vm1798_vm8, %v6014_v3, %v6015_v56  ;;  %v11821_v3 = vld [vmem:[#allocation12 + $0x304] sm:$0xf0] }
 0x88f   : > { %v5627_v54 = vpop.f32.mrf.mxu3  ;;  %v5542_v27 = vpop.f32.mrf.mxu0 }
 0x890   : > { %v13889_v44 = vadd.f32 %v5627_v54, %v5598_v58  ;;  %v6053_v58 = vpack.c.bf16 %v6007_v43, %v6001_v32  ;;  %v10744_v54 = vld [vmem:[#allocation12 + $0x3a0] sm:$0xf]  ;;  %v6021_v32 = vrot.slane %v5946_v51, 2  ;;  %v10741_v43 = vor.u32 %v11838_v63, %v10738_v37  ;;  %v11837_v37 = vld [vmem:[#allocation12 + $0x384] sm:$0xf0] }
 0x891   : > { %v5571_v40 = vpop.f32.mrf.mxu1  ;;  %v10745_v35 = vor.u32 %v11841_v55, %v10744_v54  ;;  %6665 = vmatpush.bf16.msra.mxu2 %v10677_v33  ;;  %v10730_v54 = vld [vmem:[#allocation12 + $0x388] sm:$0xf0]  ;;  %v6013_v55 = vsel %vm1798_vm8, %v6011_v60, %v6012_v4  ;;  %v5951_v63 = vld [vmem:[#allocation3 + $0xe0] sm:$0xfc] }
 0x892   : > { %v13891_v26 = vadd.f32 %v5571_v40, %v5542_v27  ;;  %v10681_v27 = vor.u32 %v11825_v20, %v10680_v14  ;;  %v5944_v40 = vld [vmem:[#allocation3 + $0xa8] sm:$0xfc]  ;;  %6694 = vmatpush.bf16.msra.mxu3 %v10741_v43  ;;  %v6055_v51 = vpack.c.bf16 %v6019_v42, %v6013_v55  ;;  %v5949_v33 = vld [vmem:[#allocation3 + $0xd0] sm:$0x3]  ;;  %v10850_v43 = vld [vmem:[#allocation12 + $0x478] sm:$0xf0] }
 0x893   : > { %6635 = vmatpush.bf16.msra.mxu1 %v10745_v35  ;;  %v11836_v20 = vld [vmem:[#allocation12 + $0x384] sm:$0xf]  ;;  %v6024_v55 = vrot.slane %v5949_v33, 2  ;;  %v6029_v42 = vrot.slane %v5951_v63, 2  ;;  %v10906_v63 = vld [vmem:[#allocation12 + $0x4e8] sm:$0xf0] }
 0x894   : > { %6606 = vmatpush.bf16.msra.mxu0 %v10681_v27  ;;  %v10733_v49 = vor.u32 %v11836_v20, %v10730_v54  ;;  %v6023_v54 = vrot.slane %v5947_v52, 2  ;;  %v11864_v52 = vld [vmem:[#allocation12 + $0x464] sm:$0xf] }
 0x895   : > { %v5600_v39 = vpop.f32.mrf.mxu2  ;;  %v11880_v33 = vld [vmem:[#allocation12 + $0x4e4] sm:$0xf] }
 0x896   : > { %6695 = vmatpush.bf16.msra.mxu3 %v10733_v49 }
 0x897   : > { %v5629_v46 = vpop.f32.mrf.mxu3  ;;  %v5545_v50 = vpop.f32.mrf.mxu0 }
 0x898   : > { %v13897_v47 = vadd.f32 %v5629_v46, %v5600_v39  ;;  %v6020_v39 = vrot.slane %v5944_v40, 2  ;;  %v10672_v46 = vld [vmem:[#allocation12 + $0x310] sm:$0xf]  ;;  %v5047_v40 = vmul.f32 %v13759_v9, %v13679_v16  ;;  %v5953_v16 = vld [vmem:[#allocation3 + $0xf0] sm:$0x3]  ;;  %v10665_v9 = vor.u32 %v11821_v3, %v10664_v30 }
 0x899   : > { %v5574_v13 = vpop.f32.mrf.mxu1  ;;  %v6030_v49 = vrot.slane %v5953_v16, 2  ;;  %v10842_v30 = vld [vmem:[#allocation12 + $0x468] sm:$0xf0] }
 0x89a   : > { %v13899_v5 = vadd.f32 %v5574_v13, %v5545_v50  ;;  %6265 = vmatmul.bf16.gmra.mxu0 %v6053_v58  ;;  %6323 = vmatmul.bf16.gmra.mxu2 %v6053_v58  ;;  %v11823_v50 = vld [vmem:[#allocation12 + $0x314] sm:$0xf0]  ;;  %v11820_v13 = vld [vmem:[#allocation12 + $0x304] sm:$0xf]  ;;  %v6022_v8 = vsel %vm1798_vm8, %v6020_v39, %v6021_v32  ;;  %v5064_v4 = vadd.f32 %v13767_v28, %v5047_v40  ;;  %v11866_v32 = vld [vmem:[#allocation12 + $0x474] sm:$0xf] }
 0x89b   : > { %v10673_v10 = vor.u32 %v11823_v50, %v10672_v46  ;;  %v11839_v58 = vld [vmem:[#allocation12 + $0x394] sm:$0xf0]  ;;  %v10669_v14 = vor.u32 %v11820_v13, %v10666_v24  ;;  %v6056_v2 = vpack.c.bf16 %v6022_v8, %v6016_v41  ;;  %v5948_v39 = vld [vmem:[#allocation3 + $0xc8] sm:$0xfc]  ;;  %v11882_v46 = vld [vmem:[#allocation12 + $0x4f4] sm:$0xf] }
 0x89c   : > { %6294 = vmatmul.bf16.gmra.mxu1 %v6054_v48  ;;  %6352 = vmatmul.bf16.gmra.mxu3 %v6054_v48  ;;  %v10737_v48 = vor.u32 %v11839_v58, %v10736_v1  ;;  %v5096_v56 = vrot.slane %v5064_v4, 7  ;;  %v5950_v1 = vld [vmem:[#allocation3 + $0xd8] sm:$0x3]  ;;  %v10914_v58 = vld [vmem:[#allocation12 + $0x4f8] sm:$0xf0] }
 0x89d   : > { %v5603_v59 = vpop.f32.mrf.mxu2  ;;  %6607 = vmatpush.bf16.msra.mxu0 %v10673_v10  ;;  %6666 = vmatpush.bf16.msra.mxu2 %v10669_v14  ;;  %v10853_v10 = vor.u32 %v11866_v32, %v10850_v43  ;;  %v5952_v13 = vld [vmem:[#allocation3 + $0xe8] sm:$0xfc]  ;;  %v5954_v24 = vld [vmem:[#allocation3 + $0xf8] sm:$0x3]  ;;  %v6027_v41 = vrot.slane %v5950_v1, 2 }
 0x89e   : > { %6636 = vmatpush.bf16.msra.mxu1 %v10737_v48  ;;  %v10917_v48 = vor.u32 %v11882_v46, %v10914_v58  ;;  %5143 = vst [vmem:[#allocation3 + $0x108] sm:$0xfe] %v5096_v56  ;;  %v6032_v8 = vrot.slane %v5952_v13, 2  ;;  %v10840_v58 = vld [vmem:[#allocation12 + $0x460] sm:$0xf] }
 0x89f   : > { %v5632_v23 = vpop.f32.mrf.mxu3  ;;  %v5547_v34 = vpop.f32.mrf.mxu0  ;;  %5145 = vst [vmem:[#allocation3 + $0x118] sm:$0x1] %v5096_v56  ;;  %v11865_v13 = vld [vmem:[#allocation12 + $0x464] sm:$0xf0] }
 0x8a0   : > { %v13901_v31 = vadd.f32 %v5632_v23, %v5603_v59  ;;  %7149 = vmatpush.bf16.msrb.mxu3 %v10917_v48  ;;  %v10841_v48 = vor.u32 %v11865_v13, %v10840_v58  ;;  %v6401_v13 = vpack.c.bf16 %v13851_v61, %v13843_v62 }
 0x8a1   : > { %v5576_v12 = vpop.f32.mrf.mxu1  ;;  %6608 = vmatpush.bf16.msra.mxu0 %v10665_v9  ;;  %7120 = vmatpush.bf16.msrb.mxu2 %v10853_v10  ;;  %v6025_v9 = vsel %vm1798_vm8, %v6023_v54, %v6024_v55  ;;  %v11862_v54 = vld [vmem:[#allocation12 + $0x454] sm:$0xf]  ;;  %v10834_v55 = vld [vmem:[#allocation12 + $0x458] sm:$0xf0] }
 0x8a2   : > { %v13903_v36 = vadd.f32 %v5576_v12, %v5547_v34  ;;  %v5063_v34 = vadd.f32 %v13767_v28, %v5046_v25  ;;  %v10729_v28 = vor.u32 %v11837_v37, %v10728_v57  ;;  %v6033_v25 = vrot.slane %v5954_v24, 2  ;;  %v10904_v24 = vld [vmem:[#allocation12 + $0x4e0] sm:$0xf] }
 0x8a3   : > { %v10845_v57 = vor.u32 %v11864_v52, %v10842_v30  ;;  %v6031_v37 = vsel %vm1798_vm8, %v6029_v42, %v6030_v49  ;;  %v11878_v42 = vld [vmem:[#allocation12 + $0x4d4] sm:$0xf]  ;;  %v10896_v52 = vld [vmem:[#allocation12 + $0x4d0] sm:$0xf] }
 0x8a4   : > { %v5095_v12 = vrot.slane %v5063_v34, 7  ;;  %6637 = vmatpush.bf16.msra.mxu1 %v10729_v28  ;;  %v10912_v34 = vld [vmem:[#allocation12 + $0x4f0] sm:$0xf]  ;;  %v6034_v32 = vsel %vm1798_vm8, %v6032_v8, %v6033_v25  ;;  %v6057_v46 = vpack.c.bf16 %v6031_v37, %v6025_v9  ;;  %v11876_v9 = vld [vmem:[#allocation12 + $0x4c4] sm:$0xf] }
 0x8a5   : > { %v5605_v27 = vpop.f32.mrf.mxu2  ;;  %7121 = vmatpush.bf16.msrb.mxu2 %v10845_v57  ;;  %v11860_v57 = vld [vmem:[#allocation12 + $0x444] sm:$0xf]  ;;  %v10890_v37 = vld [vmem:[#allocation12 + $0x4c8] sm:$0xf0] }
 0x8a6   : > { %5142 = vst [vmem:[#allocation3 + $0x100] sm:$0xfe] %v5095_v12 }
 0x8a7   : > { %v5634_v35 = vpop.f32.mrf.mxu3  ;;  %v5550_v59 = vpop.f32.mrf.mxu0  ;;  %5144 = vst [vmem:[#allocation3 + $0x110] sm:$0x1] %v5095_v12  ;;  %v10909_v12 = vor.u32 %v11880_v33, %v10906_v63  ;;  %v10826_v33 = vld [vmem:[#allocation12 + $0x448] sm:$0xf0] }
 0x8a8   : > { %v13913_v60 = vadd.f32 %v5634_v35, %v5605_v27 }
 0x8a9   : > { %v5579_v23 = vpop.f32.mrf.mxu1  ;;  %7150 = vmatpush.bf16.msrb.mxu3 %v10909_v12 }
 0x8aa   : > { %v13917_v18 = vadd.f32 %v5579_v23, %v5550_v59  ;;  %6270 = vmatmul.bf16.gmra.mxu0 %v6055_v51  ;;  %6328 = vmatmul.bf16.gmra.mxu2 %v6055_v51  ;;  %v6026_v59 = vrot.slane %v5948_v39, 2  ;;  %v10848_v51 = vld [vmem:[#allocation12 + $0x470] sm:$0xf]  ;;  %v11867_v23 = vld [vmem:[#allocation12 + $0x474] sm:$0xf0] }
 0x8ab   : > { %v10849_v4 = vor.u32 %v11867_v23, %v10848_v51 }
 0x8ac   : > { %6299 = vmatmul.bf16.gmra.mxu1 %v6056_v2  ;;  %6357 = vmatmul.bf16.gmra.mxu3 %v6056_v2  ;;  %v11883_v2 = vld [vmem:[#allocation12 + $0x4f4] sm:$0xf0]  ;;  %v6028_v28 = vsel %vm1798_vm8, %v6026_v59, %v6027_v41  ;;  %v10898_v59 = vld [vmem:[#allocation12 + $0x4d8] sm:$0xf0] }
 0x8ad   : > { %v5608_v50 = vpop.f32.mrf.mxu2  ;;  %v10913_v3 = vor.u32 %v11883_v2, %v10912_v34  ;;  %7062 = vmatpush.bf16.msrb.mxu0 %v10849_v4  ;;  %v6058_v10 = vpack.c.bf16 %v6034_v32, %v6028_v28  ;;  %v10901_v41 = vor.u32 %v11878_v42, %v10898_v59  ;;  %v10832_v4 = vld [vmem:[#allocation12 + $0x450] sm:$0xf]  ;;  %v11863_v2 = vld [vmem:[#allocation12 + $0x454] sm:$0xf0]  ;;  %v10818_v42 = vld [vmem:[#allocation12 + $0x438] sm:$0xf0] }
 0x8ae   : > { %v10833_v30 = vor.u32 %v11863_v2, %v10832_v4  ;;  %v10816_v2 = vld [vmem:[#allocation12 + $0x430] sm:$0xf] }
 0x8af   : > { %v5637_v14 = vpop.f32.mrf.mxu3  ;;  %v5552_v20 = vpop.f32.mrf.mxu0  ;;  %7091 = vmatpush.bf16.msrb.mxu1 %v10913_v3  ;;  %7151 = vmatpush.bf16.msrb.mxu3 %v10901_v41  ;;  %v11879_v3 = vld [vmem:[#allocation12 + $0x4d4] sm:$0xf0] }
 0x8b0   : > { %v13919_v27 = vadd.f32 %v5637_v14, %v5608_v50  ;;  %v11881_v14 = vld [vmem:[#allocation12 + $0x4e4] sm:$0xf0]  ;;  %v10897_v63 = vor.u32 %v11879_v3, %v10896_v52  ;;  %v11859_v52 = vld [vmem:[#allocation12 + $0x434] sm:$0xf0] }
 0x8b1   : > { %v5581_v35 = vpop.f32.mrf.mxu1  ;;  %7063 = vmatpush.bf16.msrb.mxu0 %v10841_v48  ;;  %v11861_v48 = vld [vmem:[#allocation12 + $0x444] sm:$0xf0]  ;;  %v10817_v3 = vor.u32 %v11859_v52, %v10816_v2  ;;  %v10864_v2 = vld [vmem:[#allocation12 + $0x490] sm:$0xf] }
 0x8b2   : > { %v13921_v40 = vadd.f32 %v5581_v35, %v5552_v20  ;;  %v10905_v20 = vor.u32 %v11881_v14, %v10904_v24  ;;  %v10837_v35 = vor.u32 %v11862_v54, %v10834_v55  ;;  %v10824_v24 = vld [vmem:[#allocation12 + $0x440] sm:$0xf]  ;;  %v11877_v54 = vld [vmem:[#allocation12 + $0x4c4] sm:$0xf0] }
 0x8b3   : > { %v10888_v14 = vld [vmem:[#allocation12 + $0x4c0] sm:$0xf] }
 0x8b4   : > { %7092 = vmatpush.bf16.msrb.mxu1 %v10905_v20  ;;  %7122 = vmatpush.bf16.msrb.mxu2 %v10837_v35  ;;  %v10825_v20 = vor.u32 %v11861_v48, %v10824_v24  ;;  %v10889_v55 = vor.u32 %v11877_v54, %v10888_v14  ;;  %v10882_v35 = vld [vmem:[#allocation12 + $0x4b8] sm:$0xf0]  ;;  %v6403_v48 = vpack.c.bf16 %v13863_v7, %v13853_v21  ;;  %v11857_v14 = vld [vmem:[#allocation12 + $0x424] sm:$0xf0] }
 0x8b5   : > { %v5610_v16 = vpop.f32.mrf.mxu2  ;;  %7064 = vmatpush.bf16.msrb.mxu0 %v10833_v30  ;;  %v10880_v30 = vld [vmem:[#allocation12 + $0x4b0] sm:$0xf] }
 0x8b7   : > { %v5639_v56 = vpop.f32.mrf.mxu3  ;;  %v5555_v39 = vpop.f32.mrf.mxu0 }
 0x8b8   : > { %v13927_v43 = vadd.f32 %v5639_v56, %v5610_v16  ;;  %v10829_v16 = vor.u32 %v11860_v57, %v10826_v33  ;;  %v10893_v56 = vor.u32 %v11876_v9, %v10890_v37  ;;  %7093 = vmatpush.bf16.msrb.mxu1 %v10897_v63  ;;  %v11875_v57 = vld [vmem:[#allocation12 + $0x4b4] sm:$0xf0]  ;;  %v11856_v33 = vld [vmem:[#allocation12 + $0x424] sm:$0xf]  ;;  %v10874_v37 = vld [vmem:[#allocation12 + $0x4a8] sm:$0xf0] }
 0x8b9   : > { %v5584_v50 = vpop.f32.mrf.mxu1  ;;  %7065 = vmatpush.bf16.msrb.mxu0 %v10825_v20  ;;  %v10881_v63 = vor.u32 %v11875_v57, %v10880_v30  ;;  %v11872_v9 = vld [vmem:[#allocation12 + $0x4a4] sm:$0xf]  ;;  %v10872_v20 = vld [vmem:[#allocation12 + $0x4a0] sm:$0xf]  ;;  %v11871_v30 = vld [vmem:[#allocation12 + $0x494] sm:$0xf0] }
 0x8ba   : > { %v13929_v1 = vadd.f32 %v5584_v50, %v5555_v39  ;;  %6275 = vmatmul.bf16.gmra.mxu0 %v6057_v46  ;;  %6333 = vmatmul.bf16.gmra.mxu2 %v6057_v46  ;;  %v6400_v50 = vpack.c.bf16 %v13847_v19, %v13841_v6  ;;  %v10865_v57 = vor.u32 %v11871_v30, %v10864_v2 }
 0x8bb   : > { %7123 = vmatpush.bf16.msrb.mxu2 %v10829_v16  ;;  %7152 = vmatpush.bf16.msrb.mxu3 %v10893_v56  ;;  %v10877_v56 = vor.u32 %v11872_v9, %v10874_v37 }
 0x8bc   : > { %6304 = vmatmul.bf16.gmra.mxu1 %v6058_v10  ;;  %6362 = vmatmul.bf16.gmra.mxu3 %v6058_v10 }
 0x8bd   : > { %v5613_v49 = vpop.f32.mrf.mxu2  ;;  %7094 = vmatpush.bf16.msrb.mxu1 %v10889_v55  ;;  %7066 = vmatpush.bf16.msrb.mxu0 %v10817_v3  ;;  %v11873_v55 = vld [vmem:[#allocation12 + $0x4a4] sm:$0xf0]  ;;  %v11852_v3 = vld [vmem:[#allocation12 + $0x404] sm:$0xf] }
 0x8bf   : > { %v5642_v8 = vpop.f32.mrf.mxu3  ;;  %v5557_v25 = vpop.f32.mrf.mxu0 }
 0x8c0   : > { %v13931_v51 = vadd.f32 %v5642_v8, %v5613_v49  ;;  %v11874_v49 = vld [vmem:[#allocation12 + $0x4b4] sm:$0xf] }
 0x8c1   : > { %v5586_v23 = vpop.f32.mrf.mxu1  ;;  %v10885_v62 = vor.u32 %v11874_v49, %v10882_v35  ;;  %7095 = vmatpush.bf16.msrb.mxu1 %v10881_v63  ;;  %v11870_v49 = vld [vmem:[#allocation12 + $0x494] sm:$0xf]  ;;  %v10858_v63 = vld [vmem:[#allocation12 + $0x488] sm:$0xf0] }
 0x8c2   : > { %v13933_v34 = vadd.f32 %v5586_v23, %v5557_v25 }
 0x8c3   : > { %7153 = vmatpush.bf16.msrb.mxu3 %v10885_v62 }
 0x8c5   : > { %v5615_v12 = vpop.f32.mrf.mxu2 }
 0x8c7   : > { %v5644_v39 = vpop.f32.mrf.mxu3  ;;  %v5816_v28 = vpop.f32.mrf.mxu0  ;;  %7154 = vmatpush.bf16.msrb.mxu3 %v10877_v56 }
 0x8c8   : > { %v13935_v32 = vadd.f32 %v5644_v39, %v5615_v12  ;;  %v5817_v46 = vadd.f32 %v5816_v28, %v13887_v11  ;;  %v11858_v11 = vld [vmem:[#allocation12 + $0x434] sm:$0xf] }
 0x8c9   : > { %v5845_v10 = vpop.f32.mrf.mxu1  ;;  %v10821_v19 = vor.u32 %v11858_v11, %v10818_v42  ;;  %v10873_v11 = vor.u32 %v11873_v55, %v10872_v20  ;;  %v10802_v42 = vld [vmem:[#allocation12 + $0x418] sm:$0xf0]  ;;  %v11869_v20 = vld [vmem:[#allocation12 + $0x484] sm:$0xf0] }
 0x8ca   : > { %v13940_v58 = vadd.f32 %v5845_v10, %v5817_v46  ;;  %6609 = vmatmul.bf16.vlgmr.msra.gmra.mxu0 %v6400_v50  ;;  %6667 = vmatmul.bf16.vlgmr.msra.gmra.mxu2 %v6400_v50  ;;  %v6402_v10 = vpack.c.bf16 %v13859_v38, %v13849_v0 }
 0x8cb   : > { %7124 = vmatpush.bf16.msrb.mxu2 %v10821_v19  ;;  %7096 = vmatpush.bf16.msrb.mxu1 %v10873_v11  ;;  %v11914_v11 = vld [vmem:[#allocation12 + $0x5f4] sm:$0xf] }
 0x8cc   : > { %6638 = vmatmul.bf16.vlgmr.msra.gmra.mxu1 %v6401_v13  ;;  %6696 = vmatmul.bf16.vlgmr.msra.gmra.mxu3 %v6401_v13 }
 0x8cd   : > { %v5874_v6 = vpop.f32.mrf.mxu2 }
 0x8ce   : > { %v5875_v59 = vadd.f32 %v5874_v6, %v13889_v44  ;;  %v10810_v44 = vld [vmem:[#allocation12 + $0x428] sm:$0xf0]  ;;  %v10866_v6 = vld [vmem:[#allocation12 + $0x498] sm:$0xf0] }
 0x8cf   : > { %v5903_v61 = vpop.f32.mrf.mxu3  ;;  %v5818_v41 = vpop.f32.mrf.mxu0  ;;  %v10813_v16 = vor.u32 %v11856_v33, %v10810_v44  ;;  %v10869_v21 = vor.u32 %v11870_v49, %v10866_v6  ;;  %v11868_v44 = vld [vmem:[#allocation12 + $0x484] sm:$0xf]  ;;  %7097 = vmatpush.bf16.msrb.mxu1 %v10865_v57 }
 0x8d0   : > { %v13945_v8 = vadd.f32 %v5903_v61, %v5875_v59  ;;  %v5819_v25 = vadd.f32 %v5818_v41, %v13891_v26  ;;  %v10861_v9 = vor.u32 %v11868_v44, %v10858_v63 }
 0x8d1   : > { %v5847_v23 = vpop.f32.mrf.mxu1  ;;  %7125 = vmatpush.bf16.msrb.mxu2 %v10813_v16  ;;  %7155 = vmatpush.bf16.msrb.mxu3 %v10869_v21  ;;  %v11899_v21 = vld [vmem:[#allocation12 + $0x574] sm:$0xf0] }
 0x8d2   : > { %v13948_v4 = vadd.f32 %v5847_v23, %v5819_v25  ;;  %v10800_v25 = vld [vmem:[#allocation12 + $0x410] sm:$0xf]  ;;  %v11855_v23 = vld [vmem:[#allocation12 + $0x414] sm:$0xf0] }
 0x8d3   : > { %v10801_v52 = vor.u32 %v11855_v23, %v10800_v25  ;;  %v11896_v25 = vld [vmem:[#allocation12 + $0x564] sm:$0xf]  ;;  %v10970_v23 = vld [vmem:[#allocation12 + $0x568] sm:$0xf0] }
 0x8d4   : > { %v10973_v30 = vor.u32 %v11896_v25, %v10970_v23 }
 0x8d5   : > { %v5876_v12 = vpop.f32.mrf.mxu2  ;;  %7156 = vmatpush.bf16.msrb.mxu3 %v10861_v9 }
 0x8d6   : > { %v5877_v26 = vadd.f32 %v5876_v12, %v13897_v47  ;;  %v10808_v47 = vld [vmem:[#allocation12 + $0x420] sm:$0xf] }
 0x8d7   : > { %v5905_v39 = vpop.f32.mrf.mxu3  ;;  %v5821_v28 = vpop.f32.mrf.mxu0  ;;  %v10809_v54 = vor.u32 %v11857_v14, %v10808_v47 }
 0x8d8   : > { %v13951_v46 = vadd.f32 %v5905_v39, %v5877_v26  ;;  %v5822_v50 = vadd.f32 %v5821_v28, %v13899_v5  ;;  %v11854_v5 = vld [vmem:[#allocation12 + $0x414] sm:$0xf]  ;;  %v6404_v39 = vpack.c.bf16 %v13871_v17, %v13861_v22 }
 0x8d9   : > { %v5850_v13 = vpop.f32.mrf.mxu1  ;;  %7067 = vmatpush.bf16.msrb.mxu0 %v10809_v54  ;;  %v10805_v38 = vor.u32 %v11854_v5, %v10802_v42  ;;  %v10978_v54 = vld [vmem:[#allocation12 + $0x578] sm:$0xf0] }
 0x8da   : > { %v13956_v24 = vadd.f32 %v5850_v13, %v5822_v50  ;;  %6614 = vmatmul.bf16.gmra.mxu0 %v6402_v10  ;;  %6672 = vmatmul.bf16.gmra.mxu2 %v6402_v10  ;;  %v6405_v10 = vpack.c.bf16 %v13875_v53, %v13865_v45  ;;  %v11853_v13 = vld [vmem:[#allocation12 + $0x404] sm:$0xf0]  ;;  %v11042_v5 = vld [vmem:[#allocation12 + $0x5f8] sm:$0xf0] }
 0x8db   : > { %7126 = vmatpush.bf16.msrb.mxu2 %v10805_v38  ;;  %v11045_v45 = vor.u32 %v11914_v11, %v11042_v5  ;;  %v6734_v11 = vld [vmem:[#allocation3 + $0x28] sm:$0xfe] }
 0x8dc   : > { %6643 = vmatmul.bf16.gmra.mxu1 %v6403_v48  ;;  %6701 = vmatmul.bf16.gmra.mxu3 %v6403_v48  ;;  %v10856_v48 = vld [vmem:[#allocation12 + $0x480] sm:$0xf] }
 0x8dd   : > { %v5879_v0 = vpop.f32.mrf.mxu2  ;;  %7068 = vmatpush.bf16.msrb.mxu0 %v10801_v52  ;;  %v10857_v17 = vor.u32 %v11869_v20, %v10856_v48  ;;  %7610 = vmatpush.bf16.msra.mxu3 %v11045_v45  ;;  %v11894_v48 = vld [vmem:[#allocation12 + $0x554] sm:$0xf]  ;;  %v6739_v20 = vld [vmem:[#allocation3 + $0x50] sm:$0x1] }
 0x8de   : > { %v5880_v19 = vadd.f32 %v5879_v0, %v13901_v31  ;;  %v10794_v31 = vld [vmem:[#allocation12 + $0x408] sm:$0xf0]  ;;  %v6736_v45 = vld [vmem:[#allocation3 + $0x38] sm:$0x1] }
 0x8df   : > { %v5908_v7 = vpop.f32.mrf.mxu3  ;;  %v5823_v35 = vpop.f32.mrf.mxu0  ;;  %v10797_v33 = vor.u32 %v11852_v3, %v10794_v31  ;;  %7098 = vmatpush.bf16.msrb.mxu1 %v10857_v17  ;;  %v11034_v3 = vld [vmem:[#allocation12 + $0x5e8] sm:$0xf0] }
 0x8e0   : > { %v13961_v59 = vadd.f32 %v5908_v7, %v5880_v19  ;;  %v5824_v62 = vadd.f32 %v5823_v35, %v13903_v36  ;;  %v6398_v19 = vld [vmem:[#allocation3 + $0x100] sm:$0xff]  ;;  %v11040_v7 = vld [vmem:[#allocation12 + $0x5f0] sm:$0xf] }
 0x8e1   : > { %v5852_v61 = vpop.f32.mrf.mxu1  ;;  %7127 = vmatpush.bf16.msrb.mxu2 %v10797_v33  ;;  %v6399_v33 = vld [vmem:[#allocation3 + $0x108] sm:$0xff]  ;;  %v6406_v9 = vpack.c.bf16 %v6398_v19, %v13873_v29 }
 0x8e2   : > { %v13964_v41 = vadd.f32 %v5852_v61, %v5824_v62  ;;  %v11915_v61 = vld [vmem:[#allocation12 + $0x5f4] sm:$0xf0] }
 0x8e3   : > { %v11041_v52 = vor.u32 %v11915_v61, %v11040_v7  ;;  %v6804_v7 = vrot.slane %v6739_v20, 1  ;;  %v6801_v61 = vrot.slane %v6736_v45, 1  ;;  %v6743_v20 = vld [vmem:[#allocation3 + $0x70] sm:$0x1] }
 0x8e4   : > { %v6747_v45 = vld [vmem:[#allocation3 + $0x90] sm:$0x1] }
 0x8e5   : > { %v5881_v16 = vpop.f32.mrf.mxu2  ;;  %7552 = vmatpush.bf16.msra.mxu1 %v11041_v52  ;;  %v11895_v52 = vld [vmem:[#allocation12 + $0x554] sm:$0xf0] }
 0x8e6   : > { %v5882_v36 = vadd.f32 %v5881_v16, %v13913_v60  ;;  %v10792_v60 = vld [vmem:[#allocation12 + $0x400] sm:$0xf] }
 0x8e7   : > { %v5910_v37 = vpop.f32.mrf.mxu3  ;;  %v5826_v12 = vpop.f32.mrf.mxu0  ;;  %v10793_v14 = vor.u32 %v11853_v13, %v10792_v60  ;;  %v11913_v13 = vld [vmem:[#allocation12 + $0x5e4] sm:$0xf0] }
 0x8e8   : > { %v13967_v56 = vadd.f32 %v5910_v37, %v5882_v36  ;;  %v5827_v26 = vadd.f32 %v5826_v12, %v13917_v18  ;;  %v11898_v18 = vld [vmem:[#allocation12 + $0x574] sm:$0xf]  ;;  %v6407_v37 = vpack.c.bf16 %v6399_v33, %v13877_v15  ;;  %v6733_v12 = vld [vmem:[#allocation3 + $0x20] sm:$0xfe]  ;;  %v11892_v33 = vld [vmem:[#allocation12 + $0x544] sm:$0xf] }
 0x8e9   : > { %v5855_v28 = vpop.f32.mrf.mxu1  ;;  %v10981_v55 = vor.u32 %v11898_v18, %v10978_v54  ;;  %7069 = vmatpush.bf16.msrb.mxu0 %v10793_v14  ;;  %v11910_v15 = vld [vmem:[#allocation12 + $0x5d4] sm:$0xf]  ;;  %v6797_v19 = vrot.slane %v6733_v12, 1  ;;  %v11018_v12 = vld [vmem:[#allocation12 + $0x5c8] sm:$0xf0] }
 0x8ea   : > { %v13972_v50 = vadd.f32 %v5855_v28, %v5827_v26  ;;  %6619 = vmatmul.bf16.gmra.mxu0 %v6404_v39  ;;  %6677 = vmatmul.bf16.gmra.mxu2 %v6404_v39  ;;  %v6735_v26 = vld [vmem:[#allocation3 + $0x30] sm:$0x1]  ;;  %v6737_v39 = vld [vmem:[#allocation3 + $0x40] sm:$0xfe] }
 0x8eb   : > { %7581 = vmatpush.bf16.msra.mxu2 %v10981_v55  ;;  %v10968_v28 = vld [vmem:[#allocation12 + $0x560] sm:$0xf] }
 0x8ec   : > { %6648 = vmatmul.bf16.gmra.mxu1 %v6405_v10  ;;  %6706 = vmatmul.bf16.gmra.mxu3 %v6405_v10  ;;  %v11897_v10 = vld [vmem:[#allocation12 + $0x564] sm:$0xf0] }
 0x8ed   : > { %v5884_v47 = vpop.f32.mrf.mxu2  ;;  %v10969_v29 = vor.u32 %v11897_v10, %v10968_v28 }
 0x8ee   : > { %v5885_v22 = vadd.f32 %v5884_v47, %v13919_v27  ;;  %v10976_v27 = vld [vmem:[#allocation12 + $0x570] sm:$0xf]  ;;  %v10962_v47 = vld [vmem:[#allocation12 + $0x558] sm:$0xf0] }
 0x8ef   : > { %v5913_v42 = vpop.f32.mrf.mxu3  ;;  %v5828_v49 = vpop.f32.mrf.mxu0  ;;  %v10977_v62 = vor.u32 %v11899_v21, %v10976_v27  ;;  %7582 = vmatpush.bf16.msra.mxu2 %v10973_v30  ;;  %v10965_v54 = vor.u32 %v11894_v48, %v10962_v47  ;;  %v6798_v27 = vrot.slane %v6735_v26, 1  ;;  %v6803_v21 = vrot.slane %v6737_v39, 1 }
 0x8f0   : > { %v13977_v53 = vadd.f32 %v5913_v42, %v5885_v22  ;;  %v5829_v0 = vadd.f32 %v5828_v49, %v13921_v40  ;;  %v11912_v40 = vld [vmem:[#allocation12 + $0x5e4] sm:$0xf]  ;;  %v11026_v22 = vld [vmem:[#allocation12 + $0x5d8] sm:$0xf0] }
 0x8f1   : > { %v5857_v38 = vpop.f32.mrf.mxu1  ;;  %7523 = vmatpush.bf16.msra.mxu0 %v10977_v62  ;;  %v11037_v44 = vor.u32 %v11912_v40, %v11034_v3  ;;  %v11029_v5 = vor.u32 %v11910_v15, %v11026_v22  ;;  %v6800_v62 = vrot.slane %v6734_v11, 1  ;;  %v6799_v40 = vsel %vm1076_vm14, %v6797_v19, %v6798_v27  ;;  %v11893_v15 = vld [vmem:[#allocation12 + $0x544] sm:$0xf0]  ;;  %v11016_v22 = vld [vmem:[#allocation12 + $0x5c0] sm:$0xf] }
 0x8f2   : > { %v13980_v6 = vadd.f32 %v5857_v38, %v5829_v0  ;;  %v6738_v0 = vld [vmem:[#allocation3 + $0x48] sm:$0xfe]  ;;  %v6740_v38 = vld [vmem:[#allocation3 + $0x58] sm:$0x1]  ;;  %v6805_v3 = vsel %vm1076_vm14, %v6803_v21, %v6804_v7  ;;  %v11010_v19 = vld [vmem:[#allocation12 + $0x5b8] sm:$0xf0] }
 0x8f3   : > { %7611 = vmatpush.bf16.msra.mxu3 %v11037_v44  ;;  %7583 = vmatpush.bf16.msra.mxu2 %v10965_v54  ;;  %v6806_v25 = vrot.slane %v6738_v0, 1  ;;  %v6807_v23 = vrot.slane %v6740_v38, 1  ;;  %v10954_v44 = vld [vmem:[#allocation12 + $0x548] sm:$0xf0]  ;;  %v6802_v28 = vsel %vm1076_vm14, %v6800_v62, %v6801_v61  ;;  %v10952_v54 = vld [vmem:[#allocation12 + $0x540] sm:$0xf] }
 0x8f4   : > { %v11909_v11 = vld [vmem:[#allocation12 + $0x5c4] sm:$0xf0]  ;;  %v6744_v61 = vld [vmem:[#allocation3 + $0x78] sm:$0x1] }
 0x8f5   : > { %v5886_v35 = vpop.f32.mrf.mxu2  ;;  %7524 = vmatpush.bf16.msra.mxu0 %v10969_v29  ;;  %v6808_v10 = vsel %vm1076_vm14, %v6806_v25, %v6807_v23  ;;  %v6861_v29 = vpack.c.bf16 %v6805_v3, %v6799_v40  ;;  %v11017_v0 = vor.u32 %v11909_v11, %v11016_v22  ;;  %v6742_v21 = vld [vmem:[#allocation3 + $0x68] sm:$0xfe]  ;;  %v6748_v23 = vld [vmem:[#allocation3 + $0x98] sm:$0x1]  ;;  %v6816_v40 = vrot.slane %v6747_v45, 1 }
 0x8f6   : > { %v5887_v2 = vadd.f32 %v5886_v35, %v13927_v43  ;;  %v6862_v48 = vpack.c.bf16 %v6808_v10, %v6802_v28  ;;  %v6746_v25 = vld [vmem:[#allocation3 + $0x88] sm:$0xfe] }
 0x8f7   : > { %v5915_v31 = vpop.f32.mrf.mxu3  ;;  %v5831_v57 = vpop.f32.mrf.mxu0  ;;  %7612 = vmatpush.bf16.msra.mxu3 %v11029_v5  ;;  %v11890_v5 = vld [vmem:[#allocation12 + $0x534] sm:$0xf] }
 0x8f8   : > { %v13983_v63 = vadd.f32 %v5915_v31, %v5887_v2  ;;  %v5832_v16 = vadd.f32 %v5831_v57, %v13929_v1  ;;  %v11032_v1 = vld [vmem:[#allocation12 + $0x5e0] sm:$0xf]  ;;  %v10960_v2 = vld [vmem:[#allocation12 + $0x550] sm:$0xf]  ;;  %v11911_v57 = vld [vmem:[#allocation12 + $0x5d4] sm:$0xf0] }
 0x8f9   : > { %v5860_v36 = vpop.f32.mrf.mxu1  ;;  %v11033_v18 = vor.u32 %v11913_v13, %v11032_v1  ;;  %v10961_v31 = vor.u32 %v11895_v52, %v10960_v2 }
 0x8fa   : > { %v13987_v43 = vadd.f32 %v5860_v36, %v5832_v16  ;;  %6624 = vmatmul.bf16.gmra.mxu0 %v6406_v9  ;;  %6682 = vmatmul.bf16.gmra.mxu2 %v6406_v9  ;;  %v10957_v36 = vor.u32 %v11892_v33, %v10954_v44  ;;  %v6813_v33 = vrot.slane %v6744_v61, 1  ;;  %v6818_v44 = vrot.slane %v6746_v25, 1  ;;  %v10930_v61 = vld [vmem:[#allocation12 + $0x518] sm:$0xf0]  ;;  %v6755_v25 = vld [vmem:[#allocation3 + $0xd0] sm:$0x1] }
 0x8fb   : > { %7553 = vmatpush.bf16.msra.mxu1 %v11033_v18  ;;  %7525 = vmatpush.bf16.msra.mxu0 %v10961_v31  ;;  %v6745_v18 = vld [vmem:[#allocation3 + $0x80] sm:$0xfe] }
 0x8fc   : > { %6653 = vmatmul.bf16.gmra.mxu1 %v6407_v37  ;;  %6711 = vmatmul.bf16.gmra.mxu3 %v6407_v37  ;;  %v11908_v37 = vld [vmem:[#allocation12 + $0x5c4] sm:$0xf] }
 0x8fd   : > { %v5889_v60 = vpop.f32.mrf.mxu2  ;;  %v11021_v1 = vor.u32 %v11908_v37, %v11018_v12  ;;  %7584 = vmatpush.bf16.msra.mxu2 %v10957_v36  ;;  %v10944_v36 = vld [vmem:[#allocation12 + $0x530] sm:$0xf]  ;;  %v11891_v37 = vld [vmem:[#allocation12 + $0x534] sm:$0xf0] }
 0x8fe   : > { %v5890_v14 = vadd.f32 %v5889_v60, %v13931_v51  ;;  %v11008_v12 = vld [vmem:[#allocation12 + $0x5b0] sm:$0xf]  ;;  %v10945_v10 = vor.u32 %v11891_v37, %v10944_v36 }
 0x8ff   : > { %v5918_v17 = vpop.f32.mrf.mxu3  ;;  %v5833_v55 = vpop.f32.mrf.mxu0  ;;  %7613 = vmatpush.bf16.msra.mxu3 %v11021_v1  ;;  %v11907_v1 = vld [vmem:[#allocation12 + $0x5b4] sm:$0xf0] }
 0x900   : > { %v13991_v42 = vadd.f32 %v5918_v17, %v5890_v14  ;;  %v5834_v49 = vadd.f32 %v5833_v55, %v13933_v34  ;;  %v11024_v34 = vld [vmem:[#allocation12 + $0x5d0] sm:$0xf]  ;;  %v6741_v14 = vld [vmem:[#allocation3 + $0x60] sm:$0xfe]  ;;  %v10953_v55 = vor.u32 %v11893_v15, %v10952_v54 }
 0x901   : > { %v5862_v51 = vpop.f32.mrf.mxu1  ;;  %v11025_v9 = vor.u32 %v11911_v57, %v11024_v34  ;;  %v6809_v52 = vrot.slane %v6741_v14, 1  ;;  %v6810_v34 = vrot.slane %v6743_v20, 1  ;;  %v6812_v57 = vrot.slane %v6742_v21, 1  ;;  %v11002_v14 = vld [vmem:[#allocation12 + $0x5a8] sm:$0xf0] }
 0x902   : > { %v13994_v35 = vadd.f32 %v5862_v51, %v5834_v49  ;;  %v10946_v49 = vld [vmem:[#allocation12 + $0x538] sm:$0xf0]  ;;  %v11906_v51 = vld [vmem:[#allocation12 + $0x5b4] sm:$0xf]  ;;  %7526 = vmatpush.bf16.msra.mxu0 %v10953_v55 }
 0x903   : > { %7554 = vmatpush.bf16.msra.mxu1 %v11025_v9  ;;  %v10949_v38 = vor.u32 %v11890_v5, %v10946_v49  ;;  %v11013_v7 = vor.u32 %v11906_v51, %v11010_v19  ;;  %v6753_v51 = vld [vmem:[#allocation3 + $0xc0] sm:$0xfe] }
 0x904   : > { %v10936_v19 = vld [vmem:[#allocation12 + $0x520] sm:$0xf] }
 0x905   : > { %v5891_v30 = vpop.f32.mrf.mxu2  ;;  %7585 = vmatpush.bf16.msra.mxu2 %v10949_v38  ;;  %7614 = vmatpush.bf16.msra.mxu3 %v11013_v7  ;;  %v6751_v38 = vld [vmem:[#allocation3 + $0xb0] sm:$0x1] }
 0x906   : > { %v5892_v16 = vadd.f32 %v5891_v30, %v13935_v32  ;;  %v6815_v30 = vrot.slane %v6745_v18, 1  ;;  %7527 = vmatpush.bf16.msra.mxu0 %v10945_v10 }
 0x907   : > { %v5920_v26 = vpop.f32.mrf.mxu3  ;;  %v6261_v39 = vpop.f32.mrf.mxu0  ;;  %7555 = vmatpush.bf16.msra.mxu1 %v11017_v0  ;;  %v6749_v0 = vld [vmem:[#allocation3 + $0xa0] sm:$0xfe] }
 0x908   : > { %v14001_v60 = vadd.f32 %v5920_v26, %v5892_v16  ;;  %v6819_v16 = vrot.slane %v6748_v23, 1  ;;  %v6817_v28 = vsel %vm1076_vm14, %v6815_v30, %v6816_v40  ;;  %v6750_v40 = vld [vmem:[#allocation3 + $0xa8] sm:$0xfe]  ;;  %v6821_v37 = vrot.slane %v6749_v0, 1  ;;  %v10986_v0 = vld [vmem:[#allocation12 + $0x588] sm:$0xf0] }
 0x909   : > { %v6290_v13 = vpop.f32.mrf.mxu1 }
 0x90a   : > { %v6291_v32 = vadd.f32 %v6290_v13, %v6261_v39  ;;  %7070 = vmatmul.bf16.vlgmr.msrb.gmra.mxu0 %v6861_v29  ;;  %7128 = vmatmul.bf16.vlgmr.msrb.gmra.mxu2 %v6861_v29  ;;  %v6811_v39 = vsel %vm1076_vm14, %v6809_v52, %v6810_v34  ;;  %v10938_v29 = vld [vmem:[#allocation12 + $0x528] sm:$0xf0]  ;;  %v11009_v13 = vor.u32 %v11907_v1, %v11008_v12  ;;  %v11902_v52 = vld [vmem:[#allocation12 + $0x594] sm:$0xf]  ;;  %v10994_v34 = vld [vmem:[#allocation12 + $0x598] sm:$0xf0] }
 0x90b   : > { %v6820_v54 = vsel %vm1076_vm14, %v6818_v44, %v6819_v16  ;;  %v6754_v44 = vld [vmem:[#allocation3 + $0xc8] sm:$0xfe]  ;;  %v6756_v16 = vld [vmem:[#allocation3 + $0xd8] sm:$0x1]  ;;  %v6822_v12 = vrot.slane %v6751_v38, 1  ;;  %v6824_v1 = vrot.slane %v6750_v40, 1 }
 0x90c   : > { %v14004_v47 = vadd.f32 %v6291_v32, %v13940_v58  ;;  %7099 = vmatmul.bf16.vlgmr.msrb.gmra.mxu1 %v6862_v48  ;;  %7157 = vmatmul.bf16.vlgmr.msrb.gmra.mxu3 %v6862_v48  ;;  %v11904_v48 = vld [vmem:[#allocation12 + $0x5a4] sm:$0xf] }
 0x90d   : > { %v6319_v17 = vpop.f32.mrf.mxu2  ;;  %v11005_v15 = vor.u32 %v11904_v48, %v11002_v14  ;;  %7556 = vmatpush.bf16.msra.mxu1 %v11009_v13  ;;  %v6831_v13 = vrot.slane %v6756_v16, 1  ;;  %v10928_v48 = vld [vmem:[#allocation12 + $0x510] sm:$0xf]  ;;  %v11887_v14 = vld [vmem:[#allocation12 + $0x514] sm:$0xf0] }
 0x90f   : > { %v6348_v58 = vpop.f32.mrf.mxu3  ;;  %v6263_v27 = vpop.f32.mrf.mxu0  ;;  %7615 = vmatpush.bf16.msra.mxu3 %v11005_v15  ;;  %v10929_v15 = vor.u32 %v11887_v14, %v10928_v48 }
 0x910   : > { %v6349_v62 = vadd.f32 %v6348_v58, %v6319_v17  ;;  %v6863_v17 = vpack.c.bf16 %v6817_v28, %v6811_v39  ;;  %v11889_v58 = vld [vmem:[#allocation12 + $0x524] sm:$0xf0]  ;;  %v6828_v39 = vrot.slane %v6755_v25, 1 }
 0x911   : > { %v6292_v2 = vpop.f32.mrf.mxu1  ;;  %v10937_v7 = vor.u32 %v11889_v58, %v10936_v19 }
 0x912   : > { %v14007_v3 = vadd.f32 %v6349_v62, %v13945_v8  ;;  %v6293_v31 = vadd.f32 %v6292_v2, %v6263_v27  ;;  %v11888_v8 = vld [vmem:[#allocation12 + $0x524] sm:$0xf]  ;;  %v11000_v27 = vld [vmem:[#allocation12 + $0x5a0] sm:$0xf]  ;;  %v11905_v62 = vld [vmem:[#allocation12 + $0x5a4] sm:$0xf0] }
 0x913   : > { %v10941_v32 = vor.u32 %v11888_v8, %v10938_v29  ;;  %v11001_v23 = vor.u32 %v11905_v62, %v11000_v27  ;;  %7528 = vmatpush.bf16.msra.mxu0 %v10937_v7  ;;  %v6830_v29 = vrot.slane %v6754_v44, 1  ;;  %v6763_v44 = vld [vmem:[#allocation3 + $0x110] sm:$0x1] }
 0x914   : > { %v14010_v9 = vadd.f32 %v6293_v31, %v13948_v4  ;;  %v6814_v4 = vsel %vm1076_vm14, %v6812_v57, %v6813_v33  ;;  %v10997_v31 = vor.u32 %v11902_v52, %v10994_v34  ;;  %v6752_v33 = vld [vmem:[#allocation3 + $0xb8] sm:$0x1]  ;;  %v6761_v52 = vld [vmem:[#allocation3 + $0x100] sm:$0xfe] }
 0x915   : > { %v6321_v26 = vpop.f32.mrf.mxu2  ;;  %7586 = vmatpush.bf16.msra.mxu2 %v10941_v32  ;;  %v6864_v49 = vpack.c.bf16 %v6820_v54, %v6814_v4  ;;  %7557 = vmatpush.bf16.msra.mxu1 %v11001_v23  ;;  %v6825_v8 = vrot.slane %v6752_v33, 1  ;;  %v6823_v4 = vsel %vm1076_vm14, %v6821_v37, %v6822_v12  ;;  %v6832_v19 = vsel %vm1076_vm14, %v6830_v29, %v6831_v13  ;;  %v6757_v23 = vld [vmem:[#allocation3 + $0xe0] sm:$0xfe]  ;;  %v11946_v37 = vld [vmem:[#allocation12 + $0x6f4] sm:$0xf] }
 0x916   : > { %7616 = vmatpush.bf16.msra.mxu3 %v10997_v31  ;;  %v10920_v34 = vld [vmem:[#allocation12 + $0x500] sm:$0xf]  ;;  %v11106_v33 = vld [vmem:[#allocation12 + $0x678] sm:$0xf0]  ;;  %v6762_v29 = vld [vmem:[#allocation3 + $0x108] sm:$0xfe] }
 0x917   : > { %v6350_v20 = vpop.f32.mrf.mxu3  ;;  %v6266_v18 = vpop.f32.mrf.mxu0  ;;  %7529 = vmatpush.bf16.msra.mxu0 %v10929_v15  ;;  %v11170_v12 = vld [vmem:[#allocation12 + $0x6f8] sm:$0xf0]  ;;  %v6764_v13 = vld [vmem:[#allocation3 + $0x118] sm:$0x1]  ;;  %v6833_v14 = vrot.slane %v6757_v23, 1 }
 0x918   : > { %v6351_v22 = vadd.f32 %v6350_v20, %v6321_v26  ;;  %v6827_v26 = vrot.slane %v6753_v51, 1  ;;  %v10992_v20 = vld [vmem:[#allocation12 + $0x590] sm:$0xf]  ;;  %v11162_v23 = vld [vmem:[#allocation12 + $0x6e8] sm:$0xf0] }
 0x919   : > { %v6295_v55 = vpop.f32.mrf.mxu1 }
 0x91a   : > { %v14017_v11 = vadd.f32 %v6351_v22, %v13951_v46  ;;  %v6296_v5 = vadd.f32 %v6295_v55, %v6266_v18  ;;  %7075 = vmatmul.bf16.gmra.mxu0 %v6863_v17  ;;  %7133 = vmatmul.bf16.gmra.mxu2 %v6863_v17  ;;  %v11886_v46 = vld [vmem:[#allocation12 + $0x514] sm:$0xf]  ;;  %v6829_v54 = vsel %vm1076_vm14, %v6827_v26, %v6828_v39  ;;  %v11903_v22 = vld [vmem:[#allocation12 + $0x594] sm:$0xf0]  ;;  %v10922_v17 = vld [vmem:[#allocation12 + $0x508] sm:$0xf0] }
 0x91b   : > { %v10933_v2 = vor.u32 %v11886_v46, %v10930_v61  ;;  %v10993_v55 = vor.u32 %v11903_v22, %v10992_v20  ;;  %v6758_v39 = vld [vmem:[#allocation3 + $0xe8] sm:$0xfe] }
 0x91c   : > { %v14020_v45 = vadd.f32 %v6296_v5, %v13956_v24  ;;  %7104 = vmatmul.bf16.gmra.mxu1 %v6864_v49  ;;  %7162 = vmatmul.bf16.gmra.mxu3 %v6864_v49  ;;  %v11900_v49 = vld [vmem:[#allocation12 + $0x584] sm:$0xf]  ;;  %v6836_v22 = vrot.slane %v6758_v39, 1 }
 0x91d   : > { %v6324_v21 = vpop.f32.mrf.mxu2  ;;  %7587 = vmatpush.bf16.msra.mxu2 %v10933_v2  ;;  %v10989_v58 = vor.u32 %v11900_v49, %v10986_v0  ;;  %7558 = vmatpush.bf16.msra.mxu1 %v10993_v55  ;;  %v6759_v2 = vld [vmem:[#allocation3 + $0xf0] sm:$0x1]  ;;  %v6843_v55 = vrot.slane %v6764_v13, 1  ;;  %v11104_v49 = vld [vmem:[#allocation12 + $0x670] sm:$0xf] }
 0x91e   : > { %v6834_v20 = vrot.slane %v6759_v2, 1  ;;  %v11931_v0 = vld [vmem:[#allocation12 + $0x674] sm:$0xf0] }
 0x91f   : > { %v6353_v24 = vpop.f32.mrf.mxu3  ;;  %v6268_v30 = vpop.f32.mrf.mxu0  ;;  %7617 = vmatpush.bf16.msra.mxu3 %v10989_v58  ;;  %v11105_v58 = vor.u32 %v11931_v0, %v11104_v49 }
 0x920   : > { %v6354_v57 = vadd.f32 %v6353_v24, %v6324_v21  ;;  %v6865_v21 = vpack.c.bf16 %v6829_v54, %v6823_v4  ;;  %v11885_v24 = vld [vmem:[#allocation12 + $0x504] sm:$0xf0]  ;;  %v6840_v4 = vrot.slane %v6763_v44, 1 }
 0x921   : > { %v6297_v36 = vpop.f32.mrf.mxu1  ;;  %v10921_v31 = vor.u32 %v11885_v24, %v10920_v34 }
 0x922   : > { %v14023_v28 = vadd.f32 %v6354_v57, %v13961_v59  ;;  %v6298_v10 = vadd.f32 %v6297_v36, %v6268_v30  ;;  %v11884_v59 = vld [vmem:[#allocation12 + $0x504] sm:$0xf]  ;;  %v10984_v30 = vld [vmem:[#allocation12 + $0x580] sm:$0xf]  ;;  %v11901_v57 = vld [vmem:[#allocation12 + $0x584] sm:$0xf0] }
 0x923   : > { %v10925_v5 = vor.u32 %v11884_v59, %v10922_v17  ;;  %v10985_v16 = vor.u32 %v11901_v57, %v10984_v30  ;;  %7530 = vmatpush.bf16.msra.mxu0 %v10921_v31  ;;  %v6842_v17 = vrot.slane %v6762_v29, 1  ;;  %v7200_v29 = vld [vmem:[#allocation3 + $0x50] sm:$0x3] }
 0x924   : > { %v14026_v32 = vadd.f32 %v6298_v10, %v13964_v41  ;;  %v6826_v41 = vsel %vm1076_vm14, %v6824_v1, %v6825_v8  ;;  %v11173_v10 = vor.u32 %v11946_v37, %v11170_v12  ;;  %v6760_v8 = vld [vmem:[#allocation3 + $0xf8] sm:$0x1]  ;;  %v7198_v37 = vld [vmem:[#allocation3 + $0x40] sm:$0xfc] }
 0x925   : > { %v6326_v18 = vpop.f32.mrf.mxu2  ;;  %7588 = vmatpush.bf16.msra.mxu2 %v10925_v5  ;;  %v6866_v61 = vpack.c.bf16 %v6832_v19, %v6826_v41  ;;  %7559 = vmatpush.bf16.msra.mxu1 %v10985_v16  ;;  %v6837_v59 = vrot.slane %v6760_v8, 1  ;;  %v6835_v41 = vsel %vm1076_vm14, %v6833_v14, %v6834_v20  ;;  %v6844_v34 = vsel %vm1076_vm14, %v6842_v17, %v6843_v55  ;;  %v7194_v16 = vld [vmem:[#allocation3 + $0x20] sm:$0xfc]  ;;  %v11942_v14 = vld [vmem:[#allocation12 + $0x6d4] sm:$0xf] }
 0x926   : > { %7960 = vmatpush.bf16.msrb.mxu3 %v11173_v10  ;;  %v11096_v12 = vld [vmem:[#allocation12 + $0x660] sm:$0xf]  ;;  %v11090_v8 = vld [vmem:[#allocation12 + $0x658] sm:$0xf0]  ;;  %v7199_v17 = vld [vmem:[#allocation3 + $0x48] sm:$0xfc] }
 0x927   : > { %v6355_v38 = vpop.f32.mrf.mxu3  ;;  %v6271_v51 = vpop.f32.mrf.mxu0  ;;  %7873 = vmatpush.bf16.msrb.mxu0 %v11105_v58  ;;  %v11154_v20 = vld [vmem:[#allocation12 + $0x6d8] sm:$0xf0]  ;;  %v7201_v55 = vld [vmem:[#allocation3 + $0x58] sm:$0x3]  ;;  %v7258_v0 = vrot.slane %v7194_v16, 2 }
 0x928   : > { %v6356_v27 = vadd.f32 %v6355_v38, %v6326_v18  ;;  %v6839_v18 = vrot.slane %v6761_v52, 1  ;;  %v11168_v38 = vld [vmem:[#allocation12 + $0x6f0] sm:$0xf]  ;;  %v11146_v16 = vld [vmem:[#allocation12 + $0x6c8] sm:$0xf0] }
 0x929   : > { %v6300_v7 = vpop.f32.mrf.mxu1 }
 0x92a   : > { %v14033_v62 = vadd.f32 %v6356_v27, %v13967_v56  ;;  %v6301_v46 = vadd.f32 %v6300_v7, %v6271_v51  ;;  %7080 = vmatmul.bf16.gmra.mxu0 %v6865_v21  ;;  %7138 = vmatmul.bf16.gmra.mxu2 %v6865_v21  ;;  %v11930_v56 = vld [vmem:[#allocation12 + $0x674] sm:$0xf]  ;;  %v6841_v19 = vsel %vm1076_vm14, %v6839_v18, %v6840_v4  ;;  %v11947_v27 = vld [vmem:[#allocation12 + $0x6f4] sm:$0xf0]  ;;  %v11098_v21 = vld [vmem:[#allocation12 + $0x668] sm:$0xf0] }
 0x92b   : > { %v11109_v36 = vor.u32 %v11930_v56, %v11106_v33  ;;  %v11169_v7 = vor.u32 %v11947_v27, %v11168_v38  ;;  %v7195_v4 = vld [vmem:[#allocation3 + $0x28] sm:$0xfc] }
 0x92c   : > { %v14036_v25 = vadd.f32 %v6301_v46, %v13972_v50  ;;  %7109 = vmatmul.bf16.gmra.mxu1 %v6866_v61  ;;  %7167 = vmatmul.bf16.gmra.mxu3 %v6866_v61  ;;  %v11944_v61 = vld [vmem:[#allocation12 + $0x6e4] sm:$0xf]  ;;  %v7261_v27 = vrot.slane %v7195_v4, 2 }
 0x92d   : > { %v6329_v40 = vpop.f32.mrf.mxu2  ;;  %7931 = vmatpush.bf16.msrb.mxu2 %v11109_v36  ;;  %v11165_v24 = vor.u32 %v11944_v61, %v11162_v23  ;;  %7902 = vmatpush.bf16.msrb.mxu1 %v11169_v7  ;;  %v7196_v36 = vld [vmem:[#allocation3 + $0x30] sm:$0x3]  ;;  %v7268_v7 = vrot.slane %v7201_v55, 2  ;;  %v11088_v61 = vld [vmem:[#allocation12 + $0x650] sm:$0xf] }
 0x92e   : > { %v7259_v38 = vrot.slane %v7196_v36, 2  ;;  %v11927_v23 = vld [vmem:[#allocation12 + $0x654] sm:$0xf0] }
 0x92f   : > { %v6358_v50 = vpop.f32.mrf.mxu3  ;;  %v6273_v26 = vpop.f32.mrf.mxu0  ;;  %7961 = vmatpush.bf16.msrb.mxu3 %v11165_v24  ;;  %v11089_v24 = vor.u32 %v11927_v23, %v11088_v61 }
 0x930   : > { %v6359_v1 = vadd.f32 %v6358_v50, %v6329_v40  ;;  %v6867_v40 = vpack.c.bf16 %v6841_v19, %v6835_v41  ;;  %v11929_v50 = vld [vmem:[#allocation12 + $0x664] sm:$0xf0]  ;;  %v7265_v41 = vrot.slane %v7200_v29, 2 }
 0x931   : > { %v6302_v48 = vpop.f32.mrf.mxu1  ;;  %v11097_v10 = vor.u32 %v11929_v50, %v11096_v12 }
 0x932   : > { %v14039_v54 = vadd.f32 %v6359_v1, %v13977_v53  ;;  %v6303_v15 = vadd.f32 %v6302_v48, %v6273_v26  ;;  %v11928_v53 = vld [vmem:[#allocation12 + $0x664] sm:$0xf]  ;;  %v11160_v26 = vld [vmem:[#allocation12 + $0x6e0] sm:$0xf]  ;;  %v11945_v1 = vld [vmem:[#allocation12 + $0x6e4] sm:$0xf0] }
 0x933   : > { %v11101_v46 = vor.u32 %v11928_v53, %v11098_v21  ;;  %v11161_v13 = vor.u32 %v11945_v1, %v11160_v26  ;;  %7874 = vmatpush.bf16.msrb.mxu0 %v11097_v10  ;;  %v7267_v21 = vrot.slane %v7199_v17, 2  ;;  %v7208_v17 = vld [vmem:[#allocation3 + $0x90] sm:$0x3] }
 0x934   : > { %v14042_v5 = vadd.f32 %v6303_v15, %v13980_v6  ;;  %v6838_v6 = vsel %vm1076_vm14, %v6836_v22, %v6837_v59  ;;  %v11157_v15 = vor.u32 %v11942_v14, %v11154_v20  ;;  %v7197_v59 = vld [vmem:[#allocation3 + $0x38] sm:$0x3]  ;;  %v7206_v14 = vld [vmem:[#allocation3 + $0x80] sm:$0xfc] }
 0x935   : > { %v6331_v51 = vpop.f32.mrf.mxu2  ;;  %7932 = vmatpush.bf16.msrb.mxu2 %v11101_v46  ;;  %v6868_v33 = vpack.c.bf16 %v6844_v34, %v6838_v6  ;;  %7903 = vmatpush.bf16.msrb.mxu1 %v11161_v13  ;;  %v7262_v53 = vrot.slane %v7197_v59, 2  ;;  %v7260_v6 = vsel %vm1798_vm8, %v7258_v0, %v7259_v38  ;;  %v7269_v12 = vsel %vm1798_vm8, %v7267_v21, %v7268_v7  ;;  %v7202_v13 = vld [vmem:[#allocation3 + $0x60] sm:$0xfc]  ;;  %v11938_v0 = vld [vmem:[#allocation12 + $0x6b4] sm:$0xf] }
 0x936   : > { %7962 = vmatpush.bf16.msrb.mxu3 %v11157_v15  ;;  %v11080_v20 = vld [vmem:[#allocation12 + $0x640] sm:$0xf]  ;;  %v11074_v59 = vld [vmem:[#allocation12 + $0x638] sm:$0xf0]  ;;  %v7207_v21 = vld [vmem:[#allocation3 + $0x88] sm:$0xfc] }
 0x937   : > { %v6360_v2 = vpop.f32.mrf.mxu3  ;;  %v6276_v52 = vpop.f32.mrf.mxu0  ;;  %7875 = vmatpush.bf16.msrb.mxu0 %v11089_v24  ;;  %v11138_v38 = vld [vmem:[#allocation12 + $0x6b8] sm:$0xf0]  ;;  %v7209_v7 = vld [vmem:[#allocation3 + $0x98] sm:$0x3]  ;;  %v7270_v23 = vrot.slane %v7202_v13, 2 }
 0x938   : > { %v6361_v30 = vadd.f32 %v6360_v2, %v6331_v51  ;;  %v7264_v51 = vrot.slane %v7198_v37, 2  ;;  %v11152_v2 = vld [vmem:[#allocation12 + $0x6d0] sm:$0xf]  ;;  %v11130_v13 = vld [vmem:[#allocation12 + $0x6a8] sm:$0xf0] }
 0x939   : > { %v6305_v31 = vpop.f32.mrf.mxu1 }
 0x93a   : > { %v14049_v57 = vadd.f32 %v6361_v30, %v13983_v63  ;;  %v6306_v56 = vadd.f32 %v6305_v31, %v6276_v52  ;;  %7085 = vmatmul.bf16.gmra.mxu0 %v6867_v40  ;;  %7143 = vmatmul.bf16.gmra.mxu2 %v6867_v40  ;;  %v11926_v63 = vld [vmem:[#allocation12 + $0x654] sm:$0xf]  ;;  %v7266_v34 = vsel %vm1798_vm8, %v7264_v51, %v7265_v41  ;;  %v11943_v30 = vld [vmem:[#allocation12 + $0x6d4] sm:$0xf0]  ;;  %v11082_v40 = vld [vmem:[#allocation12 + $0x648] sm:$0xf0] }
 0x93b   : > { %v11093_v48 = vor.u32 %v11926_v63, %v11090_v8  ;;  %v11153_v31 = vor.u32 %v11943_v30, %v11152_v2  ;;  %v7203_v41 = vld [vmem:[#allocation3 + $0x68] sm:$0xfc] }
 0x93c   : > { %v14052_v44 = vadd.f32 %v6306_v56, %v13987_v43  ;;  %7114 = vmatmul.bf16.gmra.mxu1 %v6868_v33  ;;  %7172 = vmatmul.bf16.gmra.mxu3 %v6868_v33  ;;  %v11940_v33 = vld [vmem:[#allocation12 + $0x6c4] sm:$0xf]  ;;  %v7273_v30 = vrot.slane %v7203_v41, 2 }
 0x93d   : > { %v6334_v39 = vpop.f32.mrf.mxu2  ;;  %7933 = vmatpush.bf16.msrb.mxu2 %v11093_v48  ;;  %v11149_v50 = vor.u32 %v11940_v33, %v11146_v16  ;;  %7904 = vmatpush.bf16.msrb.mxu1 %v11153_v31  ;;  %v7204_v48 = vld [vmem:[#allocation3 + $0x70] sm:$0x3]  ;;  %v7280_v31 = vrot.slane %v7209_v7, 2  ;;  %v11072_v33 = vld [vmem:[#allocation12 + $0x630] sm:$0xf] }
 0x93e   : > { %v7271_v2 = vrot.slane %v7204_v48, 2  ;;  %v11923_v16 = vld [vmem:[#allocation12 + $0x634] sm:$0xf0] }
 0x93f   : > { %v6363_v43 = vpop.f32.mrf.mxu3  ;;  %v6278_v18 = vpop.f32.mrf.mxu0  ;;  %7963 = vmatpush.bf16.msrb.mxu3 %v11149_v50  ;;  %v11073_v50 = vor.u32 %v11923_v16, %v11072_v33 }
 0x940   : > { %v6364_v22 = vadd.f32 %v6363_v43, %v6334_v39  ;;  %v7322_v39 = vpack.c.bf16 %v7266_v34, %v7260_v6  ;;  %v11925_v43 = vld [vmem:[#allocation12 + $0x644] sm:$0xf0]  ;;  %v7277_v6 = vrot.slane %v7208_v17, 2 }
 0x941   : > { %v6307_v49 = vpop.f32.mrf.mxu1  ;;  %v11081_v15 = vor.u32 %v11925_v43, %v11080_v20 }
 0x942   : > { %v14055_v19 = vadd.f32 %v6364_v22, %v13991_v42  ;;  %v6308_v58 = vadd.f32 %v6307_v49, %v6278_v18  ;;  %v11924_v42 = vld [vmem:[#allocation12 + $0x644] sm:$0xf]  ;;  %v11144_v18 = vld [vmem:[#allocation12 + $0x6c0] sm:$0xf]  ;;  %v11941_v22 = vld [vmem:[#allocation12 + $0x6c4] sm:$0xf0] }
 0x943   : > { %v11085_v56 = vor.u32 %v11924_v42, %v11082_v40  ;;  %v11145_v55 = vor.u32 %v11941_v22, %v11144_v18  ;;  %7876 = vmatpush.bf16.msrb.mxu0 %v11081_v15  ;;  %v7279_v40 = vrot.slane %v7207_v21, 2  ;;  %v7216_v21 = vld [vmem:[#allocation3 + $0xd0] sm:$0x3] }
 0x944   : > { %v14058_v46 = vadd.f32 %v6308_v58, %v13994_v35  ;;  %v7263_v35 = vsel %vm1798_vm8, %v7261_v27, %v7262_v53  ;;  %v11141_v58 = vor.u32 %v11938_v0, %v11138_v38  ;;  %v7205_v53 = vld [vmem:[#allocation3 + $0x78] sm:$0x3]  ;;  %v7214_v0 = vld [vmem:[#allocation3 + $0xc0] sm:$0xfc] }
 0x945   : > { %v6336_v52 = vpop.f32.mrf.mxu2  ;;  %7934 = vmatpush.bf16.msrb.mxu2 %v11085_v56  ;;  %v7323_v8 = vpack.c.bf16 %v7269_v12, %v7263_v35  ;;  %7905 = vmatpush.bf16.msrb.mxu1 %v11145_v55  ;;  %v7274_v42 = vrot.slane %v7205_v53, 2  ;;  %v7272_v35 = vsel %vm1798_vm8, %v7270_v23, %v7271_v2  ;;  %v7281_v20 = vsel %vm1798_vm8, %v7279_v40, %v7280_v31  ;;  %v7210_v55 = vld [vmem:[#allocation3 + $0xa0] sm:$0xfc]  ;;  %v11934_v23 = vld [vmem:[#allocation12 + $0x694] sm:$0xf] }
 0x946   : > { %7964 = vmatpush.bf16.msrb.mxu3 %v11141_v58  ;;  %v11064_v38 = vld [vmem:[#allocation12 + $0x620] sm:$0xf]  ;;  %v11058_v53 = vld [vmem:[#allocation12 + $0x618] sm:$0xf0]  ;;  %v7215_v40 = vld [vmem:[#allocation3 + $0xc8] sm:$0xfc] }
 0x947   : > { %v6365_v36 = vpop.f32.mrf.mxu3  ;;  %v6610_v37 = vpop.f32.mrf.mxu0  ;;  %7877 = vmatpush.bf16.msrb.mxu0 %v11073_v50  ;;  %v11122_v2 = vld [vmem:[#allocation12 + $0x698] sm:$0xf0]  ;;  %v7217_v31 = vld [vmem:[#allocation3 + $0xd8] sm:$0x3]  ;;  %v7282_v16 = vrot.slane %v7210_v55, 2 }
 0x948   : > { %v6366_v26 = vadd.f32 %v6365_v36, %v6336_v52  ;;  %v7276_v52 = vrot.slane %v7206_v14, 2  ;;  %v11136_v36 = vld [vmem:[#allocation12 + $0x6b0] sm:$0xf]  ;;  %v11114_v55 = vld [vmem:[#allocation12 + $0x688] sm:$0xf0] }
 0x949   : > { %v6639_v10 = vpop.f32.mrf.mxu1 }
 0x94a   : > { %v14065_v1 = vadd.f32 %v6366_v26, %v14001_v60  ;;  %v6640_v63 = vadd.f32 %v6639_v10, %v6610_v37  ;;  %7531 = vmatmul.bf16.vlgmr.msra.gmra.mxu0 %v7322_v39  ;;  %7589 = vmatmul.bf16.vlgmr.msra.gmra.mxu2 %v7322_v39  ;;  %v11922_v60 = vld [vmem:[#allocation12 + $0x634] sm:$0xf]  ;;  %v7278_v12 = vsel %vm1798_vm8, %v7276_v52, %v7277_v6  ;;  %v11939_v26 = vld [vmem:[#allocation12 + $0x6b4] sm:$0xf0]  ;;  %v11066_v39 = vld [vmem:[#allocation12 + $0x628] sm:$0xf0] }
 0x94b   : > { %v11077_v49 = vor.u32 %v11922_v60, %v11074_v59  ;;  %v11137_v10 = vor.u32 %v11939_v26, %v11136_v36  ;;  %v7211_v6 = vld [vmem:[#allocation3 + $0xa8] sm:$0xfc] }
 0x94c   : > { %v14068_v29 = vadd.f32 %v6640_v63, %v14004_v47  ;;  %7560 = vmatmul.bf16.vlgmr.msra.gmra.mxu1 %v7323_v8  ;;  %7618 = vmatmul.bf16.vlgmr.msra.gmra.mxu3 %v7323_v8  ;;  %v11936_v8 = vld [vmem:[#allocation12 + $0x6a4] sm:$0xf]  ;;  %v7285_v26 = vrot.slane %v7211_v6, 2 }
 0x94d   : > { %v6668_v4 = vpop.f32.mrf.mxu2  ;;  %7935 = vmatpush.bf16.msrb.mxu2 %v11077_v49  ;;  %v11133_v43 = vor.u32 %v11936_v8, %v11130_v13  ;;  %7906 = vmatpush.bf16.msrb.mxu1 %v11137_v10  ;;  %v7212_v49 = vld [vmem:[#allocation3 + $0xb0] sm:$0x3]  ;;  %v7292_v10 = vrot.slane %v7217_v31, 2  ;;  %v11056_v8 = vld [vmem:[#allocation12 + $0x610] sm:$0xf] }
 0x94e   : > { %v7283_v36 = vrot.slane %v7212_v49, 2  ;;  %v11919_v13 = vld [vmem:[#allocation12 + $0x614] sm:$0xf0] }
 0x94f   : > { %v6697_v47 = vpop.f32.mrf.mxu3  ;;  %v6612_v51 = vpop.f32.mrf.mxu0  ;;  %7965 = vmatpush.bf16.msrb.mxu3 %v11133_v43  ;;  %v11057_v43 = vor.u32 %v11919_v13, %v11056_v8 }
 0x950   : > { %v6698_v27 = vadd.f32 %v6697_v47, %v6668_v4  ;;  %v7324_v4 = vpack.c.bf16 %v7278_v12, %v7272_v35  ;;  %v11921_v47 = vld [vmem:[#allocation12 + $0x624] sm:$0xf0]  ;;  %v7289_v35 = vrot.slane %v7216_v21, 2 }
 0x951   : > { %v6641_v61 = vpop.f32.mrf.mxu1  ;;  %v11065_v58 = vor.u32 %v11921_v47, %v11064_v38 }
 0x952   : > { %v14071_v34 = vadd.f32 %v6698_v27, %v14007_v3  ;;  %v6642_v24 = vadd.f32 %v6641_v61, %v6612_v51  ;;  %v11920_v3 = vld [vmem:[#allocation12 + $0x624] sm:$0xf]  ;;  %v11128_v51 = vld [vmem:[#allocation12 + $0x6a0] sm:$0xf]  ;;  %v11937_v27 = vld [vmem:[#allocation12 + $0x6a4] sm:$0xf0] }
 0x953   : > { %v11069_v63 = vor.u32 %v11920_v3, %v11066_v39  ;;  %v11129_v7 = vor.u32 %v11937_v27, %v11128_v51  ;;  %7878 = vmatpush.bf16.msrb.mxu0 %v11065_v58  ;;  %v7291_v39 = vrot.slane %v7215_v40, 2  ;;  %v7224_v40 = vld [vmem:[#allocation3 + $0x110] sm:$0x3] }
 0x954   : > { %v14074_v56 = vadd.f32 %v6642_v24, %v14010_v9  ;;  %v7275_v9 = vsel %vm1798_vm8, %v7273_v30, %v7274_v42  ;;  %v11125_v24 = vor.u32 %v11934_v23, %v11122_v2  ;;  %v7213_v42 = vld [vmem:[#allocation3 + $0xb8] sm:$0x3]  ;;  %v7222_v23 = vld [vmem:[#allocation3 + $0x100] sm:$0xfc] }
 0x955   : > { %v6670_v37 = vpop.f32.mrf.mxu2  ;;  %7936 = vmatpush.bf16.msrb.mxu2 %v11069_v63  ;;  %v7325_v59 = vpack.c.bf16 %v7281_v20, %v7275_v9  ;;  %7907 = vmatpush.bf16.msrb.mxu1 %v11129_v7  ;;  %v7286_v3 = vrot.slane %v7213_v42, 2  ;;  %v7284_v9 = vsel %vm1798_vm8, %v7282_v16, %v7283_v36  ;;  %v7293_v38 = vsel %vm1798_vm8, %v7291_v39, %v7292_v10  ;;  %v7218_v7 = vld [vmem:[#allocation3 + $0xe0] sm:$0xfc]  ;;  %v11978_v16 = vld [vmem:[#allocation12 + $0x7f4] sm:$0xf] }
 0x956   : > { %7966 = vmatpush.bf16.msrb.mxu3 %v11125_v24  ;;  %v11048_v2 = vld [vmem:[#allocation12 + $0x600] sm:$0xf]  ;;  %v11234_v42 = vld [vmem:[#allocation12 + $0x778] sm:$0xf0]  ;;  %v7223_v39 = vld [vmem:[#allocation3 + $0x108] sm:$0xfc] }
 0x957   : > { %v6699_v48 = vpop.f32.mrf.mxu3  ;;  %v6615_v14 = vpop.f32.mrf.mxu0  ;;  %7879 = vmatpush.bf16.msrb.mxu0 %v11057_v43  ;;  %v11298_v36 = vld [vmem:[#allocation12 + $0x7f8] sm:$0xf0]  ;;  %v7225_v10 = vld [vmem:[#allocation3 + $0x118] sm:$0x3]  ;;  %v7294_v13 = vrot.slane %v7218_v7, 2 }
 0x958   : > { %v6700_v18 = vadd.f32 %v6699_v48, %v6670_v37  ;;  %v7288_v37 = vrot.slane %v7214_v0, 2  ;;  %v11120_v48 = vld [vmem:[#allocation12 + $0x690] sm:$0xf]  ;;  %v11290_v7 = vld [vmem:[#allocation12 + $0x7e8] sm:$0xf0] }
 0x959   : > { %v6644_v15 = vpop.f32.mrf.mxu1 }
 0x95a   : > { %v14081_v22 = vadd.f32 %v6700_v18, %v14017_v11  ;;  %v6645_v60 = vadd.f32 %v6644_v15, %v6615_v14  ;;  %7536 = vmatmul.bf16.gmra.mxu0 %v7324_v4  ;;  %7594 = vmatmul.bf16.gmra.mxu2 %v7324_v4  ;;  %v11918_v11 = vld [vmem:[#allocation12 + $0x614] sm:$0xf]  ;;  %v7290_v20 = vsel %vm1798_vm8, %v7288_v37, %v7289_v35  ;;  %v11935_v18 = vld [vmem:[#allocation12 + $0x694] sm:$0xf0]  ;;  %v11050_v4 = vld [vmem:[#allocation12 + $0x608] sm:$0xf0] }
 0x95b   : > { %v11061_v61 = vor.u32 %v11918_v11, %v11058_v53  ;;  %v11121_v15 = vor.u32 %v11935_v18, %v11120_v48  ;;  %v7219_v35 = vld [vmem:[#allocation3 + $0xe8] sm:$0xfc] }
 0x95c   : > { %v14084_v17 = vadd.f32 %v6645_v60, %v14020_v45  ;;  %7565 = vmatmul.bf16.gmra.mxu1 %v7325_v59  ;;  %7623 = vmatmul.bf16.gmra.mxu3 %v7325_v59  ;;  %v11932_v59 = vld [vmem:[#allocation12 + $0x684] sm:$0xf]  ;;  %v7297_v18 = vrot.slane %v7219_v35, 2  ;;  %v11958_v35 = vld [vmem:[#allocation12 + $0x754] sm:$0xf] }
 0x95d   : > { %v6673_v41 = vpop.f32.mrf.mxu2  ;;  %7937 = vmatpush.bf16.msrb.mxu2 %v11061_v61  ;;  %v11117_v47 = vor.u32 %v11932_v59, %v11114_v55  ;;  %7908 = vmatpush.bf16.msrb.mxu1 %v11121_v15  ;;  %v7220_v61 = vld [vmem:[#allocation3 + $0xf0] sm:$0x3]  ;;  %v7304_v15 = vrot.slane %v7225_v10, 2  ;;  %v11232_v59 = vld [vmem:[#allocation12 + $0x770] sm:$0xf] }
 0x95e   : > { %v7295_v48 = vrot.slane %v7220_v61, 2  ;;  %v11963_v55 = vld [vmem:[#allocation12 + $0x774] sm:$0xf0] }
 0x95f   : > { %v6702_v45 = vpop.f32.mrf.mxu3  ;;  %v6617_v52 = vpop.f32.mrf.mxu0  ;;  %7967 = vmatpush.bf16.msrb.mxu3 %v11117_v47  ;;  %v11233_v47 = vor.u32 %v11963_v55, %v11232_v59  ;;  %v11280_v59 = vld [vmem:[#allocation12 + $0x7d0] sm:$0xf] }
 0x960   : > { %v6703_v30 = vadd.f32 %v6702_v45, %v6673_v41  ;;  %v7326_v41 = vpack.c.bf16 %v7290_v20, %v7284_v9  ;;  %v11917_v45 = vld [vmem:[#allocation12 + $0x604] sm:$0xf0]  ;;  %v7301_v9 = vrot.slane %v7224_v40, 2 }
 0x961   : > { %v6646_v33 = vpop.f32.mrf.mxu1  ;;  %v11049_v24 = vor.u32 %v11917_v45, %v11048_v2 }
 0x962   : > { %v14087_v12 = vadd.f32 %v6703_v30, %v14023_v28  ;;  %v6647_v50 = vadd.f32 %v6646_v33, %v6617_v52  ;;  %v11916_v28 = vld [vmem:[#allocation12 + $0x604] sm:$0xf]  ;;  %v11112_v52 = vld [vmem:[#allocation12 + $0x680] sm:$0xf]  ;;  %v11933_v30 = vld [vmem:[#allocation12 + $0x684] sm:$0xf0] }
 0x963   : > { %v11053_v60 = vor.u32 %v11916_v28, %v11050_v4  ;;  %v11113_v31 = vor.u32 %v11933_v30, %v11112_v52  ;;  %7880 = vmatpush.bf16.msrb.mxu0 %v11049_v24  ;;  %v7303_v4 = vrot.slane %v7223_v39, 2  ;;  %v11282_v39 = vld [vmem:[#allocation12 + $0x7d8] sm:$0xf0] }
 0x964   : > { %v14090_v63 = vadd.f32 %v6647_v50, %v14026_v32  ;;  %v7287_v32 = vsel %vm1798_vm8, %v7285_v26, %v7286_v3  ;;  %v11301_v50 = vor.u32 %v11978_v16, %v11298_v36  ;;  %v7221_v3 = vld [vmem:[#allocation3 + $0xf8] sm:$0x3]  ;;  %v11288_v16 = vld [vmem:[#allocation12 + $0x7e0] sm:$0xf] }
 0x965   : > { %v6675_v14 = vpop.f32.mrf.mxu2  ;;  %7938 = vmatpush.bf16.msrb.mxu2 %v11053_v60  ;;  %v7327_v53 = vpack.c.bf16 %v7293_v38, %v7287_v32  ;;  %7909 = vmatpush.bf16.msrb.mxu1 %v11113_v31  ;;  %v7298_v28 = vrot.slane %v7221_v3, 2  ;;  %v7296_v32 = vsel %vm1798_vm8, %v7294_v13, %v7295_v48  ;;  %v7305_v2 = vsel %vm1798_vm8, %v7303_v4, %v7304_v15  ;;  %v11224_v31 = vld [vmem:[#allocation12 + $0x760] sm:$0xf]  ;;  %v11974_v3 = vld [vmem:[#allocation12 + $0x7d4] sm:$0xf] }
 0x966   : > { %8421 = vmatpush.bf16.msra.mxu3 %v11301_v50  ;;  %v11218_v50 = vld [vmem:[#allocation12 + $0x758] sm:$0xf0]  ;;  %v11285_v13 = vor.u32 %v11974_v3, %v11282_v39  ;;  %v11216_v4 = vld [vmem:[#allocation12 + $0x750] sm:$0xf]  ;;  %v11959_v15 = vld [vmem:[#allocation12 + $0x754] sm:$0xf0] }
 0x967   : > { %v6704_v49 = vpop.f32.mrf.mxu3  ;;  %v6620_v0 = vpop.f32.mrf.mxu0  ;;  %8334 = vmatpush.bf16.msra.mxu0 %v11233_v47 }
 0x968   : > { %v6705_v51 = vadd.f32 %v6704_v49, %v6675_v14  ;;  %v7300_v14 = vrot.slane %v7222_v23, 2  ;;  %v11296_v49 = vld [vmem:[#allocation12 + $0x7f0] sm:$0xf] }
 0x969   : > { %v6649_v58 = vpop.f32.mrf.mxu1 }
 0x96a   : > { %v14097_v27 = vadd.f32 %v6705_v51, %v14033_v62  ;;  %v6650_v11 = vadd.f32 %v6649_v58, %v6620_v0  ;;  %7541 = vmatmul.bf16.gmra.mxu0 %v7326_v41  ;;  %7599 = vmatmul.bf16.gmra.mxu2 %v7326_v41  ;;  %v11962_v62 = vld [vmem:[#allocation12 + $0x774] sm:$0xf]  ;;  %v7302_v38 = vsel %vm1798_vm8, %v7300_v14, %v7301_v9  ;;  %v11979_v51 = vld [vmem:[#allocation12 + $0x7f4] sm:$0xf0]  ;;  %v11226_v41 = vld [vmem:[#allocation12 + $0x768] sm:$0xf0] }
 0x96b   : > { %v11237_v33 = vor.u32 %v11962_v62, %v11234_v42  ;;  %v11297_v58 = vor.u32 %v11979_v51, %v11296_v49  ;;  %v11217_v49 = vor.u32 %v11959_v15, %v11216_v4  ;;  %v11971_v15 = vld [vmem:[#allocation12 + $0x7b4] sm:$0xf0] }
 0x96c   : > { %v14100_v21 = vadd.f32 %v6650_v11, %v14036_v25  ;;  %7570 = vmatmul.bf16.gmra.mxu1 %v7327_v53  ;;  %7628 = vmatmul.bf16.gmra.mxu3 %v7327_v53  ;;  %v11976_v53 = vld [vmem:[#allocation12 + $0x7e4] sm:$0xf] }
 0x96d   : > { %v6678_v6 = vpop.f32.mrf.mxu2  ;;  %8392 = vmatpush.bf16.msra.mxu2 %v11237_v33  ;;  %v11293_v45 = vor.u32 %v11976_v53, %v11290_v7  ;;  %8363 = vmatpush.bf16.msra.mxu1 %v11297_v58  ;;  %v11961_v33 = vld [vmem:[#allocation12 + $0x764] sm:$0xf0] }
 0x96e   : > { %v7659_v53 = vld [vmem:[#allocation3 + $0x68] sm:$0xff] }
 0x96f   : > { %v6707_v25 = vpop.f32.mrf.mxu3  ;;  %v6622_v37 = vpop.f32.mrf.mxu0  ;;  %8422 = vmatpush.bf16.msra.mxu3 %v11293_v45 }
 0x970   : > { %v6708_v26 = vadd.f32 %v6707_v25, %v6678_v6  ;;  %v7328_v6 = vpack.c.bf16 %v7302_v38, %v7296_v32  ;;  %v11225_v25 = vor.u32 %v11961_v33, %v11224_v31  ;;  %v11956_v32 = vld [vmem:[#allocation12 + $0x744] sm:$0xf]  ;;  %v11210_v38 = vld [vmem:[#allocation12 + $0x748] sm:$0xf0]  ;;  %v11973_v33 = vld [vmem:[#allocation12 + $0x7c4] sm:$0xf0] }
 0x971   : > { %v6651_v8 = vpop.f32.mrf.mxu1  ;;  %v11213_v51 = vor.u32 %v11956_v32, %v11210_v38  ;;  %v11968_v32 = vld [vmem:[#allocation12 + $0x7a4] sm:$0xf]  ;;  %v11258_v38 = vld [vmem:[#allocation12 + $0x7a8] sm:$0xf0] }
 0x972   : > { %v14103_v20 = vadd.f32 %v6708_v26, %v14039_v54  ;;  %v6652_v43 = vadd.f32 %v6651_v8, %v6622_v37  ;;  %v11960_v54 = vld [vmem:[#allocation12 + $0x764] sm:$0xf]  ;;  %v11977_v37 = vld [vmem:[#allocation12 + $0x7e4] sm:$0xf0]  ;;  %8335 = vmatpush.bf16.msra.mxu0 %v11225_v25 }
 0x973   : > { %v11229_v11 = vor.u32 %v11960_v54, %v11226_v41  ;;  %v11289_v26 = vor.u32 %v11977_v37, %v11288_v16  ;;  %8423 = vmatpush.bf16.msra.mxu3 %v11285_v13  ;;  %v11972_v54 = vld [vmem:[#allocation12 + $0x7c4] sm:$0xf]  ;;  %v11274_v41 = vld [vmem:[#allocation12 + $0x7c8] sm:$0xf0]  ;;  %v11954_v16 = vld [vmem:[#allocation12 + $0x734] sm:$0xf] }
 0x974   : > { %v14106_v60 = vadd.f32 %v6652_v43, %v14042_v5  ;;  %v7299_v5 = vsel %vm1798_vm8, %v7297_v18, %v7298_v28  ;;  %v7656_v43 = vld [vmem:[#allocation3 + $0x40] sm:$0xff]  ;;  %v11277_v7 = vor.u32 %v11972_v54, %v11274_v41  ;;  %v11970_v37 = vld [vmem:[#allocation12 + $0x7b4] sm:$0xf]  ;;  %v7663_v54 = vld [vmem:[#allocation3 + $0xa8] sm:$0xff]  ;;  %v11261_v41 = vor.u32 %v11968_v32, %v11258_v38 }
 0x975   : > { %v6680_v0 = vpop.f32.mrf.mxu2  ;;  %8393 = vmatpush.bf16.msra.mxu2 %v11229_v11  ;;  %v7329_v42 = vpack.c.bf16 %v7305_v2, %v7299_v5  ;;  %8364 = vmatpush.bf16.msra.mxu1 %v11289_v26  ;;  %v7658_v18 = vld [vmem:[#allocation3 + $0x60] sm:$0xff]  ;;  %v7657_v11 = vld [vmem:[#allocation3 + $0x48] sm:$0xff] }
 0x976   : > { %8336 = vmatpush.bf16.msra.mxu0 %v11217_v49  ;;  %v7673_v45 = vpack.c.bf16 %v7659_v53, %v7657_v11  ;;  %v7662_v13 = vld [vmem:[#allocation3 + $0xa0] sm:$0xff]  ;;  %v7667_v32 = vld [vmem:[#allocation3 + $0xe8] sm:$0xff] }
 0x977   : > { %v6709_v61 = vpop.f32.mrf.mxu3  ;;  %v6625_v23 = vpop.f32.mrf.mxu0  ;;  %8424 = vmatpush.bf16.msra.mxu3 %v11277_v7 }
 0x978   : > { %v6710_v52 = vadd.f32 %v6709_v61, %v6680_v0  ;;  %v11975_v0 = vld [vmem:[#allocation12 + $0x7d4] sm:$0xf0]  ;;  %v7672_v61 = vpack.c.bf16 %v7658_v18, %v7656_v43  ;;  %v11264_v43 = vld [vmem:[#allocation12 + $0x7b0] sm:$0xf] }
 0x979   : > { %v6654_v24 = vpop.f32.mrf.mxu1  ;;  %v11281_v47 = vor.u32 %v11975_v0, %v11280_v59  ;;  %v11952_v59 = vld [vmem:[#allocation12 + $0x724] sm:$0xf]  ;;  %v11265_v49 = vor.u32 %v11971_v15, %v11264_v43 }
 0x97a   : > { %v14113_v30 = vadd.f32 %v6710_v52, %v14049_v57  ;;  %v6655_v62 = vadd.f32 %v6654_v24, %v6625_v23  ;;  %7546 = vmatmul.bf16.gmra.mxu0 %v7328_v6  ;;  %7604 = vmatmul.bf16.gmra.mxu2 %v7328_v6  ;;  %v11221_v57 = vor.u32 %v11958_v35, %v11218_v50  ;;  %v11208_v6 = vld [vmem:[#allocation12 + $0x740] sm:$0xf]  ;;  %v11957_v24 = vld [vmem:[#allocation12 + $0x744] sm:$0xf0]  ;;  %v11266_v35 = vld [vmem:[#allocation12 + $0x7b8] sm:$0xf0] }
 0x97b   : > { %8365 = vmatpush.bf16.msra.mxu1 %v11281_v47  ;;  %v11209_v31 = vor.u32 %v11957_v24, %v11208_v6  ;;  %v11969_v24 = vld [vmem:[#allocation12 + $0x7a4] sm:$0xf0]  ;;  %v11948_v43 = vld [vmem:[#allocation12 + $0x704] sm:$0xf] }
 0x97c   : > { %v14116_v40 = vadd.f32 %v6655_v62, %v14052_v44  ;;  %7575 = vmatmul.bf16.gmra.mxu1 %v7329_v42  ;;  %7633 = vmatmul.bf16.gmra.mxu3 %v7329_v42  ;;  %v11272_v62 = vld [vmem:[#allocation12 + $0x7c0] sm:$0xf] }
 0x97d   : > { %v6683_v36 = vpop.f32.mrf.mxu2  ;;  %8394 = vmatpush.bf16.msra.mxu2 %v11221_v57  ;;  %v11273_v25 = vor.u32 %v11973_v33, %v11272_v62  ;;  %8337 = vmatpush.bf16.msra.mxu0 %v11209_v31  ;;  %v11269_v57 = vor.u32 %v11970_v37, %v11266_v35  ;;  %v11950_v62 = vld [vmem:[#allocation12 + $0x714] sm:$0xf] }
 0x97e   : > { %v11966_v33 = vld [vmem:[#allocation12 + $0x794] sm:$0xf] }
 0x97f   : > { %v6712_v10 = vpop.f32.mrf.mxu3  ;;  %v6627_v8 = vpop.f32.mrf.mxu0  ;;  %8366 = vmatpush.bf16.msra.mxu1 %v11273_v25  ;;  %8425 = vmatpush.bf16.msra.mxu3 %v11269_v57  ;;  %v7666_v57 = vld [vmem:[#allocation3 + $0xe0] sm:$0xff] }
 0x980   : > { %v6713_v44 = vadd.f32 %v6712_v10, %v6683_v36  ;;  %v11202_v36 = vld [vmem:[#allocation12 + $0x738] sm:$0xf0] }
 0x981   : > { %v6656_v48 = vpop.f32.mrf.mxu1  ;;  %8395 = vmatpush.bf16.msra.mxu2 %v11213_v51  ;;  %v7661_v51 = vld [vmem:[#allocation3 + $0x88] sm:$0xff] }
 0x982   : > { %v14119_v14 = vadd.f32 %v6713_v44, %v14055_v19  ;;  %v6657_v9 = vadd.f32 %v6656_v48, %v6627_v8  ;;  %v7660_v8 = vld [vmem:[#allocation3 + $0x80] sm:$0xff]  ;;  %v11200_v48 = vld [vmem:[#allocation12 + $0x730] sm:$0xf]  ;;  %v7675_v7 = vpack.c.bf16 %v7663_v54, %v7661_v51 }
 0x983   : > { %8367 = vmatpush.bf16.msra.mxu1 %v11265_v49  ;;  %8426 = vmatpush.bf16.msra.mxu3 %v11261_v41 }
 0x984   : > { %v14122_v28 = vadd.f32 %v6657_v9, %v14058_v46  ;;  %v11955_v9 = vld [vmem:[#allocation12 + $0x734] sm:$0xf0] }
 0x985   : > { %v6685_v55 = vpop.f32.mrf.mxu2  ;;  %v11201_v4 = vor.u32 %v11955_v9, %v11200_v48  ;;  %v11967_v9 = vld [vmem:[#allocation12 + $0x794] sm:$0xf0] }
 0x987   : > { %v6714_v19 = vpop.f32.mrf.mxu3  ;;  %v7071_v58 = vpop.f32.mrf.mxu0  ;;  %8338 = vmatpush.bf16.msra.mxu0 %v11201_v4 }
 0x988   : > { %v6715_v46 = vadd.f32 %v6714_v19, %v6685_v55  ;;  %v11194_v55 = vld [vmem:[#allocation12 + $0x728] sm:$0xf0]  ;;  %v7674_v19 = vpack.c.bf16 %v7662_v13, %v7660_v8  ;;  %v11248_v8 = vld [vmem:[#allocation12 + $0x790] sm:$0xf] }
 0x989   : > { %v7100_v23 = vpop.f32.mrf.mxu1  ;;  %v11197_v0 = vor.u32 %v11952_v59, %v11194_v55  ;;  %v11249_v4 = vor.u32 %v11967_v9, %v11248_v8  ;;  %v11964_v59 = vld [vmem:[#allocation12 + $0x784] sm:$0xf]  ;;  %v11242_v55 = vld [vmem:[#allocation12 + $0x788] sm:$0xf0] }
 0x98a   : > { %v14125_v5 = vadd.f32 %v6715_v46, %v14065_v1  ;;  %v7101_v2 = vadd.f32 %v7100_v23, %v7071_v58  ;;  %7881 = vmatmul.bf16.vlgmr.msrb.gmra.mxu0 %v7672_v61  ;;  %7939 = vmatmul.bf16.vlgmr.msrb.gmra.mxu2 %v7672_v61  ;;  %v11205_v1 = vor.u32 %v11954_v16, %v11202_v36  ;;  %v11192_v61 = vld [vmem:[#allocation12 + $0x720] sm:$0xf]  ;;  %v11953_v23 = vld [vmem:[#allocation12 + $0x724] sm:$0xf0]  ;;  %v11250_v16 = vld [vmem:[#allocation12 + $0x798] sm:$0xf0] }
 0x98b   : > { %v11193_v6 = vor.u32 %v11953_v23, %v11192_v61  ;;  %v11245_v38 = vor.u32 %v11964_v59, %v11242_v55  ;;  %v11965_v23 = vld [vmem:[#allocation12 + $0x784] sm:$0xf0]  ;;  %v11992_v8 = vld [vmem:[#allocation12 + $0x864] sm:$0xf] }
 0x98c   : > { %v14128_v52 = vadd.f32 %v7101_v2, %v14068_v29  ;;  %7910 = vmatmul.bf16.vlgmr.msrb.gmra.mxu1 %v7673_v45  ;;  %7968 = vmatmul.bf16.vlgmr.msrb.gmra.mxu3 %v7673_v45  ;;  %v11256_v2 = vld [vmem:[#allocation12 + $0x7a0] sm:$0xf]  ;;  %v7671_v59 = vld [vmem:[#allocation3 + $0x128] sm:$0xff] }
 0x98d   : > { %v7129_v42 = vpop.f32.mrf.mxu2  ;;  %8396 = vmatpush.bf16.msra.mxu2 %v11205_v1  ;;  %v11257_v31 = vor.u32 %v11969_v24, %v11256_v2  ;;  %8339 = vmatpush.bf16.msra.mxu0 %v11193_v6  ;;  %v11253_v1 = vor.u32 %v11966_v33, %v11250_v16  ;;  %v11994_v2 = vld [vmem:[#allocation12 + $0x874] sm:$0xf] }
 0x98e   : > { %v12010_v24 = vld [vmem:[#allocation12 + $0x8f4] sm:$0xf] }
 0x98f   : > { %v7158_v50 = vpop.f32.mrf.mxu3  ;;  %v7073_v26 = vpop.f32.mrf.mxu0  ;;  %8368 = vmatpush.bf16.msra.mxu1 %v11257_v31  ;;  %8427 = vmatpush.bf16.msra.mxu3 %v11253_v1  ;;  %v7670_v1 = vld [vmem:[#allocation3 + $0x120] sm:$0xff] }
 0x990   : > { %v7159_v29 = vadd.f32 %v7158_v50, %v7129_v42  ;;  %v11186_v42 = vld [vmem:[#allocation12 + $0x718] sm:$0xf0] }
 0x991   : > { %v7102_v3 = vpop.f32.mrf.mxu1  ;;  %8397 = vmatpush.bf16.msra.mxu2 %v11197_v0  ;;  %v7665_v0 = vld [vmem:[#allocation3 + $0xc8] sm:$0xff] }
 0x992   : > { %v14131_v39 = vadd.f32 %v7159_v29, %v14071_v34  ;;  %v7103_v10 = vadd.f32 %v7102_v3, %v7073_v26  ;;  %v7664_v26 = vld [vmem:[#allocation3 + $0xc0] sm:$0xff]  ;;  %v11184_v3 = vld [vmem:[#allocation12 + $0x710] sm:$0xf]  ;;  %v7677_v41 = vpack.c.bf16 %v7667_v32, %v7665_v0 }
 0x993   : > { %8369 = vmatpush.bf16.msra.mxu1 %v11249_v4  ;;  %8428 = vmatpush.bf16.msra.mxu3 %v11245_v38 }
 0x994   : > { %v14134_v44 = vadd.f32 %v7103_v10, %v14074_v56  ;;  %v11951_v10 = vld [vmem:[#allocation12 + $0x714] sm:$0xf0] }
 0x995   : > { %v7131_v18 = vpop.f32.mrf.mxu2  ;;  %v11185_v48 = vor.u32 %v11951_v10, %v11184_v3  ;;  %v12011_v10 = vld [vmem:[#allocation12 + $0x8f4] sm:$0xf0] }
 0x997   : > { %v7160_v34 = vpop.f32.mrf.mxu3  ;;  %v7076_v47 = vpop.f32.mrf.mxu0  ;;  %8340 = vmatpush.bf16.msra.mxu0 %v11185_v48 }
 0x998   : > { %v7161_v56 = vadd.f32 %v7160_v34, %v7131_v18  ;;  %v11178_v18 = vld [vmem:[#allocation12 + $0x708] sm:$0xf0]  ;;  %v7676_v34 = vpack.c.bf16 %v7666_v57, %v7664_v26  ;;  %v11424_v26 = vld [vmem:[#allocation12 + $0x8f0] sm:$0xf] }
 0x999   : > { %v7105_v58 = vpop.f32.mrf.mxu1  ;;  %v11181_v15 = vor.u32 %v11948_v43, %v11178_v18  ;;  %v11425_v48 = vor.u32 %v12011_v10, %v11424_v26  ;;  %v12008_v43 = vld [vmem:[#allocation12 + $0x8e4] sm:$0xf]  ;;  %v11418_v18 = vld [vmem:[#allocation12 + $0x8e8] sm:$0xf0] }
 0x99a   : > { %v14137_v11 = vadd.f32 %v7161_v56, %v14081_v22  ;;  %v7106_v53 = vadd.f32 %v7105_v58, %v7076_v47  ;;  %7886 = vmatmul.bf16.gmra.mxu0 %v7674_v19  ;;  %7944 = vmatmul.bf16.gmra.mxu2 %v7674_v19  ;;  %v11189_v22 = vor.u32 %v11950_v62, %v11186_v42  ;;  %v11176_v19 = vld [vmem:[#allocation12 + $0x700] sm:$0xf]  ;;  %v11949_v58 = vld [vmem:[#allocation12 + $0x704] sm:$0xf0]  ;;  %v11426_v62 = vld [vmem:[#allocation12 + $0x8f8] sm:$0xf0] }
 0x99b   : > { %v11177_v61 = vor.u32 %v11949_v58, %v11176_v19  ;;  %v11421_v55 = vor.u32 %v12008_v43, %v11418_v18  ;;  %v11993_v19 = vld [vmem:[#allocation12 + $0x864] sm:$0xf0]  ;;  %v11416_v58 = vld [vmem:[#allocation12 + $0x8e0] sm:$0xf]  ;;  %v11344_v43 = vld [vmem:[#allocation12 + $0x850] sm:$0xf] }
 0x99c   : > { %v14140_v46 = vadd.f32 %v7106_v53, %v14084_v17  ;;  %7915 = vmatmul.bf16.gmra.mxu1 %v7675_v7  ;;  %7973 = vmatmul.bf16.gmra.mxu3 %v7675_v7  ;;  %v11240_v53 = vld [vmem:[#allocation12 + $0x780] sm:$0xf]  ;;  %v11991_v18 = vld [vmem:[#allocation12 + $0x854] sm:$0xf0] }
 0x99d   : > { %v7134_v45 = vpop.f32.mrf.mxu2  ;;  %8398 = vmatpush.bf16.msra.mxu2 %v11189_v22  ;;  %v11241_v6 = vor.u32 %v11965_v23, %v11240_v53  ;;  %8341 = vmatpush.bf16.msra.mxu0 %v11177_v61  ;;  %v11429_v22 = vor.u32 %v12010_v24, %v11426_v62  ;;  %v12009_v61 = vld [vmem:[#allocation12 + $0x8e4] sm:$0xf0]  ;;  %v11346_v23 = vld [vmem:[#allocation12 + $0x858] sm:$0xf0] }
 0x99e   : > { %v11410_v24 = vld [vmem:[#allocation12 + $0x8d8] sm:$0xf0] }
 0x99f   : > { %v7163_v36 = vpop.f32.mrf.mxu3  ;;  %v7078_v25 = vpop.f32.mrf.mxu0  ;;  %8370 = vmatpush.bf16.msra.mxu1 %v11241_v6  ;;  %8882 = vmatpush.bf16.msrb.mxu3 %v11429_v22 }
 0x9a0   : > { %v7164_v17 = vadd.f32 %v7163_v36, %v7134_v45  ;;  %v11362_v45 = vld [vmem:[#allocation12 + $0x878] sm:$0xf0] }
 0x9a1   : > { %v7107_v37 = vpop.f32.mrf.mxu1  ;;  %8399 = vmatpush.bf16.msra.mxu2 %v11181_v15  ;;  %v7669_v15 = vld [vmem:[#allocation3 + $0x108] sm:$0xff] }
 0x9a2   : > { %v14143_v35 = vadd.f32 %v7164_v17, %v14087_v12  ;;  %v7108_v50 = vadd.f32 %v7107_v37, %v7078_v25  ;;  %v7668_v25 = vld [vmem:[#allocation3 + $0x100] sm:$0xff]  ;;  %v11360_v37 = vld [vmem:[#allocation12 + $0x870] sm:$0xf]  ;;  %v7679_v38 = vpack.c.bf16 %v7671_v59, %v7669_v15 }
 0x9a3   : > { %8824 = vmatpush.bf16.msrb.mxu1 %v11425_v48  ;;  %8883 = vmatpush.bf16.msrb.mxu3 %v11421_v55  ;;  %v11345_v55 = vor.u32 %v11991_v18, %v11344_v43 }
 0x9a4   : > { %v14146_v29 = vadd.f32 %v7108_v50, %v14090_v63  ;;  %v11995_v50 = vld [vmem:[#allocation12 + $0x874] sm:$0xf0] }
 0x9a5   : > { %v7136_v13 = vpop.f32.mrf.mxu2  ;;  %v11361_v3 = vor.u32 %v11995_v50, %v11360_v37 }
 0x9a7   : > { %v7165_v12 = vpop.f32.mrf.mxu3  ;;  %v7081_v49 = vpop.f32.mrf.mxu0  ;;  %8795 = vmatpush.bf16.msrb.mxu0 %v11361_v3 }
 0x9a8   : > { %v7166_v63 = vadd.f32 %v7165_v12, %v7136_v13  ;;  %v11354_v13 = vld [vmem:[#allocation12 + $0x868] sm:$0xf0]  ;;  %v7678_v12 = vpack.c.bf16 %v7670_v1, %v7668_v25 }
 0x9a9   : > { %v7110_v47 = vpop.f32.mrf.mxu1  ;;  %v11357_v9 = vor.u32 %v11992_v8, %v11354_v13 }
 0x9aa   : > { %v14149_v51 = vadd.f32 %v7166_v63, %v14097_v27  ;;  %v7111_v54 = vadd.f32 %v7110_v47, %v7081_v49  ;;  %7891 = vmatmul.bf16.gmra.mxu0 %v7676_v34  ;;  %7949 = vmatmul.bf16.gmra.mxu2 %v7676_v34  ;;  %v11365_v27 = vor.u32 %v11994_v2, %v11362_v45  ;;  %v8005_v34 = vld [vmem:[#allocation3 + $0x40] sm:$0xfe]  ;;  %v8007_v47 = vld [vmem:[#allocation3 + $0x50] sm:$0x1] }
 0x9ab   : > { %v8011_v2 = vld [vmem:[#allocation3 + $0x70] sm:$0x1]  ;;  %v11417_v45 = vor.u32 %v12009_v61, %v11416_v58  ;;  %v8069_v1 = vrot.slane %v8005_v34, 1  ;;  %v8070_v37 = vrot.slane %v8007_v47, 1 }
 0x9ac   : > { %v14152_v56 = vadd.f32 %v7111_v54, %v14100_v21  ;;  %7920 = vmatmul.bf16.gmra.mxu1 %v7677_v41  ;;  %7978 = vmatmul.bf16.gmra.mxu3 %v7677_v41  ;;  %v8009_v54 = vld [vmem:[#allocation3 + $0x60] sm:$0xfe]  ;;  %v8076_v26 = vrot.slane %v8011_v2, 1  ;;  %v11402_v34 = vld [vmem:[#allocation12 + $0x8c8] sm:$0xf0] }
 0x9ad   : > { %v7139_v7 = vpop.f32.mrf.mxu2  ;;  %8853 = vmatpush.bf16.msrb.mxu2 %v11365_v27  ;;  %v11352_v41 = vld [vmem:[#allocation12 + $0x860] sm:$0xf]  ;;  %v12006_v27 = vld [vmem:[#allocation12 + $0x8d4] sm:$0xf]  ;;  %8825 = vmatpush.bf16.msrb.mxu1 %v11417_v45  ;;  %v8075_v50 = vrot.slane %v8009_v54, 1  ;;  %v8071_v15 = vsel %vm1076_vm14, %v8069_v1, %v8070_v37 }
 0x9ae   : > { %v8013_v45 = vld [vmem:[#allocation3 + $0x80] sm:$0xfe]  ;;  %v12002_v1 = vld [vmem:[#allocation12 + $0x8b4] sm:$0xf] }
 0x9af   : > { %v7168_v42 = vpop.f32.mrf.mxu3  ;;  %v7083_v31 = vpop.f32.mrf.mxu0  ;;  %v8077_v59 = vsel %vm1076_vm14, %v8075_v50, %v8076_v26  ;;  %v11394_v37 = vld [vmem:[#allocation12 + $0x8b8] sm:$0xf0]  ;;  %v8014_v26 = vld [vmem:[#allocation3 + $0x88] sm:$0xfe]  ;;  %v8081_v18 = vrot.slane %v8013_v45, 1 }
 0x9b0   : > { %v7169_v21 = vadd.f32 %v7168_v42, %v7139_v7  ;;  %v11353_v7 = vor.u32 %v11993_v19, %v11352_v41  ;;  %v8006_v42 = vld [vmem:[#allocation3 + $0x48] sm:$0xfe]  ;;  %v11386_v45 = vld [vmem:[#allocation12 + $0x8a8] sm:$0xf0] }
 0x9b1   : > { %v7112_v33 = vpop.f32.mrf.mxu1  ;;  %8854 = vmatpush.bf16.msrb.mxu2 %v11357_v9  ;;  %v8072_v10 = vrot.slane %v8006_v42, 1 }
 0x9b2   : > { %v14155_v16 = vadd.f32 %v7169_v21, %v14103_v20  ;;  %v7113_v36 = vadd.f32 %v7112_v33, %v7083_v31  ;;  %8796 = vmatpush.bf16.msrb.mxu0 %v11353_v7  ;;  %v11413_v31 = vor.u32 %v12006_v27, %v11410_v24  ;;  %v8008_v21 = vld [vmem:[#allocation3 + $0x58] sm:$0x1]  ;;  %v8010_v33 = vld [vmem:[#allocation3 + $0x68] sm:$0xfe]  ;;  %v8017_v27 = vld [vmem:[#allocation3 + $0xa0] sm:$0xfe] }
 0x9b3   : > { %v8073_v8 = vrot.slane %v8008_v21, 1  ;;  %v8078_v13 = vrot.slane %v8010_v33, 1  ;;  %v11336_v24 = vld [vmem:[#allocation12 + $0x840] sm:$0xf]  ;;  %v11330_v21 = vld [vmem:[#allocation12 + $0x838] sm:$0xf0] }
 0x9b4   : > { %v14158_v17 = vadd.f32 %v7113_v36, %v14106_v60  ;;  %v8012_v36 = vld [vmem:[#allocation3 + $0x78] sm:$0x1]  ;;  %8884 = vmatpush.bf16.msrb.mxu3 %v11413_v31  ;;  %v8019_v33 = vld [vmem:[#allocation3 + $0xb0] sm:$0x1] }
 0x9b5   : > { %v7141_v57 = vpop.f32.mrf.mxu2  ;;  %v8079_v48 = vrot.slane %v8012_v36, 1 }
 0x9b6   : > { %8797 = vmatpush.bf16.msrb.mxu0 %v11345_v55 }
 0x9b7   : > { %v7170_v20 = vpop.f32.mrf.mxu3  ;;  %v7086_v4 = vpop.f32.mrf.mxu0  ;;  %v8080_v41 = vsel %vm1076_vm14, %v8078_v13, %v8079_v48  ;;  %v8018_v13 = vld [vmem:[#allocation3 + $0xa8] sm:$0xfe]  ;;  %v8020_v48 = vld [vmem:[#allocation3 + $0xb8] sm:$0x1] }
 0x9b8   : > { %v7171_v60 = vadd.f32 %v7170_v20, %v7141_v57  ;;  %v11408_v20 = vld [vmem:[#allocation12 + $0x8d0] sm:$0xf] }
 0x9b9   : > { %v7115_v49 = vpop.f32.mrf.mxu1 }
 0x9ba   : > { %v14161_v0 = vadd.f32 %v7171_v60, %v14113_v30  ;;  %v7116_v32 = vadd.f32 %v7115_v49, %v7086_v4  ;;  %7896 = vmatmul.bf16.gmra.mxu0 %v7678_v12  ;;  %7954 = vmatmul.bf16.gmra.mxu2 %v7678_v12  ;;  %v11990_v30 = vld [vmem:[#allocation12 + $0x854] sm:$0xf]  ;;  %v12007_v60 = vld [vmem:[#allocation12 + $0x8d4] sm:$0xf0]  ;;  %v11338_v12 = vld [vmem:[#allocation12 + $0x848] sm:$0xf0] }
 0x9bb   : > { %v11349_v6 = vor.u32 %v11990_v30, %v11346_v23  ;;  %v11409_v49 = vor.u32 %v12007_v60, %v11408_v20  ;;  %v8084_v60 = vrot.slane %v8014_v26, 1 }
 0x9bc   : > { %v14164_v63 = vadd.f32 %v7116_v32, %v14116_v40  ;;  %7925 = vmatmul.bf16.gmra.mxu1 %v7679_v38  ;;  %7983 = vmatmul.bf16.gmra.mxu3 %v7679_v38  ;;  %v12004_v38 = vld [vmem:[#allocation12 + $0x8c4] sm:$0xf] }
 0x9bd   : > { %v7144_v53 = vpop.f32.mrf.mxu2  ;;  %8855 = vmatpush.bf16.msrb.mxu2 %v11349_v6  ;;  %v11405_v19 = vor.u32 %v12004_v38, %v11402_v34  ;;  %8826 = vmatpush.bf16.msrb.mxu1 %v11409_v49  ;;  %v8015_v6 = vld [vmem:[#allocation3 + $0x90] sm:$0x1]  ;;  %v8091_v49 = vrot.slane %v8020_v48, 1  ;;  %v11328_v38 = vld [vmem:[#allocation12 + $0x830] sm:$0xf] }
 0x9be   : > { %v8082_v20 = vrot.slane %v8015_v6, 1  ;;  %v11987_v34 = vld [vmem:[#allocation12 + $0x834] sm:$0xf0] }
 0x9bf   : > { %v7173_v40 = vpop.f32.mrf.mxu3  ;;  %v7088_v62 = vpop.f32.mrf.mxu0  ;;  %8885 = vmatpush.bf16.msrb.mxu3 %v11405_v19  ;;  %v11329_v19 = vor.u32 %v11987_v34, %v11328_v38 }
 0x9c0   : > { %v7174_v22 = vadd.f32 %v7173_v40, %v7144_v53  ;;  %v8133_v53 = vpack.c.bf16 %v8077_v59, %v8071_v15  ;;  %v11989_v40 = vld [vmem:[#allocation12 + $0x844] sm:$0xf0]  ;;  %v8088_v15 = vrot.slane %v8019_v33, 1 }
 0x9c1   : > { %v7117_v25 = vpop.f32.mrf.mxu1  ;;  %v11337_v31 = vor.u32 %v11989_v40, %v11336_v24 }
 0x9c2   : > { %v14167_v57 = vadd.f32 %v7174_v22, %v14119_v14  ;;  %v7118_v3 = vadd.f32 %v7117_v25, %v7088_v62  ;;  %v11988_v14 = vld [vmem:[#allocation12 + $0x844] sm:$0xf]  ;;  %v11400_v62 = vld [vmem:[#allocation12 + $0x8c0] sm:$0xf]  ;;  %v12005_v22 = vld [vmem:[#allocation12 + $0x8c4] sm:$0xf0] }
 0x9c3   : > { %v11341_v32 = vor.u32 %v11988_v14, %v11338_v12  ;;  %v11401_v36 = vor.u32 %v12005_v22, %v11400_v62  ;;  %8798 = vmatpush.bf16.msrb.mxu0 %v11337_v31  ;;  %v8090_v12 = vrot.slane %v8018_v13, 1  ;;  %v8027_v13 = vld [vmem:[#allocation3 + $0xf0] sm:$0x1] }
 0x9c4   : > { %v14170_v9 = vadd.f32 %v7118_v3, %v14122_v28  ;;  %v8074_v28 = vsel %vm1076_vm14, %v8072_v10, %v8073_v8  ;;  %v11397_v3 = vor.u32 %v12002_v1, %v11394_v37  ;;  %v8016_v8 = vld [vmem:[#allocation3 + $0x98] sm:$0x1]  ;;  %v8025_v1 = vld [vmem:[#allocation3 + $0xe0] sm:$0xfe] }
 0x9c5   : > { %v7146_v4 = vpop.f32.mrf.mxu2  ;;  %8856 = vmatpush.bf16.msrb.mxu2 %v11341_v32  ;;  %v8134_v23 = vpack.c.bf16 %v8080_v41, %v8074_v28  ;;  %8827 = vmatpush.bf16.msrb.mxu1 %v11401_v36  ;;  %v8085_v14 = vrot.slane %v8016_v8, 1  ;;  %v8083_v28 = vsel %vm1076_vm14, %v8081_v18, %v8082_v20  ;;  %v8092_v24 = vsel %vm1076_vm14, %v8090_v12, %v8091_v49  ;;  %v8021_v36 = vld [vmem:[#allocation3 + $0xc0] sm:$0xfe]  ;;  %v11998_v18 = vld [vmem:[#allocation12 + $0x894] sm:$0xf] }
 0x9c6   : > { %8886 = vmatpush.bf16.msrb.mxu3 %v11397_v3  ;;  %v11320_v37 = vld [vmem:[#allocation12 + $0x820] sm:$0xf]  ;;  %v11314_v8 = vld [vmem:[#allocation12 + $0x818] sm:$0xf0]  ;;  %v8026_v12 = vld [vmem:[#allocation3 + $0xe8] sm:$0xfe] }
 0x9c7   : > { %v7175_v47 = vpop.f32.mrf.mxu3  ;;  %v7532_v54 = vpop.f32.mrf.mxu0  ;;  %8799 = vmatpush.bf16.msrb.mxu0 %v11329_v19  ;;  %v11378_v20 = vld [vmem:[#allocation12 + $0x898] sm:$0xf0]  ;;  %v8028_v49 = vld [vmem:[#allocation3 + $0xf8] sm:$0x1]  ;;  %v8093_v34 = vrot.slane %v8021_v36, 1 }
 0x9c8   : > { %v7176_v58 = vadd.f32 %v7175_v47, %v7146_v4  ;;  %v8087_v4 = vrot.slane %v8017_v27, 1  ;;  %v11392_v47 = vld [vmem:[#allocation12 + $0x8b0] sm:$0xf]  ;;  %v11370_v36 = vld [vmem:[#allocation12 + $0x888] sm:$0xf0] }
 0x9c9   : > { %v7561_v7 = vpop.f32.mrf.mxu1 }
 0x9ca   : > { %v14177_v61 = vadd.f32 %v7176_v58, %v14125_v5  ;;  %v7562_v30 = vadd.f32 %v7561_v7, %v7532_v54  ;;  %8342 = vmatmul.bf16.vlgmr.msra.gmra.mxu0 %v8133_v53  ;;  %8400 = vmatmul.bf16.vlgmr.msra.gmra.mxu2 %v8133_v53  ;;  %v11986_v5 = vld [vmem:[#allocation12 + $0x834] sm:$0xf]  ;;  %v8089_v41 = vsel %vm1076_vm14, %v8087_v4, %v8088_v15  ;;  %v12003_v58 = vld [vmem:[#allocation12 + $0x8b4] sm:$0xf0]  ;;  %v11322_v53 = vld [vmem:[#allocation12 + $0x828] sm:$0xf0] }
 0x9cb   : > { %v11333_v25 = vor.u32 %v11986_v5, %v11330_v21  ;;  %v11393_v7 = vor.u32 %v12003_v58, %v11392_v47  ;;  %v8022_v15 = vld [vmem:[#allocation3 + $0xc8] sm:$0xfe] }
 0x9cc   : > { %v14180_v2 = vadd.f32 %v7562_v30, %v14128_v52  ;;  %8371 = vmatmul.bf16.vlgmr.msra.gmra.mxu1 %v8134_v23  ;;  %8429 = vmatmul.bf16.vlgmr.msra.gmra.mxu3 %v8134_v23  ;;  %v12000_v23 = vld [vmem:[#allocation12 + $0x8a4] sm:$0xf]  ;;  %v8096_v58 = vrot.slane %v8022_v15, 1  ;;  %v11997_v15 = vld [vmem:[#allocation12 + $0x884] sm:$0xf0] }
 0x9cd   : > { %v7590_v42 = vpop.f32.mrf.mxu2  ;;  %8857 = vmatpush.bf16.msrb.mxu2 %v11333_v25  ;;  %v11389_v40 = vor.u32 %v12000_v23, %v11386_v45  ;;  %8828 = vmatpush.bf16.msrb.mxu1 %v11393_v7  ;;  %v8023_v25 = vld [vmem:[#allocation3 + $0xd0] sm:$0x1]  ;;  %v8103_v7 = vrot.slane %v8028_v49, 1  ;;  %v11312_v23 = vld [vmem:[#allocation12 + $0x810] sm:$0xf] }
 0x9ce   : > { %v8094_v47 = vrot.slane %v8023_v25, 1  ;;  %v11983_v45 = vld [vmem:[#allocation12 + $0x814] sm:$0xf0] }
 0x9cf   : > { %v7619_v52 = vpop.f32.mrf.mxu3  ;;  %v7534_v50 = vpop.f32.mrf.mxu0  ;;  %8887 = vmatpush.bf16.msrb.mxu3 %v11389_v40  ;;  %v11313_v40 = vor.u32 %v11983_v45, %v11312_v23 }
 0x9d0   : > { %v7620_v10 = vadd.f32 %v7619_v52, %v7590_v42  ;;  %v8135_v42 = vpack.c.bf16 %v8089_v41, %v8083_v28  ;;  %v11985_v52 = vld [vmem:[#allocation12 + $0x824] sm:$0xf0]  ;;  %v8100_v28 = vrot.slane %v8027_v13, 1 }
 0x9d1   : > { %v7563_v43 = vpop.f32.mrf.mxu1  ;;  %v11321_v3 = vor.u32 %v11985_v52, %v11320_v37 }
 0x9d2   : > { %v14183_v59 = vadd.f32 %v7620_v10, %v14131_v39  ;;  %v7564_v55 = vadd.f32 %v7563_v43, %v7534_v50  ;;  %v11984_v39 = vld [vmem:[#allocation12 + $0x824] sm:$0xf]  ;;  %v11384_v50 = vld [vmem:[#allocation12 + $0x8a0] sm:$0xf]  ;;  %v12001_v10 = vld [vmem:[#allocation12 + $0x8a4] sm:$0xf0] }
 0x9d3   : > { %v11325_v30 = vor.u32 %v11984_v39, %v11322_v53  ;;  %v11385_v48 = vor.u32 %v12001_v10, %v11384_v50  ;;  %8800 = vmatpush.bf16.msrb.mxu0 %v11321_v3  ;;  %v8102_v53 = vrot.slane %v8026_v12, 1 }
 0x9d4   : > { %v14186_v32 = vadd.f32 %v7564_v55, %v14134_v44  ;;  %v8086_v44 = vsel %vm1076_vm14, %v8084_v60, %v8085_v14  ;;  %v11381_v55 = vor.u32 %v11998_v18, %v11378_v20  ;;  %v8024_v14 = vld [vmem:[#allocation3 + $0xd8] sm:$0x1]  ;;  %v11368_v18 = vld [vmem:[#allocation12 + $0x880] sm:$0xf] }
 0x9d5   : > { %v7592_v54 = vpop.f32.mrf.mxu2  ;;  %8858 = vmatpush.bf16.msrb.mxu2 %v11325_v30  ;;  %v8136_v21 = vpack.c.bf16 %v8092_v24, %v8086_v44  ;;  %8829 = vmatpush.bf16.msrb.mxu1 %v11385_v48  ;;  %v8097_v39 = vrot.slane %v8024_v14, 1  ;;  %v8095_v44 = vsel %vm1076_vm14, %v8093_v34, %v8094_v47  ;;  %v8104_v37 = vsel %vm1076_vm14, %v8102_v53, %v8103_v7  ;;  %v11304_v48 = vld [vmem:[#allocation12 + $0x800] sm:$0xf]  ;;  %v8034_v47 = vld [vmem:[#allocation3 + $0x128] sm:$0xfe] }
 0x9d6   : > { %8888 = vmatpush.bf16.msrb.mxu3 %v11381_v55  ;;  %v8031_v55 = vld [vmem:[#allocation3 + $0x110] sm:$0x1]  ;;  %v11369_v14 = vor.u32 %v11997_v15, %v11368_v18 }
 0x9d7   : > { %v7621_v6 = vpop.f32.mrf.mxu3  ;;  %v7537_v27 = vpop.f32.mrf.mxu0  ;;  %8801 = vmatpush.bf16.msrb.mxu0 %v11313_v40 }
 0x9d8   : > { %v7622_v62 = vadd.f32 %v7621_v6, %v7592_v54  ;;  %v8099_v54 = vrot.slane %v8025_v1, 1  ;;  %v11376_v6 = vld [vmem:[#allocation12 + $0x890] sm:$0xf] }
 0x9d9   : > { %v7566_v31 = vpop.f32.mrf.mxu1 }
 0x9da   : > { %v14193_v22 = vadd.f32 %v7622_v62, %v14137_v11  ;;  %v7567_v5 = vadd.f32 %v7566_v31, %v7537_v27  ;;  %8347 = vmatmul.bf16.gmra.mxu0 %v8135_v42  ;;  %8405 = vmatmul.bf16.gmra.mxu2 %v8135_v42  ;;  %v11982_v11 = vld [vmem:[#allocation12 + $0x814] sm:$0xf]  ;;  %v8101_v24 = vsel %vm1076_vm14, %v8099_v54, %v8100_v28  ;;  %v11999_v62 = vld [vmem:[#allocation12 + $0x894] sm:$0xf0]  ;;  %v11306_v42 = vld [vmem:[#allocation12 + $0x808] sm:$0xf0] }
 0x9db   : > { %v11317_v43 = vor.u32 %v11982_v11, %v11314_v8  ;;  %v11377_v31 = vor.u32 %v11999_v62, %v11376_v6  ;;  %v8036_v54 = vld [vmem:[#allocation3 + $0x138] sm:$0x1] }
 0x9dc   : > { %v14196_v33 = vadd.f32 %v7567_v5, %v14140_v46  ;;  %8376 = vmatmul.bf16.gmra.mxu1 %v8136_v21  ;;  %8434 = vmatmul.bf16.gmra.mxu3 %v8136_v21  ;;  %v11996_v21 = vld [vmem:[#allocation12 + $0x884] sm:$0xf] }
 0x9dd   : > { %v7595_v26 = vpop.f32.mrf.mxu2  ;;  %8859 = vmatpush.bf16.msrb.mxu2 %v11317_v43  ;;  %v11373_v52 = vor.u32 %v11996_v21, %v11370_v36  ;;  %8830 = vmatpush.bf16.msrb.mxu1 %v11377_v31  ;;  %v11981_v43 = vld [vmem:[#allocation12 + $0x804] sm:$0xf0] }
 0x9df   : > { %v7624_v46 = vpop.f32.mrf.mxu3  ;;  %v7539_v4 = vpop.f32.mrf.mxu0  ;;  %8889 = vmatpush.bf16.msrb.mxu3 %v11373_v52 }
 0x9e0   : > { %v7625_v60 = vadd.f32 %v7624_v46, %v7595_v26  ;;  %v8137_v26 = vpack.c.bf16 %v8101_v24, %v8095_v44  ;;  %v8029_v46 = vld [vmem:[#allocation3 + $0x100] sm:$0xfe]  ;;  %v8115_v44 = vrot.slane %v8036_v54, 1 }
 0x9e1   : > { %v7568_v38 = vpop.f32.mrf.mxu1  ;;  %8831 = vmatpush.bf16.msrb.mxu1 %v11369_v14 }
 0x9e2   : > { %v14199_v41 = vadd.f32 %v7625_v60, %v14143_v35  ;;  %v7569_v19 = vadd.f32 %v7568_v38, %v7539_v4  ;;  %v11980_v35 = vld [vmem:[#allocation12 + $0x804] sm:$0xf]  ;;  %v11305_v4 = vor.u32 %v11981_v43, %v11304_v48  ;;  %v8033_v60 = vld [vmem:[#allocation3 + $0x120] sm:$0xfe] }
 0x9e3   : > { %v11309_v5 = vor.u32 %v11980_v35, %v11306_v42  ;;  %v8030_v38 = vld [vmem:[#allocation3 + $0x108] sm:$0xfe] }
 0x9e4   : > { %v14202_v30 = vadd.f32 %v7569_v19, %v14146_v29  ;;  %v8098_v29 = vsel %vm1076_vm14, %v8096_v58, %v8097_v39  ;;  %8802 = vmatpush.bf16.msrb.mxu0 %v11305_v4  ;;  %v8105_v19 = vrot.slane %v8029_v46, 1  ;;  %v8106_v58 = vrot.slane %v8031_v55, 1  ;;  %v8467_v43 = vld [vmem:[#allocation3 + $0x48] sm:$0xfc]  ;;  %v8473_v46 = vld [vmem:[#allocation3 + $0x78] sm:$0x3] }
 0x9e5   : > { %v7597_v27 = vpop.f32.mrf.mxu2  ;;  %8860 = vmatpush.bf16.msrb.mxu2 %v11309_v5  ;;  %v8138_v8 = vpack.c.bf16 %v8104_v37, %v8098_v29  ;;  %v8111_v39 = vrot.slane %v8033_v60, 1  ;;  %v8108_v45 = vrot.slane %v8030_v38, 1 }
 0x9e6   : > { %v8107_v62 = vsel %vm1076_vm14, %v8105_v19, %v8106_v58 }
 0x9e7   : > { %v7626_v25 = vpop.f32.mrf.mxu3  ;;  %v7542_v1 = vpop.f32.mrf.mxu0 }
 0x9e8   : > { %v7627_v50 = vadd.f32 %v7626_v25, %v7597_v27  ;;  %v8114_v27 = vrot.slane %v8034_v47, 1 }
 0x9e9   : > { %v7571_v3 = vpop.f32.mrf.mxu1 }
 0x9ea   : > { %v14209_v10 = vadd.f32 %v7627_v50, %v14149_v51  ;;  %v7572_v11 = vadd.f32 %v7571_v3, %v7542_v1  ;;  %8352 = vmatmul.bf16.gmra.mxu0 %v8137_v26  ;;  %8410 = vmatmul.bf16.gmra.mxu2 %v8137_v26  ;;  %v8035_v51 = vld [vmem:[#allocation3 + $0x130] sm:$0x1]  ;;  %v8466_v50 = vld [vmem:[#allocation3 + $0x40] sm:$0xfc] }
 0x9eb   : > { %v8112_v53 = vrot.slane %v8035_v51, 1  ;;  %v8468_v26 = vld [vmem:[#allocation3 + $0x50] sm:$0x3]  ;;  %v8470_v3 = vld [vmem:[#allocation3 + $0x60] sm:$0xfc]  ;;  %v8530_v15 = vrot.slane %v8466_v50, 2 }
 0x9ec   : > { %v14212_v13 = vadd.f32 %v7572_v11, %v14152_v56  ;;  %8381 = vmatmul.bf16.gmra.mxu1 %v8138_v8  ;;  %8439 = vmatmul.bf16.gmra.mxu3 %v8138_v8  ;;  %v8032_v56 = vld [vmem:[#allocation3 + $0x118] sm:$0x1]  ;;  %v8472_v11 = vld [vmem:[#allocation3 + $0x70] sm:$0x3]  ;;  %v8531_v55 = vrot.slane %v8468_v26, 2  ;;  %v8536_v60 = vrot.slane %v8470_v3, 2 }
 0x9ed   : > { %v7600_v20 = vpop.f32.mrf.mxu2  ;;  %v8109_v6 = vrot.slane %v8032_v56, 1  ;;  %v8113_v35 = vsel %vm1076_vm14, %v8111_v39, %v8112_v53 }
 0x9ee   : > { %v8139_v36 = vpack.c.bf16 %v8113_v35, %v8107_v62  ;;  %v8532_v54 = vsel %vm1798_vm8, %v8530_v15, %v8531_v55  ;;  %v8474_v62 = vld [vmem:[#allocation3 + $0x80] sm:$0xfc]  ;;  %v8476_v35 = vld [vmem:[#allocation3 + $0x90] sm:$0x3] }
 0x9ef   : > { %v7629_v12 = vpop.f32.mrf.mxu3  ;;  %v7544_v49 = vpop.f32.mrf.mxu0  ;;  %v8110_v5 = vsel %vm1076_vm14, %v8108_v45, %v8109_v6  ;;  %v8543_v50 = vrot.slane %v8476_v35, 2 }
 0x9f0   : > { %v7630_v34 = vadd.f32 %v7629_v12, %v7600_v20  ;;  %v8471_v20 = vld [vmem:[#allocation3 + $0x68] sm:$0xfc]  ;;  %v8533_v12 = vrot.slane %v8467_v43, 2 }
 0x9f1   : > { %v7573_v28 = vpop.f32.mrf.mxu1  ;;  %v8539_v38 = vrot.slane %v8471_v20, 2 }
 0x9f2   : > { %v14215_v7 = vadd.f32 %v7630_v34, %v14155_v16  ;;  %v7574_v23 = vadd.f32 %v7573_v28, %v7544_v49  ;;  %v8116_v16 = vsel %vm1076_vm14, %v8114_v27, %v8115_v44  ;;  %v8540_v34 = vrot.slane %v8473_v46, 2 }
 0x9f4   : > { %v14218_v24 = vadd.f32 %v7574_v23, %v14158_v17  ;;  %v8140_v17 = vpack.c.bf16 %v8116_v16, %v8110_v5 }
 0x9f5   : > { %v7602_v40 = vpop.f32.mrf.mxu2 }
 0x9f7   : > { %v7631_v42 = vpop.f32.mrf.mxu3  ;;  %v7547_v31 = vpop.f32.mrf.mxu0 }
 0x9f8   : > { %v7632_v21 = vadd.f32 %v7631_v42, %v7602_v40  ;;  %v8478_v42 = vld [vmem:[#allocation3 + $0xa0] sm:$0xfc] }
 0x9f9   : > { %v7576_v25 = vpop.f32.mrf.mxu1  ;;  %v8548_v26 = vrot.slane %v8478_v42, 2 }
 0x9fa   : > { %v14225_v1 = vadd.f32 %v7632_v21, %v14161_v0  ;;  %v7577_v29 = vadd.f32 %v7576_v25, %v7547_v31  ;;  %8357 = vmatmul.bf16.gmra.mxu0 %v8139_v36  ;;  %8415 = vmatmul.bf16.gmra.mxu2 %v8139_v36  ;;  %v8469_v0 = vld [vmem:[#allocation3 + $0x58] sm:$0x3]  ;;  %v8480_v31 = vld [vmem:[#allocation3 + $0xb0] sm:$0x3]  ;;  %v8475_v21 = vld [vmem:[#allocation3 + $0x88] sm:$0xfc] }
 0x9fb   : > { %v8534_v49 = vrot.slane %v8469_v0, 2  ;;  %v8479_v25 = vld [vmem:[#allocation3 + $0xa8] sm:$0xfc] }
 0x9fc   : > { %v14228_v37 = vadd.f32 %v7577_v29, %v14164_v63  ;;  %8386 = vmatmul.bf16.gmra.mxu1 %v8140_v17  ;;  %8444 = vmatmul.bf16.gmra.mxu3 %v8140_v17  ;;  %v8537_v63 = vrot.slane %v8472_v11, 2  ;;  %v8481_v29 = vld [vmem:[#allocation3 + $0xb8] sm:$0x3]  ;;  %v8551_v43 = vrot.slane %v8479_v25, 2 }
 0x9fd   : > { %v7605_v52 = vpop.f32.mrf.mxu2  ;;  %v8535_v39 = vsel %vm1798_vm8, %v8533_v12, %v8534_v49 }
 0x9fe   : > { %v8538_v28 = vsel %vm1798_vm8, %v8536_v60, %v8537_v63 }
 0x9ff   : > { %v7634_v8 = vpop.f32.mrf.mxu3  ;;  %v7549_v48 = vpop.f32.mrf.mxu0  ;;  %v8594_v23 = vpack.c.bf16 %v8538_v28, %v8532_v54  ;;  %v8482_v54 = vld [vmem:[#allocation3 + $0xc0] sm:$0xfc]  ;;  %v8484_v28 = vld [vmem:[#allocation3 + $0xd0] sm:$0x3] }
 0xa00   : > { %v7635_v18 = vadd.f32 %v7634_v8, %v7605_v52  ;;  %v8542_v52 = vrot.slane %v8474_v62, 2  ;;  %v8545_v8 = vrot.slane %v8475_v21, 2  ;;  %v8555_v62 = vrot.slane %v8484_v28, 2 }
 0xa01   : > { %v7578_v4 = vpop.f32.mrf.mxu1 }
 0xa02   : > { %v14231_v51 = vadd.f32 %v7635_v18, %v14167_v57  ;;  %v7579_v14 = vadd.f32 %v7578_v4, %v7549_v48  ;;  %v8541_v57 = vsel %vm1798_vm8, %v8539_v38, %v8540_v34  ;;  %v8552_v18 = vrot.slane %v8481_v29, 2 }
 0xa03   : > { %v8544_v46 = vsel %vm1798_vm8, %v8542_v52, %v8543_v50 }
 0xa04   : > { %v14234_v56 = vadd.f32 %v7579_v14, %v14170_v9  ;;  %v8595_v9 = vpack.c.bf16 %v8541_v57, %v8535_v39 }
 0xa05   : > { %v7607_v47 = vpop.f32.mrf.mxu2 }
 0xa07   : > { %v7636_v19 = vpop.f32.mrf.mxu3  ;;  %v7882_v58 = vpop.f32.mrf.mxu0 }
 0xa08   : > { %v7637_v53 = vadd.f32 %v7636_v19, %v7607_v47  ;;  %v8486_v19 = vld [vmem:[#allocation3 + $0xe0] sm:$0xfc] }
 0xa09   : > { %v7911_v45 = vpop.f32.mrf.mxu1  ;;  %v8560_v35 = vrot.slane %v8486_v19, 2 }
 0xa0a   : > { %v14241_v6 = vadd.f32 %v7637_v53, %v14177_v61  ;;  %v7912_v27 = vadd.f32 %v7911_v45, %v7882_v58  ;;  %8803 = vmatmul.bf16.vlgmr.msrb.gmra.mxu0 %v8594_v23  ;;  %8861 = vmatmul.bf16.vlgmr.msrb.gmra.mxu2 %v8594_v23  ;;  %v8477_v61 = vld [vmem:[#allocation3 + $0x98] sm:$0x3]  ;;  %v8488_v58 = vld [vmem:[#allocation3 + $0xf0] sm:$0x3]  ;;  %v8483_v53 = vld [vmem:[#allocation3 + $0xc8] sm:$0xfc] }
 0xa0b   : > { %v8546_v48 = vrot.slane %v8477_v61, 2  ;;  %v8487_v45 = vld [vmem:[#allocation3 + $0xe8] sm:$0xfc] }
 0xa0c   : > { %v14244_v44 = vadd.f32 %v7912_v27, %v14180_v2  ;;  %8832 = vmatmul.bf16.vlgmr.msrb.gmra.mxu1 %v8595_v9  ;;  %8890 = vmatmul.bf16.vlgmr.msrb.gmra.mxu3 %v8595_v9  ;;  %v8549_v2 = vrot.slane %v8480_v31, 2  ;;  %v8489_v27 = vld [vmem:[#allocation3 + $0xf8] sm:$0x3]  ;;  %v8563_v21 = vrot.slane %v8487_v45, 2 }
 0xa0d   : > { %v7940_v40 = vpop.f32.mrf.mxu2  ;;  %v8547_v60 = vsel %vm1798_vm8, %v8545_v8, %v8546_v48 }
 0xa0e   : > { %v8550_v4 = vsel %vm1798_vm8, %v8548_v26, %v8549_v2 }
 0xa0f   : > { %v7969_v5 = vpop.f32.mrf.mxu3  ;;  %v7884_v16 = vpop.f32.mrf.mxu0  ;;  %v8596_v14 = vpack.c.bf16 %v8550_v4, %v8544_v46  ;;  %v8490_v46 = vld [vmem:[#allocation3 + $0x100] sm:$0xfc]  ;;  %v8492_v4 = vld [vmem:[#allocation3 + $0x110] sm:$0x3] }
 0xa10   : > { %v7970_v36 = vadd.f32 %v7969_v5, %v7940_v40  ;;  %v8554_v40 = vrot.slane %v8482_v54, 2  ;;  %v8557_v5 = vrot.slane %v8483_v53, 2  ;;  %v8567_v54 = vrot.slane %v8492_v4, 2 }
 0xa11   : > { %v7913_v17 = vpop.f32.mrf.mxu1 }
 0xa12   : > { %v14247_v3 = vadd.f32 %v7970_v36, %v14183_v59  ;;  %v7914_v11 = vadd.f32 %v7913_v17, %v7884_v16  ;;  %v8553_v59 = vsel %vm1798_vm8, %v8551_v43, %v8552_v18  ;;  %v8564_v36 = vrot.slane %v8489_v27, 2 }
 0xa13   : > { %v8556_v29 = vsel %vm1798_vm8, %v8554_v40, %v8555_v62 }
 0xa14   : > { %v14250_v0 = vadd.f32 %v7914_v11, %v14186_v32  ;;  %v8597_v32 = vpack.c.bf16 %v8553_v59, %v8547_v60 }
 0xa15   : > { %v7942_v20 = vpop.f32.mrf.mxu2 }
 0xa17   : > { %v7971_v15 = vpop.f32.mrf.mxu3  ;;  %v7887_v55 = vpop.f32.mrf.mxu0 }
 0xa18   : > { %v7972_v63 = vadd.f32 %v7971_v15, %v7942_v20  ;;  %v8494_v15 = vld [vmem:[#allocation3 + $0x120] sm:$0xfc] }
 0xa19   : > { %v7916_v12 = vpop.f32.mrf.mxu1  ;;  %v8572_v28 = vrot.slane %v8494_v15, 2 }
 0xa1a   : > { %v14257_v49 = vadd.f32 %v7972_v63, %v14193_v22  ;;  %v7917_v38 = vadd.f32 %v7916_v12, %v7887_v55  ;;  %8808 = vmatmul.bf16.gmra.mxu0 %v8596_v14  ;;  %8866 = vmatmul.bf16.gmra.mxu2 %v8596_v14  ;;  %v8485_v22 = vld [vmem:[#allocation3 + $0xd8] sm:$0x3]  ;;  %v8496_v55 = vld [vmem:[#allocation3 + $0x130] sm:$0x3]  ;;  %v8491_v63 = vld [vmem:[#allocation3 + $0x108] sm:$0xfc] }
 0xa1b   : > { %v8558_v16 = vrot.slane %v8485_v22, 2  ;;  %v8495_v12 = vld [vmem:[#allocation3 + $0x128] sm:$0xfc] }
 0xa1c   : > { %v14260_v34 = vadd.f32 %v7917_v38, %v14196_v33  ;;  %8837 = vmatmul.bf16.gmra.mxu1 %v8597_v32  ;;  %8895 = vmatmul.bf16.gmra.mxu3 %v8597_v32  ;;  %v8561_v33 = vrot.slane %v8488_v58, 2  ;;  %v8497_v38 = vld [vmem:[#allocation3 + $0x138] sm:$0x3]  ;;  %v8575_v53 = vrot.slane %v8495_v12, 2 }
 0xa1d   : > { %v7945_v47 = vpop.f32.mrf.mxu2  ;;  %v8559_v26 = vsel %vm1798_vm8, %v8557_v5, %v8558_v16 }
 0xa1e   : > { %v8562_v17 = vsel %vm1798_vm8, %v8560_v35, %v8561_v33 }
 0xa1f   : > { %v7974_v39 = vpop.f32.mrf.mxu3  ;;  %v7889_v57 = vpop.f32.mrf.mxu0  ;;  %v8598_v11 = vpack.c.bf16 %v8562_v17, %v8556_v29 }
 0xa20   : > { %v7975_v23 = vadd.f32 %v7974_v39, %v7945_v47  ;;  %v8566_v47 = vrot.slane %v8490_v46, 2  ;;  %v8569_v39 = vrot.slane %v8491_v63, 2 }
 0xa21   : > { %v7918_v9 = vpop.f32.mrf.mxu1 }
 0xa22   : > { %v14263_v42 = vadd.f32 %v7975_v23, %v14199_v41  ;;  %v7919_v31 = vadd.f32 %v7918_v9, %v7889_v57  ;;  %v8565_v41 = vsel %vm1798_vm8, %v8563_v21, %v8564_v36  ;;  %v8576_v23 = vrot.slane %v8497_v38, 2 }
 0xa23   : > { %v8568_v27 = vsel %vm1798_vm8, %v8566_v47, %v8567_v54 }
 0xa24   : > { %v14266_v61 = vadd.f32 %v7919_v31, %v14202_v30  ;;  %v8599_v30 = vpack.c.bf16 %v8565_v41, %v8559_v26 }
 0xa25   : > { %v7947_v25 = vpop.f32.mrf.mxu2 }
 0xa27   : > { %v7976_v52 = vpop.f32.mrf.mxu3  ;;  %v7892_v50 = vpop.f32.mrf.mxu0 }
 0xa28   : > { %v7977_v2 = vadd.f32 %v7976_v52, %v7947_v25 }
 0xa29   : > { %v7921_v8 = vpop.f32.mrf.mxu1 }
 0xa2a   : > { %v14273_v48 = vadd.f32 %v7977_v2, %v14209_v10  ;;  %v7922_v43 = vadd.f32 %v7921_v8, %v7892_v50  ;;  %8813 = vmatmul.bf16.gmra.mxu0 %v8598_v11  ;;  %8871 = vmatmul.bf16.gmra.mxu2 %v8598_v11  ;;  %v8493_v10 = vld [vmem:[#allocation3 + $0x118] sm:$0x3] }
 0xa2b   : > { %v8570_v57 = vrot.slane %v8493_v10, 2 }
 0xa2c   : > { %v14276_v18 = vadd.f32 %v7922_v43, %v14212_v13  ;;  %8842 = vmatmul.bf16.gmra.mxu1 %v8599_v30  ;;  %8900 = vmatmul.bf16.gmra.mxu3 %v8599_v30  ;;  %v8573_v13 = vrot.slane %v8496_v55, 2 }
 0xa2d   : > { %v7950_v20 = vpop.f32.mrf.mxu2  ;;  %v8571_v35 = vsel %vm1798_vm8, %v8569_v39, %v8570_v57 }
 0xa2e   : > { %v8574_v9 = vsel %vm1798_vm8, %v8572_v28, %v8573_v13 }
 0xa2f   : > { %v7979_v60 = vpop.f32.mrf.mxu3  ;;  %v7894_v59 = vpop.f32.mrf.mxu0  ;;  %v8600_v31 = vpack.c.bf16 %v8574_v9, %v8568_v27 }
 0xa30   : > { %v7980_v14 = vadd.f32 %v7979_v60, %v7950_v20 }
 0xa31   : > { %v7923_v32 = vpop.f32.mrf.mxu1 }
 0xa32   : > { %v14279_v19 = vadd.f32 %v7980_v14, %v14215_v7  ;;  %v7924_v58 = vadd.f32 %v7923_v32, %v7894_v59  ;;  %v8577_v7 = vsel %vm1798_vm8, %v8575_v53, %v8576_v23 }
 0xa34   : > { %v14282_v22 = vadd.f32 %v7924_v58, %v14218_v24  ;;  %v8601_v24 = vpack.c.bf16 %v8577_v7, %v8571_v35 }
 0xa35   : > { %v7952_v45 = vpop.f32.mrf.mxu2 }
 0xa37   : > { %v7981_v40 = vpop.f32.mrf.mxu3  ;;  %v7897_v62 = vpop.f32.mrf.mxu0 }
 0xa38   : > { %v7982_v33 = vadd.f32 %v7981_v40, %v7952_v45 }
 0xa39   : > { %v7926_v5 = vpop.f32.mrf.mxu1 }
 0xa3a   : > { %v14289_v16 = vadd.f32 %v7982_v33, %v14225_v1  ;;  %v7927_v21 = vadd.f32 %v7926_v5, %v7897_v62  ;;  %8818 = vmatmul.bf16.gmra.mxu0 %v8600_v31  ;;  %8876 = vmatmul.bf16.gmra.mxu2 %v8600_v31 }
 0xa3c   : > { %v14292_v36 = vadd.f32 %v7927_v21, %v14228_v37  ;;  %8847 = vmatmul.bf16.gmra.mxu1 %v8601_v24  ;;  %8905 = vmatmul.bf16.gmra.mxu3 %v8601_v24 }
 0xa3d   : > { %v7955_v25 = vpop.f32.mrf.mxu2 }
 0xa3f   : > { %v7984_v29 = vpop.f32.mrf.mxu3  ;;  %v7899_v17 = vpop.f32.mrf.mxu0 }
 0xa40   : > { %v7985_v52 = vadd.f32 %v7984_v29, %v7955_v25 }
 0xa41   : > { %v7928_v50 = vpop.f32.mrf.mxu1 }
 0xa42   : > { %v14295_v26 = vadd.f32 %v7985_v52, %v14231_v51  ;;  %v7929_v41 = vadd.f32 %v7928_v50, %v7899_v17 }
 0xa44   : > { %v14298_v1 = vadd.f32 %v7929_v41, %v14234_v56 }
 0xa45   : > { %v7957_v2 = vpop.f32.mrf.mxu2 }
 0xa47   : > { %v7986_v11 = vpop.f32.mrf.mxu3  ;;  %v8343_v8 = vpop.f32.mrf.mxu0 }
 0xa48   : > { %v7987_v43 = vadd.f32 %v7986_v11, %v7957_v2 }
 0xa49   : > { %v8372_v37 = vpop.f32.mrf.mxu1 }
 0xa4a   : > { %v14301_v30 = vadd.f32 %v7987_v43, %v14241_v6  ;;  %v8373_v62 = vadd.f32 %v8372_v37, %v8343_v8 }
 0xa4c   : > { %v8450_v31 = vadd.f32 %v8373_v62, %v14244_v44 }
 0xa4d   : > { %v8401_v20 = vpop.f32.mrf.mxu2 }
 0xa4f   : > { %v8430_v46 = vpop.f32.mrf.mxu3  ;;  %v8345_v4 = vpop.f32.mrf.mxu0 }
 0xa50   : > { %v8431_v21 = vadd.f32 %v8430_v46, %v8401_v20 }
 0xa51   : > { %v8374_v15 = vpop.f32.mrf.mxu1 }
 0xa52   : > { %v8375_v29 = vadd.f32 %v8374_v15, %v8345_v4  ;;  %v8451_v41 = vadd.f32 %v8431_v21, %v14247_v3 }
 0xa54   : > { %v8452_v44 = vadd.f32 %v8375_v29, %v14250_v0 }
 0xa55   : > { %v8403_v55 = vpop.f32.mrf.mxu2 }
 0xa57   : > { %v8432_v60 = vpop.f32.mrf.mxu3  ;;  %v8348_v51 = vpop.f32.mrf.mxu0 }
 0xa58   : > { %v8433_v37 = vadd.f32 %v8432_v60, %v8403_v55 }
 0xa59   : > { %v8377_v59 = vpop.f32.mrf.mxu1 }
 0xa5a   : > { %v8378_v15 = vadd.f32 %v8377_v59, %v8348_v51 }
 0xa5c   : > { %v8454_v0 = vadd.f32 %v8378_v15, %v14260_v34 }
 0xa5d   : > { %v8406_v63 = vpop.f32.mrf.mxu2 }
 0xa5f   : > { %v8435_v14 = vpop.f32.mrf.mxu3  ;;  %v8350_v56 = vpop.f32.mrf.mxu0 }
 0xa60   : > { %v8436_v55 = vadd.f32 %v8435_v14, %v8406_v63 }
 0xa61   : > { %v8379_v10 = vpop.f32.mrf.mxu1 }
 0xa62   : > { %v8380_v51 = vadd.f32 %v8379_v10, %v8350_v56 }
 0xa64   : > { %v8456_v34 = vadd.f32 %v8380_v51, %v14266_v61 }
 0xa65   : > { %v14303_v12 = vpop.f32.mrf.mxu2 }
 0xa67   : > { %v14305_v38 = vpop.f32.mrf.mxu3  ;;  %v14307_v32 = vpop.f32.mrf.mxu0 }
 0xa68   : > { %v8438_v63 = vadd.f32 %v14305_v38, %v14303_v12 }
 0xa69   : > { %v14309_v6 = vpop.f32.mrf.mxu1 }
 0xa6d   : > { %v14311_v47 = vpop.f32.mrf.mxu2 }
 0xa6f   : > { %v14313_v54 = vpop.f32.mrf.mxu3  ;;  %v14315_v28 = vpop.f32.mrf.mxu0 }
 0xa71   : > { %v14317_v13 = vpop.f32.mrf.mxu1 }
 0xa75   : > { %v14319_v58 = vpop.f32.mrf.mxu2 }
 0xa77   : > { %v14321_v39 = vpop.f32.mrf.mxu3  ;;  %v14323_v57 = vpop.f32.mrf.mxu0 }
 0xa79   : > { %v14325_v53 = vpop.f32.mrf.mxu1 }
 0xa7d   : > { %v14327_v23 = vpop.f32.mrf.mxu2 }
 0xa7f   : > { %v14329_v45 = vpop.f32.mrf.mxu3  ;;  %v14331_v27 = vpop.f32.mrf.mxu0 }
 0xa81   : > { %v14333_v9 = vpop.f32.mrf.mxu1 }
 0xa85   : > { %v14335_v40 = vpop.f32.mrf.mxu2 }
 0xa87   : > { %v14337_v35 = vpop.f32.mrf.mxu3  ;;  %v8804_v7 = vpop.f32.mrf.mxu0 }
 0xa89   : > { %v8833_v33 = vpop.f32.mrf.mxu1 }
 0xa8a   : > { %v8834_v5 = vadd.f32 %v8833_v33, %v8804_v7  ;;  %v8453_v33 = vadd.f32 %v8433_v37, %v14257_v49  ;;  %v8455_v49 = vadd.f32 %v8436_v55, %v14263_v42  ;;  %v8457_v37 = vadd.f32 %v8438_v63, %v14273_v48 }
 0xa8c   : > { %v8911_v24 = vadd.f32 %v8834_v5, %v8450_v31 }
 0xa8d   : > { %v8862_v25 = vpop.f32.mrf.mxu2 }
 0xa8e   : > { %v8927_v17 = vmax.f32 %v8911_v24, 0.0 }
 0xa8f   : > { %v8891_v52 = vpop.f32.mrf.mxu3  ;;  %v8806_v50 = vpop.f32.mrf.mxu0 }
 0xa90   : > { %8943 = vst [vmem:[%s14342_s29] sm:$0xff] %v8927_v17  ;;  %v8892_v2 = vadd.f32 %v8891_v52, %v8862_v25 }
 0xa91   : > { %v8835_v11 = vpop.f32.mrf.mxu1 }
 0xa92   : > { %v8912_v8 = vadd.f32 %v8892_v2, %v8451_v41  ;;  %v8836_v43 = vadd.f32 %v8835_v11, %v8806_v50 }
 0xa94   : > { %v8928_v20 = vmax.f32 %v8912_v8, 0.0  ;;  %v8913_v46 = vadd.f32 %v8836_v43, %v8452_v44  ;;  %v8383_v44 = vadd.f32 %v14309_v6, %v14307_v32 }
 0xa95   : > { %v8864_v4 = vpop.f32.mrf.mxu2 }
 0xa96   : > { %8944 = vst [vmem:[%s14342_s29 + $0x8] sm:$0xff] %v8928_v20  ;;  %v8929_v3 = vmax.f32 %v8913_v46, 0.0  ;;  %v8458_v46 = vadd.f32 %v8383_v44, %v14276_v18 }
 0xa97   : > { %v8893_v62 = vpop.f32.mrf.mxu3  ;;  %v8809_v7 = vpop.f32.mrf.mxu0 }
 0xa98   : > { %8945 = vst [vmem:[%s14342_s29 + $0x10] sm:$0xff] %v8929_v3  ;;  %v8894_v31 = vadd.f32 %v8893_v62, %v8864_v4  ;;  %v8441_v4 = vadd.f32 %v14313_v54, %v14311_v47  ;;  %v8385_v3 = vadd.f32 %v14317_v13, %v14315_v28 }
 0xa99   : > { %v8838_v5 = vpop.f32.mrf.mxu1 }
 0xa9a   : > { %v8914_v21 = vadd.f32 %v8894_v31, %v8453_v33  ;;  %v8839_v24 = vadd.f32 %v8838_v5, %v8809_v7  ;;  %v8459_v33 = vadd.f32 %v8441_v4, %v14279_v19  ;;  %v8460_v5 = vadd.f32 %v8385_v3, %v14282_v22 }
 0xa9c   : > { %v8930_v60 = vmax.f32 %v8914_v21, 0.0  ;;  %v8915_v25 = vadd.f32 %v8839_v24, %v8454_v0  ;;  %v8443_v0 = vadd.f32 %v14321_v39, %v14319_v58  ;;  %v8388_v24 = vadd.f32 %v14325_v53, %v14323_v57 }
 0xa9d   : > { %v8867_v29 = vpop.f32.mrf.mxu2 }
 0xa9e   : > { %8946 = vst [vmem:[%s14342_s29 + $0x18] sm:$0xff] %v8930_v60  ;;  %v8931_v59 = vmax.f32 %v8915_v25, 0.0  ;;  %v8461_v25 = vadd.f32 %v8443_v0, %v14289_v16  ;;  %v8462_v51 = vadd.f32 %v8388_v24, %v14292_v36 }
 0xa9f   : > { %v8896_v17 = vpop.f32.mrf.mxu3  ;;  %v8811_v52 = vpop.f32.mrf.mxu0 }
 0xaa0   : > { %8947 = vst [vmem:[%s14342_s29 + $0x20] sm:$0xff] %v8931_v59  ;;  %v8897_v50 = vadd.f32 %v8896_v17, %v8867_v29  ;;  %v8446_v59 = vadd.f32 %v14329_v45, %v14327_v23 }
 0xaa1   : > { %v8840_v41 = vpop.f32.mrf.mxu1 }
 0xaa2   : > { %v8916_v2 = vadd.f32 %v8897_v50, %v8455_v49  ;;  %v8841_v11 = vadd.f32 %v8840_v41, %v8811_v52  ;;  %v8390_v52 = vadd.f32 %v14333_v9, %v14331_v27  ;;  %v8463_v41 = vadd.f32 %v8446_v59, %v14295_v26 }
 0xaa3   : > { %v8448_v27 = vadd.f32 %v14337_v35, %v14335_v40 }
 0xaa4   : > { %v8932_v14 = vmax.f32 %v8916_v2, 0.0  ;;  %v8917_v56 = vadd.f32 %v8841_v11, %v8456_v34  ;;  %v8464_v23 = vadd.f32 %v8390_v52, %v14298_v1 }
 0xaa5   : > { %v8869_v10 = vpop.f32.mrf.mxu2  ;;  %v8465_v1 = vadd.f32 %v8448_v27, %v14301_v30 }
 0xaa6   : > { %8948 = vst [vmem:[%s14342_s29 + $0x28] sm:$0xff] %v8932_v14  ;;  %v8933_v42 = vmax.f32 %v8917_v56, 0.0 }
 0xaa7   : > { %v8898_v8 = vpop.f32.mrf.mxu3  ;;  %v8814_v43 = vpop.f32.mrf.mxu0 }
 0xaa8   : > { %8949 = vst [vmem:[%s14342_s29 + $0x30] sm:$0xff] %v8933_v42  ;;  %v8899_v61 = vadd.f32 %v8898_v8, %v8869_v10 }
 0xaa9   : > { %v8843_v20 = vpop.f32.mrf.mxu1 }
 0xaaa   : > { %v8918_v12 = vadd.f32 %v8899_v61, %v8457_v37  ;;  %v8844_v38 = vadd.f32 %v8843_v20, %v8814_v43 }
 0xaac   : > { %v8934_v15 = vmax.f32 %v8918_v12, 0.0  ;;  %v8919_v32 = vadd.f32 %v8844_v38, %v8458_v46 }
 0xaad   : > { %v8872_v6 = vpop.f32.mrf.mxu2 }
 0xaae   : > { %8950 = vst [vmem:[%s14342_s29 + $0x38] sm:$0xff] %v8934_v15  ;;  %v8935_v48 = vmax.f32 %v8919_v32, 0.0 }
 0xaaf   : > { %v8901_v62 = vpop.f32.mrf.mxu3  ;;  %v8816_v7 = vpop.f32.mrf.mxu0 }
 0xab0   : > { %8951 = vst [vmem:[%s14342_s29 + $0x40] sm:$0xff] %v8935_v48  ;;  %v8902_v18 = vadd.f32 %v8901_v62, %v8872_v6 }
 0xab1   : > { %v8845_v31 = vpop.f32.mrf.mxu1 }
 0xab2   : > { %v8920_v47 = vadd.f32 %v8902_v18, %v8459_v33  ;;  %v8846_v54 = vadd.f32 %v8845_v31, %v8816_v7 }
 0xab4   : > { %v8936_v21 = vmax.f32 %v8920_v47, 0.0  ;;  %v8921_v28 = vadd.f32 %v8846_v54, %v8460_v5 }
 0xab5   : > { %v8874_v13 = vpop.f32.mrf.mxu2 }
 0xab6   : > { %8952 = vst [vmem:[%s14342_s29 + $0x48] sm:$0xff] %v8936_v21  ;;  %v8937_v19 = vmax.f32 %v8921_v28, 0.0 }
 0xab7   : > { %v8903_v55 = vpop.f32.mrf.mxu3  ;;  %v8819_v60 = vpop.f32.mrf.mxu0 }
 0xab8   : > { %8953 = vst [vmem:[%s14342_s29 + $0x50] sm:$0xff] %v8937_v19  ;;  %v8904_v22 = vadd.f32 %v8903_v55, %v8874_v13 }
 0xab9   : > { %v8848_v29 = vpop.f32.mrf.mxu1 }
 0xaba   : > { %v8922_v58 = vadd.f32 %v8904_v22, %v8461_v25  ;;  %v8849_v39 = vadd.f32 %v8848_v29, %v8819_v60 }
 0xabc   : > { %v8938_v57 = vmax.f32 %v8922_v58, 0.0  ;;  %v8923_v53 = vadd.f32 %v8849_v39, %v8462_v51 }
 0xabd   : > { %v8877_v17 = vpop.f32.mrf.mxu2 }
 0xabe   : > { %8954 = vst [vmem:[%s14342_s29 + $0x58] sm:$0xff] %v8938_v57  ;;  %v8939_v16 = vmax.f32 %v8923_v53, 0.0 }
 0xabf   : > { %v8906_v49 = vpop.f32.mrf.mxu3  ;;  %v8821_v50 = vpop.f32.mrf.mxu0 }
 0xac0   : > { %8955 = vst [vmem:[%s14342_s29 + $0x60] sm:$0xff] %v8939_v16  ;;  %v8907_v36 = vadd.f32 %v8906_v49, %v8877_v17 }
 0xac1   : > { %v8850_v34 = vpop.f32.mrf.mxu1 }
 0xac2   : > { %v8924_v45 = vadd.f32 %v8907_v36, %v8463_v41  ;;  %v8851_v2 = vadd.f32 %v8850_v34, %v8821_v50 }
 0xac4   : > { %v8940_v9 = vmax.f32 %v8924_v45, 0.0  ;;  %v8925_v11 = vadd.f32 %v8851_v2, %v8464_v23 }
 0xac5   : > { %v8879_v63 = vpop.f32.mrf.mxu2 }
 0xac6   : > { %8956 = vst [vmem:[%s14342_s29 + $0x68] sm:$0xff] %v8940_v9  ;;  %v8941_v26 = vmax.f32 %v8925_v11, 0.0 }
 0xac7   : > { %v8908_v14 = vpop.f32.mrf.mxu3 }
 0xac8   : > { %8957 = vst [vmem:[%s14342_s29 + $0x70] sm:$0xff] %v8941_v26  ;;  %v8909_v56 = vadd.f32 %v8908_v14, %v8879_v63 }
 0xaca   : > { %v8926_v40 = vadd.f32 %v8909_v56, %v8465_v1 }
 0xacc   : > { %v8942_v35 = vmax.f32 %v8926_v40, 0.0 }
 0xace   : > { %8958 = vst [vmem:[%s14342_s29 + $0x78] sm:$0xff] %v8942_v35 }
 0xacf   : > { %12376 = shalt.err (!%p12373_p9)
}
 0xad0   : > { %s12448_s13 = smov 256   ;;  %s12449_s14 = smov 16  }
 0xad1   : > { %12039 = dma.vmem_to_hbm [thread:$0]  (%p12593_p4), %s8973_s8, 2048, %s8975_s21, %s8960_s22, %s12448_s13, %s12448_s13, %s12449_s14  }
 0xad2 PF: > { %s8989_s29 = sand.u32 1, %s12415_s24   ;;  %p14479_p10 = scmp.ge.s32.totalorder %s12427_s27, 2 }
 0xad3   : > { %s8990_s1 = scalar_lea.sflag [#allocation6], %s8989_s29 }
 0xad4   : > { %p12065_p13 = pnand %p14479_p10, %p12597_p6 }
 0xad6   : > { %p12066_p11 = pneg %p12065_p13 }
 0xad8   : > { %12410 = dma.done.wait (%p12066_p11), %s8990_s1, 2048  }
 0xad9   : > { %12412 = vsyncadd (%p12066_p11), %s8990_s1, 4294965248  ;;  %p23_p0 = scmp.ge.s32.totalorder %s12567_s12, 4   ;;  %s14480_s24 = smov %s12419_s25 }
 0xada   : > { %s14481_s25 = smov %s12423_s26  ;;  %s14482_s26 = smov %s12578_s30 }
 0xadb   : > { %s14483_s27 = smov %s12567_s12  ;;  %25 = sbr.rel (!%p23_p0) target bundleno = 11 (0xb), region = 177 }
 0xae0   :  { %8996 = vsyncpa [#allocation5], 1 }
 0xae1   :  { %8998 = vsyncpa [#allocation5 + $0x1], 1 }
 0xae2   :  { %8999 = vsyncpa [#allocation8], 1 }
 0xae3   :  { %9000 = vsyncpa [#allocation11], 1 }
 0xae4   :  { %9001 = vsyncpa [#allocation14], 1 }
 0xae5   :  { %9002 = vsyncpa [#allocation6], 1 }
 0xae6   :  { %9004 = vsyncpa [#allocation6 + $0x1], 1 }

</bundles_post_ra>
